<compile_context>
chip_gen: v7x
topology: tpu7x:2x2x1
jax: 0.10.0
libtpu: 0.0.40
codegen_flags: <defaults>
</compile_context>

<pallas_src>
import functools

import jax
import jax.numpy as jnp
from jax import lax
from jax.experimental import pallas as pl
from jax.experimental.pallas import tpu as pltpu

EPS = 1e-5


# ----------------------- fused depthwise-separable conv -----------------------

def _make_fused_dsconv_kernel(H, W, Cin, Cout, stride, has_skip, has_residual):
    """One kernel instance processes one batch image (grid is over batch)."""
    Ho = (H + 4 - 5) // stride + 1
    Wo = (W + 4 - 5) // stride + 1
    Hp = H + 4

    # Static tap addressing.  For stride 2 the input was de-interleaved on the host
    # into even/odd W columns stacked along H (parity p rows live at [p*Hp,(p+1)*Hp)),
    # so every tap below is a contiguous (Wo, Cin) slice.
    taps = []
    for kh in range(5):
        for kw in range(5):
            if stride == 1:
                taps.append((kh, kw))
            else:
                taps.append(((kw % 2) * Hp + kh, kw // 2))

    def mm(a, w_ref):
        # MXU matmul with bf16 operands, f32 accumulation.  Pad rows to >=8
        # sublanes for tiny spatial tiles (last block has Wo=4).
        if Wo < 8:
            a = jnp.concatenate([a, jnp.zeros((8 - Wo, Cin), a.dtype)], axis=0)
        y = jnp.dot(a.astype(jnp.bfloat16), w_ref[...],
                    preferred_element_type=jnp.float32)
        return y[:Wo] if Wo < 8 else y

    def kernel(*refs):
        it = iter(refs)
        x_ref = next(it)        # (1, stride*Hp, (W+4)//stride, Cin)
        dw_ref = next(it)       # (25, 1, Cin)   depthwise weights
        pw_ref = next(it)       # (Cin, Cout)    bf16, BN scale folded in
        sh_ref = next(it)       # (1, Cout)      BN shift
        skip_ref = next(it) if has_skip else None       # (Cin, Cout) bf16
        res_ref = next(it) if has_residual else None    # (1, Ho, Wo, Cout)
        o_ref = next(it)        # (1, Ho, Wo, Cout)

        def row_body(ho, carry):
            base = ho * stride
            acc = None
            for k, (hoff, woff) in enumerate(taps):
                tap = x_ref[0, base + hoff, woff:woff + Wo, :]      # (Wo, Cin)
                term = tap * dw_ref[k]                              # per-channel weight
                acc = term if acc is None else acc + term
            # pointwise conv + BN + ReLU (scale already folded into pw weights)
            y = jnp.maximum(mm(acc, pw_ref) + sh_ref[...], 0.0)
            if has_skip:
                # 1x1 stride-2 skip conv on the block input, then block ReLU
                srow = x_ref[0, 2 * ho + 2, 1:1 + Wo, :]
                y = jnp.maximum(y + mm(srow, skip_ref), 0.0)
            if has_residual:
                y = jnp.maximum(y + res_ref[0, ho], 0.0)
            o_ref[0, ho] = y
            return carry

        lax.fori_loop(0, Ho, row_body, 0)

    return kernel


@functools.lru_cache(maxsize=None)
def _fused_dsconv_call(B, H, W, Cin, Cout, stride, has_skip, has_residual):
    Ho = (H + 4 - 5) // stride + 1
    Wo = (W + 4 - 5) // stride + 1
    Hp = H + 4
    Wk = (W + 4) // stride

    in_specs = [
        pl.BlockSpec((1, stride * Hp, Wk, Cin), lambda b: (b, 0, 0, 0)),
        pl.BlockSpec((25, 1, Cin), lambda b: (0, 0, 0)),
        pl.BlockSpec((Cin, Cout), lambda b: (0, 0)),
        pl.BlockSpec((1, Cout), lambda b: (0, 0)),
    ]
    if has_skip:
        in_specs.append(pl.BlockSpec((Cin, Cout), lambda b: (0, 0)))
    if has_residual:
        in_specs.append(pl.BlockSpec((1, Ho, Wo, Cout), lambda b: (b, 0, 0, 0)))

    return pl.pallas_call(
        _make_fused_dsconv_kernel(H, W, Cin, Cout, stride, has_skip, has_residual),
        out_shape=jax.ShapeDtypeStruct((B, Ho, Wo, Cout), jnp.float32),
        grid=(B,),
        in_specs=in_specs,
        out_specs=pl.BlockSpec((1, Ho, Wo, Cout), lambda b: (b, 0, 0, 0)),
        compiler_params=pltpu.CompilerParams(dimension_semantics=("parallel",)),
    )


def fused_dsconv(x, p, stride, skip_w=None, residual=None):
    """x: (B,H,W,Cin) NHWC -> (B,Ho,Wo,Cout).  depthwise+pointwise+BN+ReLU
    (+ optional fused 1x1 skip conv or residual add + block ReLU)."""
    B, H, W, Cin = x.shape
    Cout = p["pw"].shape[1]

    scale = p["gamma"] / jnp.sqrt(p["var"] + EPS)
    shift = (p["beta"] - p["mean"] * scale).reshape(1, Cout).astype(jnp.float32)
    pw_eff = (p["pw"] * scale[None, :]).astype(jnp.bfloat16)   # fold BN scale into pw
    dw = p["dw"].reshape(25, 1, Cin).astype(jnp.float32)

    xp = jnp.pad(x, ((0, 0), (2, 2), (2, 2), (0, 0)))
    if stride == 2:
        # de-interleave W (even | odd columns) so in-kernel taps are contiguous
        xk = jnp.concatenate([xp[:, :, 0::2, :], xp[:, :, 1::2, :]], axis=1)
    else:
        xk = xp

    args = [xk, dw, pw_eff, shift]
    if skip_w is not None:
        args.append(skip_w.astype(jnp.bfloat16))
    if residual is not None:
        args.append(residual)

    call = _fused_dsconv_call(B, H, W, Cin, Cout, stride,
                              skip_w is not None, residual is not None)
    return call(*args)


# -------------------- batched matmul (conv1 / heads / skip) --------------------

def _make_bmm_kernel(N, K, act, sigmoid_cols):
    Np = max(N, 8)

    def kernel(x_ref, w_ref, b_ref, o_ref):
        x = x_ref[0]
        if Np != N:
            x = jnp.concatenate([x, jnp.zeros((Np - N, K), x.dtype)], axis=0)
        y = jnp.dot(x.astype(jnp.bfloat16), w_ref[...],
                    preferred_element_type=jnp.float32)
        y = y + b_ref[...]
        if act == "relu":
            y = jnp.maximum(y, 0.0)
        if sigmoid_cols is not None:
            lo, hi = sigmoid_cols
            col = lax.broadcasted_iota(jnp.int32, y.shape, 1)
            y = jnp.where((col >= lo) & (col < hi), jax.nn.sigmoid(y), y)
        o_ref[0] = y[:N] if Np != N else y

    return kernel


@functools.lru_cache(maxsize=None)
def _bmm_call(B, N, K, M, act, sigmoid_cols):
    return pl.pallas_call(
        _make_bmm_kernel(N, K, act, sigmoid_cols),
        out_shape=jax.ShapeDtypeStruct((B, N, M), jnp.float32),
        grid=(B,),
        in_specs=[pl.BlockSpec((1, N, K), lambda b: (b, 0, 0)),
                  pl.BlockSpec((K, M), lambda b: (0, 0)),
                  pl.BlockSpec((1, M), lambda b: (0, 0))],
        out_specs=pl.BlockSpec((1, N, M), lambda b: (b, 0, 0)),
        compiler_params=pltpu.CompilerParams(dimension_semantics=("parallel",)),
    )


def batched_matmul(x, w, b, act="none", sigmoid_cols=None):
    """x: (B,N,K) f32, w: (K,M), b: (M,) -> act(x @ w + b), f32."""
    B, N, K = x.shape
    M = w.shape[1]
    return _bmm_call(B, N, K, M, act, sigmoid_cols)(
        x, w.astype(jnp.bfloat16), b.reshape(1, M).astype(jnp.float32))


# ------------------------------- model forward -------------------------------

def extract_patches5x5(x, stride):
    """Host-side im2col for a 5x5 / pad=2 conv.  Columns ordered (kh, kw, Cin)."""
    B, H, W, C = x.shape
    xp = jnp.pad(x, ((0, 0), (2, 2), (2, 2), (0, 0)))
    Ho = (H + 4 - 5) // stride + 1
    Wo = (W + 4 - 5) // stride + 1
    cols = []
    for kh in range(5):
        for kw in range(5):
            cols.append(xp[:, kh:kh + (Ho - 1) * stride + 1:stride,
                           kw:kw + (Wo - 1) * stride + 1:stride, :])
    return jnp.concatenate(cols, axis=-1), Ho, Wo


def blaze_block_forward(x, p):
    stride = 2 if p["skip"] is not None else 1
    layers = p["layers"]
    n = len(layers)

    if stride > 1 and n == 1:
        # single strided dsconv + 1x1 skip conv + residual add + ReLU: one kernel
        return fused_dsconv(x, layers[0], stride, skip_w=p["skip"])

    if p["skip"] is not None:
        # general (unused for this network) path: strided 1x1 skip conv
        B, H, W, Cin = x.shape
        xs = x[:, ::stride, ::stride, :]
        Hs, Ws = xs.shape[1], xs.shape[2]
        Cout = p["skip"].shape[1]
        residual = batched_matmul(xs.reshape(B, Hs * Ws, Cin), p["skip"],
                                  jnp.zeros((Cout,), jnp.float32)
                                  ).reshape(B, Hs, Ws, Cout)
    else:
        residual = x

    y = x
    for i, lp in enumerate(layers[:-1]):
        y = fused_dsconv(y, lp, stride if i == 0 else 1)
    # last layer fuses the residual add + block ReLU
    # TODO(synk): nn.Dropout (p=0.3) before the final ReLU is identity in eval mode.
    y = fused_dsconv(y, layers[-1], stride if n == 1 else 1, residual=residual)
    return y


def blazeface_full_forward(params, x_nchw):
    x = jnp.transpose(x_nchw, (0, 2, 3, 1)).astype(jnp.float32)   # NCHW -> NHWC
    B = x.shape[0]

    # conv1: 3->32, k=5, s=2, p=2, bias, ReLU  (host im2col + one Pallas matmul).
    # NOTE: a real PyTorch conv1 weight (Cout,Cin,5,5) must be permuted to
    # (kh,kw,Cin)-major rows before reshaping to (75, 32) to match this layout.
    patches, Ho, Wo = extract_patches5x5(x, stride=2)
    y = batched_matmul(patches.reshape(B, Ho * Wo, -1), params["conv1_w"],
                       params["conv1_b"], act="relu").reshape(B, Ho, Wo, 32)

    for bp in params["blocks"]:
        y = blaze_block_forward(y, bp)

    Bf, Hf, Wf, Cf = y.shape
    nb = params["bbox_w"].shape[1]
    nc = params["conf_w"].shape[1]
    # merged prediction heads: one lane-dense matmul, sigmoid on conf columns
    w_heads = jnp.concatenate([params["bbox_w"], params["conf_w"], params["lmk_w"]],
                              axis=1)
    b_heads = jnp.concatenate([params["bbox_b"], params["conf_b"], params["lmk_b"]])
    heads = batched_matmul(y.reshape(Bf, Hf * Wf, Cf), w_heads, b_heads,
                           act="none", sigmoid_cols=(nb, nb + nc))

    bbox = heads[:, :, :nb]
    conf = heads[:, :, nb:nb + nc]
    lmk = heads[:, :, nb + nc:]

    # replicate PyTorch's .view() on NCHW tensors exactly (C-major flattening)
    bbox = jnp.transpose(bbox, (0, 2, 1)).reshape(Bf, -1, 4)
    conf = jnp.transpose(conf, (0, 2, 1)).reshape(Bf, -1)
    lmk = jnp.transpose(lmk, (0, 2, 1)).reshape(Bf, -1, 14)
    return bbox, conf, lmk


# ------------------------------ parameter init ------------------------------

def init_params(key, num_anchors=4):
    keys = iter(jax.random.split(key, 256))

    def nrm(shape, s=0.1):
        return (jax.random.normal(next(keys), shape) * s).astype(jnp.float32)

    def init_dsconv(cin, cout):
        return dict(dw=nrm((25, cin)), pw=nrm((cin, cout)),
                    gamma=(1.0 + nrm((cout,))).astype(jnp.float32),
                    beta=nrm((cout,)),
                    mean=jnp.zeros((cout,), jnp.float32),
                    var=jnp.ones((cout,), jnp.float32))

    def init_block(cin, cout, stride=1, num_layers=1):
        layers = [init_dsconv(cin, cout)] + [init_dsconv(cout, cout)
                                             for _ in range(num_layers - 1)]
        skip = nrm((cin, cout)) if stride > 1 else None
        return dict(layers=layers, skip=skip)

    return dict(
        conv1_w=nrm((25 * 3, 32)), conv1_b=nrm((32,)),
        blocks=[
            init_block(32, 32, 1, 5),
            init_block(32, 48, 2, 1),
            init_block(48, 48, 1, 6),
            init_block(48, 96, 2, 1),
            init_block(96, 96, 1, 6),
            init_block(96, 192, 2, 1),
        ],
        bbox_w=nrm((192, num_anchors * 4)), bbox_b=nrm((num_anchors * 4,)),
        conf_w=nrm((192, num_anchors)), conf_b=nrm((num_anchors,)),
        lmk_w=nrm((192, num_anchors * 14)), lmk_b=nrm((num_anchors * 14,)),
    )


# TODO(synk): training-mode Dropout / batch-statistic BatchNorm are stochastic /
# batch-dependent; eval (inference) semantics are implemented here.

if __name__ == "__main__":
    key = jax.random.PRNGKey(0)
    pkey, xkey = jax.random.split(key)
    params = init_params(pkey, num_anchors=4)

    # NCHW input consistent with the module: 3 channels, 32x32 spatial, batch 2.
    x = jax.random.normal(xkey, (2, 3, 32, 32), dtype=jnp.float32)

    fwd = jax.jit(blazeface_full_forward)
    bboxes, confidences, landmarks = fwd(params, x)
    jax.block_until_ready((bboxes, confidences, landmarks))

    # final feature map is 2x2x192 -> 16 anchor*spatial predictions
    assert bboxes.shape == (2, 16, 4), bboxes.shape
    assert confidences.shape == (2, 16), confidences.shape
    assert landmarks.shape == (2, 16, 14), landmarks.shape
    print("KERNEL_OK")
</pallas_src>

<mosaic_0001>
module attributes {stable_mosaic.version = 11 : i64} {
  func.func @kernel(%arg0: i32, %arg1: memref<1x256x75xf32, #tpu.memory_space<vmem>>, %arg2: memref<75x32xbf16, #tpu.memory_space<vmem>>, %arg3: memref<1x32xf32, #tpu.memory_space<vmem>>, %arg4: memref<1x256x32xf32, #tpu.memory_space<vmem>>) attributes {dimension_semantics = [#tpu.dimension_semantics<parallel>], iteration_bounds = array<i64: 2>, scalar_prefetch = 0 : i64, scratch_operands = 0 : i64, tpu.core_type = #tpu.core_type<tc>, window_params = [{transform_indices = @transform_0, window_bounds = array<i64: 1, 256, 75>}, {pipeline_mode = #tpu.pipeline_mode<synchronous>, transform_indices = @transform_1, window_bounds = array<i64: 75, 32>}, {pipeline_mode = #tpu.pipeline_mode<synchronous>, transform_indices = @transform_2, window_bounds = array<i64: 1, 32>}, {transform_indices = @transform_3, window_bounds = array<i64: 1, 256, 32>}]} {
    %c0 = arith.constant 0 : index
    %c0_0 = arith.constant 0 : index
    %c0_1 = arith.constant 0 : index
    %0 = vector.load %arg1[%c0, %c0_0, %c0_1] : memref<1x256x75xf32, #tpu.memory_space<vmem>>, vector<1x256x75xf32>
    %1 = vector.shape_cast %0 : vector<1x256x75xf32> to vector<256x75xf32>
    %2 = arith.truncf %1 : vector<256x75xf32> to vector<256x75xbf16>
    %c0_2 = arith.constant 0 : index
    %c0_3 = arith.constant 0 : index
    %3 = vector.load %arg2[%c0_2, %c0_3] : memref<75x32xbf16, #tpu.memory_space<vmem>>, vector<75x32xbf16>
    %cst = arith.constant dense<0.000000e+00> : vector<256x32xf32>
    %4 = tpu.matmul %2, %3, %cst {dimension_numbers = #tpu.dot_dimension_numbers<[1], [0], [0], [1], [0, 0, 1, 1], [], []>} : vector<256x75xbf16>, vector<75x32xbf16>, vector<256x32xf32> -> vector<256x32xf32>
    %c0_4 = arith.constant 0 : index
    %c0_5 = arith.constant 0 : index
    %5 = vector.load %arg3[%c0_4, %c0_5] : memref<1x32xf32, #tpu.memory_space<vmem>>, vector<1x32xf32>
    %6 = vector.broadcast %5 : vector<1x32xf32> to vector<256x32xf32>
    %7 = arith.addf %4, %6 : vector<256x32xf32>
    %cst_6 = arith.constant 0.000000e+00 : f32
    %8 = vector.broadcast %cst_6 : f32 to vector<256x32xf32>
    %9 = arith.maximumf %7, %8 : vector<256x32xf32>
    %c0_7 = arith.constant 0 : index
    %c0_8 = arith.constant 0 : index
    %c0_9 = arith.constant 0 : index
    %10 = vector.load %arg4[%c0_7, %c0_8, %c0_9] : memref<1x256x32xf32, #tpu.memory_space<vmem>>, vector<1x256x32xf32>
    %11 = vector.shape_cast %10 : vector<1x256x32xf32> to vector<256x32xf32>
    %12 = vector.shape_cast %9 : vector<256x32xf32> to vector<1x256x32xf32>
    tpu.vector_store %arg4[%c0_7, %c0_8, %c0_9], %12 {strides = array<i32>} : memref<1x256x32xf32, #tpu.memory_space<vmem>>, vector<1x256x32xf32>,
    return
  }
  func.func @transform_0(%arg0: i32) -> (i32, i32, i32) {
    %c0_i32 = arith.constant 0 : i32
    %c0_i32_0 = arith.constant 0 : i32
    %c0_i32_1 = arith.constant 0 : i32
    return %arg0, %c0_i32, %c0_i32_0 : i32, i32, i32
  }
  func.func @transform_1(%arg0: i32) -> (i32, i32) {
    %c0_i32 = arith.constant 0 : i32
    %c0_i32_0 = arith.constant 0 : i32
    %c0_i32_1 = arith.constant 0 : i32
    return %c0_i32, %c0_i32_0 : i32, i32
  }
  func.func @transform_2(%arg0: i32) -> (i32, i32) {
    %c0_i32 = arith.constant 0 : i32
    %c0_i32_0 = arith.constant 0 : i32
    %c0_i32_1 = arith.constant 0 : i32
    return %c0_i32, %c0_i32_0 : i32, i32
  }
  func.func @transform_3(%arg0: i32) -> (i32, i32, i32) {
    %c0_i32 = arith.constant 0 : i32
    %c0_i32_0 = arith.constant 0 : i32
    %c0_i32_1 = arith.constant 0 : i32
    return %arg0, %c0_i32, %c0_i32_0 : i32, i32, i32
  }
}

module attributes {stable_mosaic.version = 11 : i64} {
  func.func @kernel(%arg0: i32, %arg1: memref<1x20x20x32xf32, #tpu.memory_space<vmem>>, %arg2: memref<25x1x32xf32, #tpu.memory_space<vmem>>, %arg3: memref<32x32xbf16, #tpu.memory_space<vmem>>, %arg4: memref<1x32xf32, #tpu.memory_space<vmem>>, %arg5: memref<1x16x16x32xf32, #tpu.memory_space<vmem>>) attributes {dimension_semantics = [#tpu.dimension_semantics<parallel>], iteration_bounds = array<i64: 2>, scalar_prefetch = 0 : i64, scratch_operands = 0 : i64, tpu.core_type = #tpu.core_type<tc>, window_params = [{transform_indices = @transform_0, window_bounds = array<i64: 1, 20, 20, 32>}, {pipeline_mode = #tpu.pipeline_mode<synchronous>, transform_indices = @transform_1, window_bounds = array<i64: 25, 1, 32>}, {pipeline_mode = #tpu.pipeline_mode<synchronous>, transform_indices = @transform_2, window_bounds = array<i64: 32, 32>}, {pipeline_mode = #tpu.pipeline_mode<synchronous>, transform_indices = @transform_3, window_bounds = array<i64: 1, 32>}, {transform_indices = @transform_4, window_bounds = array<i64: 1, 16, 16, 32>}]} {
    %c0_i32 = arith.constant 0 : i32
    %c16_i32 = arith.constant 16 : i32
    %0 = arith.addi %c0_i32, %c16_i32 : i32
    %c1_i32 = arith.constant 1 : i32
    scf.for %arg6 = %c0_i32 to %0 step %c1_i32  : i32 {
      %c1_i32_1 = arith.constant 1 : i32
      %1 = arith.muli %arg6, %c1_i32_1 : i32
      %c0_i32_2 = arith.constant 0 : i32
      %2 = arith.addi %1, %c0_i32_2 : i32
      %c0 = arith.constant 0 : index
      %3 = arith.index_cast %2 : i32 to index
      %c0_3 = arith.constant 0 : index
      %c0_4 = arith.constant 0 : index
      %4 = vector.load %arg1[%c0, %3, %c0_3, %c0_4] : memref<1x20x20x32xf32, #tpu.memory_space<vmem>>, vector<1x1x16x32xf32>
      %5 = vector.shape_cast %4 : vector<1x1x16x32xf32> to vector<16x32xf32>
      %c0_5 = arith.constant 0 : index
      %c0_6 = arith.constant 0 : index
      %c0_7 = arith.constant 0 : index
      %6 = vector.load %arg2[%c0_5, %c0_6, %c0_7] : memref<25x1x32xf32, #tpu.memory_space<vmem>>, vector<1x1x32xf32>
      %7 = vector.shape_cast %6 : vector<1x1x32xf32> to vector<1x32xf32>
      %8 = vector.broadcast %7 : vector<1x32xf32> to vector<16x32xf32>
      %9 = arith.mulf %5, %8 : vector<16x32xf32>
      %c0_i32_8 = arith.constant 0 : i32
      %10 = arith.addi %1, %c0_i32_8 : i32
      %c0_9 = arith.constant 0 : index
      %11 = arith.index_cast %10 : i32 to index
      %c1 = arith.constant 1 : index
      %c0_10 = arith.constant 0 : index
      %12 = vector.load %arg1[%c0_9, %11, %c1, %c0_10] : memref<1x20x20x32xf32, #tpu.memory_space<vmem>>, vector<1x1x16x32xf32>
      %13 = vector.shape_cast %12 : vector<1x1x16x32xf32> to vector<16x32xf32>
      %c1_11 = arith.constant 1 : index
      %c0_12 = arith.constant 0 : index
      %c0_13 = arith.constant 0 : index
      %14 = vector.load %arg2[%c1_11, %c0_12, %c0_13] : memref<25x1x32xf32, #tpu.memory_space<vmem>>, vector<1x1x32xf32>
      %15 = vector.shape_cast %14 : vector<1x1x32xf32> to vector<1x32xf32>
      %16 = vector.broadcast %15 : vector<1x32xf32> to vector<16x32xf32>
      %17 = arith.mulf %13, %16 : vector<16x32xf32>
      %18 = arith.addf %9, %17 : vector<16x32xf32>
      %c0_i32_14 = arith.constant 0 : i32
      %19 = arith.addi %1, %c0_i32_14 : i32
      %c0_15 = arith.constant 0 : index
      %20 = arith.index_cast %19 : i32 to index
      %c2 = arith.constant 2 : index
      %c0_16 = arith.constant 0 : index
      %21 = vector.load %arg1[%c0_15, %20, %c2, %c0_16] : memref<1x20x20x32xf32, #tpu.memory_space<vmem>>, vector<1x1x16x32xf32>
      %22 = vector.shape_cast %21 : vector<1x1x16x32xf32> to vector<16x32xf32>
      %c2_17 = arith.constant 2 : index
      %c0_18 = arith.constant 0 : index
      %c0_19 = arith.constant 0 : index
      %23 = vector.load %arg2[%c2_17, %c0_18, %c0_19] : memref<25x1x32xf32, #tpu.memory_space<vmem>>, vector<1x1x32xf32>
      %24 = vector.shape_cast %23 : vector<1x1x32xf32> to vector<1x32xf32>
      %25 = vector.broadcast %24 : vector<1x32xf32> to vector<16x32xf32>
      %26 = arith.mulf %22, %25 : vector<16x32xf32>
      %27 = arith.addf %18, %26 : vector<16x32xf32>
      %c0_i32_20 = arith.constant 0 : i32
      %28 = arith.addi %1, %c0_i32_20 : i32
      %c0_21 = arith.constant 0 : index
      %29 = arith.index_cast %28 : i32 to index
      %c3 = arith.constant 3 : index
      %c0_22 = arith.constant 0 : index
      %30 = vector.load %arg1[%c0_21, %29, %c3, %c0_22] : memref<1x20x20x32xf32, #tpu.memory_space<vmem>>, vector<1x1x16x32xf32>
      %31 = vector.shape_cast %30 : vector<1x1x16x32xf32> to vector<16x32xf32>
      %c3_23 = arith.constant 3 : index
      %c0_24 = arith.constant 0 : index
      %c0_25 = arith.constant 0 : index
      %32 = vector.load %arg2[%c3_23, %c0_24, %c0_25] : memref<25x1x32xf32, #tpu.memory_space<vmem>>, vector<1x1x32xf32>
      %33 = vector.shape_cast %32 : vector<1x1x32xf32> to vector<1x32xf32>
      %34 = vector.broadcast %33 : vector<1x32xf32> to vector<16x32xf32>
      %35 = arith.mulf %31, %34 : vector<16x32xf32>
      %36 = arith.addf %27, %35 : vector<16x32xf32>
      %c0_i32_26 = arith.constant 0 : i32
      %37 = arith.addi %1, %c0_i32_26 : i32
      %c0_27 = arith.constant 0 : index
      %38 = arith.index_cast %37 : i32 to index
      %c4 = arith.constant 4 : index
      %c0_28 = arith.constant 0 : index
      %39 = vector.load %arg1[%c0_27, %38, %c4, %c0_28] : memref<1x20x20x32xf32, #tpu.memory_space<vmem>>, vector<1x1x16x32xf32>
      %40 = vector.shape_cast %39 : vector<1x1x16x32xf32> to vector<16x32xf32>
      %c4_29 = arith.constant 4 : index
      %c0_30 = arith.constant 0 : index
      %c0_31 = arith.constant 0 : index
      %41 = vector.load %arg2[%c4_29, %c0_30, %c0_31] : memref<25x1x32xf32, #tpu.memory_space<vmem>>, vector<1x1x32xf32>
      %42 = vector.shape_cast %41 : vector<1x1x32xf32> to vector<1x32xf32>
      %43 = vector.broadcast %42 : vector<1x32xf32> to vector<16x32xf32>
      %44 = arith.mulf %40, %43 : vector<16x32xf32>
      %45 = arith.addf %36, %44 : vector<16x32xf32>
      %c1_i32_32 = arith.constant 1 : i32
      %46 = arith.addi %1, %c1_i32_32 : i32
      %c0_33 = arith.constant 0 : index
      %47 = arith.index_cast %46 : i32 to index
      %c0_34 = arith.constant 0 : index
      %c0_35 = arith.constant 0 : index
      %48 = vector.load %arg1[%c0_33, %47, %c0_34, %c0_35] : memref<1x20x20x32xf32, #tpu.memory_space<vmem>>, vector<1x1x16x32xf32>
      %49 = vector.shape_cast %48 : vector<1x1x16x32xf32> to vector<16x32xf32>
      %c5 = arith.constant 5 : index
      %c0_36 = arith.constant 0 : index
      %c0_37 = arith.constant 0 : index
      %50 = vector.load %arg2[%c5, %c0_36, %c0_37] : memref<25x1x32xf32, #tpu.memory_space<vmem>>, vector<1x1x32xf32>
      %51 = vector.shape_cast %50 : vector<1x1x32xf32> to vector<1x32xf32>
      %52 = vector.broadcast %51 : vector<1x32xf32> to vector<16x32xf32>
      %53 = arith.mulf %49, %52 : vector<16x32xf32>
      %54 = arith.addf %45, %53 : vector<16x32xf32>
      %c1_i32_38 = arith.constant 1 : i32
      %55 = arith.addi %1, %c1_i32_38 : i32
      %c0_39 = arith.constant 0 : index
      %56 = arith.index_cast %55 : i32 to index
      %c1_40 = arith.constant 1 : index
      %c0_41 = arith.constant 0 : index
      %57 = vector.load %arg1[%c0_39, %56, %c1_40, %c0_41] : memref<1x20x20x32xf32, #tpu.memory_space<vmem>>, vector<1x1x16x32xf32>
      %58 = vector.shape_cast %57 : vector<1x1x16x32xf32> to vector<16x32xf32>
      %c6 = arith.constant 6 : index
      %c0_42 = arith.constant 0 : index
      %c0_43 = arith.constant 0 : index
      %59 = vector.load %arg2[%c6, %c0_42, %c0_43] : memref<25x1x32xf32, #tpu.memory_space<vmem>>, vector<1x1x32xf32>
      %60 = vector.shape_cast %59 : vector<1x1x32xf32> to vector<1x32xf32>
      %61 = vector.broadcast %60 : vector<1x32xf32> to vector<16x32xf32>
      %62 = arith.mulf %58, %61 : vector<16x32xf32>
      %63 = arith.addf %54, %62 : vector<16x32xf32>
      %c1_i32_44 = arith.constant 1 : i32
      %64 = arith.addi %1, %c1_i32_44 : i32
      %c0_45 = arith.constant 0 : index
      %65 = arith.index_cast %64 : i32 to index
      %c2_46 = arith.constant 2 : index
      %c0_47 = arith.constant 0 : index
      %66 = vector.load %arg1[%c0_45, %65, %c2_46, %c0_47] : memref<1x20x20x32xf32, #tpu.memory_space<vmem>>, vector<1x1x16x32xf32>
      %67 = vector.shape_cast %66 : vector<1x1x16x32xf32> to vector<16x32xf32>
      %c7 = arith.constant 7 : index
      %c0_48 = arith.constant 0 : index
      %c0_49 = arith.constant 0 : index
      %68 = vector.load %arg2[%c7, %c0_48, %c0_49] : memref<25x1x32xf32, #tpu.memory_space<vmem>>, vector<1x1x32xf32>
      %69 = vector.shape_cast %68 : vector<1x1x32xf32> to vector<1x32xf32>
      %70 = vector.broadcast %69 : vector<1x32xf32> to vector<16x32xf32>
      %71 = arith.mulf %67, %70 : vector<16x32xf32>
      %72 = arith.addf %63, %71 : vector<16x32xf32>
      %c1_i32_50 = arith.constant 1 : i32
      %73 = arith.addi %1, %c1_i32_50 : i32
      %c0_51 = arith.constant 0 : index
      %74 = arith.index_cast %73 : i32 to index
      %c3_52 = arith.constant 3 : index
      %c0_53 = arith.constant 0 : index
      %75 = vector.load %arg1[%c0_51, %74, %c3_52, %c0_53] : memref<1x20x20x32xf32, #tpu.memory_space<vmem>>, vector<1x1x16x32xf32>
      %76 = vector.shape_cast %75 : vector<1x1x16x32xf32> to vector<16x32xf32>
      %c8 = arith.constant 8 : index
      %c0_54 = arith.constant 0 : index
      %c0_55 = arith.constant 0 : index
      %77 = vector.load %arg2[%c8, %c0_54, %c0_55] : memref<25x1x32xf32, #tpu.memory_space<vmem>>, vector<1x1x32xf32>
      %78 = vector.shape_cast %77 : vector<1x1x32xf32> to vector<1x32xf32>
      %79 = vector.broadcast %78 : vector<1x32xf32> to vector<16x32xf32>
      %80 = arith.mulf %76, %79 : vector<16x32xf32>
      %81 = arith.addf %72, %80 : vector<16x32xf32>
      %c1_i32_56 = arith.constant 1 : i32
      %82 = arith.addi %1, %c1_i32_56 : i32
      %c0_57 = arith.constant 0 : index
      %83 = arith.index_cast %82 : i32 to index
      %c4_58 = arith.constant 4 : index
      %c0_59 = arith.constant 0 : index
      %84 = vector.load %arg1[%c0_57, %83, %c4_58, %c0_59] : memref<1x20x20x32xf32, #tpu.memory_space<vmem>>, vector<1x1x16x32xf32>
      %85 = vector.shape_cast %84 : vector<1x1x16x32xf32> to vector<16x32xf32>
      %c9 = arith.constant 9 : index
      %c0_60 = arith.constant 0 : index
      %c0_61 = arith.constant 0 : index
      %86 = vector.load %arg2[%c9, %c0_60, %c0_61] : memref<25x1x32xf32, #tpu.memory_space<vmem>>, vector<1x1x32xf32>
      %87 = vector.shape_cast %86 : vector<1x1x32xf32> to vector<1x32xf32>
      %88 = vector.broadcast %87 : vector<1x32xf32> to vector<16x32xf32>
      %89 = arith.mulf %85, %88 : vector<16x32xf32>
      %90 = arith.addf %81, %89 : vector<16x32xf32>
      %c2_i32 = arith.constant 2 : i32
      %91 = arith.addi %1, %c2_i32 : i32
      %c0_62 = arith.constant 0 : index
      %92 = arith.index_cast %91 : i32 to index
      %c0_63 = arith.constant 0 : index
      %c0_64 = arith.constant 0 : index
      %93 = vector.load %arg1[%c0_62, %92, %c0_63, %c0_64] : memref<1x20x20x32xf32, #tpu.memory_space<vmem>>, vector<1x1x16x32xf32>
      %94 = vector.shape_cast %93 : vector<1x1x16x32xf32> to vector<16x32xf32>
      %c10 = arith.constant 10 : index
      %c0_65 = arith.constant 0 : index
      %c0_66 = arith.constant 0 : index
      %95 = vector.load %arg2[%c10, %c0_65, %c0_66] : memref<25x1x32xf32, #tpu.memory_space<vmem>>, vector<1x1x32xf32>
      %96 = vector.shape_cast %95 : vector<1x1x32xf32> to vector<1x32xf32>
      %97 = vector.broadcast %96 : vector<1x32xf32> to vector<16x32xf32>
      %98 = arith.mulf %94, %97 : vector<16x32xf32>
      %99 = arith.addf %90, %98 : vector<16x32xf32>
      %c2_i32_67 = arith.constant 2 : i32
      %100 = arith.addi %1, %c2_i32_67 : i32
      %c0_68 = arith.constant 0 : index
      %101 = arith.index_cast %100 : i32 to index
      %c1_69 = arith.constant 1 : index
      %c0_70 = arith.constant 0 : index
      %102 = vector.load %arg1[%c0_68, %101, %c1_69, %c0_70] : memref<1x20x20x32xf32, #tpu.memory_space<vmem>>, vector<1x1x16x32xf32>
      %103 = vector.shape_cast %102 : vector<1x1x16x32xf32> to vector<16x32xf32>
      %c11 = arith.constant 11 : index
      %c0_71 = arith.constant 0 : index
      %c0_72 = arith.constant 0 : index
      %104 = vector.load %arg2[%c11, %c0_71, %c0_72] : memref<25x1x32xf32, #tpu.memory_space<vmem>>, vector<1x1x32xf32>
      %105 = vector.shape_cast %104 : vector<1x1x32xf32> to vector<1x32xf32>
      %106 = vector.broadcast %105 : vector<1x32xf32> to vector<16x32xf32>
      %107 = arith.mulf %103, %106 : vector<16x32xf32>
      %108 = arith.addf %99, %107 : vector<16x32xf32>
      %c2_i32_73 = arith.constant 2 : i32
      %109 = arith.addi %1, %c2_i32_73 : i32
      %c0_74 = arith.constant 0 : index
      %110 = arith.index_cast %109 : i32 to index
      %c2_75 = arith.constant 2 : index
      %c0_76 = arith.constant 0 : index
      %111 = vector.load %arg1[%c0_74, %110, %c2_75, %c0_76] : memref<1x20x20x32xf32, #tpu.memory_space<vmem>>, vector<1x1x16x32xf32>
      %112 = vector.shape_cast %111 : vector<1x1x16x32xf32> to vector<16x32xf32>
      %c12 = arith.constant 12 : index
      %c0_77 = arith.constant 0 : index
      %c0_78 = arith.constant 0 : index
      %113 = vector.load %arg2[%c12, %c0_77, %c0_78] : memref<25x1x32xf32, #tpu.memory_space<vmem>>, vector<1x1x32xf32>
      %114 = vector.shape_cast %113 : vector<1x1x32xf32> to vector<1x32xf32>
      %115 = vector.broadcast %114 : vector<1x32xf32> to vector<16x32xf32>
      %116 = arith.mulf %112, %115 : vector<16x32xf32>
      %117 = arith.addf %108, %116 : vector<16x32xf32>
      %c2_i32_79 = arith.constant 2 : i32
      %118 = arith.addi %1, %c2_i32_79 : i32
      %c0_80 = arith.constant 0 : index
      %119 = arith.index_cast %118 : i32 to index
      %c3_81 = arith.constant 3 : index
      %c0_82 = arith.constant 0 : index
      %120 = vector.load %arg1[%c0_80, %119, %c3_81, %c0_82] : memref<1x20x20x32xf32, #tpu.memory_space<vmem>>, vector<1x1x16x32xf32>
      %121 = vector.shape_cast %120 : vector<1x1x16x32xf32> to vector<16x32xf32>
      %c13 = arith.constant 13 : index
      %c0_83 = arith.constant 0 : index
      %c0_84 = arith.constant 0 : index
      %122 = vector.load %arg2[%c13, %c0_83, %c0_84] : memref<25x1x32xf32, #tpu.memory_space<vmem>>, vector<1x1x32xf32>
      %123 = vector.shape_cast %122 : vector<1x1x32xf32> to vector<1x32xf32>
      %124 = vector.broadcast %123 : vector<1x32xf32> to vector<16x32xf32>
      %125 = arith.mulf %121, %124 : vector<16x32xf32>
      %126 = arith.addf %117, %125 : vector<16x32xf32>
      %c2_i32_85 = arith.constant 2 : i32
      %127 = arith.addi %1, %c2_i32_85 : i32
      %c0_86 = arith.constant 0 : index
      %128 = arith.index_cast %127 : i32 to index
      %c4_87 = arith.constant 4 : index
      %c0_88 = arith.constant 0 : index
      %129 = vector.load %arg1[%c0_86, %128, %c4_87, %c0_88] : memref<1x20x20x32xf32, #tpu.memory_space<vmem>>, vector<1x1x16x32xf32>
      %130 = vector.shape_cast %129 : vector<1x1x16x32xf32> to vector<16x32xf32>
      %c14 = arith.constant 14 : index
      %c0_89 = arith.constant 0 : index
      %c0_90 = arith.constant 0 : index
      %131 = vector.load %arg2[%c14, %c0_89, %c0_90] : memref<25x1x32xf32, #tpu.memory_space<vmem>>, vector<1x1x32xf32>
      %132 = vector.shape_cast %131 : vector<1x1x32xf32> to vector<1x32xf32>
      %133 = vector.broadcast %132 : vector<1x32xf32> to vector<16x32xf32>
      %134 = arith.mulf %130, %133 : vector<16x32xf32>
      %135 = arith.addf %126, %134 : vector<16x32xf32>
      %c3_i32 = arith.constant 3 : i32
      %136 = arith.addi %1, %c3_i32 : i32
      %c0_91 = arith.constant 0 : index
      %137 = arith.index_cast %136 : i32 to index
      %c0_92 = arith.constant 0 : index
      %c0_93 = arith.constant 0 : index
      %138 = vector.load %arg1[%c0_91, %137, %c0_92, %c0_93] : memref<1x20x20x32xf32, #tpu.memory_space<vmem>>, vector<1x1x16x32xf32>
      %139 = vector.shape_cast %138 : vector<1x1x16x32xf32> to vector<16x32xf32>
      %c15 = arith.constant 15 : index
      %c0_94 = arith.constant 0 : index
      %c0_95 = arith.constant 0 : index
      %140 = vector.load %arg2[%c15, %c0_94, %c0_95] : memref<25x1x32xf32, #tpu.memory_space<vmem>>, vector<1x1x32xf32>
      %141 = vector.shape_cast %140 : vector<1x1x32xf32> to vector<1x32xf32>
      %142 = vector.broadcast %141 : vector<1x32xf32> to vector<16x32xf32>
      %143 = arith.mulf %139, %142 : vector<16x32xf32>
      %144 = arith.addf %135, %143 : vector<16x32xf32>
      %c3_i32_96 = arith.constant 3 : i32
      %145 = arith.addi %1, %c3_i32_96 : i32
      %c0_97 = arith.constant 0 : index
      %146 = arith.index_cast %145 : i32 to index
      %c1_98 = arith.constant 1 : index
      %c0_99 = arith.constant 0 : index
      %147 = vector.load %arg1[%c0_97, %146, %c1_98, %c0_99] : memref<1x20x20x32xf32, #tpu.memory_space<vmem>>, vector<1x1x16x32xf32>
      %148 = vector.shape_cast %147 : vector<1x1x16x32xf32> to vector<16x32xf32>
      %c16 = arith.constant 16 : index
      %c0_100 = arith.constant 0 : index
      %c0_101 = arith.constant 0 : index
      %149 = vector.load %arg2[%c16, %c0_100, %c0_101] : memref<25x1x32xf32, #tpu.memory_space<vmem>>, vector<1x1x32xf32>
      %150 = vector.shape_cast %149 : vector<1x1x32xf32> to vector<1x32xf32>
      %151 = vector.broadcast %150 : vector<1x32xf32> to vector<16x32xf32>
      %152 = arith.mulf %148, %151 : vector<16x32xf32>
      %153 = arith.addf %144, %152 : vector<16x32xf32>
      %c3_i32_102 = arith.constant 3 : i32
      %154 = arith.addi %1, %c3_i32_102 : i32
      %c0_103 = arith.constant 0 : index
      %155 = arith.index_cast %154 : i32 to index
      %c2_104 = arith.constant 2 : index
      %c0_105 = arith.constant 0 : index
      %156 = vector.load %arg1[%c0_103, %155, %c2_104, %c0_105] : memref<1x20x20x32xf32, #tpu.memory_space<vmem>>, vector<1x1x16x32xf32>
      %157 = vector.shape_cast %156 : vector<1x1x16x32xf32> to vector<16x32xf32>
      %c17 = arith.constant 17 : index
      %c0_106 = arith.constant 0 : index
      %c0_107 = arith.constant 0 : index
      %158 = vector.load %arg2[%c17, %c0_106, %c0_107] : memref<25x1x32xf32, #tpu.memory_space<vmem>>, vector<1x1x32xf32>
      %159 = vector.shape_cast %158 : vector<1x1x32xf32> to vector<1x32xf32>
      %160 = vector.broadcast %159 : vector<1x32xf32> to vector<16x32xf32>
      %161 = arith.mulf %157, %160 : vector<16x32xf32>
      %162 = arith.addf %153, %161 : vector<16x32xf32>
      %c3_i32_108 = arith.constant 3 : i32
      %163 = arith.addi %1, %c3_i32_108 : i32
      %c0_109 = arith.constant 0 : index
      %164 = arith.index_cast %163 : i32 to index
      %c3_110 = arith.constant 3 : index
      %c0_111 = arith.constant 0 : index
      %165 = vector.load %arg1[%c0_109, %164, %c3_110, %c0_111] : memref<1x20x20x32xf32, #tpu.memory_space<vmem>>, vector<1x1x16x32xf32>
      %166 = vector.shape_cast %165 : vector<1x1x16x32xf32> to vector<16x32xf32>
      %c18 = arith.constant 18 : index
      %c0_112 = arith.constant 0 : index
      %c0_113 = arith.constant 0 : index
      %167 = vector.load %arg2[%c18, %c0_112, %c0_113] : memref<25x1x32xf32, #tpu.memory_space<vmem>>, vector<1x1x32xf32>
      %168 = vector.shape_cast %167 : vector<1x1x32xf32> to vector<1x32xf32>
      %169 = vector.broadcast %168 : vector<1x32xf32> to vector<16x32xf32>
      %170 = arith.mulf %166, %169 : vector<16x32xf32>
      %171 = arith.addf %162, %170 : vector<16x32xf32>
      %c3_i32_114 = arith.constant 3 : i32
      %172 = arith.addi %1, %c3_i32_114 : i32
      %c0_115 = arith.constant 0 : index
      %173 = arith.index_cast %172 : i32 to index
      %c4_116 = arith.constant 4 : index
      %c0_117 = arith.constant 0 : index
      %174 = vector.load %arg1[%c0_115, %173, %c4_116, %c0_117] : memref<1x20x20x32xf32, #tpu.memory_space<vmem>>, vector<1x1x16x32xf32>
      %175 = vector.shape_cast %174 : vector<1x1x16x32xf32> to vector<16x32xf32>
      %c19 = arith.constant 19 : index
      %c0_118 = arith.constant 0 : index
      %c0_119 = arith.constant 0 : index
      %176 = vector.load %arg2[%c19, %c0_118, %c0_119] : memref<25x1x32xf32, #tpu.memory_space<vmem>>, vector<1x1x32xf32>
      %177 = vector.shape_cast %176 : vector<1x1x32xf32> to vector<1x32xf32>
      %178 = vector.broadcast %177 : vector<1x32xf32> to vector<16x32xf32>
      %179 = arith.mulf %175, %178 : vector<16x32xf32>
      %180 = arith.addf %171, %179 : vector<16x32xf32>
      %c4_i32 = arith.constant 4 : i32
      %181 = arith.addi %1, %c4_i32 : i32
      %c0_120 = arith.constant 0 : index
      %182 = arith.index_cast %181 : i32 to index
      %c0_121 = arith.constant 0 : index
      %c0_122 = arith.constant 0 : index
      %183 = vector.load %arg1[%c0_120, %182, %c0_121, %c0_122] : memref<1x20x20x32xf32, #tpu.memory_space<vmem>>, vector<1x1x16x32xf32>
      %184 = vector.shape_cast %183 : vector<1x1x16x32xf32> to vector<16x32xf32>
      %c20 = arith.constant 20 : index
      %c0_123 = arith.constant 0 : index
      %c0_124 = arith.constant 0 : index
      %185 = vector.load %arg2[%c20, %c0_123, %c0_124] : memref<25x1x32xf32, #tpu.memory_space<vmem>>, vector<1x1x32xf32>
      %186 = vector.shape_cast %185 : vector<1x1x32xf32> to vector<1x32xf32>
      %187 = vector.broadcast %186 : vector<1x32xf32> to vector<16x32xf32>
      %188 = arith.mulf %184, %187 : vector<16x32xf32>
      %189 = arith.addf %180, %188 : vector<16x32xf32>
      %c4_i32_125 = arith.constant 4 : i32
      %190 = arith.addi %1, %c4_i32_125 : i32
      %c0_126 = arith.constant 0 : index
      %191 = arith.index_cast %190 : i32 to index
      %c1_127 = arith.constant 1 : index
      %c0_128 = arith.constant 0 : index
      %192 = vector.load %arg1[%c0_126, %191, %c1_127, %c0_128] : memref<1x20x20x32xf32, #tpu.memory_space<vmem>>, vector<1x1x16x32xf32>
      %193 = vector.shape_cast %192 : vector<1x1x16x32xf32> to vector<16x32xf32>
      %c21 = arith.constant 21 : index
      %c0_129 = arith.constant 0 : index
      %c0_130 = arith.constant 0 : index
      %194 = vector.load %arg2[%c21, %c0_129, %c0_130] : memref<25x1x32xf32, #tpu.memory_space<vmem>>, vector<1x1x32xf32>
      %195 = vector.shape_cast %194 : vector<1x1x32xf32> to vector<1x32xf32>
      %196 = vector.broadcast %195 : vector<1x32xf32> to vector<16x32xf32>
      %197 = arith.mulf %193, %196 : vector<16x32xf32>
      %198 = arith.addf %189, %197 : vector<16x32xf32>
      %c4_i32_131 = arith.constant 4 : i32
      %199 = arith.addi %1, %c4_i32_131 : i32
      %c0_132 = arith.constant 0 : index
      %200 = arith.index_cast %199 : i32 to index
      %c2_133 = arith.constant 2 : index
      %c0_134 = arith.constant 0 : index
      %201 = vector.load %arg1[%c0_132, %200, %c2_133, %c0_134] : memref<1x20x20x32xf32, #tpu.memory_space<vmem>>, vector<1x1x16x32xf32>
      %202 = vector.shape_cast %201 : vector<1x1x16x32xf32> to vector<16x32xf32>
      %c22 = arith.constant 22 : index
      %c0_135 = arith.constant 0 : index
      %c0_136 = arith.constant 0 : index
      %203 = vector.load %arg2[%c22, %c0_135, %c0_136] : memref<25x1x32xf32, #tpu.memory_space<vmem>>, vector<1x1x32xf32>
      %204 = vector.shape_cast %203 : vector<1x1x32xf32> to vector<1x32xf32>
      %205 = vector.broadcast %204 : vector<1x32xf32> to vector<16x32xf32>
      %206 = arith.mulf %202, %205 : vector<16x32xf32>
      %207 = arith.addf %198, %206 : vector<16x32xf32>
      %c4_i32_137 = arith.constant 4 : i32
      %208 = arith.addi %1, %c4_i32_137 : i32
      %c0_138 = arith.constant 0 : index
      %209 = arith.index_cast %208 : i32 to index
      %c3_139 = arith.constant 3 : index
      %c0_140 = arith.constant 0 : index
      %210 = vector.load %arg1[%c0_138, %209, %c3_139, %c0_140] : memref<1x20x20x32xf32, #tpu.memory_space<vmem>>, vector<1x1x16x32xf32>
      %211 = vector.shape_cast %210 : vector<1x1x16x32xf32> to vector<16x32xf32>
      %c23 = arith.constant 23 : index
      %c0_141 = arith.constant 0 : index
      %c0_142 = arith.constant 0 : index
      %212 = vector.load %arg2[%c23, %c0_141, %c0_142] : memref<25x1x32xf32, #tpu.memory_space<vmem>>, vector<1x1x32xf32>
      %213 = vector.shape_cast %212 : vector<1x1x32xf32> to vector<1x32xf32>
      %214 = vector.broadcast %213 : vector<1x32xf32> to vector<16x32xf32>
      %215 = arith.mulf %211, %214 : vector<16x32xf32>
      %216 = arith.addf %207, %215 : vector<16x32xf32>
      %c4_i32_143 = arith.constant 4 : i32
      %217 = arith.addi %1, %c4_i32_143 : i32
      %c0_144 = arith.constant 0 : index
      %218 = arith.index_cast %217 : i32 to index
      %c4_145 = arith.constant 4 : index
      %c0_146 = arith.constant 0 : index
      %219 = vector.load %arg1[%c0_144, %218, %c4_145, %c0_146] : memref<1x20x20x32xf32, #tpu.memory_space<vmem>>, vector<1x1x16x32xf32>
      %220 = vector.shape_cast %219 : vector<1x1x16x32xf32> to vector<16x32xf32>
      %c24 = arith.constant 24 : index
      %c0_147 = arith.constant 0 : index
      %c0_148 = arith.constant 0 : index
      %221 = vector.load %arg2[%c24, %c0_147, %c0_148] : memref<25x1x32xf32, #tpu.memory_space<vmem>>, vector<1x1x32xf32>
      %222 = vector.shape_cast %221 : vector<1x1x32xf32> to vector<1x32xf32>
      %223 = vector.broadcast %222 : vector<1x32xf32> to vector<16x32xf32>
      %224 = arith.mulf %220, %223 : vector<16x32xf32>
      %225 = arith.addf %216, %224 : vector<16x32xf32>
      %226 = arith.truncf %225 : vector<16x32xf32> to vector<16x32xbf16>
      %c0_149 = arith.constant 0 : index
      %c0_150 = arith.constant 0 : index
      %227 = vector.load %arg3[%c0_149, %c0_150] : memref<32x32xbf16, #tpu.memory_space<vmem>>, vector<32x32xbf16>
      %cst = arith.constant dense<0.000000e+00> : vector<16x32xf32>
      %228 = tpu.matmul %226, %227, %cst {dimension_numbers = #tpu.dot_dimension_numbers<[1], [0], [0], [1], [0, 0, 1, 1], [], []>} : vector<16x32xbf16>, vector<32x32xbf16>, vector<16x32xf32> -> vector<16x32xf32>
      %c0_151 = arith.constant 0 : index
      %c0_152 = arith.constant 0 : index
      %229 = vector.load %arg4[%c0_151, %c0_152] : memref<1x32xf32, #tpu.memory_space<vmem>>, vector<1x32xf32>
      %230 = vector.broadcast %229 : vector<1x32xf32> to vector<16x32xf32>
      %231 = arith.addf %228, %230 : vector<16x32xf32>
      %cst_153 = arith.constant 0.000000e+00 : f32
      %232 = vector.broadcast %cst_153 : f32 to vector<16x32xf32>
      %233 = arith.maximumf %231, %232 : vector<16x32xf32>
      %c0_154 = arith.constant 0 : index
      %234 = arith.index_cast %arg6 : i32 to index
      %c0_155 = arith.constant 0 : index
      %c0_156 = arith.constant 0 : index
      %235 = vector.load %arg5[%c0_154, %234, %c0_155, %c0_156] : memref<1x16x16x32xf32, #tpu.memory_space<vmem>>, vector<1x1x16x32xf32>
      %236 = vector.shape_cast %235 : vector<1x1x16x32xf32> to vector<16x32xf32>
      %237 = vector.shape_cast %233 : vector<16x32xf32> to vector<1x1x16x32xf32>
      tpu.vector_store %arg5[%c0_154, %234, %c0_155, %c0_156], %237 {strides = array<i32>} : memref<1x16x16x32xf32, #tpu.memory_space<vmem>>, vector<1x1x16x32xf32>,
    }
    %c16_i32_0 = arith.constant 16 : i32
    return
  }
  func.func @transform_0(%arg0: i32) -> (i32, i32, i32, i32) {
    %c0_i32 = arith.constant 0 : i32
    %c0_i32_0 = arith.constant 0 : i32
    %c0_i32_1 = arith.constant 0 : i32
    %c0_i32_2 = arith.constant 0 : i32
    return %arg0, %c0_i32, %c0_i32_0, %c0_i32_1 : i32, i32, i32, i32
  }
  func.func @transform_1(%arg0: i32) -> (i32, i32, i32) {
    %c0_i32 = arith.constant 0 : i32
    %c0_i32_0 = arith.constant 0 : i32
    %c0_i32_1 = arith.constant 0 : i32
    %c0_i32_2 = arith.constant 0 : i32
    return %c0_i32, %c0_i32_0, %c0_i32_1 : i32, i32, i32
  }
  func.func @transform_2(%arg0: i32) -> (i32, i32) {
    %c0_i32 = arith.constant 0 : i32
    %c0_i32_0 = arith.constant 0 : i32
    %c0_i32_1 = arith.constant 0 : i32
    return %c0_i32, %c0_i32_0 : i32, i32
  }
  func.func @transform_3(%arg0: i32) -> (i32, i32) {
    %c0_i32 = arith.constant 0 : i32
    %c0_i32_0 = arith.constant 0 : i32
    %c0_i32_1 = arith.constant 0 : i32
    return %c0_i32, %c0_i32_0 : i32, i32
  }
  func.func @transform_4(%arg0: i32) -> (i32, i32, i32, i32) {
    %c0_i32 = arith.constant 0 : i32
    %c0_i32_0 = arith.constant 0 : i32
    %c0_i32_1 = arith.constant 0 : i32
    %c0_i32_2 = arith.constant 0 : i32
    return %arg0, %c0_i32, %c0_i32_0, %c0_i32_1 : i32, i32, i32, i32
  }
}

module attributes {stable_mosaic.version = 11 : i64} {
  func.func @kernel(%arg0: i32, %arg1: memref<1x20x20x32xf32, #tpu.memory_space<vmem>>, %arg2: memref<25x1x32xf32, #tpu.memory_space<vmem>>, %arg3: memref<32x32xbf16, #tpu.memory_space<vmem>>, %arg4: memref<1x32xf32, #tpu.memory_space<vmem>>, %arg5: memref<1x16x16x32xf32, #tpu.memory_space<vmem>>, %arg6: memref<1x16x16x32xf32, #tpu.memory_space<vmem>>) attributes {dimension_semantics = [#tpu.dimension_semantics<parallel>], iteration_bounds = array<i64: 2>, scalar_prefetch = 0 : i64, scratch_operands = 0 : i64, tpu.core_type = #tpu.core_type<tc>, window_params = [{transform_indices = @transform_0, window_bounds = array<i64: 1, 20, 20, 32>}, {pipeline_mode = #tpu.pipeline_mode<synchronous>, transform_indices = @transform_1, window_bounds = array<i64: 25, 1, 32>}, {pipeline_mode = #tpu.pipeline_mode<synchronous>, transform_indices = @transform_2, window_bounds = array<i64: 32, 32>}, {pipeline_mode = #tpu.pipeline_mode<synchronous>, transform_indices = @transform_3, window_bounds = array<i64: 1, 32>}, {transform_indices = @transform_4, window_bounds = array<i64: 1, 16, 16, 32>}, {transform_indices = @transform_5, window_bounds = array<i64: 1, 16, 16, 32>}]} {
    %c0_i32 = arith.constant 0 : i32
    %c16_i32 = arith.constant 16 : i32
    %0 = arith.addi %c0_i32, %c16_i32 : i32
    %c1_i32 = arith.constant 1 : i32
    scf.for %arg7 = %c0_i32 to %0 step %c1_i32  : i32 {
      %c1_i32_1 = arith.constant 1 : i32
      %1 = arith.muli %arg7, %c1_i32_1 : i32
      %c0_i32_2 = arith.constant 0 : i32
      %2 = arith.addi %1, %c0_i32_2 : i32
      %c0 = arith.constant 0 : index
      %3 = arith.index_cast %2 : i32 to index
      %c0_3 = arith.constant 0 : index
      %c0_4 = arith.constant 0 : index
      %4 = vector.load %arg1[%c0, %3, %c0_3, %c0_4] : memref<1x20x20x32xf32, #tpu.memory_space<vmem>>, vector<1x1x16x32xf32>
      %5 = vector.shape_cast %4 : vector<1x1x16x32xf32> to vector<16x32xf32>
      %c0_5 = arith.constant 0 : index
      %c0_6 = arith.constant 0 : index
      %c0_7 = arith.constant 0 : index
      %6 = vector.load %arg2[%c0_5, %c0_6, %c0_7] : memref<25x1x32xf32, #tpu.memory_space<vmem>>, vector<1x1x32xf32>
      %7 = vector.shape_cast %6 : vector<1x1x32xf32> to vector<1x32xf32>
      %8 = vector.broadcast %7 : vector<1x32xf32> to vector<16x32xf32>
      %9 = arith.mulf %5, %8 : vector<16x32xf32>
      %c0_i32_8 = arith.constant 0 : i32
      %10 = arith.addi %1, %c0_i32_8 : i32
      %c0_9 = arith.constant 0 : index
      %11 = arith.index_cast %10 : i32 to index
      %c1 = arith.constant 1 : index
      %c0_10 = arith.constant 0 : index
      %12 = vector.load %arg1[%c0_9, %11, %c1, %c0_10] : memref<1x20x20x32xf32, #tpu.memory_space<vmem>>, vector<1x1x16x32xf32>
      %13 = vector.shape_cast %12 : vector<1x1x16x32xf32> to vector<16x32xf32>
      %c1_11 = arith.constant 1 : index
      %c0_12 = arith.constant 0 : index
      %c0_13 = arith.constant 0 : index
      %14 = vector.load %arg2[%c1_11, %c0_12, %c0_13] : memref<25x1x32xf32, #tpu.memory_space<vmem>>, vector<1x1x32xf32>
      %15 = vector.shape_cast %14 : vector<1x1x32xf32> to vector<1x32xf32>
      %16 = vector.broadcast %15 : vector<1x32xf32> to vector<16x32xf32>
      %17 = arith.mulf %13, %16 : vector<16x32xf32>
      %18 = arith.addf %9, %17 : vector<16x32xf32>
      %c0_i32_14 = arith.constant 0 : i32
      %19 = arith.addi %1, %c0_i32_14 : i32
      %c0_15 = arith.constant 0 : index
      %20 = arith.index_cast %19 : i32 to index
      %c2 = arith.constant 2 : index
      %c0_16 = arith.constant 0 : index
      %21 = vector.load %arg1[%c0_15, %20, %c2, %c0_16] : memref<1x20x20x32xf32, #tpu.memory_space<vmem>>, vector<1x1x16x32xf32>
      %22 = vector.shape_cast %21 : vector<1x1x16x32xf32> to vector<16x32xf32>
      %c2_17 = arith.constant 2 : index
      %c0_18 = arith.constant 0 : index
      %c0_19 = arith.constant 0 : index
      %23 = vector.load %arg2[%c2_17, %c0_18, %c0_19] : memref<25x1x32xf32, #tpu.memory_space<vmem>>, vector<1x1x32xf32>
      %24 = vector.shape_cast %23 : vector<1x1x32xf32> to vector<1x32xf32>
      %25 = vector.broadcast %24 : vector<1x32xf32> to vector<16x32xf32>
      %26 = arith.mulf %22, %25 : vector<16x32xf32>
      %27 = arith.addf %18, %26 : vector<16x32xf32>
      %c0_i32_20 = arith.constant 0 : i32
      %28 = arith.addi %1, %c0_i32_20 : i32
      %c0_21 = arith.constant 0 : index
      %29 = arith.index_cast %28 : i32 to index
      %c3 = arith.constant 3 : index
      %c0_22 = arith.constant 0 : index
      %30 = vector.load %arg1[%c0_21, %29, %c3, %c0_22] : memref<1x20x20x32xf32, #tpu.memory_space<vmem>>, vector<1x1x16x32xf32>
      %31 = vector.shape_cast %30 : vector<1x1x16x32xf32> to vector<16x32xf32>
      %c3_23 = arith.constant 3 : index
      %c0_24 = arith.constant 0 : index
      %c0_25 = arith.constant 0 : index
      %32 = vector.load %arg2[%c3_23, %c0_24, %c0_25] : memref<25x1x32xf32, #tpu.memory_space<vmem>>, vector<1x1x32xf32>
      %33 = vector.shape_cast %32 : vector<1x1x32xf32> to vector<1x32xf32>
      %34 = vector.broadcast %33 : vector<1x32xf32> to vector<16x32xf32>
      %35 = arith.mulf %31, %34 : vector<16x32xf32>
      %36 = arith.addf %27, %35 : vector<16x32xf32>
      %c0_i32_26 = arith.constant 0 : i32
      %37 = arith.addi %1, %c0_i32_26 : i32
      %c0_27 = arith.constant 0 : index
      %38 = arith.index_cast %37 : i32 to index
      %c4 = arith.constant 4 : index
      %c0_28 = arith.constant 0 : index
      %39 = vector.load %arg1[%c0_27, %38, %c4, %c0_28] : memref<1x20x20x32xf32, #tpu.memory_space<vmem>>, vector<1x1x16x32xf32>
      %40 = vector.shape_cast %39 : vector<1x1x16x32xf32> to vector<16x32xf32>
      %c4_29 = arith.constant 4 : index
      %c0_30 = arith.constant 0 : index
      %c0_31 = arith.constant 0 : index
      %41 = vector.load %arg2[%c4_29, %c0_30, %c0_31] : memref<25x1x32xf32, #tpu.memory_space<vmem>>, vector<1x1x32xf32>
      %42 = vector.shape_cast %41 : vector<1x1x32xf32> to vector<1x32xf32>
      %43 = vector.broadcast %42 : vector<1x32xf32> to vector<16x32xf32>
      %44 = arith.mulf %40, %43 : vector<16x32xf32>
      %45 = arith.addf %36, %44 : vector<16x32xf32>
      %c1_i32_32 = arith.constant 1 : i32
      %46 = arith.addi %1, %c1_i32_32 : i32
      %c0_33 = arith.constant 0 : index
      %47 = arith.index_cast %46 : i32 to index
      %c0_34 = arith.constant 0 : index
      %c0_35 = arith.constant 0 : index
      %48 = vector.load %arg1[%c0_33, %47, %c0_34, %c0_35] : memref<1x20x20x32xf32, #tpu.memory_space<vmem>>, vector<1x1x16x32xf32>
      %49 = vector.shape_cast %48 : vector<1x1x16x32xf32> to vector<16x32xf32>
      %c5 = arith.constant 5 : index
      %c0_36 = arith.constant 0 : index
      %c0_37 = arith.constant 0 : index
      %50 = vector.load %arg2[%c5, %c0_36, %c0_37] : memref<25x1x32xf32, #tpu.memory_space<vmem>>, vector<1x1x32xf32>
      %51 = vector.shape_cast %50 : vector<1x1x32xf32> to vector<1x32xf32>
      %52 = vector.broadcast %51 : vector<1x32xf32> to vector<16x32xf32>
      %53 = arith.mulf %49, %52 : vector<16x32xf32>
      %54 = arith.addf %45, %53 : vector<16x32xf32>
      %c1_i32_38 = arith.constant 1 : i32
      %55 = arith.addi %1, %c1_i32_38 : i32
      %c0_39 = arith.constant 0 : index
      %56 = arith.index_cast %55 : i32 to index
      %c1_40 = arith.constant 1 : index
      %c0_41 = arith.constant 0 : index
      %57 = vector.load %arg1[%c0_39, %56, %c1_40, %c0_41] : memref<1x20x20x32xf32, #tpu.memory_space<vmem>>, vector<1x1x16x32xf32>
      %58 = vector.shape_cast %57 : vector<1x1x16x32xf32> to vector<16x32xf32>
      %c6 = arith.constant 6 : index
      %c0_42 = arith.constant 0 : index
      %c0_43 = arith.constant 0 : index
      %59 = vector.load %arg2[%c6, %c0_42, %c0_43] : memref<25x1x32xf32, #tpu.memory_space<vmem>>, vector<1x1x32xf32>
      %60 = vector.shape_cast %59 : vector<1x1x32xf32> to vector<1x32xf32>
      %61 = vector.broadcast %60 : vector<1x32xf32> to vector<16x32xf32>
      %62 = arith.mulf %58, %61 : vector<16x32xf32>
      %63 = arith.addf %54, %62 : vector<16x32xf32>
      %c1_i32_44 = arith.constant 1 : i32
      %64 = arith.addi %1, %c1_i32_44 : i32
      %c0_45 = arith.constant 0 : index
      %65 = arith.index_cast %64 : i32 to index
      %c2_46 = arith.constant 2 : index
      %c0_47 = arith.constant 0 : index
      %66 = vector.load %arg1[%c0_45, %65, %c2_46, %c0_47] : memref<1x20x20x32xf32, #tpu.memory_space<vmem>>, vector<1x1x16x32xf32>
      %67 = vector.shape_cast %66 : vector<1x1x16x32xf32> to vector<16x32xf32>
      %c7 = arith.constant 7 : index
      %c0_48 = arith.constant 0 : index
      %c0_49 = arith.constant 0 : index
      %68 = vector.load %arg2[%c7, %c0_48, %c0_49] : memref<25x1x32xf32, #tpu.memory_space<vmem>>, vector<1x1x32xf32>
      %69 = vector.shape_cast %68 : vector<1x1x32xf32> to vector<1x32xf32>
      %70 = vector.broadcast %69 : vector<1x32xf32> to vector<16x32xf32>
      %71 = arith.mulf %67, %70 : vector<16x32xf32>
      %72 = arith.addf %63, %71 : vector<16x32xf32>
      %c1_i32_50 = arith.constant 1 : i32
      %73 = arith.addi %1, %c1_i32_50 : i32
      %c0_51 = arith.constant 0 : index
      %74 = arith.index_cast %73 : i32 to index
      %c3_52 = arith.constant 3 : index
      %c0_53 = arith.constant 0 : index
      %75 = vector.load %arg1[%c0_51, %74, %c3_52, %c0_53] : memref<1x20x20x32xf32, #tpu.memory_space<vmem>>, vector<1x1x16x32xf32>
      %76 = vector.shape_cast %75 : vector<1x1x16x32xf32> to vector<16x32xf32>
      %c8 = arith.constant 8 : index
      %c0_54 = arith.constant 0 : index
      %c0_55 = arith.constant 0 : index
      %77 = vector.load %arg2[%c8, %c0_54, %c0_55] : memref<25x1x32xf32, #tpu.memory_space<vmem>>, vector<1x1x32xf32>
      %78 = vector.shape_cast %77 : vector<1x1x32xf32> to vector<1x32xf32>
      %79 = vector.broadcast %78 : vector<1x32xf32> to vector<16x32xf32>
      %80 = arith.mulf %76, %79 : vector<16x32xf32>
      %81 = arith.addf %72, %80 : vector<16x32xf32>
      %c1_i32_56 = arith.constant 1 : i32
      %82 = arith.addi %1, %c1_i32_56 : i32
      %c0_57 = arith.constant 0 : index
      %83 = arith.index_cast %82 : i32 to index
      %c4_58 = arith.constant 4 : index
      %c0_59 = arith.constant 0 : index
      %84 = vector.load %arg1[%c0_57, %83, %c4_58, %c0_59] : memref<1x20x20x32xf32, #tpu.memory_space<vmem>>, vector<1x1x16x32xf32>
      %85 = vector.shape_cast %84 : vector<1x1x16x32xf32> to vector<16x32xf32>
      %c9 = arith.constant 9 : index
      %c0_60 = arith.constant 0 : index
      %c0_61 = arith.constant 0 : index
      %86 = vector.load %arg2[%c9, %c0_60, %c0_61] : memref<25x1x32xf32, #tpu.memory_space<vmem>>, vector<1x1x32xf32>
      %87 = vector.shape_cast %86 : vector<1x1x32xf32> to vector<1x32xf32>
      %88 = vector.broadcast %87 : vector<1x32xf32> to vector<16x32xf32>
      %89 = arith.mulf %85, %88 : vector<16x32xf32>
      %90 = arith.addf %81, %89 : vector<16x32xf32>
      %c2_i32 = arith.constant 2 : i32
      %91 = arith.addi %1, %c2_i32 : i32
      %c0_62 = arith.constant 0 : index
      %92 = arith.index_cast %91 : i32 to index
      %c0_63 = arith.constant 0 : index
      %c0_64 = arith.constant 0 : index
      %93 = vector.load %arg1[%c0_62, %92, %c0_63, %c0_64] : memref<1x20x20x32xf32, #tpu.memory_space<vmem>>, vector<1x1x16x32xf32>
      %94 = vector.shape_cast %93 : vector<1x1x16x32xf32> to vector<16x32xf32>
      %c10 = arith.constant 10 : index
      %c0_65 = arith.constant 0 : index
      %c0_66 = arith.constant 0 : index
      %95 = vector.load %arg2[%c10, %c0_65, %c0_66] : memref<25x1x32xf32, #tpu.memory_space<vmem>>, vector<1x1x32xf32>
      %96 = vector.shape_cast %95 : vector<1x1x32xf32> to vector<1x32xf32>
      %97 = vector.broadcast %96 : vector<1x32xf32> to vector<16x32xf32>
      %98 = arith.mulf %94, %97 : vector<16x32xf32>
      %99 = arith.addf %90, %98 : vector<16x32xf32>
      %c2_i32_67 = arith.constant 2 : i32
      %100 = arith.addi %1, %c2_i32_67 : i32
      %c0_68 = arith.constant 0 : index
      %101 = arith.index_cast %100 : i32 to index
      %c1_69 = arith.constant 1 : index
      %c0_70 = arith.constant 0 : index
      %102 = vector.load %arg1[%c0_68, %101, %c1_69, %c0_70] : memref<1x20x20x32xf32, #tpu.memory_space<vmem>>, vector<1x1x16x32xf32>
      %103 = vector.shape_cast %102 : vector<1x1x16x32xf32> to vector<16x32xf32>
      %c11 = arith.constant 11 : index
      %c0_71 = arith.constant 0 : index
      %c0_72 = arith.constant 0 : index
      %104 = vector.load %arg2[%c11, %c0_71, %c0_72] : memref<25x1x32xf32, #tpu.memory_space<vmem>>, vector<1x1x32xf32>
      %105 = vector.shape_cast %104 : vector<1x1x32xf32> to vector<1x32xf32>
      %106 = vector.broadcast %105 : vector<1x32xf32> to vector<16x32xf32>
      %107 = arith.mulf %103, %106 : vector<16x32xf32>
      %108 = arith.addf %99, %107 : vector<16x32xf32>
      %c2_i32_73 = arith.constant 2 : i32
      %109 = arith.addi %1, %c2_i32_73 : i32
      %c0_74 = arith.constant 0 : index
      %110 = arith.index_cast %109 : i32 to index
      %c2_75 = arith.constant 2 : index
      %c0_76 = arith.constant 0 : index
      %111 = vector.load %arg1[%c0_74, %110, %c2_75, %c0_76] : memref<1x20x20x32xf32, #tpu.memory_space<vmem>>, vector<1x1x16x32xf32>
      %112 = vector.shape_cast %111 : vector<1x1x16x32xf32> to vector<16x32xf32>
      %c12 = arith.constant 12 : index
      %c0_77 = arith.constant 0 : index
      %c0_78 = arith.constant 0 : index
      %113 = vector.load %arg2[%c12, %c0_77, %c0_78] : memref<25x1x32xf32, #tpu.memory_space<vmem>>, vector<1x1x32xf32>
      %114 = vector.shape_cast %113 : vector<1x1x32xf32> to vector<1x32xf32>
      %115 = vector.broadcast %114 : vector<1x32xf32> to vector<16x32xf32>
      %116 = arith.mulf %112, %115 : vector<16x32xf32>
      %117 = arith.addf %108, %116 : vector<16x32xf32>
      %c2_i32_79 = arith.constant 2 : i32
      %118 = arith.addi %1, %c2_i32_79 : i32
      %c0_80 = arith.constant 0 : index
      %119 = arith.index_cast %118 : i32 to index
      %c3_81 = arith.constant 3 : index
      %c0_82 = arith.constant 0 : index
      %120 = vector.load %arg1[%c0_80, %119, %c3_81, %c0_82] : memref<1x20x20x32xf32, #tpu.memory_space<vmem>>, vector<1x1x16x32xf32>
      %121 = vector.shape_cast %120 : vector<1x1x16x32xf32> to vector<16x32xf32>
      %c13 = arith.constant 13 : index
      %c0_83 = arith.constant 0 : index
      %c0_84 = arith.constant 0 : index
      %122 = vector.load %arg2[%c13, %c0_83, %c0_84] : memref<25x1x32xf32, #tpu.memory_space<vmem>>, vector<1x1x32xf32>
      %123 = vector.shape_cast %122 : vector<1x1x32xf32> to vector<1x32xf32>
      %124 = vector.broadcast %123 : vector<1x32xf32> to vector<16x32xf32>
      %125 = arith.mulf %121, %124 : vector<16x32xf32>
      %126 = arith.addf %117, %125 : vector<16x32xf32>
      %c2_i32_85 = arith.constant 2 : i32
      %127 = arith.addi %1, %c2_i32_85 : i32
      %c0_86 = arith.constant 0 : index
      %128 = arith.index_cast %127 : i32 to index
      %c4_87 = arith.constant 4 : index
      %c0_88 = arith.constant 0 : index
      %129 = vector.load %arg1[%c0_86, %128, %c4_87, %c0_88] : memref<1x20x20x32xf32, #tpu.memory_space<vmem>>, vector<1x1x16x32xf32>
      %130 = vector.shape_cast %129 : vector<1x1x16x32xf32> to vector<16x32xf32>
      %c14 = arith.constant 14 : index
      %c0_89 = arith.constant 0 : index
      %c0_90 = arith.constant 0 : index
      %131 = vector.load %arg2[%c14, %c0_89, %c0_90] : memref<25x1x32xf32, #tpu.memory_space<vmem>>, vector<1x1x32xf32>
      %132 = vector.shape_cast %131 : vector<1x1x32xf32> to vector<1x32xf32>
      %133 = vector.broadcast %132 : vector<1x32xf32> to vector<16x32xf32>
      %134 = arith.mulf %130, %133 : vector<16x32xf32>
      %135 = arith.addf %126, %134 : vector<16x32xf32>
      %c3_i32 = arith.constant 3 : i32
      %136 = arith.addi %1, %c3_i32 : i32
      %c0_91 = arith.constant 0 : index
      %137 = arith.index_cast %136 : i32 to index
      %c0_92 = arith.constant 0 : index
      %c0_93 = arith.constant 0 : index
      %138 = vector.load %arg1[%c0_91, %137, %c0_92, %c0_93] : memref<1x20x20x32xf32, #tpu.memory_space<vmem>>, vector<1x1x16x32xf32>
      %139 = vector.shape_cast %138 : vector<1x1x16x32xf32> to vector<16x32xf32>
      %c15 = arith.constant 15 : index
      %c0_94 = arith.constant 0 : index
      %c0_95 = arith.constant 0 : index
      %140 = vector.load %arg2[%c15, %c0_94, %c0_95] : memref<25x1x32xf32, #tpu.memory_space<vmem>>, vector<1x1x32xf32>
      %141 = vector.shape_cast %140 : vector<1x1x32xf32> to vector<1x32xf32>
      %142 = vector.broadcast %141 : vector<1x32xf32> to vector<16x32xf32>
      %143 = arith.mulf %139, %142 : vector<16x32xf32>
      %144 = arith.addf %135, %143 : vector<16x32xf32>
      %c3_i32_96 = arith.constant 3 : i32
      %145 = arith.addi %1, %c3_i32_96 : i32
      %c0_97 = arith.constant 0 : index
      %146 = arith.index_cast %145 : i32 to index
      %c1_98 = arith.constant 1 : index
      %c0_99 = arith.constant 0 : index
      %147 = vector.load %arg1[%c0_97, %146, %c1_98, %c0_99] : memref<1x20x20x32xf32, #tpu.memory_space<vmem>>, vector<1x1x16x32xf32>
      %148 = vector.shape_cast %147 : vector<1x1x16x32xf32> to vector<16x32xf32>
      %c16 = arith.constant 16 : index
      %c0_100 = arith.constant 0 : index
      %c0_101 = arith.constant 0 : index
      %149 = vector.load %arg2[%c16, %c0_100, %c0_101] : memref<25x1x32xf32, #tpu.memory_space<vmem>>, vector<1x1x32xf32>
      %150 = vector.shape_cast %149 : vector<1x1x32xf32> to vector<1x32xf32>
      %151 = vector.broadcast %150 : vector<1x32xf32> to vector<16x32xf32>
      %152 = arith.mulf %148, %151 : vector<16x32xf32>
      %153 = arith.addf %144, %152 : vector<16x32xf32>
      %c3_i32_102 = arith.constant 3 : i32
      %154 = arith.addi %1, %c3_i32_102 : i32
      %c0_103 = arith.constant 0 : index
      %155 = arith.index_cast %154 : i32 to index
      %c2_104 = arith.constant 2 : index
      %c0_105 = arith.constant 0 : index
      %156 = vector.load %arg1[%c0_103, %155, %c2_104, %c0_105] : memref<1x20x20x32xf32, #tpu.memory_space<vmem>>, vector<1x1x16x32xf32>
      %157 = vector.shape_cast %156 : vector<1x1x16x32xf32> to vector<16x32xf32>
      %c17 = arith.constant 17 : index
      %c0_106 = arith.constant 0 : index
      %c0_107 = arith.constant 0 : index
      %158 = vector.load %arg2[%c17, %c0_106, %c0_107] : memref<25x1x32xf32, #tpu.memory_space<vmem>>, vector<1x1x32xf32>
      %159 = vector.shape_cast %158 : vector<1x1x32xf32> to vector<1x32xf32>
      %160 = vector.broadcast %159 : vector<1x32xf32> to vector<16x32xf32>
      %161 = arith.mulf %157, %160 : vector<16x32xf32>
      %162 = arith.addf %153, %161 : vector<16x32xf32>
      %c3_i32_108 = arith.constant 3 : i32
      %163 = arith.addi %1, %c3_i32_108 : i32
      %c0_109 = arith.constant 0 : index
      %164 = arith.index_cast %163 : i32 to index
      %c3_110 = arith.constant 3 : index
      %c0_111 = arith.constant 0 : index
      %165 = vector.load %arg1[%c0_109, %164, %c3_110, %c0_111] : memref<1x20x20x32xf32, #tpu.memory_space<vmem>>, vector<1x1x16x32xf32>
      %166 = vector.shape_cast %165 : vector<1x1x16x32xf32> to vector<16x32xf32>
      %c18 = arith.constant 18 : index
      %c0_112 = arith.constant 0 : index
      %c0_113 = arith.constant 0 : index
      %167 = vector.load %arg2[%c18, %c0_112, %c0_113] : memref<25x1x32xf32, #tpu.memory_space<vmem>>, vector<1x1x32xf32>
      %168 = vector.shape_cast %167 : vector<1x1x32xf32> to vector<1x32xf32>
      %169 = vector.broadcast %168 : vector<1x32xf32> to vector<16x32xf32>
      %170 = arith.mulf %166, %169 : vector<16x32xf32>
      %171 = arith.addf %162, %170 : vector<16x32xf32>
      %c3_i32_114 = arith.constant 3 : i32
      %172 = arith.addi %1, %c3_i32_114 : i32
      %c0_115 = arith.constant 0 : index
      %173 = arith.index_cast %172 : i32 to index
      %c4_116 = arith.constant 4 : index
      %c0_117 = arith.constant 0 : index
      %174 = vector.load %arg1[%c0_115, %173, %c4_116, %c0_117] : memref<1x20x20x32xf32, #tpu.memory_space<vmem>>, vector<1x1x16x32xf32>
      %175 = vector.shape_cast %174 : vector<1x1x16x32xf32> to vector<16x32xf32>
      %c19 = arith.constant 19 : index
      %c0_118 = arith.constant 0 : index
      %c0_119 = arith.constant 0 : index
      %176 = vector.load %arg2[%c19, %c0_118, %c0_119] : memref<25x1x32xf32, #tpu.memory_space<vmem>>, vector<1x1x32xf32>
      %177 = vector.shape_cast %176 : vector<1x1x32xf32> to vector<1x32xf32>
      %178 = vector.broadcast %177 : vector<1x32xf32> to vector<16x32xf32>
      %179 = arith.mulf %175, %178 : vector<16x32xf32>
      %180 = arith.addf %171, %179 : vector<16x32xf32>
      %c4_i32 = arith.constant 4 : i32
      %181 = arith.addi %1, %c4_i32 : i32
      %c0_120 = arith.constant 0 : index
      %182 = arith.index_cast %181 : i32 to index
      %c0_121 = arith.constant 0 : index
      %c0_122 = arith.constant 0 : index
      %183 = vector.load %arg1[%c0_120, %182, %c0_121, %c0_122] : memref<1x20x20x32xf32, #tpu.memory_space<vmem>>, vector<1x1x16x32xf32>
      %184 = vector.shape_cast %183 : vector<1x1x16x32xf32> to vector<16x32xf32>
      %c20 = arith.constant 20 : index
      %c0_123 = arith.constant 0 : index
      %c0_124 = arith.constant 0 : index
      %185 = vector.load %arg2[%c20, %c0_123, %c0_124] : memref<25x1x32xf32, #tpu.memory_space<vmem>>, vector<1x1x32xf32>
      %186 = vector.shape_cast %185 : vector<1x1x32xf32> to vector<1x32xf32>
      %187 = vector.broadcast %186 : vector<1x32xf32> to vector<16x32xf32>
      %188 = arith.mulf %184, %187 : vector<16x32xf32>
      %189 = arith.addf %180, %188 : vector<16x32xf32>
      %c4_i32_125 = arith.constant 4 : i32
      %190 = arith.addi %1, %c4_i32_125 : i32
      %c0_126 = arith.constant 0 : index
      %191 = arith.index_cast %190 : i32 to index
      %c1_127 = arith.constant 1 : index
      %c0_128 = arith.constant 0 : index
      %192 = vector.load %arg1[%c0_126, %191, %c1_127, %c0_128] : memref<1x20x20x32xf32, #tpu.memory_space<vmem>>, vector<1x1x16x32xf32>
      %193 = vector.shape_cast %192 : vector<1x1x16x32xf32> to vector<16x32xf32>
      %c21 = arith.constant 21 : index
      %c0_129 = arith.constant 0 : index
      %c0_130 = arith.constant 0 : index
      %194 = vector.load %arg2[%c21, %c0_129, %c0_130] : memref<25x1x32xf32, #tpu.memory_space<vmem>>, vector<1x1x32xf32>
      %195 = vector.shape_cast %194 : vector<1x1x32xf32> to vector<1x32xf32>
      %196 = vector.broadcast %195 : vector<1x32xf32> to vector<16x32xf32>
      %197 = arith.mulf %193, %196 : vector<16x32xf32>
      %198 = arith.addf %189, %197 : vector<16x32xf32>
      %c4_i32_131 = arith.constant 4 : i32
      %199 = arith.addi %1, %c4_i32_131 : i32
      %c0_132 = arith.constant 0 : index
      %200 = arith.index_cast %199 : i32 to index
      %c2_133 = arith.constant 2 : index
      %c0_134 = arith.constant 0 : index
      %201 = vector.load %arg1[%c0_132, %200, %c2_133, %c0_134] : memref<1x20x20x32xf32, #tpu.memory_space<vmem>>, vector<1x1x16x32xf32>
      %202 = vector.shape_cast %201 : vector<1x1x16x32xf32> to vector<16x32xf32>
      %c22 = arith.constant 22 : index
      %c0_135 = arith.constant 0 : index
      %c0_136 = arith.constant 0 : index
      %203 = vector.load %arg2[%c22, %c0_135, %c0_136] : memref<25x1x32xf32, #tpu.memory_space<vmem>>, vector<1x1x32xf32>
      %204 = vector.shape_cast %203 : vector<1x1x32xf32> to vector<1x32xf32>
      %205 = vector.broadcast %204 : vector<1x32xf32> to vector<16x32xf32>
      %206 = arith.mulf %202, %205 : vector<16x32xf32>
      %207 = arith.addf %198, %206 : vector<16x32xf32>
      %c4_i32_137 = arith.constant 4 : i32
      %208 = arith.addi %1, %c4_i32_137 : i32
      %c0_138 = arith.constant 0 : index
      %209 = arith.index_cast %208 : i32 to index
      %c3_139 = arith.constant 3 : index
      %c0_140 = arith.constant 0 : index
      %210 = vector.load %arg1[%c0_138, %209, %c3_139, %c0_140] : memref<1x20x20x32xf32, #tpu.memory_space<vmem>>, vector<1x1x16x32xf32>
      %211 = vector.shape_cast %210 : vector<1x1x16x32xf32> to vector<16x32xf32>
      %c23 = arith.constant 23 : index
      %c0_141 = arith.constant 0 : index
      %c0_142 = arith.constant 0 : index
      %212 = vector.load %arg2[%c23, %c0_141, %c0_142] : memref<25x1x32xf32, #tpu.memory_space<vmem>>, vector<1x1x32xf32>
      %213 = vector.shape_cast %212 : vector<1x1x32xf32> to vector<1x32xf32>
      %214 = vector.broadcast %213 : vector<1x32xf32> to vector<16x32xf32>
      %215 = arith.mulf %211, %214 : vector<16x32xf32>
      %216 = arith.addf %207, %215 : vector<16x32xf32>
      %c4_i32_143 = arith.constant 4 : i32
      %217 = arith.addi %1, %c4_i32_143 : i32
      %c0_144 = arith.constant 0 : index
      %218 = arith.index_cast %217 : i32 to index
      %c4_145 = arith.constant 4 : index
      %c0_146 = arith.constant 0 : index
      %219 = vector.load %arg1[%c0_144, %218, %c4_145, %c0_146] : memref<1x20x20x32xf32, #tpu.memory_space<vmem>>, vector<1x1x16x32xf32>
      %220 = vector.shape_cast %219 : vector<1x1x16x32xf32> to vector<16x32xf32>
      %c24 = arith.constant 24 : index
      %c0_147 = arith.constant 0 : index
      %c0_148 = arith.constant 0 : index
      %221 = vector.load %arg2[%c24, %c0_147, %c0_148] : memref<25x1x32xf32, #tpu.memory_space<vmem>>, vector<1x1x32xf32>
      %222 = vector.shape_cast %221 : vector<1x1x32xf32> to vector<1x32xf32>
      %223 = vector.broadcast %222 : vector<1x32xf32> to vector<16x32xf32>
      %224 = arith.mulf %220, %223 : vector<16x32xf32>
      %225 = arith.addf %216, %224 : vector<16x32xf32>
      %226 = arith.truncf %225 : vector<16x32xf32> to vector<16x32xbf16>
      %c0_149 = arith.constant 0 : index
      %c0_150 = arith.constant 0 : index
      %227 = vector.load %arg3[%c0_149, %c0_150] : memref<32x32xbf16, #tpu.memory_space<vmem>>, vector<32x32xbf16>
      %cst = arith.constant dense<0.000000e+00> : vector<16x32xf32>
      %228 = tpu.matmul %226, %227, %cst {dimension_numbers = #tpu.dot_dimension_numbers<[1], [0], [0], [1], [0, 0, 1, 1], [], []>} : vector<16x32xbf16>, vector<32x32xbf16>, vector<16x32xf32> -> vector<16x32xf32>
      %c0_151 = arith.constant 0 : index
      %c0_152 = arith.constant 0 : index
      %229 = vector.load %arg4[%c0_151, %c0_152] : memref<1x32xf32, #tpu.memory_space<vmem>>, vector<1x32xf32>
      %230 = vector.broadcast %229 : vector<1x32xf32> to vector<16x32xf32>
      %231 = arith.addf %228, %230 : vector<16x32xf32>
      %cst_153 = arith.constant 0.000000e+00 : f32
      %232 = vector.broadcast %cst_153 : f32 to vector<16x32xf32>
      %233 = arith.maximumf %231, %232 : vector<16x32xf32>
      %c0_154 = arith.constant 0 : index
      %234 = arith.index_cast %arg7 : i32 to index
      %c0_155 = arith.constant 0 : index
      %c0_156 = arith.constant 0 : index
      %235 = vector.load %arg5[%c0_154, %234, %c0_155, %c0_156] : memref<1x16x16x32xf32, #tpu.memory_space<vmem>>, vector<1x1x16x32xf32>
      %236 = vector.shape_cast %235 : vector<1x1x16x32xf32> to vector<16x32xf32>
      %237 = arith.addf %233, %236 : vector<16x32xf32>
      %cst_157 = arith.constant 0.000000e+00 : f32
      %238 = vector.broadcast %cst_157 : f32 to vector<16x32xf32>
      %239 = arith.maximumf %237, %238 : vector<16x32xf32>
      %c0_158 = arith.constant 0 : index
      %240 = arith.index_cast %arg7 : i32 to index
      %c0_159 = arith.constant 0 : index
      %c0_160 = arith.constant 0 : index
      %241 = vector.load %arg6[%c0_158, %240, %c0_159, %c0_160] : memref<1x16x16x32xf32, #tpu.memory_space<vmem>>, vector<1x1x16x32xf32>
      %242 = vector.shape_cast %241 : vector<1x1x16x32xf32> to vector<16x32xf32>
      %243 = vector.shape_cast %239 : vector<16x32xf32> to vector<1x1x16x32xf32>
      tpu.vector_store %arg6[%c0_158, %240, %c0_159, %c0_160], %243 {strides = array<i32>} : memref<1x16x16x32xf32, #tpu.memory_space<vmem>>, vector<1x1x16x32xf32>,
    }
    %c16_i32_0 = arith.constant 16 : i32
    return
  }
  func.func @transform_0(%arg0: i32) -> (i32, i32, i32, i32) {
    %c0_i32 = arith.constant 0 : i32
    %c0_i32_0 = arith.constant 0 : i32
    %c0_i32_1 = arith.constant 0 : i32
    %c0_i32_2 = arith.constant 0 : i32
    return %arg0, %c0_i32, %c0_i32_0, %c0_i32_1 : i32, i32, i32, i32
  }
  func.func @transform_1(%arg0: i32) -> (i32, i32, i32) {
    %c0_i32 = arith.constant 0 : i32
    %c0_i32_0 = arith.constant 0 : i32
    %c0_i32_1 = arith.constant 0 : i32
    %c0_i32_2 = arith.constant 0 : i32
    return %c0_i32, %c0_i32_0, %c0_i32_1 : i32, i32, i32
  }
  func.func @transform_2(%arg0: i32) -> (i32, i32) {
    %c0_i32 = arith.constant 0 : i32
    %c0_i32_0 = arith.constant 0 : i32
    %c0_i32_1 = arith.constant 0 : i32
    return %c0_i32, %c0_i32_0 : i32, i32
  }
  func.func @transform_3(%arg0: i32) -> (i32, i32) {
    %c0_i32 = arith.constant 0 : i32
    %c0_i32_0 = arith.constant 0 : i32
    %c0_i32_1 = arith.constant 0 : i32
    return %c0_i32, %c0_i32_0 : i32, i32
  }
  func.func @transform_4(%arg0: i32) -> (i32, i32, i32, i32) {
    %c0_i32 = arith.constant 0 : i32
    %c0_i32_0 = arith.constant 0 : i32
    %c0_i32_1 = arith.constant 0 : i32
    %c0_i32_2 = arith.constant 0 : i32
    return %arg0, %c0_i32, %c0_i32_0, %c0_i32_1 : i32, i32, i32, i32
  }
  func.func @transform_5(%arg0: i32) -> (i32, i32, i32, i32) {
    %c0_i32 = arith.constant 0 : i32
    %c0_i32_0 = arith.constant 0 : i32
    %c0_i32_1 = arith.constant 0 : i32
    %c0_i32_2 = arith.constant 0 : i32
    return %arg0, %c0_i32, %c0_i32_0, %c0_i32_1 : i32, i32, i32, i32
  }
}

module attributes {stable_mosaic.version = 11 : i64} {
  func.func @kernel(%arg0: i32, %arg1: memref<1x12x12x48xf32, #tpu.memory_space<vmem>>, %arg2: memref<25x1x48xf32, #tpu.memory_space<vmem>>, %arg3: memref<48x48xbf16, #tpu.memory_space<vmem>>, %arg4: memref<1x48xf32, #tpu.memory_space<vmem>>, %arg5: memref<1x8x8x48xf32, #tpu.memory_space<vmem>>, %arg6: memref<1x8x8x48xf32, #tpu.memory_space<vmem>>) attributes {dimension_semantics = [#tpu.dimension_semantics<parallel>], iteration_bounds = array<i64: 2>, scalar_prefetch = 0 : i64, scratch_operands = 0 : i64, tpu.core_type = #tpu.core_type<tc>, window_params = [{transform_indices = @transform_0, window_bounds = array<i64: 1, 12, 12, 48>}, {pipeline_mode = #tpu.pipeline_mode<synchronous>, transform_indices = @transform_1, window_bounds = array<i64: 25, 1, 48>}, {pipeline_mode = #tpu.pipeline_mode<synchronous>, transform_indices = @transform_2, window_bounds = array<i64: 48, 48>}, {pipeline_mode = #tpu.pipeline_mode<synchronous>, transform_indices = @transform_3, window_bounds = array<i64: 1, 48>}, {transform_indices = @transform_4, window_bounds = array<i64: 1, 8, 8, 48>}, {transform_indices = @transform_5, window_bounds = array<i64: 1, 8, 8, 48>}]} {
    %c0_i32 = arith.constant 0 : i32
    %c8_i32 = arith.constant 8 : i32
    %0 = arith.addi %c0_i32, %c8_i32 : i32
    %c1_i32 = arith.constant 1 : i32
    scf.for %arg7 = %c0_i32 to %0 step %c1_i32  : i32 {
      %c1_i32_1 = arith.constant 1 : i32
      %1 = arith.muli %arg7, %c1_i32_1 : i32
      %c0_i32_2 = arith.constant 0 : i32
      %2 = arith.addi %1, %c0_i32_2 : i32
      %c0 = arith.constant 0 : index
      %3 = arith.index_cast %2 : i32 to index
      %c0_3 = arith.constant 0 : index
      %c0_4 = arith.constant 0 : index
      %4 = vector.load %arg1[%c0, %3, %c0_3, %c0_4] : memref<1x12x12x48xf32, #tpu.memory_space<vmem>>, vector<1x1x8x48xf32>
      %5 = vector.shape_cast %4 : vector<1x1x8x48xf32> to vector<8x48xf32>
      %c0_5 = arith.constant 0 : index
      %c0_6 = arith.constant 0 : index
      %c0_7 = arith.constant 0 : index
      %6 = vector.load %arg2[%c0_5, %c0_6, %c0_7] : memref<25x1x48xf32, #tpu.memory_space<vmem>>, vector<1x1x48xf32>
      %7 = vector.shape_cast %6 : vector<1x1x48xf32> to vector<1x48xf32>
      %8 = vector.broadcast %7 : vector<1x48xf32> to vector<8x48xf32>
      %9 = arith.mulf %5, %8 : vector<8x48xf32>
      %c0_i32_8 = arith.constant 0 : i32
      %10 = arith.addi %1, %c0_i32_8 : i32
      %c0_9 = arith.constant 0 : index
      %11 = arith.index_cast %10 : i32 to index
      %c1 = arith.constant 1 : index
      %c0_10 = arith.constant 0 : index
      %12 = vector.load %arg1[%c0_9, %11, %c1, %c0_10] : memref<1x12x12x48xf32, #tpu.memory_space<vmem>>, vector<1x1x8x48xf32>
      %13 = vector.shape_cast %12 : vector<1x1x8x48xf32> to vector<8x48xf32>
      %c1_11 = arith.constant 1 : index
      %c0_12 = arith.constant 0 : index
      %c0_13 = arith.constant 0 : index
      %14 = vector.load %arg2[%c1_11, %c0_12, %c0_13] : memref<25x1x48xf32, #tpu.memory_space<vmem>>, vector<1x1x48xf32>
      %15 = vector.shape_cast %14 : vector<1x1x48xf32> to vector<1x48xf32>
      %16 = vector.broadcast %15 : vector<1x48xf32> to vector<8x48xf32>
      %17 = arith.mulf %13, %16 : vector<8x48xf32>
      %18 = arith.addf %9, %17 : vector<8x48xf32>
      %c0_i32_14 = arith.constant 0 : i32
      %19 = arith.addi %1, %c0_i32_14 : i32
      %c0_15 = arith.constant 0 : index
      %20 = arith.index_cast %19 : i32 to index
      %c2 = arith.constant 2 : index
      %c0_16 = arith.constant 0 : index
      %21 = vector.load %arg1[%c0_15, %20, %c2, %c0_16] : memref<1x12x12x48xf32, #tpu.memory_space<vmem>>, vector<1x1x8x48xf32>
      %22 = vector.shape_cast %21 : vector<1x1x8x48xf32> to vector<8x48xf32>
      %c2_17 = arith.constant 2 : index
      %c0_18 = arith.constant 0 : index
      %c0_19 = arith.constant 0 : index
      %23 = vector.load %arg2[%c2_17, %c0_18, %c0_19] : memref<25x1x48xf32, #tpu.memory_space<vmem>>, vector<1x1x48xf32>
      %24 = vector.shape_cast %23 : vector<1x1x48xf32> to vector<1x48xf32>
      %25 = vector.broadcast %24 : vector<1x48xf32> to vector<8x48xf32>
      %26 = arith.mulf %22, %25 : vector<8x48xf32>
      %27 = arith.addf %18, %26 : vector<8x48xf32>
      %c0_i32_20 = arith.constant 0 : i32
      %28 = arith.addi %1, %c0_i32_20 : i32
      %c0_21 = arith.constant 0 : index
      %29 = arith.index_cast %28 : i32 to index
      %c3 = arith.constant 3 : index
      %c0_22 = arith.constant 0 : index
      %30 = vector.load %arg1[%c0_21, %29, %c3, %c0_22] : memref<1x12x12x48xf32, #tpu.memory_space<vmem>>, vector<1x1x8x48xf32>
      %31 = vector.shape_cast %30 : vector<1x1x8x48xf32> to vector<8x48xf32>
      %c3_23 = arith.constant 3 : index
      %c0_24 = arith.constant 0 : index
      %c0_25 = arith.constant 0 : index
      %32 = vector.load %arg2[%c3_23, %c0_24, %c0_25] : memref<25x1x48xf32, #tpu.memory_space<vmem>>, vector<1x1x48xf32>
      %33 = vector.shape_cast %32 : vector<1x1x48xf32> to vector<1x48xf32>
      %34 = vector.broadcast %33 : vector<1x48xf32> to vector<8x48xf32>
      %35 = arith.mulf %31, %34 : vector<8x48xf32>
      %36 = arith.addf %27, %35 : vector<8x48xf32>
      %c0_i32_26 = arith.constant 0 : i32
      %37 = arith.addi %1, %c0_i32_26 : i32
      %c0_27 = arith.constant 0 : index
      %38 = arith.index_cast %37 : i32 to index
      %c4 = arith.constant 4 : index
      %c0_28 = arith.constant 0 : index
      %39 = vector.load %arg1[%c0_27, %38, %c4, %c0_28] : memref<1x12x12x48xf32, #tpu.memory_space<vmem>>, vector<1x1x8x48xf32>
      %40 = vector.shape_cast %39 : vector<1x1x8x48xf32> to vector<8x48xf32>
      %c4_29 = arith.constant 4 : index
      %c0_30 = arith.constant 0 : index
      %c0_31 = arith.constant 0 : index
      %41 = vector.load %arg2[%c4_29, %c0_30, %c0_31] : memref<25x1x48xf32, #tpu.memory_space<vmem>>, vector<1x1x48xf32>
      %42 = vector.shape_cast %41 : vector<1x1x48xf32> to vector<1x48xf32>
      %43 = vector.broadcast %42 : vector<1x48xf32> to vector<8x48xf32>
      %44 = arith.mulf %40, %43 : vector<8x48xf32>
      %45 = arith.addf %36, %44 : vector<8x48xf32>
      %c1_i32_32 = arith.constant 1 : i32
      %46 = arith.addi %1, %c1_i32_32 : i32
      %c0_33 = arith.constant 0 : index
      %47 = arith.index_cast %46 : i32 to index
      %c0_34 = arith.constant 0 : index
      %c0_35 = arith.constant 0 : index
      %48 = vector.load %arg1[%c0_33, %47, %c0_34, %c0_35] : memref<1x12x12x48xf32, #tpu.memory_space<vmem>>, vector<1x1x8x48xf32>
      %49 = vector.shape_cast %48 : vector<1x1x8x48xf32> to vector<8x48xf32>
      %c5 = arith.constant 5 : index
      %c0_36 = arith.constant 0 : index
      %c0_37 = arith.constant 0 : index
      %50 = vector.load %arg2[%c5, %c0_36, %c0_37] : memref<25x1x48xf32, #tpu.memory_space<vmem>>, vector<1x1x48xf32>
      %51 = vector.shape_cast %50 : vector<1x1x48xf32> to vector<1x48xf32>
      %52 = vector.broadcast %51 : vector<1x48xf32> to vector<8x48xf32>
      %53 = arith.mulf %49, %52 : vector<8x48xf32>
      %54 = arith.addf %45, %53 : vector<8x48xf32>
      %c1_i32_38 = arith.constant 1 : i32
      %55 = arith.addi %1, %c1_i32_38 : i32
      %c0_39 = arith.constant 0 : index
      %56 = arith.index_cast %55 : i32 to index
      %c1_40 = arith.constant 1 : index
      %c0_41 = arith.constant 0 : index
      %57 = vector.load %arg1[%c0_39, %56, %c1_40, %c0_41] : memref<1x12x12x48xf32, #tpu.memory_space<vmem>>, vector<1x1x8x48xf32>
      %58 = vector.shape_cast %57 : vector<1x1x8x48xf32> to vector<8x48xf32>
      %c6 = arith.constant 6 : index
      %c0_42 = arith.constant 0 : index
      %c0_43 = arith.constant 0 : index
      %59 = vector.load %arg2[%c6, %c0_42, %c0_43] : memref<25x1x48xf32, #tpu.memory_space<vmem>>, vector<1x1x48xf32>
      %60 = vector.shape_cast %59 : vector<1x1x48xf32> to vector<1x48xf32>
      %61 = vector.broadcast %60 : vector<1x48xf32> to vector<8x48xf32>
      %62 = arith.mulf %58, %61 : vector<8x48xf32>
      %63 = arith.addf %54, %62 : vector<8x48xf32>
      %c1_i32_44 = arith.constant 1 : i32
      %64 = arith.addi %1, %c1_i32_44 : i32
      %c0_45 = arith.constant 0 : index
      %65 = arith.index_cast %64 : i32 to index
      %c2_46 = arith.constant 2 : index
      %c0_47 = arith.constant 0 : index
      %66 = vector.load %arg1[%c0_45, %65, %c2_46, %c0_47] : memref<1x12x12x48xf32, #tpu.memory_space<vmem>>, vector<1x1x8x48xf32>
      %67 = vector.shape_cast %66 : vector<1x1x8x48xf32> to vector<8x48xf32>
      %c7 = arith.constant 7 : index
      %c0_48 = arith.constant 0 : index
      %c0_49 = arith.constant 0 : index
      %68 = vector.load %arg2[%c7, %c0_48, %c0_49] : memref<25x1x48xf32, #tpu.memory_space<vmem>>, vector<1x1x48xf32>
      %69 = vector.shape_cast %68 : vector<1x1x48xf32> to vector<1x48xf32>
      %70 = vector.broadcast %69 : vector<1x48xf32> to vector<8x48xf32>
      %71 = arith.mulf %67, %70 : vector<8x48xf32>
      %72 = arith.addf %63, %71 : vector<8x48xf32>
      %c1_i32_50 = arith.constant 1 : i32
      %73 = arith.addi %1, %c1_i32_50 : i32
      %c0_51 = arith.constant 0 : index
      %74 = arith.index_cast %73 : i32 to index
      %c3_52 = arith.constant 3 : index
      %c0_53 = arith.constant 0 : index
      %75 = vector.load %arg1[%c0_51, %74, %c3_52, %c0_53] : memref<1x12x12x48xf32, #tpu.memory_space<vmem>>, vector<1x1x8x48xf32>
      %76 = vector.shape_cast %75 : vector<1x1x8x48xf32> to vector<8x48xf32>
      %c8 = arith.constant 8 : index
      %c0_54 = arith.constant 0 : index
      %c0_55 = arith.constant 0 : index
      %77 = vector.load %arg2[%c8, %c0_54, %c0_55] : memref<25x1x48xf32, #tpu.memory_space<vmem>>, vector<1x1x48xf32>
      %78 = vector.shape_cast %77 : vector<1x1x48xf32> to vector<1x48xf32>
      %79 = vector.broadcast %78 : vector<1x48xf32> to vector<8x48xf32>
      %80 = arith.mulf %76, %79 : vector<8x48xf32>
      %81 = arith.addf %72, %80 : vector<8x48xf32>
      %c1_i32_56 = arith.constant 1 : i32
      %82 = arith.addi %1, %c1_i32_56 : i32
      %c0_57 = arith.constant 0 : index
      %83 = arith.index_cast %82 : i32 to index
      %c4_58 = arith.constant 4 : index
      %c0_59 = arith.constant 0 : index
      %84 = vector.load %arg1[%c0_57, %83, %c4_58, %c0_59] : memref<1x12x12x48xf32, #tpu.memory_space<vmem>>, vector<1x1x8x48xf32>
      %85 = vector.shape_cast %84 : vector<1x1x8x48xf32> to vector<8x48xf32>
      %c9 = arith.constant 9 : index
      %c0_60 = arith.constant 0 : index
      %c0_61 = arith.constant 0 : index
      %86 = vector.load %arg2[%c9, %c0_60, %c0_61] : memref<25x1x48xf32, #tpu.memory_space<vmem>>, vector<1x1x48xf32>
      %87 = vector.shape_cast %86 : vector<1x1x48xf32> to vector<1x48xf32>
      %88 = vector.broadcast %87 : vector<1x48xf32> to vector<8x48xf32>
      %89 = arith.mulf %85, %88 : vector<8x48xf32>
      %90 = arith.addf %81, %89 : vector<8x48xf32>
      %c2_i32 = arith.constant 2 : i32
      %91 = arith.addi %1, %c2_i32 : i32
      %c0_62 = arith.constant 0 : index
      %92 = arith.index_cast %91 : i32 to index
      %c0_63 = arith.constant 0 : index
      %c0_64 = arith.constant 0 : index
      %93 = vector.load %arg1[%c0_62, %92, %c0_63, %c0_64] : memref<1x12x12x48xf32, #tpu.memory_space<vmem>>, vector<1x1x8x48xf32>
      %94 = vector.shape_cast %93 : vector<1x1x8x48xf32> to vector<8x48xf32>
      %c10 = arith.constant 10 : index
      %c0_65 = arith.constant 0 : index
      %c0_66 = arith.constant 0 : index
      %95 = vector.load %arg2[%c10, %c0_65, %c0_66] : memref<25x1x48xf32, #tpu.memory_space<vmem>>, vector<1x1x48xf32>
      %96 = vector.shape_cast %95 : vector<1x1x48xf32> to vector<1x48xf32>
      %97 = vector.broadcast %96 : vector<1x48xf32> to vector<8x48xf32>
      %98 = arith.mulf %94, %97 : vector<8x48xf32>
      %99 = arith.addf %90, %98 : vector<8x48xf32>
      %c2_i32_67 = arith.constant 2 : i32
      %100 = arith.addi %1, %c2_i32_67 : i32
      %c0_68 = arith.constant 0 : index
      %101 = arith.index_cast %100 : i32 to index
      %c1_69 = arith.constant 1 : index
      %c0_70 = arith.constant 0 : index
      %102 = vector.load %arg1[%c0_68, %101, %c1_69, %c0_70] : memref<1x12x12x48xf32, #tpu.memory_space<vmem>>, vector<1x1x8x48xf32>
      %103 = vector.shape_cast %102 : vector<1x1x8x48xf32> to vector<8x48xf32>
      %c11 = arith.constant 11 : index
      %c0_71 = arith.constant 0 : index
      %c0_72 = arith.constant 0 : index
      %104 = vector.load %arg2[%c11, %c0_71, %c0_72] : memref<25x1x48xf32, #tpu.memory_space<vmem>>, vector<1x1x48xf32>
      %105 = vector.shape_cast %104 : vector<1x1x48xf32> to vector<1x48xf32>
      %106 = vector.broadcast %105 : vector<1x48xf32> to vector<8x48xf32>
      %107 = arith.mulf %103, %106 : vector<8x48xf32>
      %108 = arith.addf %99, %107 : vector<8x48xf32>
      %c2_i32_73 = arith.constant 2 : i32
      %109 = arith.addi %1, %c2_i32_73 : i32
      %c0_74 = arith.constant 0 : index
      %110 = arith.index_cast %109 : i32 to index
      %c2_75 = arith.constant 2 : index
      %c0_76 = arith.constant 0 : index
      %111 = vector.load %arg1[%c0_74, %110, %c2_75, %c0_76] : memref<1x12x12x48xf32, #tpu.memory_space<vmem>>, vector<1x1x8x48xf32>
      %112 = vector.shape_cast %111 : vector<1x1x8x48xf32> to vector<8x48xf32>
      %c12 = arith.constant 12 : index
      %c0_77 = arith.constant 0 : index
      %c0_78 = arith.constant 0 : index
      %113 = vector.load %arg2[%c12, %c0_77, %c0_78] : memref<25x1x48xf32, #tpu.memory_space<vmem>>, vector<1x1x48xf32>
      %114 = vector.shape_cast %113 : vector<1x1x48xf32> to vector<1x48xf32>
      %115 = vector.broadcast %114 : vector<1x48xf32> to vector<8x48xf32>
      %116 = arith.mulf %112, %115 : vector<8x48xf32>
      %117 = arith.addf %108, %116 : vector<8x48xf32>
      %c2_i32_79 = arith.constant 2 : i32
      %118 = arith.addi %1, %c2_i32_79 : i32
      %c0_80 = arith.constant 0 : index
      %119 = arith.index_cast %118 : i32 to index
      %c3_81 = arith.constant 3 : index
      %c0_82 = arith.constant 0 : index
      %120 = vector.load %arg1[%c0_80, %119, %c3_81, %c0_82] : memref<1x12x12x48xf32, #tpu.memory_space<vmem>>, vector<1x1x8x48xf32>
      %121 = vector.shape_cast %120 : vector<1x1x8x48xf32> to vector<8x48xf32>
      %c13 = arith.constant 13 : index
      %c0_83 = arith.constant 0 : index
      %c0_84 = arith.constant 0 : index
      %122 = vector.load %arg2[%c13, %c0_83, %c0_84] : memref<25x1x48xf32, #tpu.memory_space<vmem>>, vector<1x1x48xf32>
      %123 = vector.shape_cast %122 : vector<1x1x48xf32> to vector<1x48xf32>
      %124 = vector.broadcast %123 : vector<1x48xf32> to vector<8x48xf32>
      %125 = arith.mulf %121, %124 : vector<8x48xf32>
      %126 = arith.addf %117, %125 : vector<8x48xf32>
      %c2_i32_85 = arith.constant 2 : i32
      %127 = arith.addi %1, %c2_i32_85 : i32
      %c0_86 = arith.constant 0 : index
      %128 = arith.index_cast %127 : i32 to index
      %c4_87 = arith.constant 4 : index
      %c0_88 = arith.constant 0 : index
      %129 = vector.load %arg1[%c0_86, %128, %c4_87, %c0_88] : memref<1x12x12x48xf32, #tpu.memory_space<vmem>>, vector<1x1x8x48xf32>
      %130 = vector.shape_cast %129 : vector<1x1x8x48xf32> to vector<8x48xf32>
      %c14 = arith.constant 14 : index
      %c0_89 = arith.constant 0 : index
      %c0_90 = arith.constant 0 : index
      %131 = vector.load %arg2[%c14, %c0_89, %c0_90] : memref<25x1x48xf32, #tpu.memory_space<vmem>>, vector<1x1x48xf32>
      %132 = vector.shape_cast %131 : vector<1x1x48xf32> to vector<1x48xf32>
      %133 = vector.broadcast %132 : vector<1x48xf32> to vector<8x48xf32>
      %134 = arith.mulf %130, %133 : vector<8x48xf32>
      %135 = arith.addf %126, %134 : vector<8x48xf32>
      %c3_i32 = arith.constant 3 : i32
      %136 = arith.addi %1, %c3_i32 : i32
      %c0_91 = arith.constant 0 : index
      %137 = arith.index_cast %136 : i32 to index
      %c0_92 = arith.constant 0 : index
      %c0_93 = arith.constant 0 : index
      %138 = vector.load %arg1[%c0_91, %137, %c0_92, %c0_93] : memref<1x12x12x48xf32, #tpu.memory_space<vmem>>, vector<1x1x8x48xf32>
      %139 = vector.shape_cast %138 : vector<1x1x8x48xf32> to vector<8x48xf32>
      %c15 = arith.constant 15 : index
      %c0_94 = arith.constant 0 : index
      %c0_95 = arith.constant 0 : index
      %140 = vector.load %arg2[%c15, %c0_94, %c0_95] : memref<25x1x48xf32, #tpu.memory_space<vmem>>, vector<1x1x48xf32>
      %141 = vector.shape_cast %140 : vector<1x1x48xf32> to vector<1x48xf32>
      %142 = vector.broadcast %141 : vector<1x48xf32> to vector<8x48xf32>
      %143 = arith.mulf %139, %142 : vector<8x48xf32>
      %144 = arith.addf %135, %143 : vector<8x48xf32>
      %c3_i32_96 = arith.constant 3 : i32
      %145 = arith.addi %1, %c3_i32_96 : i32
      %c0_97 = arith.constant 0 : index
      %146 = arith.index_cast %145 : i32 to index
      %c1_98 = arith.constant 1 : index
      %c0_99 = arith.constant 0 : index
      %147 = vector.load %arg1[%c0_97, %146, %c1_98, %c0_99] : memref<1x12x12x48xf32, #tpu.memory_space<vmem>>, vector<1x1x8x48xf32>
      %148 = vector.shape_cast %147 : vector<1x1x8x48xf32> to vector<8x48xf32>
      %c16 = arith.constant 16 : index
      %c0_100 = arith.constant 0 : index
      %c0_101 = arith.constant 0 : index
      %149 = vector.load %arg2[%c16, %c0_100, %c0_101] : memref<25x1x48xf32, #tpu.memory_space<vmem>>, vector<1x1x48xf32>
      %150 = vector.shape_cast %149 : vector<1x1x48xf32> to vector<1x48xf32>
      %151 = vector.broadcast %150 : vector<1x48xf32> to vector<8x48xf32>
      %152 = arith.mulf %148, %151 : vector<8x48xf32>
      %153 = arith.addf %144, %152 : vector<8x48xf32>
      %c3_i32_102 = arith.constant 3 : i32
      %154 = arith.addi %1, %c3_i32_102 : i32
      %c0_103 = arith.constant 0 : index
      %155 = arith.index_cast %154 : i32 to index
      %c2_104 = arith.constant 2 : index
      %c0_105 = arith.constant 0 : index
      %156 = vector.load %arg1[%c0_103, %155, %c2_104, %c0_105] : memref<1x12x12x48xf32, #tpu.memory_space<vmem>>, vector<1x1x8x48xf32>
      %157 = vector.shape_cast %156 : vector<1x1x8x48xf32> to vector<8x48xf32>
      %c17 = arith.constant 17 : index
      %c0_106 = arith.constant 0 : index
      %c0_107 = arith.constant 0 : index
      %158 = vector.load %arg2[%c17, %c0_106, %c0_107] : memref<25x1x48xf32, #tpu.memory_space<vmem>>, vector<1x1x48xf32>
      %159 = vector.shape_cast %158 : vector<1x1x48xf32> to vector<1x48xf32>
      %160 = vector.broadcast %159 : vector<1x48xf32> to vector<8x48xf32>
      %161 = arith.mulf %157, %160 : vector<8x48xf32>
      %162 = arith.addf %153, %161 : vector<8x48xf32>
      %c3_i32_108 = arith.constant 3 : i32
      %163 = arith.addi %1, %c3_i32_108 : i32
      %c0_109 = arith.constant 0 : index
      %164 = arith.index_cast %163 : i32 to index
      %c3_110 = arith.constant 3 : index
      %c0_111 = arith.constant 0 : index
      %165 = vector.load %arg1[%c0_109, %164, %c3_110, %c0_111] : memref<1x12x12x48xf32, #tpu.memory_space<vmem>>, vector<1x1x8x48xf32>
      %166 = vector.shape_cast %165 : vector<1x1x8x48xf32> to vector<8x48xf32>
      %c18 = arith.constant 18 : index
      %c0_112 = arith.constant 0 : index
      %c0_113 = arith.constant 0 : index
      %167 = vector.load %arg2[%c18, %c0_112, %c0_113] : memref<25x1x48xf32, #tpu.memory_space<vmem>>, vector<1x1x48xf32>
      %168 = vector.shape_cast %167 : vector<1x1x48xf32> to vector<1x48xf32>
      %169 = vector.broadcast %168 : vector<1x48xf32> to vector<8x48xf32>
      %170 = arith.mulf %166, %169 : vector<8x48xf32>
      %171 = arith.addf %162, %170 : vector<8x48xf32>
      %c3_i32_114 = arith.constant 3 : i32
      %172 = arith.addi %1, %c3_i32_114 : i32
      %c0_115 = arith.constant 0 : index
      %173 = arith.index_cast %172 : i32 to index
      %c4_116 = arith.constant 4 : index
      %c0_117 = arith.constant 0 : index
      %174 = vector.load %arg1[%c0_115, %173, %c4_116, %c0_117] : memref<1x12x12x48xf32, #tpu.memory_space<vmem>>, vector<1x1x8x48xf32>
      %175 = vector.shape_cast %174 : vector<1x1x8x48xf32> to vector<8x48xf32>
      %c19 = arith.constant 19 : index
      %c0_118 = arith.constant 0 : index
      %c0_119 = arith.constant 0 : index
      %176 = vector.load %arg2[%c19, %c0_118, %c0_119] : memref<25x1x48xf32, #tpu.memory_space<vmem>>, vector<1x1x48xf32>
      %177 = vector.shape_cast %176 : vector<1x1x48xf32> to vector<1x48xf32>
      %178 = vector.broadcast %177 : vector<1x48xf32> to vector<8x48xf32>
      %179 = arith.mulf %175, %178 : vector<8x48xf32>
      %180 = arith.addf %171, %179 : vector<8x48xf32>
      %c4_i32 = arith.constant 4 : i32
      %181 = arith.addi %1, %c4_i32 : i32
      %c0_120 = arith.constant 0 : index
      %182 = arith.index_cast %181 : i32 to index
      %c0_121 = arith.constant 0 : index
      %c0_122 = arith.constant 0 : index
      %183 = vector.load %arg1[%c0_120, %182, %c0_121, %c0_122] : memref<1x12x12x48xf32, #tpu.memory_space<vmem>>, vector<1x1x8x48xf32>
      %184 = vector.shape_cast %183 : vector<1x1x8x48xf32> to vector<8x48xf32>
      %c20 = arith.constant 20 : index
      %c0_123 = arith.constant 0 : index
      %c0_124 = arith.constant 0 : index
      %185 = vector.load %arg2[%c20, %c0_123, %c0_124] : memref<25x1x48xf32, #tpu.memory_space<vmem>>, vector<1x1x48xf32>
      %186 = vector.shape_cast %185 : vector<1x1x48xf32> to vector<1x48xf32>
      %187 = vector.broadcast %186 : vector<1x48xf32> to vector<8x48xf32>
      %188 = arith.mulf %184, %187 : vector<8x48xf32>
      %189 = arith.addf %180, %188 : vector<8x48xf32>
      %c4_i32_125 = arith.constant 4 : i32
      %190 = arith.addi %1, %c4_i32_125 : i32
      %c0_126 = arith.constant 0 : index
      %191 = arith.index_cast %190 : i32 to index
      %c1_127 = arith.constant 1 : index
      %c0_128 = arith.constant 0 : index
      %192 = vector.load %arg1[%c0_126, %191, %c1_127, %c0_128] : memref<1x12x12x48xf32, #tpu.memory_space<vmem>>, vector<1x1x8x48xf32>
      %193 = vector.shape_cast %192 : vector<1x1x8x48xf32> to vector<8x48xf32>
      %c21 = arith.constant 21 : index
      %c0_129 = arith.constant 0 : index
      %c0_130 = arith.constant 0 : index
      %194 = vector.load %arg2[%c21, %c0_129, %c0_130] : memref<25x1x48xf32, #tpu.memory_space<vmem>>, vector<1x1x48xf32>
      %195 = vector.shape_cast %194 : vector<1x1x48xf32> to vector<1x48xf32>
      %196 = vector.broadcast %195 : vector<1x48xf32> to vector<8x48xf32>
      %197 = arith.mulf %193, %196 : vector<8x48xf32>
      %198 = arith.addf %189, %197 : vector<8x48xf32>
      %c4_i32_131 = arith.constant 4 : i32
      %199 = arith.addi %1, %c4_i32_131 : i32
      %c0_132 = arith.constant 0 : index
      %200 = arith.index_cast %199 : i32 to index
      %c2_133 = arith.constant 2 : index
      %c0_134 = arith.constant 0 : index
      %201 = vector.load %arg1[%c0_132, %200, %c2_133, %c0_134] : memref<1x12x12x48xf32, #tpu.memory_space<vmem>>, vector<1x1x8x48xf32>
      %202 = vector.shape_cast %201 : vector<1x1x8x48xf32> to vector<8x48xf32>
      %c22 = arith.constant 22 : index
      %c0_135 = arith.constant 0 : index
      %c0_136 = arith.constant 0 : index
      %203 = vector.load %arg2[%c22, %c0_135, %c0_136] : memref<25x1x48xf32, #tpu.memory_space<vmem>>, vector<1x1x48xf32>
      %204 = vector.shape_cast %203 : vector<1x1x48xf32> to vector<1x48xf32>
      %205 = vector.broadcast %204 : vector<1x48xf32> to vector<8x48xf32>
      %206 = arith.mulf %202, %205 : vector<8x48xf32>
      %207 = arith.addf %198, %206 : vector<8x48xf32>
      %c4_i32_137 = arith.constant 4 : i32
      %208 = arith.addi %1, %c4_i32_137 : i32
      %c0_138 = arith.constant 0 : index
      %209 = arith.index_cast %208 : i32 to index
      %c3_139 = arith.constant 3 : index
      %c0_140 = arith.constant 0 : index
      %210 = vector.load %arg1[%c0_138, %209, %c3_139, %c0_140] : memref<1x12x12x48xf32, #tpu.memory_space<vmem>>, vector<1x1x8x48xf32>
      %211 = vector.shape_cast %210 : vector<1x1x8x48xf32> to vector<8x48xf32>
      %c23 = arith.constant 23 : index
      %c0_141 = arith.constant 0 : index
      %c0_142 = arith.constant 0 : index
      %212 = vector.load %arg2[%c23, %c0_141, %c0_142] : memref<25x1x48xf32, #tpu.memory_space<vmem>>, vector<1x1x48xf32>
      %213 = vector.shape_cast %212 : vector<1x1x48xf32> to vector<1x48xf32>
      %214 = vector.broadcast %213 : vector<1x48xf32> to vector<8x48xf32>
      %215 = arith.mulf %211, %214 : vector<8x48xf32>
      %216 = arith.addf %207, %215 : vector<8x48xf32>
      %c4_i32_143 = arith.constant 4 : i32
      %217 = arith.addi %1, %c4_i32_143 : i32
      %c0_144 = arith.constant 0 : index
      %218 = arith.index_cast %217 : i32 to index
      %c4_145 = arith.constant 4 : index
      %c0_146 = arith.constant 0 : index
      %219 = vector.load %arg1[%c0_144, %218, %c4_145, %c0_146] : memref<1x12x12x48xf32, #tpu.memory_space<vmem>>, vector<1x1x8x48xf32>
      %220 = vector.shape_cast %219 : vector<1x1x8x48xf32> to vector<8x48xf32>
      %c24 = arith.constant 24 : index
      %c0_147 = arith.constant 0 : index
      %c0_148 = arith.constant 0 : index
      %221 = vector.load %arg2[%c24, %c0_147, %c0_148] : memref<25x1x48xf32, #tpu.memory_space<vmem>>, vector<1x1x48xf32>
      %222 = vector.shape_cast %221 : vector<1x1x48xf32> to vector<1x48xf32>
      %223 = vector.broadcast %222 : vector<1x48xf32> to vector<8x48xf32>
      %224 = arith.mulf %220, %223 : vector<8x48xf32>
      %225 = arith.addf %216, %224 : vector<8x48xf32>
      %226 = arith.truncf %225 : vector<8x48xf32> to vector<8x48xbf16>
      %c0_149 = arith.constant 0 : index
      %c0_150 = arith.constant 0 : index
      %227 = vector.load %arg3[%c0_149, %c0_150] : memref<48x48xbf16, #tpu.memory_space<vmem>>, vector<48x48xbf16>
      %cst = arith.constant dense<0.000000e+00> : vector<8x48xf32>
      %228 = tpu.matmul %226, %227, %cst {dimension_numbers = #tpu.dot_dimension_numbers<[1], [0], [0], [1], [0, 0, 1, 1], [], []>} : vector<8x48xbf16>, vector<48x48xbf16>, vector<8x48xf32> -> vector<8x48xf32>
      %c0_151 = arith.constant 0 : index
      %c0_152 = arith.constant 0 : index
      %229 = vector.load %arg4[%c0_151, %c0_152] : memref<1x48xf32, #tpu.memory_space<vmem>>, vector<1x48xf32>
      %230 = vector.broadcast %229 : vector<1x48xf32> to vector<8x48xf32>
      %231 = arith.addf %228, %230 : vector<8x48xf32>
      %cst_153 = arith.constant 0.000000e+00 : f32
      %232 = vector.broadcast %cst_153 : f32 to vector<8x48xf32>
      %233 = arith.maximumf %231, %232 : vector<8x48xf32>
      %c0_154 = arith.constant 0 : index
      %234 = arith.index_cast %arg7 : i32 to index
      %c0_155 = arith.constant 0 : index
      %c0_156 = arith.constant 0 : index
      %235 = vector.load %arg5[%c0_154, %234, %c0_155, %c0_156] : memref<1x8x8x48xf32, #tpu.memory_space<vmem>>, vector<1x1x8x48xf32>
      %236 = vector.shape_cast %235 : vector<1x1x8x48xf32> to vector<8x48xf32>
      %237 = arith.addf %233, %236 : vector<8x48xf32>
      %cst_157 = arith.constant 0.000000e+00 : f32
      %238 = vector.broadcast %cst_157 : f32 to vector<8x48xf32>
      %239 = arith.maximumf %237, %238 : vector<8x48xf32>
      %c0_158 = arith.constant 0 : index
      %240 = arith.index_cast %arg7 : i32 to index
      %c0_159 = arith.constant 0 : index
      %c0_160 = arith.constant 0 : index
      %241 = vector.load %arg6[%c0_158, %240, %c0_159, %c0_160] : memref<1x8x8x48xf32, #tpu.memory_space<vmem>>, vector<1x1x8x48xf32>
      %242 = vector.shape_cast %241 : vector<1x1x8x48xf32> to vector<8x48xf32>
      %243 = vector.shape_cast %239 : vector<8x48xf32> to vector<1x1x8x48xf32>
      tpu.vector_store %arg6[%c0_158, %240, %c0_159, %c0_160], %243 {strides = array<i32>} : memref<1x8x8x48xf32, #tpu.memory_space<vmem>>, vector<1x1x8x48xf32>,
    }
    %c8_i32_0 = arith.constant 8 : i32
    return
  }
  func.func @transform_0(%arg0: i32) -> (i32, i32, i32, i32) {
    %c0_i32 = arith.constant 0 : i32
    %c0_i32_0 = arith.constant 0 : i32
    %c0_i32_1 = arith.constant 0 : i32
    %c0_i32_2 = arith.constant 0 : i32
    return %arg0, %c0_i32, %c0_i32_0, %c0_i32_1 : i32, i32, i32, i32
  }
  func.func @transform_1(%arg0: i32) -> (i32, i32, i32) {
    %c0_i32 = arith.constant 0 : i32
    %c0_i32_0 = arith.constant 0 : i32
    %c0_i32_1 = arith.constant 0 : i32
    %c0_i32_2 = arith.constant 0 : i32
    return %c0_i32, %c0_i32_0, %c0_i32_1 : i32, i32, i32
  }
  func.func @transform_2(%arg0: i32) -> (i32, i32) {
    %c0_i32 = arith.constant 0 : i32
    %c0_i32_0 = arith.constant 0 : i32
    %c0_i32_1 = arith.constant 0 : i32
    return %c0_i32, %c0_i32_0 : i32, i32
  }
  func.func @transform_3(%arg0: i32) -> (i32, i32) {
    %c0_i32 = arith.constant 0 : i32
    %c0_i32_0 = arith.constant 0 : i32
    %c0_i32_1 = arith.constant 0 : i32
    return %c0_i32, %c0_i32_0 : i32, i32
  }
  func.func @transform_4(%arg0: i32) -> (i32, i32, i32, i32) {
    %c0_i32 = arith.constant 0 : i32
    %c0_i32_0 = arith.constant 0 : i32
    %c0_i32_1 = arith.constant 0 : i32
    %c0_i32_2 = arith.constant 0 : i32
    return %arg0, %c0_i32, %c0_i32_0, %c0_i32_1 : i32, i32, i32, i32
  }
  func.func @transform_5(%arg0: i32) -> (i32, i32, i32, i32) {
    %c0_i32 = arith.constant 0 : i32
    %c0_i32_0 = arith.constant 0 : i32
    %c0_i32_1 = arith.constant 0 : i32
    %c0_i32_2 = arith.constant 0 : i32
    return %arg0, %c0_i32, %c0_i32_0, %c0_i32_1 : i32, i32, i32, i32
  }
}

module attributes {stable_mosaic.version = 11 : i64} {
  func.func @kernel(%arg0: i32, %arg1: memref<1x12x12x48xf32, #tpu.memory_space<vmem>>, %arg2: memref<25x1x48xf32, #tpu.memory_space<vmem>>, %arg3: memref<48x48xbf16, #tpu.memory_space<vmem>>, %arg4: memref<1x48xf32, #tpu.memory_space<vmem>>, %arg5: memref<1x8x8x48xf32, #tpu.memory_space<vmem>>) attributes {dimension_semantics = [#tpu.dimension_semantics<parallel>], iteration_bounds = array<i64: 2>, scalar_prefetch = 0 : i64, scratch_operands = 0 : i64, tpu.core_type = #tpu.core_type<tc>, window_params = [{transform_indices = @transform_0, window_bounds = array<i64: 1, 12, 12, 48>}, {pipeline_mode = #tpu.pipeline_mode<synchronous>, transform_indices = @transform_1, window_bounds = array<i64: 25, 1, 48>}, {pipeline_mode = #tpu.pipeline_mode<synchronous>, transform_indices = @transform_2, window_bounds = array<i64: 48, 48>}, {pipeline_mode = #tpu.pipeline_mode<synchronous>, transform_indices = @transform_3, window_bounds = array<i64: 1, 48>}, {transform_indices = @transform_4, window_bounds = array<i64: 1, 8, 8, 48>}]} {
    %c0_i32 = arith.constant 0 : i32
    %c8_i32 = arith.constant 8 : i32
    %0 = arith.addi %c0_i32, %c8_i32 : i32
    %c1_i32 = arith.constant 1 : i32
    scf.for %arg6 = %c0_i32 to %0 step %c1_i32  : i32 {
      %c1_i32_1 = arith.constant 1 : i32
      %1 = arith.muli %arg6, %c1_i32_1 : i32
      %c0_i32_2 = arith.constant 0 : i32
      %2 = arith.addi %1, %c0_i32_2 : i32
      %c0 = arith.constant 0 : index
      %3 = arith.index_cast %2 : i32 to index
      %c0_3 = arith.constant 0 : index
      %c0_4 = arith.constant 0 : index
      %4 = vector.load %arg1[%c0, %3, %c0_3, %c0_4] : memref<1x12x12x48xf32, #tpu.memory_space<vmem>>, vector<1x1x8x48xf32>
      %5 = vector.shape_cast %4 : vector<1x1x8x48xf32> to vector<8x48xf32>
      %c0_5 = arith.constant 0 : index
      %c0_6 = arith.constant 0 : index
      %c0_7 = arith.constant 0 : index
      %6 = vector.load %arg2[%c0_5, %c0_6, %c0_7] : memref<25x1x48xf32, #tpu.memory_space<vmem>>, vector<1x1x48xf32>
      %7 = vector.shape_cast %6 : vector<1x1x48xf32> to vector<1x48xf32>
      %8 = vector.broadcast %7 : vector<1x48xf32> to vector<8x48xf32>
      %9 = arith.mulf %5, %8 : vector<8x48xf32>
      %c0_i32_8 = arith.constant 0 : i32
      %10 = arith.addi %1, %c0_i32_8 : i32
      %c0_9 = arith.constant 0 : index
      %11 = arith.index_cast %10 : i32 to index
      %c1 = arith.constant 1 : index
      %c0_10 = arith.constant 0 : index
      %12 = vector.load %arg1[%c0_9, %11, %c1, %c0_10] : memref<1x12x12x48xf32, #tpu.memory_space<vmem>>, vector<1x1x8x48xf32>
      %13 = vector.shape_cast %12 : vector<1x1x8x48xf32> to vector<8x48xf32>
      %c1_11 = arith.constant 1 : index
      %c0_12 = arith.constant 0 : index
      %c0_13 = arith.constant 0 : index
      %14 = vector.load %arg2[%c1_11, %c0_12, %c0_13] : memref<25x1x48xf32, #tpu.memory_space<vmem>>, vector<1x1x48xf32>
      %15 = vector.shape_cast %14 : vector<1x1x48xf32> to vector<1x48xf32>
      %16 = vector.broadcast %15 : vector<1x48xf32> to vector<8x48xf32>
      %17 = arith.mulf %13, %16 : vector<8x48xf32>
      %18 = arith.addf %9, %17 : vector<8x48xf32>
      %c0_i32_14 = arith.constant 0 : i32
      %19 = arith.addi %1, %c0_i32_14 : i32
      %c0_15 = arith.constant 0 : index
      %20 = arith.index_cast %19 : i32 to index
      %c2 = arith.constant 2 : index
      %c0_16 = arith.constant 0 : index
      %21 = vector.load %arg1[%c0_15, %20, %c2, %c0_16] : memref<1x12x12x48xf32, #tpu.memory_space<vmem>>, vector<1x1x8x48xf32>
      %22 = vector.shape_cast %21 : vector<1x1x8x48xf32> to vector<8x48xf32>
      %c2_17 = arith.constant 2 : index
      %c0_18 = arith.constant 0 : index
      %c0_19 = arith.constant 0 : index
      %23 = vector.load %arg2[%c2_17, %c0_18, %c0_19] : memref<25x1x48xf32, #tpu.memory_space<vmem>>, vector<1x1x48xf32>
      %24 = vector.shape_cast %23 : vector<1x1x48xf32> to vector<1x48xf32>
      %25 = vector.broadcast %24 : vector<1x48xf32> to vector<8x48xf32>
      %26 = arith.mulf %22, %25 : vector<8x48xf32>
      %27 = arith.addf %18, %26 : vector<8x48xf32>
      %c0_i32_20 = arith.constant 0 : i32
      %28 = arith.addi %1, %c0_i32_20 : i32
      %c0_21 = arith.constant 0 : index
      %29 = arith.index_cast %28 : i32 to index
      %c3 = arith.constant 3 : index
      %c0_22 = arith.constant 0 : index
      %30 = vector.load %arg1[%c0_21, %29, %c3, %c0_22] : memref<1x12x12x48xf32, #tpu.memory_space<vmem>>, vector<1x1x8x48xf32>
      %31 = vector.shape_cast %30 : vector<1x1x8x48xf32> to vector<8x48xf32>
      %c3_23 = arith.constant 3 : index
      %c0_24 = arith.constant 0 : index
      %c0_25 = arith.constant 0 : index
      %32 = vector.load %arg2[%c3_23, %c0_24, %c0_25] : memref<25x1x48xf32, #tpu.memory_space<vmem>>, vector<1x1x48xf32>
      %33 = vector.shape_cast %32 : vector<1x1x48xf32> to vector<1x48xf32>
      %34 = vector.broadcast %33 : vector<1x48xf32> to vector<8x48xf32>
      %35 = arith.mulf %31, %34 : vector<8x48xf32>
      %36 = arith.addf %27, %35 : vector<8x48xf32>
      %c0_i32_26 = arith.constant 0 : i32
      %37 = arith.addi %1, %c0_i32_26 : i32
      %c0_27 = arith.constant 0 : index
      %38 = arith.index_cast %37 : i32 to index
      %c4 = arith.constant 4 : index
      %c0_28 = arith.constant 0 : index
      %39 = vector.load %arg1[%c0_27, %38, %c4, %c0_28] : memref<1x12x12x48xf32, #tpu.memory_space<vmem>>, vector<1x1x8x48xf32>
      %40 = vector.shape_cast %39 : vector<1x1x8x48xf32> to vector<8x48xf32>
      %c4_29 = arith.constant 4 : index
      %c0_30 = arith.constant 0 : index
      %c0_31 = arith.constant 0 : index
      %41 = vector.load %arg2[%c4_29, %c0_30, %c0_31] : memref<25x1x48xf32, #tpu.memory_space<vmem>>, vector<1x1x48xf32>
      %42 = vector.shape_cast %41 : vector<1x1x48xf32> to vector<1x48xf32>
      %43 = vector.broadcast %42 : vector<1x48xf32> to vector<8x48xf32>
      %44 = arith.mulf %40, %43 : vector<8x48xf32>
      %45 = arith.addf %36, %44 : vector<8x48xf32>
      %c1_i32_32 = arith.constant 1 : i32
      %46 = arith.addi %1, %c1_i32_32 : i32
      %c0_33 = arith.constant 0 : index
      %47 = arith.index_cast %46 : i32 to index
      %c0_34 = arith.constant 0 : index
      %c0_35 = arith.constant 0 : index
      %48 = vector.load %arg1[%c0_33, %47, %c0_34, %c0_35] : memref<1x12x12x48xf32, #tpu.memory_space<vmem>>, vector<1x1x8x48xf32>
      %49 = vector.shape_cast %48 : vector<1x1x8x48xf32> to vector<8x48xf32>
      %c5 = arith.constant 5 : index
      %c0_36 = arith.constant 0 : index
      %c0_37 = arith.constant 0 : index
      %50 = vector.load %arg2[%c5, %c0_36, %c0_37] : memref<25x1x48xf32, #tpu.memory_space<vmem>>, vector<1x1x48xf32>
      %51 = vector.shape_cast %50 : vector<1x1x48xf32> to vector<1x48xf32>
      %52 = vector.broadcast %51 : vector<1x48xf32> to vector<8x48xf32>
      %53 = arith.mulf %49, %52 : vector<8x48xf32>
      %54 = arith.addf %45, %53 : vector<8x48xf32>
      %c1_i32_38 = arith.constant 1 : i32
      %55 = arith.addi %1, %c1_i32_38 : i32
      %c0_39 = arith.constant 0 : index
      %56 = arith.index_cast %55 : i32 to index
      %c1_40 = arith.constant 1 : index
      %c0_41 = arith.constant 0 : index
      %57 = vector.load %arg1[%c0_39, %56, %c1_40, %c0_41] : memref<1x12x12x48xf32, #tpu.memory_space<vmem>>, vector<1x1x8x48xf32>
      %58 = vector.shape_cast %57 : vector<1x1x8x48xf32> to vector<8x48xf32>
      %c6 = arith.constant 6 : index
      %c0_42 = arith.constant 0 : index
      %c0_43 = arith.constant 0 : index
      %59 = vector.load %arg2[%c6, %c0_42, %c0_43] : memref<25x1x48xf32, #tpu.memory_space<vmem>>, vector<1x1x48xf32>
      %60 = vector.shape_cast %59 : vector<1x1x48xf32> to vector<1x48xf32>
      %61 = vector.broadcast %60 : vector<1x48xf32> to vector<8x48xf32>
      %62 = arith.mulf %58, %61 : vector<8x48xf32>
      %63 = arith.addf %54, %62 : vector<8x48xf32>
      %c1_i32_44 = arith.constant 1 : i32
      %64 = arith.addi %1, %c1_i32_44 : i32
      %c0_45 = arith.constant 0 : index
      %65 = arith.index_cast %64 : i32 to index
      %c2_46 = arith.constant 2 : index
      %c0_47 = arith.constant 0 : index
      %66 = vector.load %arg1[%c0_45, %65, %c2_46, %c0_47] : memref<1x12x12x48xf32, #tpu.memory_space<vmem>>, vector<1x1x8x48xf32>
      %67 = vector.shape_cast %66 : vector<1x1x8x48xf32> to vector<8x48xf32>
      %c7 = arith.constant 7 : index
      %c0_48 = arith.constant 0 : index
      %c0_49 = arith.constant 0 : index
      %68 = vector.load %arg2[%c7, %c0_48, %c0_49] : memref<25x1x48xf32, #tpu.memory_space<vmem>>, vector<1x1x48xf32>
      %69 = vector.shape_cast %68 : vector<1x1x48xf32> to vector<1x48xf32>
      %70 = vector.broadcast %69 : vector<1x48xf32> to vector<8x48xf32>
      %71 = arith.mulf %67, %70 : vector<8x48xf32>
      %72 = arith.addf %63, %71 : vector<8x48xf32>
      %c1_i32_50 = arith.constant 1 : i32
      %73 = arith.addi %1, %c1_i32_50 : i32
      %c0_51 = arith.constant 0 : index
      %74 = arith.index_cast %73 : i32 to index
      %c3_52 = arith.constant 3 : index
      %c0_53 = arith.constant 0 : index
      %75 = vector.load %arg1[%c0_51, %74, %c3_52, %c0_53] : memref<1x12x12x48xf32, #tpu.memory_space<vmem>>, vector<1x1x8x48xf32>
      %76 = vector.shape_cast %75 : vector<1x1x8x48xf32> to vector<8x48xf32>
      %c8 = arith.constant 8 : index
      %c0_54 = arith.constant 0 : index
      %c0_55 = arith.constant 0 : index
      %77 = vector.load %arg2[%c8, %c0_54, %c0_55] : memref<25x1x48xf32, #tpu.memory_space<vmem>>, vector<1x1x48xf32>
      %78 = vector.shape_cast %77 : vector<1x1x48xf32> to vector<1x48xf32>
      %79 = vector.broadcast %78 : vector<1x48xf32> to vector<8x48xf32>
      %80 = arith.mulf %76, %79 : vector<8x48xf32>
      %81 = arith.addf %72, %80 : vector<8x48xf32>
      %c1_i32_56 = arith.constant 1 : i32
      %82 = arith.addi %1, %c1_i32_56 : i32
      %c0_57 = arith.constant 0 : index
      %83 = arith.index_cast %82 : i32 to index
      %c4_58 = arith.constant 4 : index
      %c0_59 = arith.constant 0 : index
      %84 = vector.load %arg1[%c0_57, %83, %c4_58, %c0_59] : memref<1x12x12x48xf32, #tpu.memory_space<vmem>>, vector<1x1x8x48xf32>
      %85 = vector.shape_cast %84 : vector<1x1x8x48xf32> to vector<8x48xf32>
      %c9 = arith.constant 9 : index
      %c0_60 = arith.constant 0 : index
      %c0_61 = arith.constant 0 : index
      %86 = vector.load %arg2[%c9, %c0_60, %c0_61] : memref<25x1x48xf32, #tpu.memory_space<vmem>>, vector<1x1x48xf32>
      %87 = vector.shape_cast %86 : vector<1x1x48xf32> to vector<1x48xf32>
      %88 = vector.broadcast %87 : vector<1x48xf32> to vector<8x48xf32>
      %89 = arith.mulf %85, %88 : vector<8x48xf32>
      %90 = arith.addf %81, %89 : vector<8x48xf32>
      %c2_i32 = arith.constant 2 : i32
      %91 = arith.addi %1, %c2_i32 : i32
      %c0_62 = arith.constant 0 : index
      %92 = arith.index_cast %91 : i32 to index
      %c0_63 = arith.constant 0 : index
      %c0_64 = arith.constant 0 : index
      %93 = vector.load %arg1[%c0_62, %92, %c0_63, %c0_64] : memref<1x12x12x48xf32, #tpu.memory_space<vmem>>, vector<1x1x8x48xf32>
      %94 = vector.shape_cast %93 : vector<1x1x8x48xf32> to vector<8x48xf32>
      %c10 = arith.constant 10 : index
      %c0_65 = arith.constant 0 : index
      %c0_66 = arith.constant 0 : index
      %95 = vector.load %arg2[%c10, %c0_65, %c0_66] : memref<25x1x48xf32, #tpu.memory_space<vmem>>, vector<1x1x48xf32>
      %96 = vector.shape_cast %95 : vector<1x1x48xf32> to vector<1x48xf32>
      %97 = vector.broadcast %96 : vector<1x48xf32> to vector<8x48xf32>
      %98 = arith.mulf %94, %97 : vector<8x48xf32>
      %99 = arith.addf %90, %98 : vector<8x48xf32>
      %c2_i32_67 = arith.constant 2 : i32
      %100 = arith.addi %1, %c2_i32_67 : i32
      %c0_68 = arith.constant 0 : index
      %101 = arith.index_cast %100 : i32 to index
      %c1_69 = arith.constant 1 : index
      %c0_70 = arith.constant 0 : index
      %102 = vector.load %arg1[%c0_68, %101, %c1_69, %c0_70] : memref<1x12x12x48xf32, #tpu.memory_space<vmem>>, vector<1x1x8x48xf32>
      %103 = vector.shape_cast %102 : vector<1x1x8x48xf32> to vector<8x48xf32>
      %c11 = arith.constant 11 : index
      %c0_71 = arith.constant 0 : index
      %c0_72 = arith.constant 0 : index
      %104 = vector.load %arg2[%c11, %c0_71, %c0_72] : memref<25x1x48xf32, #tpu.memory_space<vmem>>, vector<1x1x48xf32>
      %105 = vector.shape_cast %104 : vector<1x1x48xf32> to vector<1x48xf32>
      %106 = vector.broadcast %105 : vector<1x48xf32> to vector<8x48xf32>
      %107 = arith.mulf %103, %106 : vector<8x48xf32>
      %108 = arith.addf %99, %107 : vector<8x48xf32>
      %c2_i32_73 = arith.constant 2 : i32
      %109 = arith.addi %1, %c2_i32_73 : i32
      %c0_74 = arith.constant 0 : index
      %110 = arith.index_cast %109 : i32 to index
      %c2_75 = arith.constant 2 : index
      %c0_76 = arith.constant 0 : index
      %111 = vector.load %arg1[%c0_74, %110, %c2_75, %c0_76] : memref<1x12x12x48xf32, #tpu.memory_space<vmem>>, vector<1x1x8x48xf32>
      %112 = vector.shape_cast %111 : vector<1x1x8x48xf32> to vector<8x48xf32>
      %c12 = arith.constant 12 : index
      %c0_77 = arith.constant 0 : index
      %c0_78 = arith.constant 0 : index
      %113 = vector.load %arg2[%c12, %c0_77, %c0_78] : memref<25x1x48xf32, #tpu.memory_space<vmem>>, vector<1x1x48xf32>
      %114 = vector.shape_cast %113 : vector<1x1x48xf32> to vector<1x48xf32>
      %115 = vector.broadcast %114 : vector<1x48xf32> to vector<8x48xf32>
      %116 = arith.mulf %112, %115 : vector<8x48xf32>
      %117 = arith.addf %108, %116 : vector<8x48xf32>
      %c2_i32_79 = arith.constant 2 : i32
      %118 = arith.addi %1, %c2_i32_79 : i32
      %c0_80 = arith.constant 0 : index
      %119 = arith.index_cast %118 : i32 to index
      %c3_81 = arith.constant 3 : index
      %c0_82 = arith.constant 0 : index
      %120 = vector.load %arg1[%c0_80, %119, %c3_81, %c0_82] : memref<1x12x12x48xf32, #tpu.memory_space<vmem>>, vector<1x1x8x48xf32>
      %121 = vector.shape_cast %120 : vector<1x1x8x48xf32> to vector<8x48xf32>
      %c13 = arith.constant 13 : index
      %c0_83 = arith.constant 0 : index
      %c0_84 = arith.constant 0 : index
      %122 = vector.load %arg2[%c13, %c0_83, %c0_84] : memref<25x1x48xf32, #tpu.memory_space<vmem>>, vector<1x1x48xf32>
      %123 = vector.shape_cast %122 : vector<1x1x48xf32> to vector<1x48xf32>
      %124 = vector.broadcast %123 : vector<1x48xf32> to vector<8x48xf32>
      %125 = arith.mulf %121, %124 : vector<8x48xf32>
      %126 = arith.addf %117, %125 : vector<8x48xf32>
      %c2_i32_85 = arith.constant 2 : i32
      %127 = arith.addi %1, %c2_i32_85 : i32
      %c0_86 = arith.constant 0 : index
      %128 = arith.index_cast %127 : i32 to index
      %c4_87 = arith.constant 4 : index
      %c0_88 = arith.constant 0 : index
      %129 = vector.load %arg1[%c0_86, %128, %c4_87, %c0_88] : memref<1x12x12x48xf32, #tpu.memory_space<vmem>>, vector<1x1x8x48xf32>
      %130 = vector.shape_cast %129 : vector<1x1x8x48xf32> to vector<8x48xf32>
      %c14 = arith.constant 14 : index
      %c0_89 = arith.constant 0 : index
      %c0_90 = arith.constant 0 : index
      %131 = vector.load %arg2[%c14, %c0_89, %c0_90] : memref<25x1x48xf32, #tpu.memory_space<vmem>>, vector<1x1x48xf32>
      %132 = vector.shape_cast %131 : vector<1x1x48xf32> to vector<1x48xf32>
      %133 = vector.broadcast %132 : vector<1x48xf32> to vector<8x48xf32>
      %134 = arith.mulf %130, %133 : vector<8x48xf32>
      %135 = arith.addf %126, %134 : vector<8x48xf32>
      %c3_i32 = arith.constant 3 : i32
      %136 = arith.addi %1, %c3_i32 : i32
      %c0_91 = arith.constant 0 : index
      %137 = arith.index_cast %136 : i32 to index
      %c0_92 = arith.constant 0 : index
      %c0_93 = arith.constant 0 : index
      %138 = vector.load %arg1[%c0_91, %137, %c0_92, %c0_93] : memref<1x12x12x48xf32, #tpu.memory_space<vmem>>, vector<1x1x8x48xf32>
      %139 = vector.shape_cast %138 : vector<1x1x8x48xf32> to vector<8x48xf32>
      %c15 = arith.constant 15 : index
      %c0_94 = arith.constant 0 : index
      %c0_95 = arith.constant 0 : index
      %140 = vector.load %arg2[%c15, %c0_94, %c0_95] : memref<25x1x48xf32, #tpu.memory_space<vmem>>, vector<1x1x48xf32>
      %141 = vector.shape_cast %140 : vector<1x1x48xf32> to vector<1x48xf32>
      %142 = vector.broadcast %141 : vector<1x48xf32> to vector<8x48xf32>
      %143 = arith.mulf %139, %142 : vector<8x48xf32>
      %144 = arith.addf %135, %143 : vector<8x48xf32>
      %c3_i32_96 = arith.constant 3 : i32
      %145 = arith.addi %1, %c3_i32_96 : i32
      %c0_97 = arith.constant 0 : index
      %146 = arith.index_cast %145 : i32 to index
      %c1_98 = arith.constant 1 : index
      %c0_99 = arith.constant 0 : index
      %147 = vector.load %arg1[%c0_97, %146, %c1_98, %c0_99] : memref<1x12x12x48xf32, #tpu.memory_space<vmem>>, vector<1x1x8x48xf32>
      %148 = vector.shape_cast %147 : vector<1x1x8x48xf32> to vector<8x48xf32>
      %c16 = arith.constant 16 : index
      %c0_100 = arith.constant 0 : index
      %c0_101 = arith.constant 0 : index
      %149 = vector.load %arg2[%c16, %c0_100, %c0_101] : memref<25x1x48xf32, #tpu.memory_space<vmem>>, vector<1x1x48xf32>
      %150 = vector.shape_cast %149 : vector<1x1x48xf32> to vector<1x48xf32>
      %151 = vector.broadcast %150 : vector<1x48xf32> to vector<8x48xf32>
      %152 = arith.mulf %148, %151 : vector<8x48xf32>
      %153 = arith.addf %144, %152 : vector<8x48xf32>
      %c3_i32_102 = arith.constant 3 : i32
      %154 = arith.addi %1, %c3_i32_102 : i32
      %c0_103 = arith.constant 0 : index
      %155 = arith.index_cast %154 : i32 to index
      %c2_104 = arith.constant 2 : index
      %c0_105 = arith.constant 0 : index
      %156 = vector.load %arg1[%c0_103, %155, %c2_104, %c0_105] : memref<1x12x12x48xf32, #tpu.memory_space<vmem>>, vector<1x1x8x48xf32>
      %157 = vector.shape_cast %156 : vector<1x1x8x48xf32> to vector<8x48xf32>
      %c17 = arith.constant 17 : index
      %c0_106 = arith.constant 0 : index
      %c0_107 = arith.constant 0 : index
      %158 = vector.load %arg2[%c17, %c0_106, %c0_107] : memref<25x1x48xf32, #tpu.memory_space<vmem>>, vector<1x1x48xf32>
      %159 = vector.shape_cast %158 : vector<1x1x48xf32> to vector<1x48xf32>
      %160 = vector.broadcast %159 : vector<1x48xf32> to vector<8x48xf32>
      %161 = arith.mulf %157, %160 : vector<8x48xf32>
      %162 = arith.addf %153, %161 : vector<8x48xf32>
      %c3_i32_108 = arith.constant 3 : i32
      %163 = arith.addi %1, %c3_i32_108 : i32
      %c0_109 = arith.constant 0 : index
      %164 = arith.index_cast %163 : i32 to index
      %c3_110 = arith.constant 3 : index
      %c0_111 = arith.constant 0 : index
      %165 = vector.load %arg1[%c0_109, %164, %c3_110, %c0_111] : memref<1x12x12x48xf32, #tpu.memory_space<vmem>>, vector<1x1x8x48xf32>
      %166 = vector.shape_cast %165 : vector<1x1x8x48xf32> to vector<8x48xf32>
      %c18 = arith.constant 18 : index
      %c0_112 = arith.constant 0 : index
      %c0_113 = arith.constant 0 : index
      %167 = vector.load %arg2[%c18, %c0_112, %c0_113] : memref<25x1x48xf32, #tpu.memory_space<vmem>>, vector<1x1x48xf32>
      %168 = vector.shape_cast %167 : vector<1x1x48xf32> to vector<1x48xf32>
      %169 = vector.broadcast %168 : vector<1x48xf32> to vector<8x48xf32>
      %170 = arith.mulf %166, %169 : vector<8x48xf32>
      %171 = arith.addf %162, %170 : vector<8x48xf32>
      %c3_i32_114 = arith.constant 3 : i32
      %172 = arith.addi %1, %c3_i32_114 : i32
      %c0_115 = arith.constant 0 : index
      %173 = arith.index_cast %172 : i32 to index
      %c4_116 = arith.constant 4 : index
      %c0_117 = arith.constant 0 : index
      %174 = vector.load %arg1[%c0_115, %173, %c4_116, %c0_117] : memref<1x12x12x48xf32, #tpu.memory_space<vmem>>, vector<1x1x8x48xf32>
      %175 = vector.shape_cast %174 : vector<1x1x8x48xf32> to vector<8x48xf32>
      %c19 = arith.constant 19 : index
      %c0_118 = arith.constant 0 : index
      %c0_119 = arith.constant 0 : index
      %176 = vector.load %arg2[%c19, %c0_118, %c0_119] : memref<25x1x48xf32, #tpu.memory_space<vmem>>, vector<1x1x48xf32>
      %177 = vector.shape_cast %176 : vector<1x1x48xf32> to vector<1x48xf32>
      %178 = vector.broadcast %177 : vector<1x48xf32> to vector<8x48xf32>
      %179 = arith.mulf %175, %178 : vector<8x48xf32>
      %180 = arith.addf %171, %179 : vector<8x48xf32>
      %c4_i32 = arith.constant 4 : i32
      %181 = arith.addi %1, %c4_i32 : i32
      %c0_120 = arith.constant 0 : index
      %182 = arith.index_cast %181 : i32 to index
      %c0_121 = arith.constant 0 : index
      %c0_122 = arith.constant 0 : index
      %183 = vector.load %arg1[%c0_120, %182, %c0_121, %c0_122] : memref<1x12x12x48xf32, #tpu.memory_space<vmem>>, vector<1x1x8x48xf32>
      %184 = vector.shape_cast %183 : vector<1x1x8x48xf32> to vector<8x48xf32>
      %c20 = arith.constant 20 : index
      %c0_123 = arith.constant 0 : index
      %c0_124 = arith.constant 0 : index
      %185 = vector.load %arg2[%c20, %c0_123, %c0_124] : memref<25x1x48xf32, #tpu.memory_space<vmem>>, vector<1x1x48xf32>
      %186 = vector.shape_cast %185 : vector<1x1x48xf32> to vector<1x48xf32>
      %187 = vector.broadcast %186 : vector<1x48xf32> to vector<8x48xf32>
      %188 = arith.mulf %184, %187 : vector<8x48xf32>
      %189 = arith.addf %180, %188 : vector<8x48xf32>
      %c4_i32_125 = arith.constant 4 : i32
      %190 = arith.addi %1, %c4_i32_125 : i32
      %c0_126 = arith.constant 0 : index
      %191 = arith.index_cast %190 : i32 to index
      %c1_127 = arith.constant 1 : index
      %c0_128 = arith.constant 0 : index
      %192 = vector.load %arg1[%c0_126, %191, %c1_127, %c0_128] : memref<1x12x12x48xf32, #tpu.memory_space<vmem>>, vector<1x1x8x48xf32>
      %193 = vector.shape_cast %192 : vector<1x1x8x48xf32> to vector<8x48xf32>
      %c21 = arith.constant 21 : index
      %c0_129 = arith.constant 0 : index
      %c0_130 = arith.constant 0 : index
      %194 = vector.load %arg2[%c21, %c0_129, %c0_130] : memref<25x1x48xf32, #tpu.memory_space<vmem>>, vector<1x1x48xf32>
      %195 = vector.shape_cast %194 : vector<1x1x48xf32> to vector<1x48xf32>
      %196 = vector.broadcast %195 : vector<1x48xf32> to vector<8x48xf32>
      %197 = arith.mulf %193, %196 : vector<8x48xf32>
      %198 = arith.addf %189, %197 : vector<8x48xf32>
      %c4_i32_131 = arith.constant 4 : i32
      %199 = arith.addi %1, %c4_i32_131 : i32
      %c0_132 = arith.constant 0 : index
      %200 = arith.index_cast %199 : i32 to index
      %c2_133 = arith.constant 2 : index
      %c0_134 = arith.constant 0 : index
      %201 = vector.load %arg1[%c0_132, %200, %c2_133, %c0_134] : memref<1x12x12x48xf32, #tpu.memory_space<vmem>>, vector<1x1x8x48xf32>
      %202 = vector.shape_cast %201 : vector<1x1x8x48xf32> to vector<8x48xf32>
      %c22 = arith.constant 22 : index
      %c0_135 = arith.constant 0 : index
      %c0_136 = arith.constant 0 : index
      %203 = vector.load %arg2[%c22, %c0_135, %c0_136] : memref<25x1x48xf32, #tpu.memory_space<vmem>>, vector<1x1x48xf32>
      %204 = vector.shape_cast %203 : vector<1x1x48xf32> to vector<1x48xf32>
      %205 = vector.broadcast %204 : vector<1x48xf32> to vector<8x48xf32>
      %206 = arith.mulf %202, %205 : vector<8x48xf32>
      %207 = arith.addf %198, %206 : vector<8x48xf32>
      %c4_i32_137 = arith.constant 4 : i32
      %208 = arith.addi %1, %c4_i32_137 : i32
      %c0_138 = arith.constant 0 : index
      %209 = arith.index_cast %208 : i32 to index
      %c3_139 = arith.constant 3 : index
      %c0_140 = arith.constant 0 : index
      %210 = vector.load %arg1[%c0_138, %209, %c3_139, %c0_140] : memref<1x12x12x48xf32, #tpu.memory_space<vmem>>, vector<1x1x8x48xf32>
      %211 = vector.shape_cast %210 : vector<1x1x8x48xf32> to vector<8x48xf32>
      %c23 = arith.constant 23 : index
      %c0_141 = arith.constant 0 : index
      %c0_142 = arith.constant 0 : index
      %212 = vector.load %arg2[%c23, %c0_141, %c0_142] : memref<25x1x48xf32, #tpu.memory_space<vmem>>, vector<1x1x48xf32>
      %213 = vector.shape_cast %212 : vector<1x1x48xf32> to vector<1x48xf32>
      %214 = vector.broadcast %213 : vector<1x48xf32> to vector<8x48xf32>
      %215 = arith.mulf %211, %214 : vector<8x48xf32>
      %216 = arith.addf %207, %215 : vector<8x48xf32>
      %c4_i32_143 = arith.constant 4 : i32
      %217 = arith.addi %1, %c4_i32_143 : i32
      %c0_144 = arith.constant 0 : index
      %218 = arith.index_cast %217 : i32 to index
      %c4_145 = arith.constant 4 : index
      %c0_146 = arith.constant 0 : index
      %219 = vector.load %arg1[%c0_144, %218, %c4_145, %c0_146] : memref<1x12x12x48xf32, #tpu.memory_space<vmem>>, vector<1x1x8x48xf32>
      %220 = vector.shape_cast %219 : vector<1x1x8x48xf32> to vector<8x48xf32>
      %c24 = arith.constant 24 : index
      %c0_147 = arith.constant 0 : index
      %c0_148 = arith.constant 0 : index
      %221 = vector.load %arg2[%c24, %c0_147, %c0_148] : memref<25x1x48xf32, #tpu.memory_space<vmem>>, vector<1x1x48xf32>
      %222 = vector.shape_cast %221 : vector<1x1x48xf32> to vector<1x48xf32>
      %223 = vector.broadcast %222 : vector<1x48xf32> to vector<8x48xf32>
      %224 = arith.mulf %220, %223 : vector<8x48xf32>
      %225 = arith.addf %216, %224 : vector<8x48xf32>
      %226 = arith.truncf %225 : vector<8x48xf32> to vector<8x48xbf16>
      %c0_149 = arith.constant 0 : index
      %c0_150 = arith.constant 0 : index
      %227 = vector.load %arg3[%c0_149, %c0_150] : memref<48x48xbf16, #tpu.memory_space<vmem>>, vector<48x48xbf16>
      %cst = arith.constant dense<0.000000e+00> : vector<8x48xf32>
      %228 = tpu.matmul %226, %227, %cst {dimension_numbers = #tpu.dot_dimension_numbers<[1], [0], [0], [1], [0, 0, 1, 1], [], []>} : vector<8x48xbf16>, vector<48x48xbf16>, vector<8x48xf32> -> vector<8x48xf32>
      %c0_151 = arith.constant 0 : index
      %c0_152 = arith.constant 0 : index
      %229 = vector.load %arg4[%c0_151, %c0_152] : memref<1x48xf32, #tpu.memory_space<vmem>>, vector<1x48xf32>
      %230 = vector.broadcast %229 : vector<1x48xf32> to vector<8x48xf32>
      %231 = arith.addf %228, %230 : vector<8x48xf32>
      %cst_153 = arith.constant 0.000000e+00 : f32
      %232 = vector.broadcast %cst_153 : f32 to vector<8x48xf32>
      %233 = arith.maximumf %231, %232 : vector<8x48xf32>
      %c0_154 = arith.constant 0 : index
      %234 = arith.index_cast %arg6 : i32 to index
      %c0_155 = arith.constant 0 : index
      %c0_156 = arith.constant 0 : index
      %235 = vector.load %arg5[%c0_154, %234, %c0_155, %c0_156] : memref<1x8x8x48xf32, #tpu.memory_space<vmem>>, vector<1x1x8x48xf32>
      %236 = vector.shape_cast %235 : vector<1x1x8x48xf32> to vector<8x48xf32>
      %237 = vector.shape_cast %233 : vector<8x48xf32> to vector<1x1x8x48xf32>
      tpu.vector_store %arg5[%c0_154, %234, %c0_155, %c0_156], %237 {strides = array<i32>} : memref<1x8x8x48xf32, #tpu.memory_space<vmem>>, vector<1x1x8x48xf32>,
    }
    %c8_i32_0 = arith.constant 8 : i32
    return
  }
  func.func @transform_0(%arg0: i32) -> (i32, i32, i32, i32) {
    %c0_i32 = arith.constant 0 : i32
    %c0_i32_0 = arith.constant 0 : i32
    %c0_i32_1 = arith.constant 0 : i32
    %c0_i32_2 = arith.constant 0 : i32
    return %arg0, %c0_i32, %c0_i32_0, %c0_i32_1 : i32, i32, i32, i32
  }
  func.func @transform_1(%arg0: i32) -> (i32, i32, i32) {
    %c0_i32 = arith.constant 0 : i32
    %c0_i32_0 = arith.constant 0 : i32
    %c0_i32_1 = arith.constant 0 : i32
    %c0_i32_2 = arith.constant 0 : i32
    return %c0_i32, %c0_i32_0, %c0_i32_1 : i32, i32, i32
  }
  func.func @transform_2(%arg0: i32) -> (i32, i32) {
    %c0_i32 = arith.constant 0 : i32
    %c0_i32_0 = arith.constant 0 : i32
    %c0_i32_1 = arith.constant 0 : i32
    return %c0_i32, %c0_i32_0 : i32, i32
  }
  func.func @transform_3(%arg0: i32) -> (i32, i32) {
    %c0_i32 = arith.constant 0 : i32
    %c0_i32_0 = arith.constant 0 : i32
    %c0_i32_1 = arith.constant 0 : i32
    return %c0_i32, %c0_i32_0 : i32, i32
  }
  func.func @transform_4(%arg0: i32) -> (i32, i32, i32, i32) {
    %c0_i32 = arith.constant 0 : i32
    %c0_i32_0 = arith.constant 0 : i32
    %c0_i32_1 = arith.constant 0 : i32
    %c0_i32_2 = arith.constant 0 : i32
    return %arg0, %c0_i32, %c0_i32_0, %c0_i32_1 : i32, i32, i32, i32
  }
}

module attributes {stable_mosaic.version = 11 : i64} {
  func.func @kernel(%arg0: i32, %arg1: memref<1x40x10x32xf32, #tpu.memory_space<vmem>>, %arg2: memref<25x1x32xf32, #tpu.memory_space<vmem>>, %arg3: memref<32x48xbf16, #tpu.memory_space<vmem>>, %arg4: memref<1x48xf32, #tpu.memory_space<vmem>>, %arg5: memref<32x48xbf16, #tpu.memory_space<vmem>>, %arg6: memref<1x8x8x48xf32, #tpu.memory_space<vmem>>) attributes {dimension_semantics = [#tpu.dimension_semantics<parallel>], iteration_bounds = array<i64: 2>, scalar_prefetch = 0 : i64, scratch_operands = 0 : i64, tpu.core_type = #tpu.core_type<tc>, window_params = [{transform_indices = @transform_0, window_bounds = array<i64: 1, 40, 10, 32>}, {pipeline_mode = #tpu.pipeline_mode<synchronous>, transform_indices = @transform_1, window_bounds = array<i64: 25, 1, 32>}, {pipeline_mode = #tpu.pipeline_mode<synchronous>, transform_indices = @transform_2, window_bounds = array<i64: 32, 48>}, {pipeline_mode = #tpu.pipeline_mode<synchronous>, transform_indices = @transform_3, window_bounds = array<i64: 1, 48>}, {pipeline_mode = #tpu.pipeline_mode<synchronous>, transform_indices = @transform_4, window_bounds = array<i64: 32, 48>}, {transform_indices = @transform_5, window_bounds = array<i64: 1, 8, 8, 48>}]} {
    %c0_i32 = arith.constant 0 : i32
    %c8_i32 = arith.constant 8 : i32
    %0 = arith.addi %c0_i32, %c8_i32 : i32
    %c1_i32 = arith.constant 1 : i32
    scf.for %arg7 = %c0_i32 to %0 step %c1_i32  : i32 {
      %c2_i32 = arith.constant 2 : i32
      %1 = arith.muli %arg7, %c2_i32 : i32
      %c0_i32_1 = arith.constant 0 : i32
      %2 = arith.addi %1, %c0_i32_1 : i32
      %c0 = arith.constant 0 : index
      %3 = arith.index_cast %2 : i32 to index
      %c0_2 = arith.constant 0 : index
      %c0_3 = arith.constant 0 : index
      %4 = vector.load %arg1[%c0, %3, %c0_2, %c0_3] : memref<1x40x10x32xf32, #tpu.memory_space<vmem>>, vector<1x1x8x32xf32>
      %5 = vector.shape_cast %4 : vector<1x1x8x32xf32> to vector<8x32xf32>
      %c0_4 = arith.constant 0 : index
      %c0_5 = arith.constant 0 : index
      %c0_6 = arith.constant 0 : index
      %6 = vector.load %arg2[%c0_4, %c0_5, %c0_6] : memref<25x1x32xf32, #tpu.memory_space<vmem>>, vector<1x1x32xf32>
      %7 = vector.shape_cast %6 : vector<1x1x32xf32> to vector<1x32xf32>
      %8 = vector.broadcast %7 : vector<1x32xf32> to vector<8x32xf32>
      %9 = arith.mulf %5, %8 : vector<8x32xf32>
      %c20_i32 = arith.constant 20 : i32
      %10 = arith.addi %1, %c20_i32 : i32
      %c0_7 = arith.constant 0 : index
      %11 = arith.index_cast %10 : i32 to index
      %c0_8 = arith.constant 0 : index
      %c0_9 = arith.constant 0 : index
      %12 = vector.load %arg1[%c0_7, %11, %c0_8, %c0_9] : memref<1x40x10x32xf32, #tpu.memory_space<vmem>>, vector<1x1x8x32xf32>
      %13 = vector.shape_cast %12 : vector<1x1x8x32xf32> to vector<8x32xf32>
      %c1 = arith.constant 1 : index
      %c0_10 = arith.constant 0 : index
      %c0_11 = arith.constant 0 : index
      %14 = vector.load %arg2[%c1, %c0_10, %c0_11] : memref<25x1x32xf32, #tpu.memory_space<vmem>>, vector<1x1x32xf32>
      %15 = vector.shape_cast %14 : vector<1x1x32xf32> to vector<1x32xf32>
      %16 = vector.broadcast %15 : vector<1x32xf32> to vector<8x32xf32>
      %17 = arith.mulf %13, %16 : vector<8x32xf32>
      %18 = arith.addf %9, %17 : vector<8x32xf32>
      %c0_i32_12 = arith.constant 0 : i32
      %19 = arith.addi %1, %c0_i32_12 : i32
      %c0_13 = arith.constant 0 : index
      %20 = arith.index_cast %19 : i32 to index
      %c1_14 = arith.constant 1 : index
      %c0_15 = arith.constant 0 : index
      %21 = vector.load %arg1[%c0_13, %20, %c1_14, %c0_15] : memref<1x40x10x32xf32, #tpu.memory_space<vmem>>, vector<1x1x8x32xf32>
      %22 = vector.shape_cast %21 : vector<1x1x8x32xf32> to vector<8x32xf32>
      %c2 = arith.constant 2 : index
      %c0_16 = arith.constant 0 : index
      %c0_17 = arith.constant 0 : index
      %23 = vector.load %arg2[%c2, %c0_16, %c0_17] : memref<25x1x32xf32, #tpu.memory_space<vmem>>, vector<1x1x32xf32>
      %24 = vector.shape_cast %23 : vector<1x1x32xf32> to vector<1x32xf32>
      %25 = vector.broadcast %24 : vector<1x32xf32> to vector<8x32xf32>
      %26 = arith.mulf %22, %25 : vector<8x32xf32>
      %27 = arith.addf %18, %26 : vector<8x32xf32>
      %c20_i32_18 = arith.constant 20 : i32
      %28 = arith.addi %1, %c20_i32_18 : i32
      %c0_19 = arith.constant 0 : index
      %29 = arith.index_cast %28 : i32 to index
      %c1_20 = arith.constant 1 : index
      %c0_21 = arith.constant 0 : index
      %30 = vector.load %arg1[%c0_19, %29, %c1_20, %c0_21] : memref<1x40x10x32xf32, #tpu.memory_space<vmem>>, vector<1x1x8x32xf32>
      %31 = vector.shape_cast %30 : vector<1x1x8x32xf32> to vector<8x32xf32>
      %c3 = arith.constant 3 : index
      %c0_22 = arith.constant 0 : index
      %c0_23 = arith.constant 0 : index
      %32 = vector.load %arg2[%c3, %c0_22, %c0_23] : memref<25x1x32xf32, #tpu.memory_space<vmem>>, vector<1x1x32xf32>
      %33 = vector.shape_cast %32 : vector<1x1x32xf32> to vector<1x32xf32>
      %34 = vector.broadcast %33 : vector<1x32xf32> to vector<8x32xf32>
      %35 = arith.mulf %31, %34 : vector<8x32xf32>
      %36 = arith.addf %27, %35 : vector<8x32xf32>
      %c0_i32_24 = arith.constant 0 : i32
      %37 = arith.addi %1, %c0_i32_24 : i32
      %c0_25 = arith.constant 0 : index
      %38 = arith.index_cast %37 : i32 to index
      %c2_26 = arith.constant 2 : index
      %c0_27 = arith.constant 0 : index
      %39 = vector.load %arg1[%c0_25, %38, %c2_26, %c0_27] : memref<1x40x10x32xf32, #tpu.memory_space<vmem>>, vector<1x1x8x32xf32>
      %40 = vector.shape_cast %39 : vector<1x1x8x32xf32> to vector<8x32xf32>
      %c4 = arith.constant 4 : index
      %c0_28 = arith.constant 0 : index
      %c0_29 = arith.constant 0 : index
      %41 = vector.load %arg2[%c4, %c0_28, %c0_29] : memref<25x1x32xf32, #tpu.memory_space<vmem>>, vector<1x1x32xf32>
      %42 = vector.shape_cast %41 : vector<1x1x32xf32> to vector<1x32xf32>
      %43 = vector.broadcast %42 : vector<1x32xf32> to vector<8x32xf32>
      %44 = arith.mulf %40, %43 : vector<8x32xf32>
      %45 = arith.addf %36, %44 : vector<8x32xf32>
      %c1_i32_30 = arith.constant 1 : i32
      %46 = arith.addi %1, %c1_i32_30 : i32
      %c0_31 = arith.constant 0 : index
      %47 = arith.index_cast %46 : i32 to index
      %c0_32 = arith.constant 0 : index
      %c0_33 = arith.constant 0 : index
      %48 = vector.load %arg1[%c0_31, %47, %c0_32, %c0_33] : memref<1x40x10x32xf32, #tpu.memory_space<vmem>>, vector<1x1x8x32xf32>
      %49 = vector.shape_cast %48 : vector<1x1x8x32xf32> to vector<8x32xf32>
      %c5 = arith.constant 5 : index
      %c0_34 = arith.constant 0 : index
      %c0_35 = arith.constant 0 : index
      %50 = vector.load %arg2[%c5, %c0_34, %c0_35] : memref<25x1x32xf32, #tpu.memory_space<vmem>>, vector<1x1x32xf32>
      %51 = vector.shape_cast %50 : vector<1x1x32xf32> to vector<1x32xf32>
      %52 = vector.broadcast %51 : vector<1x32xf32> to vector<8x32xf32>
      %53 = arith.mulf %49, %52 : vector<8x32xf32>
      %54 = arith.addf %45, %53 : vector<8x32xf32>
      %c21_i32 = arith.constant 21 : i32
      %55 = arith.addi %1, %c21_i32 : i32
      %c0_36 = arith.constant 0 : index
      %56 = arith.index_cast %55 : i32 to index
      %c0_37 = arith.constant 0 : index
      %c0_38 = arith.constant 0 : index
      %57 = vector.load %arg1[%c0_36, %56, %c0_37, %c0_38] : memref<1x40x10x32xf32, #tpu.memory_space<vmem>>, vector<1x1x8x32xf32>
      %58 = vector.shape_cast %57 : vector<1x1x8x32xf32> to vector<8x32xf32>
      %c6 = arith.constant 6 : index
      %c0_39 = arith.constant 0 : index
      %c0_40 = arith.constant 0 : index
      %59 = vector.load %arg2[%c6, %c0_39, %c0_40] : memref<25x1x32xf32, #tpu.memory_space<vmem>>, vector<1x1x32xf32>
      %60 = vector.shape_cast %59 : vector<1x1x32xf32> to vector<1x32xf32>
      %61 = vector.broadcast %60 : vector<1x32xf32> to vector<8x32xf32>
      %62 = arith.mulf %58, %61 : vector<8x32xf32>
      %63 = arith.addf %54, %62 : vector<8x32xf32>
      %c1_i32_41 = arith.constant 1 : i32
      %64 = arith.addi %1, %c1_i32_41 : i32
      %c0_42 = arith.constant 0 : index
      %65 = arith.index_cast %64 : i32 to index
      %c1_43 = arith.constant 1 : index
      %c0_44 = arith.constant 0 : index
      %66 = vector.load %arg1[%c0_42, %65, %c1_43, %c0_44] : memref<1x40x10x32xf32, #tpu.memory_space<vmem>>, vector<1x1x8x32xf32>
      %67 = vector.shape_cast %66 : vector<1x1x8x32xf32> to vector<8x32xf32>
      %c7 = arith.constant 7 : index
      %c0_45 = arith.constant 0 : index
      %c0_46 = arith.constant 0 : index
      %68 = vector.load %arg2[%c7, %c0_45, %c0_46] : memref<25x1x32xf32, #tpu.memory_space<vmem>>, vector<1x1x32xf32>
      %69 = vector.shape_cast %68 : vector<1x1x32xf32> to vector<1x32xf32>
      %70 = vector.broadcast %69 : vector<1x32xf32> to vector<8x32xf32>
      %71 = arith.mulf %67, %70 : vector<8x32xf32>
      %72 = arith.addf %63, %71 : vector<8x32xf32>
      %c21_i32_47 = arith.constant 21 : i32
      %73 = arith.addi %1, %c21_i32_47 : i32
      %c0_48 = arith.constant 0 : index
      %74 = arith.index_cast %73 : i32 to index
      %c1_49 = arith.constant 1 : index
      %c0_50 = arith.constant 0 : index
      %75 = vector.load %arg1[%c0_48, %74, %c1_49, %c0_50] : memref<1x40x10x32xf32, #tpu.memory_space<vmem>>, vector<1x1x8x32xf32>
      %76 = vector.shape_cast %75 : vector<1x1x8x32xf32> to vector<8x32xf32>
      %c8 = arith.constant 8 : index
      %c0_51 = arith.constant 0 : index
      %c0_52 = arith.constant 0 : index
      %77 = vector.load %arg2[%c8, %c0_51, %c0_52] : memref<25x1x32xf32, #tpu.memory_space<vmem>>, vector<1x1x32xf32>
      %78 = vector.shape_cast %77 : vector<1x1x32xf32> to vector<1x32xf32>
      %79 = vector.broadcast %78 : vector<1x32xf32> to vector<8x32xf32>
      %80 = arith.mulf %76, %79 : vector<8x32xf32>
      %81 = arith.addf %72, %80 : vector<8x32xf32>
      %c1_i32_53 = arith.constant 1 : i32
      %82 = arith.addi %1, %c1_i32_53 : i32
      %c0_54 = arith.constant 0 : index
      %83 = arith.index_cast %82 : i32 to index
      %c2_55 = arith.constant 2 : index
      %c0_56 = arith.constant 0 : index
      %84 = vector.load %arg1[%c0_54, %83, %c2_55, %c0_56] : memref<1x40x10x32xf32, #tpu.memory_space<vmem>>, vector<1x1x8x32xf32>
      %85 = vector.shape_cast %84 : vector<1x1x8x32xf32> to vector<8x32xf32>
      %c9 = arith.constant 9 : index
      %c0_57 = arith.constant 0 : index
      %c0_58 = arith.constant 0 : index
      %86 = vector.load %arg2[%c9, %c0_57, %c0_58] : memref<25x1x32xf32, #tpu.memory_space<vmem>>, vector<1x1x32xf32>
      %87 = vector.shape_cast %86 : vector<1x1x32xf32> to vector<1x32xf32>
      %88 = vector.broadcast %87 : vector<1x32xf32> to vector<8x32xf32>
      %89 = arith.mulf %85, %88 : vector<8x32xf32>
      %90 = arith.addf %81, %89 : vector<8x32xf32>
      %c2_i32_59 = arith.constant 2 : i32
      %91 = arith.addi %1, %c2_i32_59 : i32
      %c0_60 = arith.constant 0 : index
      %92 = arith.index_cast %91 : i32 to index
      %c0_61 = arith.constant 0 : index
      %c0_62 = arith.constant 0 : index
      %93 = vector.load %arg1[%c0_60, %92, %c0_61, %c0_62] : memref<1x40x10x32xf32, #tpu.memory_space<vmem>>, vector<1x1x8x32xf32>
      %94 = vector.shape_cast %93 : vector<1x1x8x32xf32> to vector<8x32xf32>
      %c10 = arith.constant 10 : index
      %c0_63 = arith.constant 0 : index
      %c0_64 = arith.constant 0 : index
      %95 = vector.load %arg2[%c10, %c0_63, %c0_64] : memref<25x1x32xf32, #tpu.memory_space<vmem>>, vector<1x1x32xf32>
      %96 = vector.shape_cast %95 : vector<1x1x32xf32> to vector<1x32xf32>
      %97 = vector.broadcast %96 : vector<1x32xf32> to vector<8x32xf32>
      %98 = arith.mulf %94, %97 : vector<8x32xf32>
      %99 = arith.addf %90, %98 : vector<8x32xf32>
      %c22_i32 = arith.constant 22 : i32
      %100 = arith.addi %1, %c22_i32 : i32
      %c0_65 = arith.constant 0 : index
      %101 = arith.index_cast %100 : i32 to index
      %c0_66 = arith.constant 0 : index
      %c0_67 = arith.constant 0 : index
      %102 = vector.load %arg1[%c0_65, %101, %c0_66, %c0_67] : memref<1x40x10x32xf32, #tpu.memory_space<vmem>>, vector<1x1x8x32xf32>
      %103 = vector.shape_cast %102 : vector<1x1x8x32xf32> to vector<8x32xf32>
      %c11 = arith.constant 11 : index
      %c0_68 = arith.constant 0 : index
      %c0_69 = arith.constant 0 : index
      %104 = vector.load %arg2[%c11, %c0_68, %c0_69] : memref<25x1x32xf32, #tpu.memory_space<vmem>>, vector<1x1x32xf32>
      %105 = vector.shape_cast %104 : vector<1x1x32xf32> to vector<1x32xf32>
      %106 = vector.broadcast %105 : vector<1x32xf32> to vector<8x32xf32>
      %107 = arith.mulf %103, %106 : vector<8x32xf32>
      %108 = arith.addf %99, %107 : vector<8x32xf32>
      %c2_i32_70 = arith.constant 2 : i32
      %109 = arith.addi %1, %c2_i32_70 : i32
      %c0_71 = arith.constant 0 : index
      %110 = arith.index_cast %109 : i32 to index
      %c1_72 = arith.constant 1 : index
      %c0_73 = arith.constant 0 : index
      %111 = vector.load %arg1[%c0_71, %110, %c1_72, %c0_73] : memref<1x40x10x32xf32, #tpu.memory_space<vmem>>, vector<1x1x8x32xf32>
      %112 = vector.shape_cast %111 : vector<1x1x8x32xf32> to vector<8x32xf32>
      %c12 = arith.constant 12 : index
      %c0_74 = arith.constant 0 : index
      %c0_75 = arith.constant 0 : index
      %113 = vector.load %arg2[%c12, %c0_74, %c0_75] : memref<25x1x32xf32, #tpu.memory_space<vmem>>, vector<1x1x32xf32>
      %114 = vector.shape_cast %113 : vector<1x1x32xf32> to vector<1x32xf32>
      %115 = vector.broadcast %114 : vector<1x32xf32> to vector<8x32xf32>
      %116 = arith.mulf %112, %115 : vector<8x32xf32>
      %117 = arith.addf %108, %116 : vector<8x32xf32>
      %c22_i32_76 = arith.constant 22 : i32
      %118 = arith.addi %1, %c22_i32_76 : i32
      %c0_77 = arith.constant 0 : index
      %119 = arith.index_cast %118 : i32 to index
      %c1_78 = arith.constant 1 : index
      %c0_79 = arith.constant 0 : index
      %120 = vector.load %arg1[%c0_77, %119, %c1_78, %c0_79] : memref<1x40x10x32xf32, #tpu.memory_space<vmem>>, vector<1x1x8x32xf32>
      %121 = vector.shape_cast %120 : vector<1x1x8x32xf32> to vector<8x32xf32>
      %c13 = arith.constant 13 : index
      %c0_80 = arith.constant 0 : index
      %c0_81 = arith.constant 0 : index
      %122 = vector.load %arg2[%c13, %c0_80, %c0_81] : memref<25x1x32xf32, #tpu.memory_space<vmem>>, vector<1x1x32xf32>
      %123 = vector.shape_cast %122 : vector<1x1x32xf32> to vector<1x32xf32>
      %124 = vector.broadcast %123 : vector<1x32xf32> to vector<8x32xf32>
      %125 = arith.mulf %121, %124 : vector<8x32xf32>
      %126 = arith.addf %117, %125 : vector<8x32xf32>
      %c2_i32_82 = arith.constant 2 : i32
      %127 = arith.addi %1, %c2_i32_82 : i32
      %c0_83 = arith.constant 0 : index
      %128 = arith.index_cast %127 : i32 to index
      %c2_84 = arith.constant 2 : index
      %c0_85 = arith.constant 0 : index
      %129 = vector.load %arg1[%c0_83, %128, %c2_84, %c0_85] : memref<1x40x10x32xf32, #tpu.memory_space<vmem>>, vector<1x1x8x32xf32>
      %130 = vector.shape_cast %129 : vector<1x1x8x32xf32> to vector<8x32xf32>
      %c14 = arith.constant 14 : index
      %c0_86 = arith.constant 0 : index
      %c0_87 = arith.constant 0 : index
      %131 = vector.load %arg2[%c14, %c0_86, %c0_87] : memref<25x1x32xf32, #tpu.memory_space<vmem>>, vector<1x1x32xf32>
      %132 = vector.shape_cast %131 : vector<1x1x32xf32> to vector<1x32xf32>
      %133 = vector.broadcast %132 : vector<1x32xf32> to vector<8x32xf32>
      %134 = arith.mulf %130, %133 : vector<8x32xf32>
      %135 = arith.addf %126, %134 : vector<8x32xf32>
      %c3_i32 = arith.constant 3 : i32
      %136 = arith.addi %1, %c3_i32 : i32
      %c0_88 = arith.constant 0 : index
      %137 = arith.index_cast %136 : i32 to index
      %c0_89 = arith.constant 0 : index
      %c0_90 = arith.constant 0 : index
      %138 = vector.load %arg1[%c0_88, %137, %c0_89, %c0_90] : memref<1x40x10x32xf32, #tpu.memory_space<vmem>>, vector<1x1x8x32xf32>
      %139 = vector.shape_cast %138 : vector<1x1x8x32xf32> to vector<8x32xf32>
      %c15 = arith.constant 15 : index
      %c0_91 = arith.constant 0 : index
      %c0_92 = arith.constant 0 : index
      %140 = vector.load %arg2[%c15, %c0_91, %c0_92] : memref<25x1x32xf32, #tpu.memory_space<vmem>>, vector<1x1x32xf32>
      %141 = vector.shape_cast %140 : vector<1x1x32xf32> to vector<1x32xf32>
      %142 = vector.broadcast %141 : vector<1x32xf32> to vector<8x32xf32>
      %143 = arith.mulf %139, %142 : vector<8x32xf32>
      %144 = arith.addf %135, %143 : vector<8x32xf32>
      %c23_i32 = arith.constant 23 : i32
      %145 = arith.addi %1, %c23_i32 : i32
      %c0_93 = arith.constant 0 : index
      %146 = arith.index_cast %145 : i32 to index
      %c0_94 = arith.constant 0 : index
      %c0_95 = arith.constant 0 : index
      %147 = vector.load %arg1[%c0_93, %146, %c0_94, %c0_95] : memref<1x40x10x32xf32, #tpu.memory_space<vmem>>, vector<1x1x8x32xf32>
      %148 = vector.shape_cast %147 : vector<1x1x8x32xf32> to vector<8x32xf32>
      %c16 = arith.constant 16 : index
      %c0_96 = arith.constant 0 : index
      %c0_97 = arith.constant 0 : index
      %149 = vector.load %arg2[%c16, %c0_96, %c0_97] : memref<25x1x32xf32, #tpu.memory_space<vmem>>, vector<1x1x32xf32>
      %150 = vector.shape_cast %149 : vector<1x1x32xf32> to vector<1x32xf32>
      %151 = vector.broadcast %150 : vector<1x32xf32> to vector<8x32xf32>
      %152 = arith.mulf %148, %151 : vector<8x32xf32>
      %153 = arith.addf %144, %152 : vector<8x32xf32>
      %c3_i32_98 = arith.constant 3 : i32
      %154 = arith.addi %1, %c3_i32_98 : i32
      %c0_99 = arith.constant 0 : index
      %155 = arith.index_cast %154 : i32 to index
      %c1_100 = arith.constant 1 : index
      %c0_101 = arith.constant 0 : index
      %156 = vector.load %arg1[%c0_99, %155, %c1_100, %c0_101] : memref<1x40x10x32xf32, #tpu.memory_space<vmem>>, vector<1x1x8x32xf32>
      %157 = vector.shape_cast %156 : vector<1x1x8x32xf32> to vector<8x32xf32>
      %c17 = arith.constant 17 : index
      %c0_102 = arith.constant 0 : index
      %c0_103 = arith.constant 0 : index
      %158 = vector.load %arg2[%c17, %c0_102, %c0_103] : memref<25x1x32xf32, #tpu.memory_space<vmem>>, vector<1x1x32xf32>
      %159 = vector.shape_cast %158 : vector<1x1x32xf32> to vector<1x32xf32>
      %160 = vector.broadcast %159 : vector<1x32xf32> to vector<8x32xf32>
      %161 = arith.mulf %157, %160 : vector<8x32xf32>
      %162 = arith.addf %153, %161 : vector<8x32xf32>
      %c23_i32_104 = arith.constant 23 : i32
      %163 = arith.addi %1, %c23_i32_104 : i32
      %c0_105 = arith.constant 0 : index
      %164 = arith.index_cast %163 : i32 to index
      %c1_106 = arith.constant 1 : index
      %c0_107 = arith.constant 0 : index
      %165 = vector.load %arg1[%c0_105, %164, %c1_106, %c0_107] : memref<1x40x10x32xf32, #tpu.memory_space<vmem>>, vector<1x1x8x32xf32>
      %166 = vector.shape_cast %165 : vector<1x1x8x32xf32> to vector<8x32xf32>
      %c18 = arith.constant 18 : index
      %c0_108 = arith.constant 0 : index
      %c0_109 = arith.constant 0 : index
      %167 = vector.load %arg2[%c18, %c0_108, %c0_109] : memref<25x1x32xf32, #tpu.memory_space<vmem>>, vector<1x1x32xf32>
      %168 = vector.shape_cast %167 : vector<1x1x32xf32> to vector<1x32xf32>
      %169 = vector.broadcast %168 : vector<1x32xf32> to vector<8x32xf32>
      %170 = arith.mulf %166, %169 : vector<8x32xf32>
      %171 = arith.addf %162, %170 : vector<8x32xf32>
      %c3_i32_110 = arith.constant 3 : i32
      %172 = arith.addi %1, %c3_i32_110 : i32
      %c0_111 = arith.constant 0 : index
      %173 = arith.index_cast %172 : i32 to index
      %c2_112 = arith.constant 2 : index
      %c0_113 = arith.constant 0 : index
      %174 = vector.load %arg1[%c0_111, %173, %c2_112, %c0_113] : memref<1x40x10x32xf32, #tpu.memory_space<vmem>>, vector<1x1x8x32xf32>
      %175 = vector.shape_cast %174 : vector<1x1x8x32xf32> to vector<8x32xf32>
      %c19 = arith.constant 19 : index
      %c0_114 = arith.constant 0 : index
      %c0_115 = arith.constant 0 : index
      %176 = vector.load %arg2[%c19, %c0_114, %c0_115] : memref<25x1x32xf32, #tpu.memory_space<vmem>>, vector<1x1x32xf32>
      %177 = vector.shape_cast %176 : vector<1x1x32xf32> to vector<1x32xf32>
      %178 = vector.broadcast %177 : vector<1x32xf32> to vector<8x32xf32>
      %179 = arith.mulf %175, %178 : vector<8x32xf32>
      %180 = arith.addf %171, %179 : vector<8x32xf32>
      %c4_i32 = arith.constant 4 : i32
      %181 = arith.addi %1, %c4_i32 : i32
      %c0_116 = arith.constant 0 : index
      %182 = arith.index_cast %181 : i32 to index
      %c0_117 = arith.constant 0 : index
      %c0_118 = arith.constant 0 : index
      %183 = vector.load %arg1[%c0_116, %182, %c0_117, %c0_118] : memref<1x40x10x32xf32, #tpu.memory_space<vmem>>, vector<1x1x8x32xf32>
      %184 = vector.shape_cast %183 : vector<1x1x8x32xf32> to vector<8x32xf32>
      %c20 = arith.constant 20 : index
      %c0_119 = arith.constant 0 : index
      %c0_120 = arith.constant 0 : index
      %185 = vector.load %arg2[%c20, %c0_119, %c0_120] : memref<25x1x32xf32, #tpu.memory_space<vmem>>, vector<1x1x32xf32>
      %186 = vector.shape_cast %185 : vector<1x1x32xf32> to vector<1x32xf32>
      %187 = vector.broadcast %186 : vector<1x32xf32> to vector<8x32xf32>
      %188 = arith.mulf %184, %187 : vector<8x32xf32>
      %189 = arith.addf %180, %188 : vector<8x32xf32>
      %c24_i32 = arith.constant 24 : i32
      %190 = arith.addi %1, %c24_i32 : i32
      %c0_121 = arith.constant 0 : index
      %191 = arith.index_cast %190 : i32 to index
      %c0_122 = arith.constant 0 : index
      %c0_123 = arith.constant 0 : index
      %192 = vector.load %arg1[%c0_121, %191, %c0_122, %c0_123] : memref<1x40x10x32xf32, #tpu.memory_space<vmem>>, vector<1x1x8x32xf32>
      %193 = vector.shape_cast %192 : vector<1x1x8x32xf32> to vector<8x32xf32>
      %c21 = arith.constant 21 : index
      %c0_124 = arith.constant 0 : index
      %c0_125 = arith.constant 0 : index
      %194 = vector.load %arg2[%c21, %c0_124, %c0_125] : memref<25x1x32xf32, #tpu.memory_space<vmem>>, vector<1x1x32xf32>
      %195 = vector.shape_cast %194 : vector<1x1x32xf32> to vector<1x32xf32>
      %196 = vector.broadcast %195 : vector<1x32xf32> to vector<8x32xf32>
      %197 = arith.mulf %193, %196 : vector<8x32xf32>
      %198 = arith.addf %189, %197 : vector<8x32xf32>
      %c4_i32_126 = arith.constant 4 : i32
      %199 = arith.addi %1, %c4_i32_126 : i32
      %c0_127 = arith.constant 0 : index
      %200 = arith.index_cast %199 : i32 to index
      %c1_128 = arith.constant 1 : index
      %c0_129 = arith.constant 0 : index
      %201 = vector.load %arg1[%c0_127, %200, %c1_128, %c0_129] : memref<1x40x10x32xf32, #tpu.memory_space<vmem>>, vector<1x1x8x32xf32>
      %202 = vector.shape_cast %201 : vector<1x1x8x32xf32> to vector<8x32xf32>
      %c22 = arith.constant 22 : index
      %c0_130 = arith.constant 0 : index
      %c0_131 = arith.constant 0 : index
      %203 = vector.load %arg2[%c22, %c0_130, %c0_131] : memref<25x1x32xf32, #tpu.memory_space<vmem>>, vector<1x1x32xf32>
      %204 = vector.shape_cast %203 : vector<1x1x32xf32> to vector<1x32xf32>
      %205 = vector.broadcast %204 : vector<1x32xf32> to vector<8x32xf32>
      %206 = arith.mulf %202, %205 : vector<8x32xf32>
      %207 = arith.addf %198, %206 : vector<8x32xf32>
      %c24_i32_132 = arith.constant 24 : i32
      %208 = arith.addi %1, %c24_i32_132 : i32
      %c0_133 = arith.constant 0 : index
      %209 = arith.index_cast %208 : i32 to index
      %c1_134 = arith.constant 1 : index
      %c0_135 = arith.constant 0 : index
      %210 = vector.load %arg1[%c0_133, %209, %c1_134, %c0_135] : memref<1x40x10x32xf32, #tpu.memory_space<vmem>>, vector<1x1x8x32xf32>
      %211 = vector.shape_cast %210 : vector<1x1x8x32xf32> to vector<8x32xf32>
      %c23 = arith.constant 23 : index
      %c0_136 = arith.constant 0 : index
      %c0_137 = arith.constant 0 : index
      %212 = vector.load %arg2[%c23, %c0_136, %c0_137] : memref<25x1x32xf32, #tpu.memory_space<vmem>>, vector<1x1x32xf32>
      %213 = vector.shape_cast %212 : vector<1x1x32xf32> to vector<1x32xf32>
      %214 = vector.broadcast %213 : vector<1x32xf32> to vector<8x32xf32>
      %215 = arith.mulf %211, %214 : vector<8x32xf32>
      %216 = arith.addf %207, %215 : vector<8x32xf32>
      %c4_i32_138 = arith.constant 4 : i32
      %217 = arith.addi %1, %c4_i32_138 : i32
      %c0_139 = arith.constant 0 : index
      %218 = arith.index_cast %217 : i32 to index
      %c2_140 = arith.constant 2 : index
      %c0_141 = arith.constant 0 : index
      %219 = vector.load %arg1[%c0_139, %218, %c2_140, %c0_141] : memref<1x40x10x32xf32, #tpu.memory_space<vmem>>, vector<1x1x8x32xf32>
      %220 = vector.shape_cast %219 : vector<1x1x8x32xf32> to vector<8x32xf32>
      %c24 = arith.constant 24 : index
      %c0_142 = arith.constant 0 : index
      %c0_143 = arith.constant 0 : index
      %221 = vector.load %arg2[%c24, %c0_142, %c0_143] : memref<25x1x32xf32, #tpu.memory_space<vmem>>, vector<1x1x32xf32>
      %222 = vector.shape_cast %221 : vector<1x1x32xf32> to vector<1x32xf32>
      %223 = vector.broadcast %222 : vector<1x32xf32> to vector<8x32xf32>
      %224 = arith.mulf %220, %223 : vector<8x32xf32>
      %225 = arith.addf %216, %224 : vector<8x32xf32>
      %226 = arith.truncf %225 : vector<8x32xf32> to vector<8x32xbf16>
      %c0_144 = arith.constant 0 : index
      %c0_145 = arith.constant 0 : index
      %227 = vector.load %arg3[%c0_144, %c0_145] : memref<32x48xbf16, #tpu.memory_space<vmem>>, vector<32x48xbf16>
      %cst = arith.constant dense<0.000000e+00> : vector<8x48xf32>
      %228 = tpu.matmul %226, %227, %cst {dimension_numbers = #tpu.dot_dimension_numbers<[1], [0], [0], [1], [0, 0, 1, 1], [], []>} : vector<8x32xbf16>, vector<32x48xbf16>, vector<8x48xf32> -> vector<8x48xf32>
      %c0_146 = arith.constant 0 : index
      %c0_147 = arith.constant 0 : index
      %229 = vector.load %arg4[%c0_146, %c0_147] : memref<1x48xf32, #tpu.memory_space<vmem>>, vector<1x48xf32>
      %230 = vector.broadcast %229 : vector<1x48xf32> to vector<8x48xf32>
      %231 = arith.addf %228, %230 : vector<8x48xf32>
      %cst_148 = arith.constant 0.000000e+00 : f32
      %232 = vector.broadcast %cst_148 : f32 to vector<8x48xf32>
      %233 = arith.maximumf %231, %232 : vector<8x48xf32>
      %c2_i32_149 = arith.constant 2 : i32
      %234 = arith.muli %c2_i32_149, %arg7 : i32
      %c2_i32_150 = arith.constant 2 : i32
      %235 = arith.addi %234, %c2_i32_150 : i32
      %c0_151 = arith.constant 0 : index
      %236 = arith.index_cast %235 : i32 to index
      %c1_152 = arith.constant 1 : index
      %c0_153 = arith.constant 0 : index
      %237 = vector.load %arg1[%c0_151, %236, %c1_152, %c0_153] : memref<1x40x10x32xf32, #tpu.memory_space<vmem>>, vector<1x1x8x32xf32>
      %238 = vector.shape_cast %237 : vector<1x1x8x32xf32> to vector<8x32xf32>
      %239 = arith.truncf %238 : vector<8x32xf32> to vector<8x32xbf16>
      %c0_154 = arith.constant 0 : index
      %c0_155 = arith.constant 0 : index
      %240 = vector.load %arg5[%c0_154, %c0_155] : memref<32x48xbf16, #tpu.memory_space<vmem>>, vector<32x48xbf16>
      %cst_156 = arith.constant dense<0.000000e+00> : vector<8x48xf32>
      %241 = tpu.matmul %239, %240, %cst_156 {dimension_numbers = #tpu.dot_dimension_numbers<[1], [0], [0], [1], [0, 0, 1, 1], [], []>} : vector<8x32xbf16>, vector<32x48xbf16>, vector<8x48xf32> -> vector<8x48xf32>
      %242 = arith.addf %233, %241 : vector<8x48xf32>
      %cst_157 = arith.constant 0.000000e+00 : f32
      %243 = vector.broadcast %cst_157 : f32 to vector<8x48xf32>
      %244 = arith.maximumf %242, %243 : vector<8x48xf32>
      %c0_158 = arith.constant 0 : index
      %245 = arith.index_cast %arg7 : i32 to index
      %c0_159 = arith.constant 0 : index
      %c0_160 = arith.constant 0 : index
      %246 = vector.load %arg6[%c0_158, %245, %c0_159, %c0_160] : memref<1x8x8x48xf32, #tpu.memory_space<vmem>>, vector<1x1x8x48xf32>
      %247 = vector.shape_cast %246 : vector<1x1x8x48xf32> to vector<8x48xf32>
      %248 = vector.shape_cast %244 : vector<8x48xf32> to vector<1x1x8x48xf32>
      tpu.vector_store %arg6[%c0_158, %245, %c0_159, %c0_160], %248 {strides = array<i32>} : memref<1x8x8x48xf32, #tpu.memory_space<vmem>>, vector<1x1x8x48xf32>,
    }
    %c8_i32_0 = arith.constant 8 : i32
    return
  }
  func.func @transform_0(%arg0: i32) -> (i32, i32, i32, i32) {
    %c0_i32 = arith.constant 0 : i32
    %c0_i32_0 = arith.constant 0 : i32
    %c0_i32_1 = arith.constant 0 : i32
    %c0_i32_2 = arith.constant 0 : i32
    return %arg0, %c0_i32, %c0_i32_0, %c0_i32_1 : i32, i32, i32, i32
  }
  func.func @transform_1(%arg0: i32) -> (i32, i32, i32) {
    %c0_i32 = arith.constant 0 : i32
    %c0_i32_0 = arith.constant 0 : i32
    %c0_i32_1 = arith.constant 0 : i32
    %c0_i32_2 = arith.constant 0 : i32
    return %c0_i32, %c0_i32_0, %c0_i32_1 : i32, i32, i32
  }
  func.func @transform_2(%arg0: i32) -> (i32, i32) {
    %c0_i32 = arith.constant 0 : i32
    %c0_i32_0 = arith.constant 0 : i32
    %c0_i32_1 = arith.constant 0 : i32
    return %c0_i32, %c0_i32_0 : i32, i32
  }
  func.func @transform_3(%arg0: i32) -> (i32, i32) {
    %c0_i32 = arith.constant 0 : i32
    %c0_i32_0 = arith.constant 0 : i32
    %c0_i32_1 = arith.constant 0 : i32
    return %c0_i32, %c0_i32_0 : i32, i32
  }
  func.func @transform_4(%arg0: i32) -> (i32, i32) {
    %c0_i32 = arith.constant 0 : i32
    %c0_i32_0 = arith.constant 0 : i32
    %c0_i32_1 = arith.constant 0 : i32
    return %c0_i32, %c0_i32_0 : i32, i32
  }
  func.func @transform_5(%arg0: i32) -> (i32, i32, i32, i32) {
    %c0_i32 = arith.constant 0 : i32
    %c0_i32_0 = arith.constant 0 : i32
    %c0_i32_1 = arith.constant 0 : i32
    %c0_i32_2 = arith.constant 0 : i32
    return %arg0, %c0_i32, %c0_i32_0, %c0_i32_1 : i32, i32, i32, i32
  }
}

module attributes {stable_mosaic.version = 11 : i64} {
  func.func @kernel(%arg0: i32, %arg1: memref<1x24x6x48xf32, #tpu.memory_space<vmem>>, %arg2: memref<25x1x48xf32, #tpu.memory_space<vmem>>, %arg3: memref<48x96xbf16, #tpu.memory_space<vmem>>, %arg4: memref<1x96xf32, #tpu.memory_space<vmem>>, %arg5: memref<48x96xbf16, #tpu.memory_space<vmem>>, %arg6: memref<1x4x4x96xf32, #tpu.memory_space<vmem>>) attributes {dimension_semantics = [#tpu.dimension_semantics<parallel>], iteration_bounds = array<i64: 2>, scalar_prefetch = 0 : i64, scratch_operands = 0 : i64, tpu.core_type = #tpu.core_type<tc>, window_params = [{transform_indices = @transform_0, window_bounds = array<i64: 1, 24, 6, 48>}, {pipeline_mode = #tpu.pipeline_mode<synchronous>, transform_indices = @transform_1, window_bounds = array<i64: 25, 1, 48>}, {pipeline_mode = #tpu.pipeline_mode<synchronous>, transform_indices = @transform_2, window_bounds = array<i64: 48, 96>}, {pipeline_mode = #tpu.pipeline_mode<synchronous>, transform_indices = @transform_3, window_bounds = array<i64: 1, 96>}, {pipeline_mode = #tpu.pipeline_mode<synchronous>, transform_indices = @transform_4, window_bounds = array<i64: 48, 96>}, {transform_indices = @transform_5, window_bounds = array<i64: 1, 4, 4, 96>}]} {
    %c0_i32 = arith.constant 0 : i32
    %c4_i32 = arith.constant 4 : i32
    %0 = arith.addi %c0_i32, %c4_i32 : i32
    %c1_i32 = arith.constant 1 : i32
    scf.for %arg7 = %c0_i32 to %0 step %c1_i32  : i32 {
      %c2_i32 = arith.constant 2 : i32
      %1 = arith.muli %arg7, %c2_i32 : i32
      %c0_i32_1 = arith.constant 0 : i32
      %2 = arith.addi %1, %c0_i32_1 : i32
      %c0 = arith.constant 0 : index
      %3 = arith.index_cast %2 : i32 to index
      %c0_2 = arith.constant 0 : index
      %c0_3 = arith.constant 0 : index
      %4 = vector.load %arg1[%c0, %3, %c0_2, %c0_3] : memref<1x24x6x48xf32, #tpu.memory_space<vmem>>, vector<1x1x4x48xf32>
      %5 = vector.shape_cast %4 : vector<1x1x4x48xf32> to vector<4x48xf32>
      %c0_4 = arith.constant 0 : index
      %c0_5 = arith.constant 0 : index
      %c0_6 = arith.constant 0 : index
      %6 = vector.load %arg2[%c0_4, %c0_5, %c0_6] : memref<25x1x48xf32, #tpu.memory_space<vmem>>, vector<1x1x48xf32>
      %7 = vector.shape_cast %6 : vector<1x1x48xf32> to vector<1x48xf32>
      %8 = vector.broadcast %7 : vector<1x48xf32> to vector<4x48xf32>
      %9 = arith.mulf %5, %8 : vector<4x48xf32>
      %c12_i32 = arith.constant 12 : i32
      %10 = arith.addi %1, %c12_i32 : i32
      %c0_7 = arith.constant 0 : index
      %11 = arith.index_cast %10 : i32 to index
      %c0_8 = arith.constant 0 : index
      %c0_9 = arith.constant 0 : index
      %12 = vector.load %arg1[%c0_7, %11, %c0_8, %c0_9] : memref<1x24x6x48xf32, #tpu.memory_space<vmem>>, vector<1x1x4x48xf32>
      %13 = vector.shape_cast %12 : vector<1x1x4x48xf32> to vector<4x48xf32>
      %c1 = arith.constant 1 : index
      %c0_10 = arith.constant 0 : index
      %c0_11 = arith.constant 0 : index
      %14 = vector.load %arg2[%c1, %c0_10, %c0_11] : memref<25x1x48xf32, #tpu.memory_space<vmem>>, vector<1x1x48xf32>
      %15 = vector.shape_cast %14 : vector<1x1x48xf32> to vector<1x48xf32>
      %16 = vector.broadcast %15 : vector<1x48xf32> to vector<4x48xf32>
      %17 = arith.mulf %13, %16 : vector<4x48xf32>
      %18 = arith.addf %9, %17 : vector<4x48xf32>
      %c0_i32_12 = arith.constant 0 : i32
      %19 = arith.addi %1, %c0_i32_12 : i32
      %c0_13 = arith.constant 0 : index
      %20 = arith.index_cast %19 : i32 to index
      %c1_14 = arith.constant 1 : index
      %c0_15 = arith.constant 0 : index
      %21 = vector.load %arg1[%c0_13, %20, %c1_14, %c0_15] : memref<1x24x6x48xf32, #tpu.memory_space<vmem>>, vector<1x1x4x48xf32>
      %22 = vector.shape_cast %21 : vector<1x1x4x48xf32> to vector<4x48xf32>
      %c2 = arith.constant 2 : index
      %c0_16 = arith.constant 0 : index
      %c0_17 = arith.constant 0 : index
      %23 = vector.load %arg2[%c2, %c0_16, %c0_17] : memref<25x1x48xf32, #tpu.memory_space<vmem>>, vector<1x1x48xf32>
      %24 = vector.shape_cast %23 : vector<1x1x48xf32> to vector<1x48xf32>
      %25 = vector.broadcast %24 : vector<1x48xf32> to vector<4x48xf32>
      %26 = arith.mulf %22, %25 : vector<4x48xf32>
      %27 = arith.addf %18, %26 : vector<4x48xf32>
      %c12_i32_18 = arith.constant 12 : i32
      %28 = arith.addi %1, %c12_i32_18 : i32
      %c0_19 = arith.constant 0 : index
      %29 = arith.index_cast %28 : i32 to index
      %c1_20 = arith.constant 1 : index
      %c0_21 = arith.constant 0 : index
      %30 = vector.load %arg1[%c0_19, %29, %c1_20, %c0_21] : memref<1x24x6x48xf32, #tpu.memory_space<vmem>>, vector<1x1x4x48xf32>
      %31 = vector.shape_cast %30 : vector<1x1x4x48xf32> to vector<4x48xf32>
      %c3 = arith.constant 3 : index
      %c0_22 = arith.constant 0 : index
      %c0_23 = arith.constant 0 : index
      %32 = vector.load %arg2[%c3, %c0_22, %c0_23] : memref<25x1x48xf32, #tpu.memory_space<vmem>>, vector<1x1x48xf32>
      %33 = vector.shape_cast %32 : vector<1x1x48xf32> to vector<1x48xf32>
      %34 = vector.broadcast %33 : vector<1x48xf32> to vector<4x48xf32>
      %35 = arith.mulf %31, %34 : vector<4x48xf32>
      %36 = arith.addf %27, %35 : vector<4x48xf32>
      %c0_i32_24 = arith.constant 0 : i32
      %37 = arith.addi %1, %c0_i32_24 : i32
      %c0_25 = arith.constant 0 : index
      %38 = arith.index_cast %37 : i32 to index
      %c2_26 = arith.constant 2 : index
      %c0_27 = arith.constant 0 : index
      %39 = vector.load %arg1[%c0_25, %38, %c2_26, %c0_27] : memref<1x24x6x48xf32, #tpu.memory_space<vmem>>, vector<1x1x4x48xf32>
      %40 = vector.shape_cast %39 : vector<1x1x4x48xf32> to vector<4x48xf32>
      %c4 = arith.constant 4 : index
      %c0_28 = arith.constant 0 : index
      %c0_29 = arith.constant 0 : index
      %41 = vector.load %arg2[%c4, %c0_28, %c0_29] : memref<25x1x48xf32, #tpu.memory_space<vmem>>, vector<1x1x48xf32>
      %42 = vector.shape_cast %41 : vector<1x1x48xf32> to vector<1x48xf32>
      %43 = vector.broadcast %42 : vector<1x48xf32> to vector<4x48xf32>
      %44 = arith.mulf %40, %43 : vector<4x48xf32>
      %45 = arith.addf %36, %44 : vector<4x48xf32>
      %c1_i32_30 = arith.constant 1 : i32
      %46 = arith.addi %1, %c1_i32_30 : i32
      %c0_31 = arith.constant 0 : index
      %47 = arith.index_cast %46 : i32 to index
      %c0_32 = arith.constant 0 : index
      %c0_33 = arith.constant 0 : index
      %48 = vector.load %arg1[%c0_31, %47, %c0_32, %c0_33] : memref<1x24x6x48xf32, #tpu.memory_space<vmem>>, vector<1x1x4x48xf32>
      %49 = vector.shape_cast %48 : vector<1x1x4x48xf32> to vector<4x48xf32>
      %c5 = arith.constant 5 : index
      %c0_34 = arith.constant 0 : index
      %c0_35 = arith.constant 0 : index
      %50 = vector.load %arg2[%c5, %c0_34, %c0_35] : memref<25x1x48xf32, #tpu.memory_space<vmem>>, vector<1x1x48xf32>
      %51 = vector.shape_cast %50 : vector<1x1x48xf32> to vector<1x48xf32>
      %52 = vector.broadcast %51 : vector<1x48xf32> to vector<4x48xf32>
      %53 = arith.mulf %49, %52 : vector<4x48xf32>
      %54 = arith.addf %45, %53 : vector<4x48xf32>
      %c13_i32 = arith.constant 13 : i32
      %55 = arith.addi %1, %c13_i32 : i32
      %c0_36 = arith.constant 0 : index
      %56 = arith.index_cast %55 : i32 to index
      %c0_37 = arith.constant 0 : index
      %c0_38 = arith.constant 0 : index
      %57 = vector.load %arg1[%c0_36, %56, %c0_37, %c0_38] : memref<1x24x6x48xf32, #tpu.memory_space<vmem>>, vector<1x1x4x48xf32>
      %58 = vector.shape_cast %57 : vector<1x1x4x48xf32> to vector<4x48xf32>
      %c6 = arith.constant 6 : index
      %c0_39 = arith.constant 0 : index
      %c0_40 = arith.constant 0 : index
      %59 = vector.load %arg2[%c6, %c0_39, %c0_40] : memref<25x1x48xf32, #tpu.memory_space<vmem>>, vector<1x1x48xf32>
      %60 = vector.shape_cast %59 : vector<1x1x48xf32> to vector<1x48xf32>
      %61 = vector.broadcast %60 : vector<1x48xf32> to vector<4x48xf32>
      %62 = arith.mulf %58, %61 : vector<4x48xf32>
      %63 = arith.addf %54, %62 : vector<4x48xf32>
      %c1_i32_41 = arith.constant 1 : i32
      %64 = arith.addi %1, %c1_i32_41 : i32
      %c0_42 = arith.constant 0 : index
      %65 = arith.index_cast %64 : i32 to index
      %c1_43 = arith.constant 1 : index
      %c0_44 = arith.constant 0 : index
      %66 = vector.load %arg1[%c0_42, %65, %c1_43, %c0_44] : memref<1x24x6x48xf32, #tpu.memory_space<vmem>>, vector<1x1x4x48xf32>
      %67 = vector.shape_cast %66 : vector<1x1x4x48xf32> to vector<4x48xf32>
      %c7 = arith.constant 7 : index
      %c0_45 = arith.constant 0 : index
      %c0_46 = arith.constant 0 : index
      %68 = vector.load %arg2[%c7, %c0_45, %c0_46] : memref<25x1x48xf32, #tpu.memory_space<vmem>>, vector<1x1x48xf32>
      %69 = vector.shape_cast %68 : vector<1x1x48xf32> to vector<1x48xf32>
      %70 = vector.broadcast %69 : vector<1x48xf32> to vector<4x48xf32>
      %71 = arith.mulf %67, %70 : vector<4x48xf32>
      %72 = arith.addf %63, %71 : vector<4x48xf32>
      %c13_i32_47 = arith.constant 13 : i32
      %73 = arith.addi %1, %c13_i32_47 : i32
      %c0_48 = arith.constant 0 : index
      %74 = arith.index_cast %73 : i32 to index
      %c1_49 = arith.constant 1 : index
      %c0_50 = arith.constant 0 : index
      %75 = vector.load %arg1[%c0_48, %74, %c1_49, %c0_50] : memref<1x24x6x48xf32, #tpu.memory_space<vmem>>, vector<1x1x4x48xf32>
      %76 = vector.shape_cast %75 : vector<1x1x4x48xf32> to vector<4x48xf32>
      %c8 = arith.constant 8 : index
      %c0_51 = arith.constant 0 : index
      %c0_52 = arith.constant 0 : index
      %77 = vector.load %arg2[%c8, %c0_51, %c0_52] : memref<25x1x48xf32, #tpu.memory_space<vmem>>, vector<1x1x48xf32>
      %78 = vector.shape_cast %77 : vector<1x1x48xf32> to vector<1x48xf32>
      %79 = vector.broadcast %78 : vector<1x48xf32> to vector<4x48xf32>
      %80 = arith.mulf %76, %79 : vector<4x48xf32>
      %81 = arith.addf %72, %80 : vector<4x48xf32>
      %c1_i32_53 = arith.constant 1 : i32
      %82 = arith.addi %1, %c1_i32_53 : i32
      %c0_54 = arith.constant 0 : index
      %83 = arith.index_cast %82 : i32 to index
      %c2_55 = arith.constant 2 : index
      %c0_56 = arith.constant 0 : index
      %84 = vector.load %arg1[%c0_54, %83, %c2_55, %c0_56] : memref<1x24x6x48xf32, #tpu.memory_space<vmem>>, vector<1x1x4x48xf32>
      %85 = vector.shape_cast %84 : vector<1x1x4x48xf32> to vector<4x48xf32>
      %c9 = arith.constant 9 : index
      %c0_57 = arith.constant 0 : index
      %c0_58 = arith.constant 0 : index
      %86 = vector.load %arg2[%c9, %c0_57, %c0_58] : memref<25x1x48xf32, #tpu.memory_space<vmem>>, vector<1x1x48xf32>
      %87 = vector.shape_cast %86 : vector<1x1x48xf32> to vector<1x48xf32>
      %88 = vector.broadcast %87 : vector<1x48xf32> to vector<4x48xf32>
      %89 = arith.mulf %85, %88 : vector<4x48xf32>
      %90 = arith.addf %81, %89 : vector<4x48xf32>
      %c2_i32_59 = arith.constant 2 : i32
      %91 = arith.addi %1, %c2_i32_59 : i32
      %c0_60 = arith.constant 0 : index
      %92 = arith.index_cast %91 : i32 to index
      %c0_61 = arith.constant 0 : index
      %c0_62 = arith.constant 0 : index
      %93 = vector.load %arg1[%c0_60, %92, %c0_61, %c0_62] : memref<1x24x6x48xf32, #tpu.memory_space<vmem>>, vector<1x1x4x48xf32>
      %94 = vector.shape_cast %93 : vector<1x1x4x48xf32> to vector<4x48xf32>
      %c10 = arith.constant 10 : index
      %c0_63 = arith.constant 0 : index
      %c0_64 = arith.constant 0 : index
      %95 = vector.load %arg2[%c10, %c0_63, %c0_64] : memref<25x1x48xf32, #tpu.memory_space<vmem>>, vector<1x1x48xf32>
      %96 = vector.shape_cast %95 : vector<1x1x48xf32> to vector<1x48xf32>
      %97 = vector.broadcast %96 : vector<1x48xf32> to vector<4x48xf32>
      %98 = arith.mulf %94, %97 : vector<4x48xf32>
      %99 = arith.addf %90, %98 : vector<4x48xf32>
      %c14_i32 = arith.constant 14 : i32
      %100 = arith.addi %1, %c14_i32 : i32
      %c0_65 = arith.constant 0 : index
      %101 = arith.index_cast %100 : i32 to index
      %c0_66 = arith.constant 0 : index
      %c0_67 = arith.constant 0 : index
      %102 = vector.load %arg1[%c0_65, %101, %c0_66, %c0_67] : memref<1x24x6x48xf32, #tpu.memory_space<vmem>>, vector<1x1x4x48xf32>
      %103 = vector.shape_cast %102 : vector<1x1x4x48xf32> to vector<4x48xf32>
      %c11 = arith.constant 11 : index
      %c0_68 = arith.constant 0 : index
      %c0_69 = arith.constant 0 : index
      %104 = vector.load %arg2[%c11, %c0_68, %c0_69] : memref<25x1x48xf32, #tpu.memory_space<vmem>>, vector<1x1x48xf32>
      %105 = vector.shape_cast %104 : vector<1x1x48xf32> to vector<1x48xf32>
      %106 = vector.broadcast %105 : vector<1x48xf32> to vector<4x48xf32>
      %107 = arith.mulf %103, %106 : vector<4x48xf32>
      %108 = arith.addf %99, %107 : vector<4x48xf32>
      %c2_i32_70 = arith.constant 2 : i32
      %109 = arith.addi %1, %c2_i32_70 : i32
      %c0_71 = arith.constant 0 : index
      %110 = arith.index_cast %109 : i32 to index
      %c1_72 = arith.constant 1 : index
      %c0_73 = arith.constant 0 : index
      %111 = vector.load %arg1[%c0_71, %110, %c1_72, %c0_73] : memref<1x24x6x48xf32, #tpu.memory_space<vmem>>, vector<1x1x4x48xf32>
      %112 = vector.shape_cast %111 : vector<1x1x4x48xf32> to vector<4x48xf32>
      %c12 = arith.constant 12 : index
      %c0_74 = arith.constant 0 : index
      %c0_75 = arith.constant 0 : index
      %113 = vector.load %arg2[%c12, %c0_74, %c0_75] : memref<25x1x48xf32, #tpu.memory_space<vmem>>, vector<1x1x48xf32>
      %114 = vector.shape_cast %113 : vector<1x1x48xf32> to vector<1x48xf32>
      %115 = vector.broadcast %114 : vector<1x48xf32> to vector<4x48xf32>
      %116 = arith.mulf %112, %115 : vector<4x48xf32>
      %117 = arith.addf %108, %116 : vector<4x48xf32>
      %c14_i32_76 = arith.constant 14 : i32
      %118 = arith.addi %1, %c14_i32_76 : i32
      %c0_77 = arith.constant 0 : index
      %119 = arith.index_cast %118 : i32 to index
      %c1_78 = arith.constant 1 : index
      %c0_79 = arith.constant 0 : index
      %120 = vector.load %arg1[%c0_77, %119, %c1_78, %c0_79] : memref<1x24x6x48xf32, #tpu.memory_space<vmem>>, vector<1x1x4x48xf32>
      %121 = vector.shape_cast %120 : vector<1x1x4x48xf32> to vector<4x48xf32>
      %c13 = arith.constant 13 : index
      %c0_80 = arith.constant 0 : index
      %c0_81 = arith.constant 0 : index
      %122 = vector.load %arg2[%c13, %c0_80, %c0_81] : memref<25x1x48xf32, #tpu.memory_space<vmem>>, vector<1x1x48xf32>
      %123 = vector.shape_cast %122 : vector<1x1x48xf32> to vector<1x48xf32>
      %124 = vector.broadcast %123 : vector<1x48xf32> to vector<4x48xf32>
      %125 = arith.mulf %121, %124 : vector<4x48xf32>
      %126 = arith.addf %117, %125 : vector<4x48xf32>
      %c2_i32_82 = arith.constant 2 : i32
      %127 = arith.addi %1, %c2_i32_82 : i32
      %c0_83 = arith.constant 0 : index
      %128 = arith.index_cast %127 : i32 to index
      %c2_84 = arith.constant 2 : index
      %c0_85 = arith.constant 0 : index
      %129 = vector.load %arg1[%c0_83, %128, %c2_84, %c0_85] : memref<1x24x6x48xf32, #tpu.memory_space<vmem>>, vector<1x1x4x48xf32>
      %130 = vector.shape_cast %129 : vector<1x1x4x48xf32> to vector<4x48xf32>
      %c14 = arith.constant 14 : index
      %c0_86 = arith.constant 0 : index
      %c0_87 = arith.constant 0 : index
      %131 = vector.load %arg2[%c14, %c0_86, %c0_87] : memref<25x1x48xf32, #tpu.memory_space<vmem>>, vector<1x1x48xf32>
      %132 = vector.shape_cast %131 : vector<1x1x48xf32> to vector<1x48xf32>
      %133 = vector.broadcast %132 : vector<1x48xf32> to vector<4x48xf32>
      %134 = arith.mulf %130, %133 : vector<4x48xf32>
      %135 = arith.addf %126, %134 : vector<4x48xf32>
      %c3_i32 = arith.constant 3 : i32
      %136 = arith.addi %1, %c3_i32 : i32
      %c0_88 = arith.constant 0 : index
      %137 = arith.index_cast %136 : i32 to index
      %c0_89 = arith.constant 0 : index
      %c0_90 = arith.constant 0 : index
      %138 = vector.load %arg1[%c0_88, %137, %c0_89, %c0_90] : memref<1x24x6x48xf32, #tpu.memory_space<vmem>>, vector<1x1x4x48xf32>
      %139 = vector.shape_cast %138 : vector<1x1x4x48xf32> to vector<4x48xf32>
      %c15 = arith.constant 15 : index
      %c0_91 = arith.constant 0 : index
      %c0_92 = arith.constant 0 : index
      %140 = vector.load %arg2[%c15, %c0_91, %c0_92] : memref<25x1x48xf32, #tpu.memory_space<vmem>>, vector<1x1x48xf32>
      %141 = vector.shape_cast %140 : vector<1x1x48xf32> to vector<1x48xf32>
      %142 = vector.broadcast %141 : vector<1x48xf32> to vector<4x48xf32>
      %143 = arith.mulf %139, %142 : vector<4x48xf32>
      %144 = arith.addf %135, %143 : vector<4x48xf32>
      %c15_i32 = arith.constant 15 : i32
      %145 = arith.addi %1, %c15_i32 : i32
      %c0_93 = arith.constant 0 : index
      %146 = arith.index_cast %145 : i32 to index
      %c0_94 = arith.constant 0 : index
      %c0_95 = arith.constant 0 : index
      %147 = vector.load %arg1[%c0_93, %146, %c0_94, %c0_95] : memref<1x24x6x48xf32, #tpu.memory_space<vmem>>, vector<1x1x4x48xf32>
      %148 = vector.shape_cast %147 : vector<1x1x4x48xf32> to vector<4x48xf32>
      %c16 = arith.constant 16 : index
      %c0_96 = arith.constant 0 : index
      %c0_97 = arith.constant 0 : index
      %149 = vector.load %arg2[%c16, %c0_96, %c0_97] : memref<25x1x48xf32, #tpu.memory_space<vmem>>, vector<1x1x48xf32>
      %150 = vector.shape_cast %149 : vector<1x1x48xf32> to vector<1x48xf32>
      %151 = vector.broadcast %150 : vector<1x48xf32> to vector<4x48xf32>
      %152 = arith.mulf %148, %151 : vector<4x48xf32>
      %153 = arith.addf %144, %152 : vector<4x48xf32>
      %c3_i32_98 = arith.constant 3 : i32
      %154 = arith.addi %1, %c3_i32_98 : i32
      %c0_99 = arith.constant 0 : index
      %155 = arith.index_cast %154 : i32 to index
      %c1_100 = arith.constant 1 : index
      %c0_101 = arith.constant 0 : index
      %156 = vector.load %arg1[%c0_99, %155, %c1_100, %c0_101] : memref<1x24x6x48xf32, #tpu.memory_space<vmem>>, vector<1x1x4x48xf32>
      %157 = vector.shape_cast %156 : vector<1x1x4x48xf32> to vector<4x48xf32>
      %c17 = arith.constant 17 : index
      %c0_102 = arith.constant 0 : index
      %c0_103 = arith.constant 0 : index
      %158 = vector.load %arg2[%c17, %c0_102, %c0_103] : memref<25x1x48xf32, #tpu.memory_space<vmem>>, vector<1x1x48xf32>
      %159 = vector.shape_cast %158 : vector<1x1x48xf32> to vector<1x48xf32>
      %160 = vector.broadcast %159 : vector<1x48xf32> to vector<4x48xf32>
      %161 = arith.mulf %157, %160 : vector<4x48xf32>
      %162 = arith.addf %153, %161 : vector<4x48xf32>
      %c15_i32_104 = arith.constant 15 : i32
      %163 = arith.addi %1, %c15_i32_104 : i32
      %c0_105 = arith.constant 0 : index
      %164 = arith.index_cast %163 : i32 to index
      %c1_106 = arith.constant 1 : index
      %c0_107 = arith.constant 0 : index
      %165 = vector.load %arg1[%c0_105, %164, %c1_106, %c0_107] : memref<1x24x6x48xf32, #tpu.memory_space<vmem>>, vector<1x1x4x48xf32>
      %166 = vector.shape_cast %165 : vector<1x1x4x48xf32> to vector<4x48xf32>
      %c18 = arith.constant 18 : index
      %c0_108 = arith.constant 0 : index
      %c0_109 = arith.constant 0 : index
      %167 = vector.load %arg2[%c18, %c0_108, %c0_109] : memref<25x1x48xf32, #tpu.memory_space<vmem>>, vector<1x1x48xf32>
      %168 = vector.shape_cast %167 : vector<1x1x48xf32> to vector<1x48xf32>
      %169 = vector.broadcast %168 : vector<1x48xf32> to vector<4x48xf32>
      %170 = arith.mulf %166, %169 : vector<4x48xf32>
      %171 = arith.addf %162, %170 : vector<4x48xf32>
      %c3_i32_110 = arith.constant 3 : i32
      %172 = arith.addi %1, %c3_i32_110 : i32
      %c0_111 = arith.constant 0 : index
      %173 = arith.index_cast %172 : i32 to index
      %c2_112 = arith.constant 2 : index
      %c0_113 = arith.constant 0 : index
      %174 = vector.load %arg1[%c0_111, %173, %c2_112, %c0_113] : memref<1x24x6x48xf32, #tpu.memory_space<vmem>>, vector<1x1x4x48xf32>
      %175 = vector.shape_cast %174 : vector<1x1x4x48xf32> to vector<4x48xf32>
      %c19 = arith.constant 19 : index
      %c0_114 = arith.constant 0 : index
      %c0_115 = arith.constant 0 : index
      %176 = vector.load %arg2[%c19, %c0_114, %c0_115] : memref<25x1x48xf32, #tpu.memory_space<vmem>>, vector<1x1x48xf32>
      %177 = vector.shape_cast %176 : vector<1x1x48xf32> to vector<1x48xf32>
      %178 = vector.broadcast %177 : vector<1x48xf32> to vector<4x48xf32>
      %179 = arith.mulf %175, %178 : vector<4x48xf32>
      %180 = arith.addf %171, %179 : vector<4x48xf32>
      %c4_i32_116 = arith.constant 4 : i32
      %181 = arith.addi %1, %c4_i32_116 : i32
      %c0_117 = arith.constant 0 : index
      %182 = arith.index_cast %181 : i32 to index
      %c0_118 = arith.constant 0 : index
      %c0_119 = arith.constant 0 : index
      %183 = vector.load %arg1[%c0_117, %182, %c0_118, %c0_119] : memref<1x24x6x48xf32, #tpu.memory_space<vmem>>, vector<1x1x4x48xf32>
      %184 = vector.shape_cast %183 : vector<1x1x4x48xf32> to vector<4x48xf32>
      %c20 = arith.constant 20 : index
      %c0_120 = arith.constant 0 : index
      %c0_121 = arith.constant 0 : index
      %185 = vector.load %arg2[%c20, %c0_120, %c0_121] : memref<25x1x48xf32, #tpu.memory_space<vmem>>, vector<1x1x48xf32>
      %186 = vector.shape_cast %185 : vector<1x1x48xf32> to vector<1x48xf32>
      %187 = vector.broadcast %186 : vector<1x48xf32> to vector<4x48xf32>
      %188 = arith.mulf %184, %187 : vector<4x48xf32>
      %189 = arith.addf %180, %188 : vector<4x48xf32>
      %c16_i32 = arith.constant 16 : i32
      %190 = arith.addi %1, %c16_i32 : i32
      %c0_122 = arith.constant 0 : index
      %191 = arith.index_cast %190 : i32 to index
      %c0_123 = arith.constant 0 : index
      %c0_124 = arith.constant 0 : index
      %192 = vector.load %arg1[%c0_122, %191, %c0_123, %c0_124] : memref<1x24x6x48xf32, #tpu.memory_space<vmem>>, vector<1x1x4x48xf32>
      %193 = vector.shape_cast %192 : vector<1x1x4x48xf32> to vector<4x48xf32>
      %c21 = arith.constant 21 : index
      %c0_125 = arith.constant 0 : index
      %c0_126 = arith.constant 0 : index
      %194 = vector.load %arg2[%c21, %c0_125, %c0_126] : memref<25x1x48xf32, #tpu.memory_space<vmem>>, vector<1x1x48xf32>
      %195 = vector.shape_cast %194 : vector<1x1x48xf32> to vector<1x48xf32>
      %196 = vector.broadcast %195 : vector<1x48xf32> to vector<4x48xf32>
      %197 = arith.mulf %193, %196 : vector<4x48xf32>
      %198 = arith.addf %189, %197 : vector<4x48xf32>
      %c4_i32_127 = arith.constant 4 : i32
      %199 = arith.addi %1, %c4_i32_127 : i32
      %c0_128 = arith.constant 0 : index
      %200 = arith.index_cast %199 : i32 to index
      %c1_129 = arith.constant 1 : index
      %c0_130 = arith.constant 0 : index
      %201 = vector.load %arg1[%c0_128, %200, %c1_129, %c0_130] : memref<1x24x6x48xf32, #tpu.memory_space<vmem>>, vector<1x1x4x48xf32>
      %202 = vector.shape_cast %201 : vector<1x1x4x48xf32> to vector<4x48xf32>
      %c22 = arith.constant 22 : index
      %c0_131 = arith.constant 0 : index
      %c0_132 = arith.constant 0 : index
      %203 = vector.load %arg2[%c22, %c0_131, %c0_132] : memref<25x1x48xf32, #tpu.memory_space<vmem>>, vector<1x1x48xf32>
      %204 = vector.shape_cast %203 : vector<1x1x48xf32> to vector<1x48xf32>
      %205 = vector.broadcast %204 : vector<1x48xf32> to vector<4x48xf32>
      %206 = arith.mulf %202, %205 : vector<4x48xf32>
      %207 = arith.addf %198, %206 : vector<4x48xf32>
      %c16_i32_133 = arith.constant 16 : i32
      %208 = arith.addi %1, %c16_i32_133 : i32
      %c0_134 = arith.constant 0 : index
      %209 = arith.index_cast %208 : i32 to index
      %c1_135 = arith.constant 1 : index
      %c0_136 = arith.constant 0 : index
      %210 = vector.load %arg1[%c0_134, %209, %c1_135, %c0_136] : memref<1x24x6x48xf32, #tpu.memory_space<vmem>>, vector<1x1x4x48xf32>
      %211 = vector.shape_cast %210 : vector<1x1x4x48xf32> to vector<4x48xf32>
      %c23 = arith.constant 23 : index
      %c0_137 = arith.constant 0 : index
      %c0_138 = arith.constant 0 : index
      %212 = vector.load %arg2[%c23, %c0_137, %c0_138] : memref<25x1x48xf32, #tpu.memory_space<vmem>>, vector<1x1x48xf32>
      %213 = vector.shape_cast %212 : vector<1x1x48xf32> to vector<1x48xf32>
      %214 = vector.broadcast %213 : vector<1x48xf32> to vector<4x48xf32>
      %215 = arith.mulf %211, %214 : vector<4x48xf32>
      %216 = arith.addf %207, %215 : vector<4x48xf32>
      %c4_i32_139 = arith.constant 4 : i32
      %217 = arith.addi %1, %c4_i32_139 : i32
      %c0_140 = arith.constant 0 : index
      %218 = arith.index_cast %217 : i32 to index
      %c2_141 = arith.constant 2 : index
      %c0_142 = arith.constant 0 : index
      %219 = vector.load %arg1[%c0_140, %218, %c2_141, %c0_142] : memref<1x24x6x48xf32, #tpu.memory_space<vmem>>, vector<1x1x4x48xf32>
      %220 = vector.shape_cast %219 : vector<1x1x4x48xf32> to vector<4x48xf32>
      %c24 = arith.constant 24 : index
      %c0_143 = arith.constant 0 : index
      %c0_144 = arith.constant 0 : index
      %221 = vector.load %arg2[%c24, %c0_143, %c0_144] : memref<25x1x48xf32, #tpu.memory_space<vmem>>, vector<1x1x48xf32>
      %222 = vector.shape_cast %221 : vector<1x1x48xf32> to vector<1x48xf32>
      %223 = vector.broadcast %222 : vector<1x48xf32> to vector<4x48xf32>
      %224 = arith.mulf %220, %223 : vector<4x48xf32>
      %225 = arith.addf %216, %224 : vector<4x48xf32>
      %cst = arith.constant 0.000000e+00 : f32
      %226 = vector.broadcast %cst : f32 to vector<4x48xf32>
      %227 = tpu.concatenate %225, %226 in 0 : vector<4x48xf32>, vector<4x48xf32> -> vector<8x48xf32>
      %228 = arith.truncf %227 : vector<8x48xf32> to vector<8x48xbf16>
      %c0_145 = arith.constant 0 : index
      %c0_146 = arith.constant 0 : index
      %229 = vector.load %arg3[%c0_145, %c0_146] : memref<48x96xbf16, #tpu.memory_space<vmem>>, vector<48x96xbf16>
      %cst_147 = arith.constant dense<0.000000e+00> : vector<8x96xf32>
      %230 = tpu.matmul %228, %229, %cst_147 {dimension_numbers = #tpu.dot_dimension_numbers<[1], [0], [0], [1], [0, 0, 1, 1], [], []>} : vector<8x48xbf16>, vector<48x96xbf16>, vector<8x96xf32> -> vector<8x96xf32>
      %231 = vector.extract_strided_slice %230 {offsets = [0, 0], sizes = [4, 96], strides = [1, 1]} : vector<8x96xf32> to vector<4x96xf32>
      %c0_148 = arith.constant 0 : index
      %c0_149 = arith.constant 0 : index
      %232 = vector.load %arg4[%c0_148, %c0_149] : memref<1x96xf32, #tpu.memory_space<vmem>>, vector<1x96xf32>
      %233 = vector.broadcast %232 : vector<1x96xf32> to vector<4x96xf32>
      %234 = arith.addf %231, %233 : vector<4x96xf32>
      %cst_150 = arith.constant 0.000000e+00 : f32
      %235 = vector.broadcast %cst_150 : f32 to vector<4x96xf32>
      %236 = arith.maximumf %234, %235 : vector<4x96xf32>
      %c2_i32_151 = arith.constant 2 : i32
      %237 = arith.muli %c2_i32_151, %arg7 : i32
      %c2_i32_152 = arith.constant 2 : i32
      %238 = arith.addi %237, %c2_i32_152 : i32
      %c0_153 = arith.constant 0 : index
      %239 = arith.index_cast %238 : i32 to index
      %c1_154 = arith.constant 1 : index
      %c0_155 = arith.constant 0 : index
      %240 = vector.load %arg1[%c0_153, %239, %c1_154, %c0_155] : memref<1x24x6x48xf32, #tpu.memory_space<vmem>>, vector<1x1x4x48xf32>
      %241 = vector.shape_cast %240 : vector<1x1x4x48xf32> to vector<4x48xf32>
      %cst_156 = arith.constant 0.000000e+00 : f32
      %242 = vector.broadcast %cst_156 : f32 to vector<4x48xf32>
      %243 = tpu.concatenate %241, %242 in 0 : vector<4x48xf32>, vector<4x48xf32> -> vector<8x48xf32>
      %244 = arith.truncf %243 : vector<8x48xf32> to vector<8x48xbf16>
      %c0_157 = arith.constant 0 : index
      %c0_158 = arith.constant 0 : index
      %245 = vector.load %arg5[%c0_157, %c0_158] : memref<48x96xbf16, #tpu.memory_space<vmem>>, vector<48x96xbf16>
      %cst_159 = arith.constant dense<0.000000e+00> : vector<8x96xf32>
      %246 = tpu.matmul %244, %245, %cst_159 {dimension_numbers = #tpu.dot_dimension_numbers<[1], [0], [0], [1], [0, 0, 1, 1], [], []>} : vector<8x48xbf16>, vector<48x96xbf16>, vector<8x96xf32> -> vector<8x96xf32>
      %247 = vector.extract_strided_slice %246 {offsets = [0, 0], sizes = [4, 96], strides = [1, 1]} : vector<8x96xf32> to vector<4x96xf32>
      %248 = arith.addf %236, %247 : vector<4x96xf32>
      %cst_160 = arith.constant 0.000000e+00 : f32
      %249 = vector.broadcast %cst_160 : f32 to vector<4x96xf32>
      %250 = arith.maximumf %248, %249 : vector<4x96xf32>
      %c0_161 = arith.constant 0 : index
      %251 = arith.index_cast %arg7 : i32 to index
      %c0_162 = arith.constant 0 : index
      %c0_163 = arith.constant 0 : index
      %252 = vector.load %arg6[%c0_161, %251, %c0_162, %c0_163] : memref<1x4x4x96xf32, #tpu.memory_space<vmem>>, vector<1x1x4x96xf32>
      %253 = vector.shape_cast %252 : vector<1x1x4x96xf32> to vector<4x96xf32>
      %254 = vector.shape_cast %250 : vector<4x96xf32> to vector<1x1x4x96xf32>
      tpu.vector_store %arg6[%c0_161, %251, %c0_162, %c0_163], %254 {strides = array<i32>} : memref<1x4x4x96xf32, #tpu.memory_space<vmem>>, vector<1x1x4x96xf32>,
    }
    %c4_i32_0 = arith.constant 4 : i32
    return
  }
  func.func @transform_0(%arg0: i32) -> (i32, i32, i32, i32) {
    %c0_i32 = arith.constant 0 : i32
    %c0_i32_0 = arith.constant 0 : i32
    %c0_i32_1 = arith.constant 0 : i32
    %c0_i32_2 = arith.constant 0 : i32
    return %arg0, %c0_i32, %c0_i32_0, %c0_i32_1 : i32, i32, i32, i32
  }
  func.func @transform_1(%arg0: i32) -> (i32, i32, i32) {
    %c0_i32 = arith.constant 0 : i32
    %c0_i32_0 = arith.constant 0 : i32
    %c0_i32_1 = arith.constant 0 : i32
    %c0_i32_2 = arith.constant 0 : i32
    return %c0_i32, %c0_i32_0, %c0_i32_1 : i32, i32, i32
  }
  func.func @transform_2(%arg0: i32) -> (i32, i32) {
    %c0_i32 = arith.constant 0 : i32
    %c0_i32_0 = arith.constant 0 : i32
    %c0_i32_1 = arith.constant 0 : i32
    return %c0_i32, %c0_i32_0 : i32, i32
  }
  func.func @transform_3(%arg0: i32) -> (i32, i32) {
    %c0_i32 = arith.constant 0 : i32
    %c0_i32_0 = arith.constant 0 : i32
    %c0_i32_1 = arith.constant 0 : i32
    return %c0_i32, %c0_i32_0 : i32, i32
  }
  func.func @transform_4(%arg0: i32) -> (i32, i32) {
    %c0_i32 = arith.constant 0 : i32
    %c0_i32_0 = arith.constant 0 : i32
    %c0_i32_1 = arith.constant 0 : i32
    return %c0_i32, %c0_i32_0 : i32, i32
  }
  func.func @transform_5(%arg0: i32) -> (i32, i32, i32, i32) {
    %c0_i32 = arith.constant 0 : i32
    %c0_i32_0 = arith.constant 0 : i32
    %c0_i32_1 = arith.constant 0 : i32
    %c0_i32_2 = arith.constant 0 : i32
    return %arg0, %c0_i32, %c0_i32_0, %c0_i32_1 : i32, i32, i32, i32
  }
}

module attributes {stable_mosaic.version = 11 : i64} {
  func.func @kernel(%arg0: i32, %arg1: memref<1x8x8x96xf32, #tpu.memory_space<vmem>>, %arg2: memref<25x1x96xf32, #tpu.memory_space<vmem>>, %arg3: memref<96x96xbf16, #tpu.memory_space<vmem>>, %arg4: memref<1x96xf32, #tpu.memory_space<vmem>>, %arg5: memref<1x4x4x96xf32, #tpu.memory_space<vmem>>) attributes {dimension_semantics = [#tpu.dimension_semantics<parallel>], iteration_bounds = array<i64: 2>, scalar_prefetch = 0 : i64, scratch_operands = 0 : i64, tpu.core_type = #tpu.core_type<tc>, window_params = [{transform_indices = @transform_0, window_bounds = array<i64: 1, 8, 8, 96>}, {pipeline_mode = #tpu.pipeline_mode<synchronous>, transform_indices = @transform_1, window_bounds = array<i64: 25, 1, 96>}, {pipeline_mode = #tpu.pipeline_mode<synchronous>, transform_indices = @transform_2, window_bounds = array<i64: 96, 96>}, {pipeline_mode = #tpu.pipeline_mode<synchronous>, transform_indices = @transform_3, window_bounds = array<i64: 1, 96>}, {transform_indices = @transform_4, window_bounds = array<i64: 1, 4, 4, 96>}]} {
    %c0_i32 = arith.constant 0 : i32
    %c4_i32 = arith.constant 4 : i32
    %0 = arith.addi %c0_i32, %c4_i32 : i32
    %c1_i32 = arith.constant 1 : i32
    scf.for %arg6 = %c0_i32 to %0 step %c1_i32  : i32 {
      %c1_i32_1 = arith.constant 1 : i32
      %1 = arith.muli %arg6, %c1_i32_1 : i32
      %c0_i32_2 = arith.constant 0 : i32
      %2 = arith.addi %1, %c0_i32_2 : i32
      %c0 = arith.constant 0 : index
      %3 = arith.index_cast %2 : i32 to index
      %c0_3 = arith.constant 0 : index
      %c0_4 = arith.constant 0 : index
      %4 = vector.load %arg1[%c0, %3, %c0_3, %c0_4] : memref<1x8x8x96xf32, #tpu.memory_space<vmem>>, vector<1x1x4x96xf32>
      %5 = vector.shape_cast %4 : vector<1x1x4x96xf32> to vector<4x96xf32>
      %c0_5 = arith.constant 0 : index
      %c0_6 = arith.constant 0 : index
      %c0_7 = arith.constant 0 : index
      %6 = vector.load %arg2[%c0_5, %c0_6, %c0_7] : memref<25x1x96xf32, #tpu.memory_space<vmem>>, vector<1x1x96xf32>
      %7 = vector.shape_cast %6 : vector<1x1x96xf32> to vector<1x96xf32>
      %8 = vector.broadcast %7 : vector<1x96xf32> to vector<4x96xf32>
      %9 = arith.mulf %5, %8 : vector<4x96xf32>
      %c0_i32_8 = arith.constant 0 : i32
      %10 = arith.addi %1, %c0_i32_8 : i32
      %c0_9 = arith.constant 0 : index
      %11 = arith.index_cast %10 : i32 to index
      %c1 = arith.constant 1 : index
      %c0_10 = arith.constant 0 : index
      %12 = vector.load %arg1[%c0_9, %11, %c1, %c0_10] : memref<1x8x8x96xf32, #tpu.memory_space<vmem>>, vector<1x1x4x96xf32>
      %13 = vector.shape_cast %12 : vector<1x1x4x96xf32> to vector<4x96xf32>
      %c1_11 = arith.constant 1 : index
      %c0_12 = arith.constant 0 : index
      %c0_13 = arith.constant 0 : index
      %14 = vector.load %arg2[%c1_11, %c0_12, %c0_13] : memref<25x1x96xf32, #tpu.memory_space<vmem>>, vector<1x1x96xf32>
      %15 = vector.shape_cast %14 : vector<1x1x96xf32> to vector<1x96xf32>
      %16 = vector.broadcast %15 : vector<1x96xf32> to vector<4x96xf32>
      %17 = arith.mulf %13, %16 : vector<4x96xf32>
      %18 = arith.addf %9, %17 : vector<4x96xf32>
      %c0_i32_14 = arith.constant 0 : i32
      %19 = arith.addi %1, %c0_i32_14 : i32
      %c0_15 = arith.constant 0 : index
      %20 = arith.index_cast %19 : i32 to index
      %c2 = arith.constant 2 : index
      %c0_16 = arith.constant 0 : index
      %21 = vector.load %arg1[%c0_15, %20, %c2, %c0_16] : memref<1x8x8x96xf32, #tpu.memory_space<vmem>>, vector<1x1x4x96xf32>
      %22 = vector.shape_cast %21 : vector<1x1x4x96xf32> to vector<4x96xf32>
      %c2_17 = arith.constant 2 : index
      %c0_18 = arith.constant 0 : index
      %c0_19 = arith.constant 0 : index
      %23 = vector.load %arg2[%c2_17, %c0_18, %c0_19] : memref<25x1x96xf32, #tpu.memory_space<vmem>>, vector<1x1x96xf32>
      %24 = vector.shape_cast %23 : vector<1x1x96xf32> to vector<1x96xf32>
      %25 = vector.broadcast %24 : vector<1x96xf32> to vector<4x96xf32>
      %26 = arith.mulf %22, %25 : vector<4x96xf32>
      %27 = arith.addf %18, %26 : vector<4x96xf32>
      %c0_i32_20 = arith.constant 0 : i32
      %28 = arith.addi %1, %c0_i32_20 : i32
      %c0_21 = arith.constant 0 : index
      %29 = arith.index_cast %28 : i32 to index
      %c3 = arith.constant 3 : index
      %c0_22 = arith.constant 0 : index
      %30 = vector.load %arg1[%c0_21, %29, %c3, %c0_22] : memref<1x8x8x96xf32, #tpu.memory_space<vmem>>, vector<1x1x4x96xf32>
      %31 = vector.shape_cast %30 : vector<1x1x4x96xf32> to vector<4x96xf32>
      %c3_23 = arith.constant 3 : index
      %c0_24 = arith.constant 0 : index
      %c0_25 = arith.constant 0 : index
      %32 = vector.load %arg2[%c3_23, %c0_24, %c0_25] : memref<25x1x96xf32, #tpu.memory_space<vmem>>, vector<1x1x96xf32>
      %33 = vector.shape_cast %32 : vector<1x1x96xf32> to vector<1x96xf32>
      %34 = vector.broadcast %33 : vector<1x96xf32> to vector<4x96xf32>
      %35 = arith.mulf %31, %34 : vector<4x96xf32>
      %36 = arith.addf %27, %35 : vector<4x96xf32>
      %c0_i32_26 = arith.constant 0 : i32
      %37 = arith.addi %1, %c0_i32_26 : i32
      %c0_27 = arith.constant 0 : index
      %38 = arith.index_cast %37 : i32 to index
      %c4 = arith.constant 4 : index
      %c0_28 = arith.constant 0 : index
      %39 = vector.load %arg1[%c0_27, %38, %c4, %c0_28] : memref<1x8x8x96xf32, #tpu.memory_space<vmem>>, vector<1x1x4x96xf32>
      %40 = vector.shape_cast %39 : vector<1x1x4x96xf32> to vector<4x96xf32>
      %c4_29 = arith.constant 4 : index
      %c0_30 = arith.constant 0 : index
      %c0_31 = arith.constant 0 : index
      %41 = vector.load %arg2[%c4_29, %c0_30, %c0_31] : memref<25x1x96xf32, #tpu.memory_space<vmem>>, vector<1x1x96xf32>
      %42 = vector.shape_cast %41 : vector<1x1x96xf32> to vector<1x96xf32>
      %43 = vector.broadcast %42 : vector<1x96xf32> to vector<4x96xf32>
      %44 = arith.mulf %40, %43 : vector<4x96xf32>
      %45 = arith.addf %36, %44 : vector<4x96xf32>
      %c1_i32_32 = arith.constant 1 : i32
      %46 = arith.addi %1, %c1_i32_32 : i32
      %c0_33 = arith.constant 0 : index
      %47 = arith.index_cast %46 : i32 to index
      %c0_34 = arith.constant 0 : index
      %c0_35 = arith.constant 0 : index
      %48 = vector.load %arg1[%c0_33, %47, %c0_34, %c0_35] : memref<1x8x8x96xf32, #tpu.memory_space<vmem>>, vector<1x1x4x96xf32>
      %49 = vector.shape_cast %48 : vector<1x1x4x96xf32> to vector<4x96xf32>
      %c5 = arith.constant 5 : index
      %c0_36 = arith.constant 0 : index
      %c0_37 = arith.constant 0 : index
      %50 = vector.load %arg2[%c5, %c0_36, %c0_37] : memref<25x1x96xf32, #tpu.memory_space<vmem>>, vector<1x1x96xf32>
      %51 = vector.shape_cast %50 : vector<1x1x96xf32> to vector<1x96xf32>
      %52 = vector.broadcast %51 : vector<1x96xf32> to vector<4x96xf32>
      %53 = arith.mulf %49, %52 : vector<4x96xf32>
      %54 = arith.addf %45, %53 : vector<4x96xf32>
      %c1_i32_38 = arith.constant 1 : i32
      %55 = arith.addi %1, %c1_i32_38 : i32
      %c0_39 = arith.constant 0 : index
      %56 = arith.index_cast %55 : i32 to index
      %c1_40 = arith.constant 1 : index
      %c0_41 = arith.constant 0 : index
      %57 = vector.load %arg1[%c0_39, %56, %c1_40, %c0_41] : memref<1x8x8x96xf32, #tpu.memory_space<vmem>>, vector<1x1x4x96xf32>
      %58 = vector.shape_cast %57 : vector<1x1x4x96xf32> to vector<4x96xf32>
      %c6 = arith.constant 6 : index
      %c0_42 = arith.constant 0 : index
      %c0_43 = arith.constant 0 : index
      %59 = vector.load %arg2[%c6, %c0_42, %c0_43] : memref<25x1x96xf32, #tpu.memory_space<vmem>>, vector<1x1x96xf32>
      %60 = vector.shape_cast %59 : vector<1x1x96xf32> to vector<1x96xf32>
      %61 = vector.broadcast %60 : vector<1x96xf32> to vector<4x96xf32>
      %62 = arith.mulf %58, %61 : vector<4x96xf32>
      %63 = arith.addf %54, %62 : vector<4x96xf32>
      %c1_i32_44 = arith.constant 1 : i32
      %64 = arith.addi %1, %c1_i32_44 : i32
      %c0_45 = arith.constant 0 : index
      %65 = arith.index_cast %64 : i32 to index
      %c2_46 = arith.constant 2 : index
      %c0_47 = arith.constant 0 : index
      %66 = vector.load %arg1[%c0_45, %65, %c2_46, %c0_47] : memref<1x8x8x96xf32, #tpu.memory_space<vmem>>, vector<1x1x4x96xf32>
      %67 = vector.shape_cast %66 : vector<1x1x4x96xf32> to vector<4x96xf32>
      %c7 = arith.constant 7 : index
      %c0_48 = arith.constant 0 : index
      %c0_49 = arith.constant 0 : index
      %68 = vector.load %arg2[%c7, %c0_48, %c0_49] : memref<25x1x96xf32, #tpu.memory_space<vmem>>, vector<1x1x96xf32>
      %69 = vector.shape_cast %68 : vector<1x1x96xf32> to vector<1x96xf32>
      %70 = vector.broadcast %69 : vector<1x96xf32> to vector<4x96xf32>
      %71 = arith.mulf %67, %70 : vector<4x96xf32>
      %72 = arith.addf %63, %71 : vector<4x96xf32>
      %c1_i32_50 = arith.constant 1 : i32
      %73 = arith.addi %1, %c1_i32_50 : i32
      %c0_51 = arith.constant 0 : index
      %74 = arith.index_cast %73 : i32 to index
      %c3_52 = arith.constant 3 : index
      %c0_53 = arith.constant 0 : index
      %75 = vector.load %arg1[%c0_51, %74, %c3_52, %c0_53] : memref<1x8x8x96xf32, #tpu.memory_space<vmem>>, vector<1x1x4x96xf32>
      %76 = vector.shape_cast %75 : vector<1x1x4x96xf32> to vector<4x96xf32>
      %c8 = arith.constant 8 : index
      %c0_54 = arith.constant 0 : index
      %c0_55 = arith.constant 0 : index
      %77 = vector.load %arg2[%c8, %c0_54, %c0_55] : memref<25x1x96xf32, #tpu.memory_space<vmem>>, vector<1x1x96xf32>
      %78 = vector.shape_cast %77 : vector<1x1x96xf32> to vector<1x96xf32>
      %79 = vector.broadcast %78 : vector<1x96xf32> to vector<4x96xf32>
      %80 = arith.mulf %76, %79 : vector<4x96xf32>
      %81 = arith.addf %72, %80 : vector<4x96xf32>
      %c1_i32_56 = arith.constant 1 : i32
      %82 = arith.addi %1, %c1_i32_56 : i32
      %c0_57 = arith.constant 0 : index
      %83 = arith.index_cast %82 : i32 to index
      %c4_58 = arith.constant 4 : index
      %c0_59 = arith.constant 0 : index
      %84 = vector.load %arg1[%c0_57, %83, %c4_58, %c0_59] : memref<1x8x8x96xf32, #tpu.memory_space<vmem>>, vector<1x1x4x96xf32>
      %85 = vector.shape_cast %84 : vector<1x1x4x96xf32> to vector<4x96xf32>
      %c9 = arith.constant 9 : index
      %c0_60 = arith.constant 0 : index
      %c0_61 = arith.constant 0 : index
      %86 = vector.load %arg2[%c9, %c0_60, %c0_61] : memref<25x1x96xf32, #tpu.memory_space<vmem>>, vector<1x1x96xf32>
      %87 = vector.shape_cast %86 : vector<1x1x96xf32> to vector<1x96xf32>
      %88 = vector.broadcast %87 : vector<1x96xf32> to vector<4x96xf32>
      %89 = arith.mulf %85, %88 : vector<4x96xf32>
      %90 = arith.addf %81, %89 : vector<4x96xf32>
      %c2_i32 = arith.constant 2 : i32
      %91 = arith.addi %1, %c2_i32 : i32
      %c0_62 = arith.constant 0 : index
      %92 = arith.index_cast %91 : i32 to index
      %c0_63 = arith.constant 0 : index
      %c0_64 = arith.constant 0 : index
      %93 = vector.load %arg1[%c0_62, %92, %c0_63, %c0_64] : memref<1x8x8x96xf32, #tpu.memory_space<vmem>>, vector<1x1x4x96xf32>
      %94 = vector.shape_cast %93 : vector<1x1x4x96xf32> to vector<4x96xf32>
      %c10 = arith.constant 10 : index
      %c0_65 = arith.constant 0 : index
      %c0_66 = arith.constant 0 : index
      %95 = vector.load %arg2[%c10, %c0_65, %c0_66] : memref<25x1x96xf32, #tpu.memory_space<vmem>>, vector<1x1x96xf32>
      %96 = vector.shape_cast %95 : vector<1x1x96xf32> to vector<1x96xf32>
      %97 = vector.broadcast %96 : vector<1x96xf32> to vector<4x96xf32>
      %98 = arith.mulf %94, %97 : vector<4x96xf32>
      %99 = arith.addf %90, %98 : vector<4x96xf32>
      %c2_i32_67 = arith.constant 2 : i32
      %100 = arith.addi %1, %c2_i32_67 : i32
      %c0_68 = arith.constant 0 : index
      %101 = arith.index_cast %100 : i32 to index
      %c1_69 = arith.constant 1 : index
      %c0_70 = arith.constant 0 : index
      %102 = vector.load %arg1[%c0_68, %101, %c1_69, %c0_70] : memref<1x8x8x96xf32, #tpu.memory_space<vmem>>, vector<1x1x4x96xf32>
      %103 = vector.shape_cast %102 : vector<1x1x4x96xf32> to vector<4x96xf32>
      %c11 = arith.constant 11 : index
      %c0_71 = arith.constant 0 : index
      %c0_72 = arith.constant 0 : index
      %104 = vector.load %arg2[%c11, %c0_71, %c0_72] : memref<25x1x96xf32, #tpu.memory_space<vmem>>, vector<1x1x96xf32>
      %105 = vector.shape_cast %104 : vector<1x1x96xf32> to vector<1x96xf32>
      %106 = vector.broadcast %105 : vector<1x96xf32> to vector<4x96xf32>
      %107 = arith.mulf %103, %106 : vector<4x96xf32>
      %108 = arith.addf %99, %107 : vector<4x96xf32>
      %c2_i32_73 = arith.constant 2 : i32
      %109 = arith.addi %1, %c2_i32_73 : i32
      %c0_74 = arith.constant 0 : index
      %110 = arith.index_cast %109 : i32 to index
      %c2_75 = arith.constant 2 : index
      %c0_76 = arith.constant 0 : index
      %111 = vector.load %arg1[%c0_74, %110, %c2_75, %c0_76] : memref<1x8x8x96xf32, #tpu.memory_space<vmem>>, vector<1x1x4x96xf32>
      %112 = vector.shape_cast %111 : vector<1x1x4x96xf32> to vector<4x96xf32>
      %c12 = arith.constant 12 : index
      %c0_77 = arith.constant 0 : index
      %c0_78 = arith.constant 0 : index
      %113 = vector.load %arg2[%c12, %c0_77, %c0_78] : memref<25x1x96xf32, #tpu.memory_space<vmem>>, vector<1x1x96xf32>
      %114 = vector.shape_cast %113 : vector<1x1x96xf32> to vector<1x96xf32>
      %115 = vector.broadcast %114 : vector<1x96xf32> to vector<4x96xf32>
      %116 = arith.mulf %112, %115 : vector<4x96xf32>
      %117 = arith.addf %108, %116 : vector<4x96xf32>
      %c2_i32_79 = arith.constant 2 : i32
      %118 = arith.addi %1, %c2_i32_79 : i32
      %c0_80 = arith.constant 0 : index
      %119 = arith.index_cast %118 : i32 to index
      %c3_81 = arith.constant 3 : index
      %c0_82 = arith.constant 0 : index
      %120 = vector.load %arg1[%c0_80, %119, %c3_81, %c0_82] : memref<1x8x8x96xf32, #tpu.memory_space<vmem>>, vector<1x1x4x96xf32>
      %121 = vector.shape_cast %120 : vector<1x1x4x96xf32> to vector<4x96xf32>
      %c13 = arith.constant 13 : index
      %c0_83 = arith.constant 0 : index
      %c0_84 = arith.constant 0 : index
      %122 = vector.load %arg2[%c13, %c0_83, %c0_84] : memref<25x1x96xf32, #tpu.memory_space<vmem>>, vector<1x1x96xf32>
      %123 = vector.shape_cast %122 : vector<1x1x96xf32> to vector<1x96xf32>
      %124 = vector.broadcast %123 : vector<1x96xf32> to vector<4x96xf32>
      %125 = arith.mulf %121, %124 : vector<4x96xf32>
      %126 = arith.addf %117, %125 : vector<4x96xf32>
      %c2_i32_85 = arith.constant 2 : i32
      %127 = arith.addi %1, %c2_i32_85 : i32
      %c0_86 = arith.constant 0 : index
      %128 = arith.index_cast %127 : i32 to index
      %c4_87 = arith.constant 4 : index
      %c0_88 = arith.constant 0 : index
      %129 = vector.load %arg1[%c0_86, %128, %c4_87, %c0_88] : memref<1x8x8x96xf32, #tpu.memory_space<vmem>>, vector<1x1x4x96xf32>
      %130 = vector.shape_cast %129 : vector<1x1x4x96xf32> to vector<4x96xf32>
      %c14 = arith.constant 14 : index
      %c0_89 = arith.constant 0 : index
      %c0_90 = arith.constant 0 : index
      %131 = vector.load %arg2[%c14, %c0_89, %c0_90] : memref<25x1x96xf32, #tpu.memory_space<vmem>>, vector<1x1x96xf32>
      %132 = vector.shape_cast %131 : vector<1x1x96xf32> to vector<1x96xf32>
      %133 = vector.broadcast %132 : vector<1x96xf32> to vector<4x96xf32>
      %134 = arith.mulf %130, %133 : vector<4x96xf32>
      %135 = arith.addf %126, %134 : vector<4x96xf32>
      %c3_i32 = arith.constant 3 : i32
      %136 = arith.addi %1, %c3_i32 : i32
      %c0_91 = arith.constant 0 : index
      %137 = arith.index_cast %136 : i32 to index
      %c0_92 = arith.constant 0 : index
      %c0_93 = arith.constant 0 : index
      %138 = vector.load %arg1[%c0_91, %137, %c0_92, %c0_93] : memref<1x8x8x96xf32, #tpu.memory_space<vmem>>, vector<1x1x4x96xf32>
      %139 = vector.shape_cast %138 : vector<1x1x4x96xf32> to vector<4x96xf32>
      %c15 = arith.constant 15 : index
      %c0_94 = arith.constant 0 : index
      %c0_95 = arith.constant 0 : index
      %140 = vector.load %arg2[%c15, %c0_94, %c0_95] : memref<25x1x96xf32, #tpu.memory_space<vmem>>, vector<1x1x96xf32>
      %141 = vector.shape_cast %140 : vector<1x1x96xf32> to vector<1x96xf32>
      %142 = vector.broadcast %141 : vector<1x96xf32> to vector<4x96xf32>
      %143 = arith.mulf %139, %142 : vector<4x96xf32>
      %144 = arith.addf %135, %143 : vector<4x96xf32>
      %c3_i32_96 = arith.constant 3 : i32
      %145 = arith.addi %1, %c3_i32_96 : i32
      %c0_97 = arith.constant 0 : index
      %146 = arith.index_cast %145 : i32 to index
      %c1_98 = arith.constant 1 : index
      %c0_99 = arith.constant 0 : index
      %147 = vector.load %arg1[%c0_97, %146, %c1_98, %c0_99] : memref<1x8x8x96xf32, #tpu.memory_space<vmem>>, vector<1x1x4x96xf32>
      %148 = vector.shape_cast %147 : vector<1x1x4x96xf32> to vector<4x96xf32>
      %c16 = arith.constant 16 : index
      %c0_100 = arith.constant 0 : index
      %c0_101 = arith.constant 0 : index
      %149 = vector.load %arg2[%c16, %c0_100, %c0_101] : memref<25x1x96xf32, #tpu.memory_space<vmem>>, vector<1x1x96xf32>
      %150 = vector.shape_cast %149 : vector<1x1x96xf32> to vector<1x96xf32>
      %151 = vector.broadcast %150 : vector<1x96xf32> to vector<4x96xf32>
      %152 = arith.mulf %148, %151 : vector<4x96xf32>
      %153 = arith.addf %144, %152 : vector<4x96xf32>
      %c3_i32_102 = arith.constant 3 : i32
      %154 = arith.addi %1, %c3_i32_102 : i32
      %c0_103 = arith.constant 0 : index
      %155 = arith.index_cast %154 : i32 to index
      %c2_104 = arith.constant 2 : index
      %c0_105 = arith.constant 0 : index
      %156 = vector.load %arg1[%c0_103, %155, %c2_104, %c0_105] : memref<1x8x8x96xf32, #tpu.memory_space<vmem>>, vector<1x1x4x96xf32>
      %157 = vector.shape_cast %156 : vector<1x1x4x96xf32> to vector<4x96xf32>
      %c17 = arith.constant 17 : index
      %c0_106 = arith.constant 0 : index
      %c0_107 = arith.constant 0 : index
      %158 = vector.load %arg2[%c17, %c0_106, %c0_107] : memref<25x1x96xf32, #tpu.memory_space<vmem>>, vector<1x1x96xf32>
      %159 = vector.shape_cast %158 : vector<1x1x96xf32> to vector<1x96xf32>
      %160 = vector.broadcast %159 : vector<1x96xf32> to vector<4x96xf32>
      %161 = arith.mulf %157, %160 : vector<4x96xf32>
      %162 = arith.addf %153, %161 : vector<4x96xf32>
      %c3_i32_108 = arith.constant 3 : i32
      %163 = arith.addi %1, %c3_i32_108 : i32
      %c0_109 = arith.constant 0 : index
      %164 = arith.index_cast %163 : i32 to index
      %c3_110 = arith.constant 3 : index
      %c0_111 = arith.constant 0 : index
      %165 = vector.load %arg1[%c0_109, %164, %c3_110, %c0_111] : memref<1x8x8x96xf32, #tpu.memory_space<vmem>>, vector<1x1x4x96xf32>
      %166 = vector.shape_cast %165 : vector<1x1x4x96xf32> to vector<4x96xf32>
      %c18 = arith.constant 18 : index
      %c0_112 = arith.constant 0 : index
      %c0_113 = arith.constant 0 : index
      %167 = vector.load %arg2[%c18, %c0_112, %c0_113] : memref<25x1x96xf32, #tpu.memory_space<vmem>>, vector<1x1x96xf32>
      %168 = vector.shape_cast %167 : vector<1x1x96xf32> to vector<1x96xf32>
      %169 = vector.broadcast %168 : vector<1x96xf32> to vector<4x96xf32>
      %170 = arith.mulf %166, %169 : vector<4x96xf32>
      %171 = arith.addf %162, %170 : vector<4x96xf32>
      %c3_i32_114 = arith.constant 3 : i32
      %172 = arith.addi %1, %c3_i32_114 : i32
      %c0_115 = arith.constant 0 : index
      %173 = arith.index_cast %172 : i32 to index
      %c4_116 = arith.constant 4 : index
      %c0_117 = arith.constant 0 : index
      %174 = vector.load %arg1[%c0_115, %173, %c4_116, %c0_117] : memref<1x8x8x96xf32, #tpu.memory_space<vmem>>, vector<1x1x4x96xf32>
      %175 = vector.shape_cast %174 : vector<1x1x4x96xf32> to vector<4x96xf32>
      %c19 = arith.constant 19 : index
      %c0_118 = arith.constant 0 : index
      %c0_119 = arith.constant 0 : index
      %176 = vector.load %arg2[%c19, %c0_118, %c0_119] : memref<25x1x96xf32, #tpu.memory_space<vmem>>, vector<1x1x96xf32>
      %177 = vector.shape_cast %176 : vector<1x1x96xf32> to vector<1x96xf32>
      %178 = vector.broadcast %177 : vector<1x96xf32> to vector<4x96xf32>
      %179 = arith.mulf %175, %178 : vector<4x96xf32>
      %180 = arith.addf %171, %179 : vector<4x96xf32>
      %c4_i32_120 = arith.constant 4 : i32
      %181 = arith.addi %1, %c4_i32_120 : i32
      %c0_121 = arith.constant 0 : index
      %182 = arith.index_cast %181 : i32 to index
      %c0_122 = arith.constant 0 : index
      %c0_123 = arith.constant 0 : index
      %183 = vector.load %arg1[%c0_121, %182, %c0_122, %c0_123] : memref<1x8x8x96xf32, #tpu.memory_space<vmem>>, vector<1x1x4x96xf32>
      %184 = vector.shape_cast %183 : vector<1x1x4x96xf32> to vector<4x96xf32>
      %c20 = arith.constant 20 : index
      %c0_124 = arith.constant 0 : index
      %c0_125 = arith.constant 0 : index
      %185 = vector.load %arg2[%c20, %c0_124, %c0_125] : memref<25x1x96xf32, #tpu.memory_space<vmem>>, vector<1x1x96xf32>
      %186 = vector.shape_cast %185 : vector<1x1x96xf32> to vector<1x96xf32>
      %187 = vector.broadcast %186 : vector<1x96xf32> to vector<4x96xf32>
      %188 = arith.mulf %184, %187 : vector<4x96xf32>
      %189 = arith.addf %180, %188 : vector<4x96xf32>
      %c4_i32_126 = arith.constant 4 : i32
      %190 = arith.addi %1, %c4_i32_126 : i32
      %c0_127 = arith.constant 0 : index
      %191 = arith.index_cast %190 : i32 to index
      %c1_128 = arith.constant 1 : index
      %c0_129 = arith.constant 0 : index
      %192 = vector.load %arg1[%c0_127, %191, %c1_128, %c0_129] : memref<1x8x8x96xf32, #tpu.memory_space<vmem>>, vector<1x1x4x96xf32>
      %193 = vector.shape_cast %192 : vector<1x1x4x96xf32> to vector<4x96xf32>
      %c21 = arith.constant 21 : index
      %c0_130 = arith.constant 0 : index
      %c0_131 = arith.constant 0 : index
      %194 = vector.load %arg2[%c21, %c0_130, %c0_131] : memref<25x1x96xf32, #tpu.memory_space<vmem>>, vector<1x1x96xf32>
      %195 = vector.shape_cast %194 : vector<1x1x96xf32> to vector<1x96xf32>
      %196 = vector.broadcast %195 : vector<1x96xf32> to vector<4x96xf32>
      %197 = arith.mulf %193, %196 : vector<4x96xf32>
      %198 = arith.addf %189, %197 : vector<4x96xf32>
      %c4_i32_132 = arith.constant 4 : i32
      %199 = arith.addi %1, %c4_i32_132 : i32
      %c0_133 = arith.constant 0 : index
      %200 = arith.index_cast %199 : i32 to index
      %c2_134 = arith.constant 2 : index
      %c0_135 = arith.constant 0 : index
      %201 = vector.load %arg1[%c0_133, %200, %c2_134, %c0_135] : memref<1x8x8x96xf32, #tpu.memory_space<vmem>>, vector<1x1x4x96xf32>
      %202 = vector.shape_cast %201 : vector<1x1x4x96xf32> to vector<4x96xf32>
      %c22 = arith.constant 22 : index
      %c0_136 = arith.constant 0 : index
      %c0_137 = arith.constant 0 : index
      %203 = vector.load %arg2[%c22, %c0_136, %c0_137] : memref<25x1x96xf32, #tpu.memory_space<vmem>>, vector<1x1x96xf32>
      %204 = vector.shape_cast %203 : vector<1x1x96xf32> to vector<1x96xf32>
      %205 = vector.broadcast %204 : vector<1x96xf32> to vector<4x96xf32>
      %206 = arith.mulf %202, %205 : vector<4x96xf32>
      %207 = arith.addf %198, %206 : vector<4x96xf32>
      %c4_i32_138 = arith.constant 4 : i32
      %208 = arith.addi %1, %c4_i32_138 : i32
      %c0_139 = arith.constant 0 : index
      %209 = arith.index_cast %208 : i32 to index
      %c3_140 = arith.constant 3 : index
      %c0_141 = arith.constant 0 : index
      %210 = vector.load %arg1[%c0_139, %209, %c3_140, %c0_141] : memref<1x8x8x96xf32, #tpu.memory_space<vmem>>, vector<1x1x4x96xf32>
      %211 = vector.shape_cast %210 : vector<1x1x4x96xf32> to vector<4x96xf32>
      %c23 = arith.constant 23 : index
      %c0_142 = arith.constant 0 : index
      %c0_143 = arith.constant 0 : index
      %212 = vector.load %arg2[%c23, %c0_142, %c0_143] : memref<25x1x96xf32, #tpu.memory_space<vmem>>, vector<1x1x96xf32>
      %213 = vector.shape_cast %212 : vector<1x1x96xf32> to vector<1x96xf32>
      %214 = vector.broadcast %213 : vector<1x96xf32> to vector<4x96xf32>
      %215 = arith.mulf %211, %214 : vector<4x96xf32>
      %216 = arith.addf %207, %215 : vector<4x96xf32>
      %c4_i32_144 = arith.constant 4 : i32
      %217 = arith.addi %1, %c4_i32_144 : i32
      %c0_145 = arith.constant 0 : index
      %218 = arith.index_cast %217 : i32 to index
      %c4_146 = arith.constant 4 : index
      %c0_147 = arith.constant 0 : index
      %219 = vector.load %arg1[%c0_145, %218, %c4_146, %c0_147] : memref<1x8x8x96xf32, #tpu.memory_space<vmem>>, vector<1x1x4x96xf32>
      %220 = vector.shape_cast %219 : vector<1x1x4x96xf32> to vector<4x96xf32>
      %c24 = arith.constant 24 : index
      %c0_148 = arith.constant 0 : index
      %c0_149 = arith.constant 0 : index
      %221 = vector.load %arg2[%c24, %c0_148, %c0_149] : memref<25x1x96xf32, #tpu.memory_space<vmem>>, vector<1x1x96xf32>
      %222 = vector.shape_cast %221 : vector<1x1x96xf32> to vector<1x96xf32>
      %223 = vector.broadcast %222 : vector<1x96xf32> to vector<4x96xf32>
      %224 = arith.mulf %220, %223 : vector<4x96xf32>
      %225 = arith.addf %216, %224 : vector<4x96xf32>
      %cst = arith.constant 0.000000e+00 : f32
      %226 = vector.broadcast %cst : f32 to vector<4x96xf32>
      %227 = tpu.concatenate %225, %226 in 0 : vector<4x96xf32>, vector<4x96xf32> -> vector<8x96xf32>
      %228 = arith.truncf %227 : vector<8x96xf32> to vector<8x96xbf16>
      %c0_150 = arith.constant 0 : index
      %c0_151 = arith.constant 0 : index
      %229 = vector.load %arg3[%c0_150, %c0_151] : memref<96x96xbf16, #tpu.memory_space<vmem>>, vector<96x96xbf16>
      %cst_152 = arith.constant dense<0.000000e+00> : vector<8x96xf32>
      %230 = tpu.matmul %228, %229, %cst_152 {dimension_numbers = #tpu.dot_dimension_numbers<[1], [0], [0], [1], [0, 0, 1, 1], [], []>} : vector<8x96xbf16>, vector<96x96xbf16>, vector<8x96xf32> -> vector<8x96xf32>
      %231 = vector.extract_strided_slice %230 {offsets = [0, 0], sizes = [4, 96], strides = [1, 1]} : vector<8x96xf32> to vector<4x96xf32>
      %c0_153 = arith.constant 0 : index
      %c0_154 = arith.constant 0 : index
      %232 = vector.load %arg4[%c0_153, %c0_154] : memref<1x96xf32, #tpu.memory_space<vmem>>, vector<1x96xf32>
      %233 = vector.broadcast %232 : vector<1x96xf32> to vector<4x96xf32>
      %234 = arith.addf %231, %233 : vector<4x96xf32>
      %cst_155 = arith.constant 0.000000e+00 : f32
      %235 = vector.broadcast %cst_155 : f32 to vector<4x96xf32>
      %236 = arith.maximumf %234, %235 : vector<4x96xf32>
      %c0_156 = arith.constant 0 : index
      %237 = arith.index_cast %arg6 : i32 to index
      %c0_157 = arith.constant 0 : index
      %c0_158 = arith.constant 0 : index
      %238 = vector.load %arg5[%c0_156, %237, %c0_157, %c0_158] : memref<1x4x4x96xf32, #tpu.memory_space<vmem>>, vector<1x1x4x96xf32>
      %239 = vector.shape_cast %238 : vector<1x1x4x96xf32> to vector<4x96xf32>
      %240 = vector.shape_cast %236 : vector<4x96xf32> to vector<1x1x4x96xf32>
      tpu.vector_store %arg5[%c0_156, %237, %c0_157, %c0_158], %240 {strides = array<i32>} : memref<1x4x4x96xf32, #tpu.memory_space<vmem>>, vector<1x1x4x96xf32>,
    }
    %c4_i32_0 = arith.constant 4 : i32
    return
  }
  func.func @transform_0(%arg0: i32) -> (i32, i32, i32, i32) {
    %c0_i32 = arith.constant 0 : i32
    %c0_i32_0 = arith.constant 0 : i32
    %c0_i32_1 = arith.constant 0 : i32
    %c0_i32_2 = arith.constant 0 : i32
    return %arg0, %c0_i32, %c0_i32_0, %c0_i32_1 : i32, i32, i32, i32
  }
  func.func @transform_1(%arg0: i32) -> (i32, i32, i32) {
    %c0_i32 = arith.constant 0 : i32
    %c0_i32_0 = arith.constant 0 : i32
    %c0_i32_1 = arith.constant 0 : i32
    %c0_i32_2 = arith.constant 0 : i32
    return %c0_i32, %c0_i32_0, %c0_i32_1 : i32, i32, i32
  }
  func.func @transform_2(%arg0: i32) -> (i32, i32) {
    %c0_i32 = arith.constant 0 : i32
    %c0_i32_0 = arith.constant 0 : i32
    %c0_i32_1 = arith.constant 0 : i32
    return %c0_i32, %c0_i32_0 : i32, i32
  }
  func.func @transform_3(%arg0: i32) -> (i32, i32) {
    %c0_i32 = arith.constant 0 : i32
    %c0_i32_0 = arith.constant 0 : i32
    %c0_i32_1 = arith.constant 0 : i32
    return %c0_i32, %c0_i32_0 : i32, i32
  }
  func.func @transform_4(%arg0: i32) -> (i32, i32, i32, i32) {
    %c0_i32 = arith.constant 0 : i32
    %c0_i32_0 = arith.constant 0 : i32
    %c0_i32_1 = arith.constant 0 : i32
    %c0_i32_2 = arith.constant 0 : i32
    return %arg0, %c0_i32, %c0_i32_0, %c0_i32_1 : i32, i32, i32, i32
  }
}

module attributes {stable_mosaic.version = 11 : i64} {
  func.func @kernel(%arg0: i32, %arg1: memref<1x8x8x96xf32, #tpu.memory_space<vmem>>, %arg2: memref<25x1x96xf32, #tpu.memory_space<vmem>>, %arg3: memref<96x96xbf16, #tpu.memory_space<vmem>>, %arg4: memref<1x96xf32, #tpu.memory_space<vmem>>, %arg5: memref<1x4x4x96xf32, #tpu.memory_space<vmem>>, %arg6: memref<1x4x4x96xf32, #tpu.memory_space<vmem>>) attributes {dimension_semantics = [#tpu.dimension_semantics<parallel>], iteration_bounds = array<i64: 2>, scalar_prefetch = 0 : i64, scratch_operands = 0 : i64, tpu.core_type = #tpu.core_type<tc>, window_params = [{transform_indices = @transform_0, window_bounds = array<i64: 1, 8, 8, 96>}, {pipeline_mode = #tpu.pipeline_mode<synchronous>, transform_indices = @transform_1, window_bounds = array<i64: 25, 1, 96>}, {pipeline_mode = #tpu.pipeline_mode<synchronous>, transform_indices = @transform_2, window_bounds = array<i64: 96, 96>}, {pipeline_mode = #tpu.pipeline_mode<synchronous>, transform_indices = @transform_3, window_bounds = array<i64: 1, 96>}, {transform_indices = @transform_4, window_bounds = array<i64: 1, 4, 4, 96>}, {transform_indices = @transform_5, window_bounds = array<i64: 1, 4, 4, 96>}]} {
    %c0_i32 = arith.constant 0 : i32
    %c4_i32 = arith.constant 4 : i32
    %0 = arith.addi %c0_i32, %c4_i32 : i32
    %c1_i32 = arith.constant 1 : i32
    scf.for %arg7 = %c0_i32 to %0 step %c1_i32  : i32 {
      %c1_i32_1 = arith.constant 1 : i32
      %1 = arith.muli %arg7, %c1_i32_1 : i32
      %c0_i32_2 = arith.constant 0 : i32
      %2 = arith.addi %1, %c0_i32_2 : i32
      %c0 = arith.constant 0 : index
      %3 = arith.index_cast %2 : i32 to index
      %c0_3 = arith.constant 0 : index
      %c0_4 = arith.constant 0 : index
      %4 = vector.load %arg1[%c0, %3, %c0_3, %c0_4] : memref<1x8x8x96xf32, #tpu.memory_space<vmem>>, vector<1x1x4x96xf32>
      %5 = vector.shape_cast %4 : vector<1x1x4x96xf32> to vector<4x96xf32>
      %c0_5 = arith.constant 0 : index
      %c0_6 = arith.constant 0 : index
      %c0_7 = arith.constant 0 : index
      %6 = vector.load %arg2[%c0_5, %c0_6, %c0_7] : memref<25x1x96xf32, #tpu.memory_space<vmem>>, vector<1x1x96xf32>
      %7 = vector.shape_cast %6 : vector<1x1x96xf32> to vector<1x96xf32>
      %8 = vector.broadcast %7 : vector<1x96xf32> to vector<4x96xf32>
      %9 = arith.mulf %5, %8 : vector<4x96xf32>
      %c0_i32_8 = arith.constant 0 : i32
      %10 = arith.addi %1, %c0_i32_8 : i32
      %c0_9 = arith.constant 0 : index
      %11 = arith.index_cast %10 : i32 to index
      %c1 = arith.constant 1 : index
      %c0_10 = arith.constant 0 : index
      %12 = vector.load %arg1[%c0_9, %11, %c1, %c0_10] : memref<1x8x8x96xf32, #tpu.memory_space<vmem>>, vector<1x1x4x96xf32>
      %13 = vector.shape_cast %12 : vector<1x1x4x96xf32> to vector<4x96xf32>
      %c1_11 = arith.constant 1 : index
      %c0_12 = arith.constant 0 : index
      %c0_13 = arith.constant 0 : index
      %14 = vector.load %arg2[%c1_11, %c0_12, %c0_13] : memref<25x1x96xf32, #tpu.memory_space<vmem>>, vector<1x1x96xf32>
      %15 = vector.shape_cast %14 : vector<1x1x96xf32> to vector<1x96xf32>
      %16 = vector.broadcast %15 : vector<1x96xf32> to vector<4x96xf32>
      %17 = arith.mulf %13, %16 : vector<4x96xf32>
      %18 = arith.addf %9, %17 : vector<4x96xf32>
      %c0_i32_14 = arith.constant 0 : i32
      %19 = arith.addi %1, %c0_i32_14 : i32
      %c0_15 = arith.constant 0 : index
      %20 = arith.index_cast %19 : i32 to index
      %c2 = arith.constant 2 : index
      %c0_16 = arith.constant 0 : index
      %21 = vector.load %arg1[%c0_15, %20, %c2, %c0_16] : memref<1x8x8x96xf32, #tpu.memory_space<vmem>>, vector<1x1x4x96xf32>
      %22 = vector.shape_cast %21 : vector<1x1x4x96xf32> to vector<4x96xf32>
      %c2_17 = arith.constant 2 : index
      %c0_18 = arith.constant 0 : index
      %c0_19 = arith.constant 0 : index
      %23 = vector.load %arg2[%c2_17, %c0_18, %c0_19] : memref<25x1x96xf32, #tpu.memory_space<vmem>>, vector<1x1x96xf32>
      %24 = vector.shape_cast %23 : vector<1x1x96xf32> to vector<1x96xf32>
      %25 = vector.broadcast %24 : vector<1x96xf32> to vector<4x96xf32>
      %26 = arith.mulf %22, %25 : vector<4x96xf32>
      %27 = arith.addf %18, %26 : vector<4x96xf32>
      %c0_i32_20 = arith.constant 0 : i32
      %28 = arith.addi %1, %c0_i32_20 : i32
      %c0_21 = arith.constant 0 : index
      %29 = arith.index_cast %28 : i32 to index
      %c3 = arith.constant 3 : index
      %c0_22 = arith.constant 0 : index
      %30 = vector.load %arg1[%c0_21, %29, %c3, %c0_22] : memref<1x8x8x96xf32, #tpu.memory_space<vmem>>, vector<1x1x4x96xf32>
      %31 = vector.shape_cast %30 : vector<1x1x4x96xf32> to vector<4x96xf32>
      %c3_23 = arith.constant 3 : index
      %c0_24 = arith.constant 0 : index
      %c0_25 = arith.constant 0 : index
      %32 = vector.load %arg2[%c3_23, %c0_24, %c0_25] : memref<25x1x96xf32, #tpu.memory_space<vmem>>, vector<1x1x96xf32>
      %33 = vector.shape_cast %32 : vector<1x1x96xf32> to vector<1x96xf32>
      %34 = vector.broadcast %33 : vector<1x96xf32> to vector<4x96xf32>
      %35 = arith.mulf %31, %34 : vector<4x96xf32>
      %36 = arith.addf %27, %35 : vector<4x96xf32>
      %c0_i32_26 = arith.constant 0 : i32
      %37 = arith.addi %1, %c0_i32_26 : i32
      %c0_27 = arith.constant 0 : index
      %38 = arith.index_cast %37 : i32 to index
      %c4 = arith.constant 4 : index
      %c0_28 = arith.constant 0 : index
      %39 = vector.load %arg1[%c0_27, %38, %c4, %c0_28] : memref<1x8x8x96xf32, #tpu.memory_space<vmem>>, vector<1x1x4x96xf32>
      %40 = vector.shape_cast %39 : vector<1x1x4x96xf32> to vector<4x96xf32>
      %c4_29 = arith.constant 4 : index
      %c0_30 = arith.constant 0 : index
      %c0_31 = arith.constant 0 : index
      %41 = vector.load %arg2[%c4_29, %c0_30, %c0_31] : memref<25x1x96xf32, #tpu.memory_space<vmem>>, vector<1x1x96xf32>
      %42 = vector.shape_cast %41 : vector<1x1x96xf32> to vector<1x96xf32>
      %43 = vector.broadcast %42 : vector<1x96xf32> to vector<4x96xf32>
      %44 = arith.mulf %40, %43 : vector<4x96xf32>
      %45 = arith.addf %36, %44 : vector<4x96xf32>
      %c1_i32_32 = arith.constant 1 : i32
      %46 = arith.addi %1, %c1_i32_32 : i32
      %c0_33 = arith.constant 0 : index
      %47 = arith.index_cast %46 : i32 to index
      %c0_34 = arith.constant 0 : index
      %c0_35 = arith.constant 0 : index
      %48 = vector.load %arg1[%c0_33, %47, %c0_34, %c0_35] : memref<1x8x8x96xf32, #tpu.memory_space<vmem>>, vector<1x1x4x96xf32>
      %49 = vector.shape_cast %48 : vector<1x1x4x96xf32> to vector<4x96xf32>
      %c5 = arith.constant 5 : index
      %c0_36 = arith.constant 0 : index
      %c0_37 = arith.constant 0 : index
      %50 = vector.load %arg2[%c5, %c0_36, %c0_37] : memref<25x1x96xf32, #tpu.memory_space<vmem>>, vector<1x1x96xf32>
      %51 = vector.shape_cast %50 : vector<1x1x96xf32> to vector<1x96xf32>
      %52 = vector.broadcast %51 : vector<1x96xf32> to vector<4x96xf32>
      %53 = arith.mulf %49, %52 : vector<4x96xf32>
      %54 = arith.addf %45, %53 : vector<4x96xf32>
      %c1_i32_38 = arith.constant 1 : i32
      %55 = arith.addi %1, %c1_i32_38 : i32
      %c0_39 = arith.constant 0 : index
      %56 = arith.index_cast %55 : i32 to index
      %c1_40 = arith.constant 1 : index
      %c0_41 = arith.constant 0 : index
      %57 = vector.load %arg1[%c0_39, %56, %c1_40, %c0_41] : memref<1x8x8x96xf32, #tpu.memory_space<vmem>>, vector<1x1x4x96xf32>
      %58 = vector.shape_cast %57 : vector<1x1x4x96xf32> to vector<4x96xf32>
      %c6 = arith.constant 6 : index
      %c0_42 = arith.constant 0 : index
      %c0_43 = arith.constant 0 : index
      %59 = vector.load %arg2[%c6, %c0_42, %c0_43] : memref<25x1x96xf32, #tpu.memory_space<vmem>>, vector<1x1x96xf32>
      %60 = vector.shape_cast %59 : vector<1x1x96xf32> to vector<1x96xf32>
      %61 = vector.broadcast %60 : vector<1x96xf32> to vector<4x96xf32>
      %62 = arith.mulf %58, %61 : vector<4x96xf32>
      %63 = arith.addf %54, %62 : vector<4x96xf32>
      %c1_i32_44 = arith.constant 1 : i32
      %64 = arith.addi %1, %c1_i32_44 : i32
      %c0_45 = arith.constant 0 : index
      %65 = arith.index_cast %64 : i32 to index
      %c2_46 = arith.constant 2 : index
      %c0_47 = arith.constant 0 : index
      %66 = vector.load %arg1[%c0_45, %65, %c2_46, %c0_47] : memref<1x8x8x96xf32, #tpu.memory_space<vmem>>, vector<1x1x4x96xf32>
      %67 = vector.shape_cast %66 : vector<1x1x4x96xf32> to vector<4x96xf32>
      %c7 = arith.constant 7 : index
      %c0_48 = arith.constant 0 : index
      %c0_49 = arith.constant 0 : index
      %68 = vector.load %arg2[%c7, %c0_48, %c0_49] : memref<25x1x96xf32, #tpu.memory_space<vmem>>, vector<1x1x96xf32>
      %69 = vector.shape_cast %68 : vector<1x1x96xf32> to vector<1x96xf32>
      %70 = vector.broadcast %69 : vector<1x96xf32> to vector<4x96xf32>
      %71 = arith.mulf %67, %70 : vector<4x96xf32>
      %72 = arith.addf %63, %71 : vector<4x96xf32>
      %c1_i32_50 = arith.constant 1 : i32
      %73 = arith.addi %1, %c1_i32_50 : i32
      %c0_51 = arith.constant 0 : index
      %74 = arith.index_cast %73 : i32 to index
      %c3_52 = arith.constant 3 : index
      %c0_53 = arith.constant 0 : index
      %75 = vector.load %arg1[%c0_51, %74, %c3_52, %c0_53] : memref<1x8x8x96xf32, #tpu.memory_space<vmem>>, vector<1x1x4x96xf32>
      %76 = vector.shape_cast %75 : vector<1x1x4x96xf32> to vector<4x96xf32>
      %c8 = arith.constant 8 : index
      %c0_54 = arith.constant 0 : index
      %c0_55 = arith.constant 0 : index
      %77 = vector.load %arg2[%c8, %c0_54, %c0_55] : memref<25x1x96xf32, #tpu.memory_space<vmem>>, vector<1x1x96xf32>
      %78 = vector.shape_cast %77 : vector<1x1x96xf32> to vector<1x96xf32>
      %79 = vector.broadcast %78 : vector<1x96xf32> to vector<4x96xf32>
      %80 = arith.mulf %76, %79 : vector<4x96xf32>
      %81 = arith.addf %72, %80 : vector<4x96xf32>
      %c1_i32_56 = arith.constant 1 : i32
      %82 = arith.addi %1, %c1_i32_56 : i32
      %c0_57 = arith.constant 0 : index
      %83 = arith.index_cast %82 : i32 to index
      %c4_58 = arith.constant 4 : index
      %c0_59 = arith.constant 0 : index
      %84 = vector.load %arg1[%c0_57, %83, %c4_58, %c0_59] : memref<1x8x8x96xf32, #tpu.memory_space<vmem>>, vector<1x1x4x96xf32>
      %85 = vector.shape_cast %84 : vector<1x1x4x96xf32> to vector<4x96xf32>
      %c9 = arith.constant 9 : index
      %c0_60 = arith.constant 0 : index
      %c0_61 = arith.constant 0 : index
      %86 = vector.load %arg2[%c9, %c0_60, %c0_61] : memref<25x1x96xf32, #tpu.memory_space<vmem>>, vector<1x1x96xf32>
      %87 = vector.shape_cast %86 : vector<1x1x96xf32> to vector<1x96xf32>
      %88 = vector.broadcast %87 : vector<1x96xf32> to vector<4x96xf32>
      %89 = arith.mulf %85, %88 : vector<4x96xf32>
      %90 = arith.addf %81, %89 : vector<4x96xf32>
      %c2_i32 = arith.constant 2 : i32
      %91 = arith.addi %1, %c2_i32 : i32
      %c0_62 = arith.constant 0 : index
      %92 = arith.index_cast %91 : i32 to index
      %c0_63 = arith.constant 0 : index
      %c0_64 = arith.constant 0 : index
      %93 = vector.load %arg1[%c0_62, %92, %c0_63, %c0_64] : memref<1x8x8x96xf32, #tpu.memory_space<vmem>>, vector<1x1x4x96xf32>
      %94 = vector.shape_cast %93 : vector<1x1x4x96xf32> to vector<4x96xf32>
      %c10 = arith.constant 10 : index
      %c0_65 = arith.constant 0 : index
      %c0_66 = arith.constant 0 : index
      %95 = vector.load %arg2[%c10, %c0_65, %c0_66] : memref<25x1x96xf32, #tpu.memory_space<vmem>>, vector<1x1x96xf32>
      %96 = vector.shape_cast %95 : vector<1x1x96xf32> to vector<1x96xf32>
      %97 = vector.broadcast %96 : vector<1x96xf32> to vector<4x96xf32>
      %98 = arith.mulf %94, %97 : vector<4x96xf32>
      %99 = arith.addf %90, %98 : vector<4x96xf32>
      %c2_i32_67 = arith.constant 2 : i32
      %100 = arith.addi %1, %c2_i32_67 : i32
      %c0_68 = arith.constant 0 : index
      %101 = arith.index_cast %100 : i32 to index
      %c1_69 = arith.constant 1 : index
      %c0_70 = arith.constant 0 : index
      %102 = vector.load %arg1[%c0_68, %101, %c1_69, %c0_70] : memref<1x8x8x96xf32, #tpu.memory_space<vmem>>, vector<1x1x4x96xf32>
      %103 = vector.shape_cast %102 : vector<1x1x4x96xf32> to vector<4x96xf32>
      %c11 = arith.constant 11 : index
      %c0_71 = arith.constant 0 : index
      %c0_72 = arith.constant 0 : index
      %104 = vector.load %arg2[%c11, %c0_71, %c0_72] : memref<25x1x96xf32, #tpu.memory_space<vmem>>, vector<1x1x96xf32>
      %105 = vector.shape_cast %104 : vector<1x1x96xf32> to vector<1x96xf32>
      %106 = vector.broadcast %105 : vector<1x96xf32> to vector<4x96xf32>
      %107 = arith.mulf %103, %106 : vector<4x96xf32>
      %108 = arith.addf %99, %107 : vector<4x96xf32>
      %c2_i32_73 = arith.constant 2 : i32
      %109 = arith.addi %1, %c2_i32_73 : i32
      %c0_74 = arith.constant 0 : index
      %110 = arith.index_cast %109 : i32 to index
      %c2_75 = arith.constant 2 : index
      %c0_76 = arith.constant 0 : index
      %111 = vector.load %arg1[%c0_74, %110, %c2_75, %c0_76] : memref<1x8x8x96xf32, #tpu.memory_space<vmem>>, vector<1x1x4x96xf32>
      %112 = vector.shape_cast %111 : vector<1x1x4x96xf32> to vector<4x96xf32>
      %c12 = arith.constant 12 : index
      %c0_77 = arith.constant 0 : index
      %c0_78 = arith.constant 0 : index
      %113 = vector.load %arg2[%c12, %c0_77, %c0_78] : memref<25x1x96xf32, #tpu.memory_space<vmem>>, vector<1x1x96xf32>
      %114 = vector.shape_cast %113 : vector<1x1x96xf32> to vector<1x96xf32>
      %115 = vector.broadcast %114 : vector<1x96xf32> to vector<4x96xf32>
      %116 = arith.mulf %112, %115 : vector<4x96xf32>
      %117 = arith.addf %108, %116 : vector<4x96xf32>
      %c2_i32_79 = arith.constant 2 : i32
      %118 = arith.addi %1, %c2_i32_79 : i32
      %c0_80 = arith.constant 0 : index
      %119 = arith.index_cast %118 : i32 to index
      %c3_81 = arith.constant 3 : index
      %c0_82 = arith.constant 0 : index
      %120 = vector.load %arg1[%c0_80, %119, %c3_81, %c0_82] : memref<1x8x8x96xf32, #tpu.memory_space<vmem>>, vector<1x1x4x96xf32>
      %121 = vector.shape_cast %120 : vector<1x1x4x96xf32> to vector<4x96xf32>
      %c13 = arith.constant 13 : index
      %c0_83 = arith.constant 0 : index
      %c0_84 = arith.constant 0 : index
      %122 = vector.load %arg2[%c13, %c0_83, %c0_84] : memref<25x1x96xf32, #tpu.memory_space<vmem>>, vector<1x1x96xf32>
      %123 = vector.shape_cast %122 : vector<1x1x96xf32> to vector<1x96xf32>
      %124 = vector.broadcast %123 : vector<1x96xf32> to vector<4x96xf32>
      %125 = arith.mulf %121, %124 : vector<4x96xf32>
      %126 = arith.addf %117, %125 : vector<4x96xf32>
      %c2_i32_85 = arith.constant 2 : i32
      %127 = arith.addi %1, %c2_i32_85 : i32
      %c0_86 = arith.constant 0 : index
      %128 = arith.index_cast %127 : i32 to index
      %c4_87 = arith.constant 4 : index
      %c0_88 = arith.constant 0 : index
      %129 = vector.load %arg1[%c0_86, %128, %c4_87, %c0_88] : memref<1x8x8x96xf32, #tpu.memory_space<vmem>>, vector<1x1x4x96xf32>
      %130 = vector.shape_cast %129 : vector<1x1x4x96xf32> to vector<4x96xf32>
      %c14 = arith.constant 14 : index
      %c0_89 = arith.constant 0 : index
      %c0_90 = arith.constant 0 : index
      %131 = vector.load %arg2[%c14, %c0_89, %c0_90] : memref<25x1x96xf32, #tpu.memory_space<vmem>>, vector<1x1x96xf32>
      %132 = vector.shape_cast %131 : vector<1x1x96xf32> to vector<1x96xf32>
      %133 = vector.broadcast %132 : vector<1x96xf32> to vector<4x96xf32>
      %134 = arith.mulf %130, %133 : vector<4x96xf32>
      %135 = arith.addf %126, %134 : vector<4x96xf32>
      %c3_i32 = arith.constant 3 : i32
      %136 = arith.addi %1, %c3_i32 : i32
      %c0_91 = arith.constant 0 : index
      %137 = arith.index_cast %136 : i32 to index
      %c0_92 = arith.constant 0 : index
      %c0_93 = arith.constant 0 : index
      %138 = vector.load %arg1[%c0_91, %137, %c0_92, %c0_93] : memref<1x8x8x96xf32, #tpu.memory_space<vmem>>, vector<1x1x4x96xf32>
      %139 = vector.shape_cast %138 : vector<1x1x4x96xf32> to vector<4x96xf32>
      %c15 = arith.constant 15 : index
      %c0_94 = arith.constant 0 : index
      %c0_95 = arith.constant 0 : index
      %140 = vector.load %arg2[%c15, %c0_94, %c0_95] : memref<25x1x96xf32, #tpu.memory_space<vmem>>, vector<1x1x96xf32>
      %141 = vector.shape_cast %140 : vector<1x1x96xf32> to vector<1x96xf32>
      %142 = vector.broadcast %141 : vector<1x96xf32> to vector<4x96xf32>
      %143 = arith.mulf %139, %142 : vector<4x96xf32>
      %144 = arith.addf %135, %143 : vector<4x96xf32>
      %c3_i32_96 = arith.constant 3 : i32
      %145 = arith.addi %1, %c3_i32_96 : i32
      %c0_97 = arith.constant 0 : index
      %146 = arith.index_cast %145 : i32 to index
      %c1_98 = arith.constant 1 : index
      %c0_99 = arith.constant 0 : index
      %147 = vector.load %arg1[%c0_97, %146, %c1_98, %c0_99] : memref<1x8x8x96xf32, #tpu.memory_space<vmem>>, vector<1x1x4x96xf32>
      %148 = vector.shape_cast %147 : vector<1x1x4x96xf32> to vector<4x96xf32>
      %c16 = arith.constant 16 : index
      %c0_100 = arith.constant 0 : index
      %c0_101 = arith.constant 0 : index
      %149 = vector.load %arg2[%c16, %c0_100, %c0_101] : memref<25x1x96xf32, #tpu.memory_space<vmem>>, vector<1x1x96xf32>
      %150 = vector.shape_cast %149 : vector<1x1x96xf32> to vector<1x96xf32>
      %151 = vector.broadcast %150 : vector<1x96xf32> to vector<4x96xf32>
      %152 = arith.mulf %148, %151 : vector<4x96xf32>
      %153 = arith.addf %144, %152 : vector<4x96xf32>
      %c3_i32_102 = arith.constant 3 : i32
      %154 = arith.addi %1, %c3_i32_102 : i32
      %c0_103 = arith.constant 0 : index
      %155 = arith.index_cast %154 : i32 to index
      %c2_104 = arith.constant 2 : index
      %c0_105 = arith.constant 0 : index
      %156 = vector.load %arg1[%c0_103, %155, %c2_104, %c0_105] : memref<1x8x8x96xf32, #tpu.memory_space<vmem>>, vector<1x1x4x96xf32>
      %157 = vector.shape_cast %156 : vector<1x1x4x96xf32> to vector<4x96xf32>
      %c17 = arith.constant 17 : index
      %c0_106 = arith.constant 0 : index
      %c0_107 = arith.constant 0 : index
      %158 = vector.load %arg2[%c17, %c0_106, %c0_107] : memref<25x1x96xf32, #tpu.memory_space<vmem>>, vector<1x1x96xf32>
      %159 = vector.shape_cast %158 : vector<1x1x96xf32> to vector<1x96xf32>
      %160 = vector.broadcast %159 : vector<1x96xf32> to vector<4x96xf32>
      %161 = arith.mulf %157, %160 : vector<4x96xf32>
      %162 = arith.addf %153, %161 : vector<4x96xf32>
      %c3_i32_108 = arith.constant 3 : i32
      %163 = arith.addi %1, %c3_i32_108 : i32
      %c0_109 = arith.constant 0 : index
      %164 = arith.index_cast %163 : i32 to index
      %c3_110 = arith.constant 3 : index
      %c0_111 = arith.constant 0 : index
      %165 = vector.load %arg1[%c0_109, %164, %c3_110, %c0_111] : memref<1x8x8x96xf32, #tpu.memory_space<vmem>>, vector<1x1x4x96xf32>
      %166 = vector.shape_cast %165 : vector<1x1x4x96xf32> to vector<4x96xf32>
      %c18 = arith.constant 18 : index
      %c0_112 = arith.constant 0 : index
      %c0_113 = arith.constant 0 : index
      %167 = vector.load %arg2[%c18, %c0_112, %c0_113] : memref<25x1x96xf32, #tpu.memory_space<vmem>>, vector<1x1x96xf32>
      %168 = vector.shape_cast %167 : vector<1x1x96xf32> to vector<1x96xf32>
      %169 = vector.broadcast %168 : vector<1x96xf32> to vector<4x96xf32>
      %170 = arith.mulf %166, %169 : vector<4x96xf32>
      %171 = arith.addf %162, %170 : vector<4x96xf32>
      %c3_i32_114 = arith.constant 3 : i32
      %172 = arith.addi %1, %c3_i32_114 : i32
      %c0_115 = arith.constant 0 : index
      %173 = arith.index_cast %172 : i32 to index
      %c4_116 = arith.constant 4 : index
      %c0_117 = arith.constant 0 : index
      %174 = vector.load %arg1[%c0_115, %173, %c4_116, %c0_117] : memref<1x8x8x96xf32, #tpu.memory_space<vmem>>, vector<1x1x4x96xf32>
      %175 = vector.shape_cast %174 : vector<1x1x4x96xf32> to vector<4x96xf32>
      %c19 = arith.constant 19 : index
      %c0_118 = arith.constant 0 : index
      %c0_119 = arith.constant 0 : index
      %176 = vector.load %arg2[%c19, %c0_118, %c0_119] : memref<25x1x96xf32, #tpu.memory_space<vmem>>, vector<1x1x96xf32>
      %177 = vector.shape_cast %176 : vector<1x1x96xf32> to vector<1x96xf32>
      %178 = vector.broadcast %177 : vector<1x96xf32> to vector<4x96xf32>
      %179 = arith.mulf %175, %178 : vector<4x96xf32>
      %180 = arith.addf %171, %179 : vector<4x96xf32>
      %c4_i32_120 = arith.constant 4 : i32
      %181 = arith.addi %1, %c4_i32_120 : i32
      %c0_121 = arith.constant 0 : index
      %182 = arith.index_cast %181 : i32 to index
      %c0_122 = arith.constant 0 : index
      %c0_123 = arith.constant 0 : index
      %183 = vector.load %arg1[%c0_121, %182, %c0_122, %c0_123] : memref<1x8x8x96xf32, #tpu.memory_space<vmem>>, vector<1x1x4x96xf32>
      %184 = vector.shape_cast %183 : vector<1x1x4x96xf32> to vector<4x96xf32>
      %c20 = arith.constant 20 : index
      %c0_124 = arith.constant 0 : index
      %c0_125 = arith.constant 0 : index
      %185 = vector.load %arg2[%c20, %c0_124, %c0_125] : memref<25x1x96xf32, #tpu.memory_space<vmem>>, vector<1x1x96xf32>
      %186 = vector.shape_cast %185 : vector<1x1x96xf32> to vector<1x96xf32>
      %187 = vector.broadcast %186 : vector<1x96xf32> to vector<4x96xf32>
      %188 = arith.mulf %184, %187 : vector<4x96xf32>
      %189 = arith.addf %180, %188 : vector<4x96xf32>
      %c4_i32_126 = arith.constant 4 : i32
      %190 = arith.addi %1, %c4_i32_126 : i32
      %c0_127 = arith.constant 0 : index
      %191 = arith.index_cast %190 : i32 to index
      %c1_128 = arith.constant 1 : index
      %c0_129 = arith.constant 0 : index
      %192 = vector.load %arg1[%c0_127, %191, %c1_128, %c0_129] : memref<1x8x8x96xf32, #tpu.memory_space<vmem>>, vector<1x1x4x96xf32>
      %193 = vector.shape_cast %192 : vector<1x1x4x96xf32> to vector<4x96xf32>
      %c21 = arith.constant 21 : index
      %c0_130 = arith.constant 0 : index
      %c0_131 = arith.constant 0 : index
      %194 = vector.load %arg2[%c21, %c0_130, %c0_131] : memref<25x1x96xf32, #tpu.memory_space<vmem>>, vector<1x1x96xf32>
      %195 = vector.shape_cast %194 : vector<1x1x96xf32> to vector<1x96xf32>
      %196 = vector.broadcast %195 : vector<1x96xf32> to vector<4x96xf32>
      %197 = arith.mulf %193, %196 : vector<4x96xf32>
      %198 = arith.addf %189, %197 : vector<4x96xf32>
      %c4_i32_132 = arith.constant 4 : i32
      %199 = arith.addi %1, %c4_i32_132 : i32
      %c0_133 = arith.constant 0 : index
      %200 = arith.index_cast %199 : i32 to index
      %c2_134 = arith.constant 2 : index
      %c0_135 = arith.constant 0 : index
      %201 = vector.load %arg1[%c0_133, %200, %c2_134, %c0_135] : memref<1x8x8x96xf32, #tpu.memory_space<vmem>>, vector<1x1x4x96xf32>
      %202 = vector.shape_cast %201 : vector<1x1x4x96xf32> to vector<4x96xf32>
      %c22 = arith.constant 22 : index
      %c0_136 = arith.constant 0 : index
      %c0_137 = arith.constant 0 : index
      %203 = vector.load %arg2[%c22, %c0_136, %c0_137] : memref<25x1x96xf32, #tpu.memory_space<vmem>>, vector<1x1x96xf32>
      %204 = vector.shape_cast %203 : vector<1x1x96xf32> to vector<1x96xf32>
      %205 = vector.broadcast %204 : vector<1x96xf32> to vector<4x96xf32>
      %206 = arith.mulf %202, %205 : vector<4x96xf32>
      %207 = arith.addf %198, %206 : vector<4x96xf32>
      %c4_i32_138 = arith.constant 4 : i32
      %208 = arith.addi %1, %c4_i32_138 : i32
      %c0_139 = arith.constant 0 : index
      %209 = arith.index_cast %208 : i32 to index
      %c3_140 = arith.constant 3 : index
      %c0_141 = arith.constant 0 : index
      %210 = vector.load %arg1[%c0_139, %209, %c3_140, %c0_141] : memref<1x8x8x96xf32, #tpu.memory_space<vmem>>, vector<1x1x4x96xf32>
      %211 = vector.shape_cast %210 : vector<1x1x4x96xf32> to vector<4x96xf32>
      %c23 = arith.constant 23 : index
      %c0_142 = arith.constant 0 : index
      %c0_143 = arith.constant 0 : index
      %212 = vector.load %arg2[%c23, %c0_142, %c0_143] : memref<25x1x96xf32, #tpu.memory_space<vmem>>, vector<1x1x96xf32>
      %213 = vector.shape_cast %212 : vector<1x1x96xf32> to vector<1x96xf32>
      %214 = vector.broadcast %213 : vector<1x96xf32> to vector<4x96xf32>
      %215 = arith.mulf %211, %214 : vector<4x96xf32>
      %216 = arith.addf %207, %215 : vector<4x96xf32>
      %c4_i32_144 = arith.constant 4 : i32
      %217 = arith.addi %1, %c4_i32_144 : i32
      %c0_145 = arith.constant 0 : index
      %218 = arith.index_cast %217 : i32 to index
      %c4_146 = arith.constant 4 : index
      %c0_147 = arith.constant 0 : index
      %219 = vector.load %arg1[%c0_145, %218, %c4_146, %c0_147] : memref<1x8x8x96xf32, #tpu.memory_space<vmem>>, vector<1x1x4x96xf32>
      %220 = vector.shape_cast %219 : vector<1x1x4x96xf32> to vector<4x96xf32>
      %c24 = arith.constant 24 : index
      %c0_148 = arith.constant 0 : index
      %c0_149 = arith.constant 0 : index
      %221 = vector.load %arg2[%c24, %c0_148, %c0_149] : memref<25x1x96xf32, #tpu.memory_space<vmem>>, vector<1x1x96xf32>
      %222 = vector.shape_cast %221 : vector<1x1x96xf32> to vector<1x96xf32>
      %223 = vector.broadcast %222 : vector<1x96xf32> to vector<4x96xf32>
      %224 = arith.mulf %220, %223 : vector<4x96xf32>
      %225 = arith.addf %216, %224 : vector<4x96xf32>
      %cst = arith.constant 0.000000e+00 : f32
      %226 = vector.broadcast %cst : f32 to vector<4x96xf32>
      %227 = tpu.concatenate %225, %226 in 0 : vector<4x96xf32>, vector<4x96xf32> -> vector<8x96xf32>
      %228 = arith.truncf %227 : vector<8x96xf32> to vector<8x96xbf16>
      %c0_150 = arith.constant 0 : index
      %c0_151 = arith.constant 0 : index
      %229 = vector.load %arg3[%c0_150, %c0_151] : memref<96x96xbf16, #tpu.memory_space<vmem>>, vector<96x96xbf16>
      %cst_152 = arith.constant dense<0.000000e+00> : vector<8x96xf32>
      %230 = tpu.matmul %228, %229, %cst_152 {dimension_numbers = #tpu.dot_dimension_numbers<[1], [0], [0], [1], [0, 0, 1, 1], [], []>} : vector<8x96xbf16>, vector<96x96xbf16>, vector<8x96xf32> -> vector<8x96xf32>
      %231 = vector.extract_strided_slice %230 {offsets = [0, 0], sizes = [4, 96], strides = [1, 1]} : vector<8x96xf32> to vector<4x96xf32>
      %c0_153 = arith.constant 0 : index
      %c0_154 = arith.constant 0 : index
      %232 = vector.load %arg4[%c0_153, %c0_154] : memref<1x96xf32, #tpu.memory_space<vmem>>, vector<1x96xf32>
      %233 = vector.broadcast %232 : vector<1x96xf32> to vector<4x96xf32>
      %234 = arith.addf %231, %233 : vector<4x96xf32>
      %cst_155 = arith.constant 0.000000e+00 : f32
      %235 = vector.broadcast %cst_155 : f32 to vector<4x96xf32>
      %236 = arith.maximumf %234, %235 : vector<4x96xf32>
      %c0_156 = arith.constant 0 : index
      %237 = arith.index_cast %arg7 : i32 to index
      %c0_157 = arith.constant 0 : index
      %c0_158 = arith.constant 0 : index
      %238 = vector.load %arg5[%c0_156, %237, %c0_157, %c0_158] : memref<1x4x4x96xf32, #tpu.memory_space<vmem>>, vector<1x1x4x96xf32>
      %239 = vector.shape_cast %238 : vector<1x1x4x96xf32> to vector<4x96xf32>
      %240 = arith.addf %236, %239 : vector<4x96xf32>
      %cst_159 = arith.constant 0.000000e+00 : f32
      %241 = vector.broadcast %cst_159 : f32 to vector<4x96xf32>
      %242 = arith.maximumf %240, %241 : vector<4x96xf32>
      %c0_160 = arith.constant 0 : index
      %243 = arith.index_cast %arg7 : i32 to index
      %c0_161 = arith.constant 0 : index
      %c0_162 = arith.constant 0 : index
      %244 = vector.load %arg6[%c0_160, %243, %c0_161, %c0_162] : memref<1x4x4x96xf32, #tpu.memory_space<vmem>>, vector<1x1x4x96xf32>
      %245 = vector.shape_cast %244 : vector<1x1x4x96xf32> to vector<4x96xf32>
      %246 = vector.shape_cast %242 : vector<4x96xf32> to vector<1x1x4x96xf32>
      tpu.vector_store %arg6[%c0_160, %243, %c0_161, %c0_162], %246 {strides = array<i32>} : memref<1x4x4x96xf32, #tpu.memory_space<vmem>>, vector<1x1x4x96xf32>,
    }
    %c4_i32_0 = arith.constant 4 : i32
    return
  }
  func.func @transform_0(%arg0: i32) -> (i32, i32, i32, i32) {
    %c0_i32 = arith.constant 0 : i32
    %c0_i32_0 = arith.constant 0 : i32
    %c0_i32_1 = arith.constant 0 : i32
    %c0_i32_2 = arith.constant 0 : i32
    return %arg0, %c0_i32, %c0_i32_0, %c0_i32_1 : i32, i32, i32, i32
  }
  func.func @transform_1(%arg0: i32) -> (i32, i32, i32) {
    %c0_i32 = arith.constant 0 : i32
    %c0_i32_0 = arith.constant 0 : i32
    %c0_i32_1 = arith.constant 0 : i32
    %c0_i32_2 = arith.constant 0 : i32
    return %c0_i32, %c0_i32_0, %c0_i32_1 : i32, i32, i32
  }
  func.func @transform_2(%arg0: i32) -> (i32, i32) {
    %c0_i32 = arith.constant 0 : i32
    %c0_i32_0 = arith.constant 0 : i32
    %c0_i32_1 = arith.constant 0 : i32
    return %c0_i32, %c0_i32_0 : i32, i32
  }
  func.func @transform_3(%arg0: i32) -> (i32, i32) {
    %c0_i32 = arith.constant 0 : i32
    %c0_i32_0 = arith.constant 0 : i32
    %c0_i32_1 = arith.constant 0 : i32
    return %c0_i32, %c0_i32_0 : i32, i32
  }
  func.func @transform_4(%arg0: i32) -> (i32, i32, i32, i32) {
    %c0_i32 = arith.constant 0 : i32
    %c0_i32_0 = arith.constant 0 : i32
    %c0_i32_1 = arith.constant 0 : i32
    %c0_i32_2 = arith.constant 0 : i32
    return %arg0, %c0_i32, %c0_i32_0, %c0_i32_1 : i32, i32, i32, i32
  }
  func.func @transform_5(%arg0: i32) -> (i32, i32, i32, i32) {
    %c0_i32 = arith.constant 0 : i32
    %c0_i32_0 = arith.constant 0 : i32
    %c0_i32_1 = arith.constant 0 : i32
    %c0_i32_2 = arith.constant 0 : i32
    return %arg0, %c0_i32, %c0_i32_0, %c0_i32_1 : i32, i32, i32, i32
  }
}

module attributes {stable_mosaic.version = 11 : i64} {
  func.func @kernel(%arg0: i32, %arg1: memref<1x16x4x96xf32, #tpu.memory_space<vmem>>, %arg2: memref<25x1x96xf32, #tpu.memory_space<vmem>>, %arg3: memref<96x192xbf16, #tpu.memory_space<vmem>>, %arg4: memref<1x192xf32, #tpu.memory_space<vmem>>, %arg5: memref<96x192xbf16, #tpu.memory_space<vmem>>, %arg6: memref<1x2x2x192xf32, #tpu.memory_space<vmem>>) attributes {dimension_semantics = [#tpu.dimension_semantics<parallel>], iteration_bounds = array<i64: 2>, scalar_prefetch = 0 : i64, scratch_operands = 0 : i64, tpu.core_type = #tpu.core_type<tc>, window_params = [{transform_indices = @transform_0, window_bounds = array<i64: 1, 16, 4, 96>}, {pipeline_mode = #tpu.pipeline_mode<synchronous>, transform_indices = @transform_1, window_bounds = array<i64: 25, 1, 96>}, {pipeline_mode = #tpu.pipeline_mode<synchronous>, transform_indices = @transform_2, window_bounds = array<i64: 96, 192>}, {pipeline_mode = #tpu.pipeline_mode<synchronous>, transform_indices = @transform_3, window_bounds = array<i64: 1, 192>}, {pipeline_mode = #tpu.pipeline_mode<synchronous>, transform_indices = @transform_4, window_bounds = array<i64: 96, 192>}, {transform_indices = @transform_5, window_bounds = array<i64: 1, 2, 2, 192>}]} {
    %c0_i32 = arith.constant 0 : i32
    %c2_i32 = arith.constant 2 : i32
    %0 = arith.addi %c0_i32, %c2_i32 : i32
    %c1_i32 = arith.constant 1 : i32
    scf.for %arg7 = %c0_i32 to %0 step %c1_i32  : i32 {
      %c2_i32_1 = arith.constant 2 : i32
      %1 = arith.muli %arg7, %c2_i32_1 : i32
      %c0_i32_2 = arith.constant 0 : i32
      %2 = arith.addi %1, %c0_i32_2 : i32
      %c0 = arith.constant 0 : index
      %3 = arith.index_cast %2 : i32 to index
      %c0_3 = arith.constant 0 : index
      %c0_4 = arith.constant 0 : index
      %4 = vector.load %arg1[%c0, %3, %c0_3, %c0_4] : memref<1x16x4x96xf32, #tpu.memory_space<vmem>>, vector<1x1x2x96xf32>
      %5 = vector.shape_cast %4 : vector<1x1x2x96xf32> to vector<2x96xf32>
      %c0_5 = arith.constant 0 : index
      %c0_6 = arith.constant 0 : index
      %c0_7 = arith.constant 0 : index
      %6 = vector.load %arg2[%c0_5, %c0_6, %c0_7] : memref<25x1x96xf32, #tpu.memory_space<vmem>>, vector<1x1x96xf32>
      %7 = vector.shape_cast %6 : vector<1x1x96xf32> to vector<1x96xf32>
      %8 = vector.broadcast %7 : vector<1x96xf32> to vector<2x96xf32>
      %9 = arith.mulf %5, %8 : vector<2x96xf32>
      %c8_i32 = arith.constant 8 : i32
      %10 = arith.addi %1, %c8_i32 : i32
      %c0_8 = arith.constant 0 : index
      %11 = arith.index_cast %10 : i32 to index
      %c0_9 = arith.constant 0 : index
      %c0_10 = arith.constant 0 : index
      %12 = vector.load %arg1[%c0_8, %11, %c0_9, %c0_10] : memref<1x16x4x96xf32, #tpu.memory_space<vmem>>, vector<1x1x2x96xf32>
      %13 = vector.shape_cast %12 : vector<1x1x2x96xf32> to vector<2x96xf32>
      %c1 = arith.constant 1 : index
      %c0_11 = arith.constant 0 : index
      %c0_12 = arith.constant 0 : index
      %14 = vector.load %arg2[%c1, %c0_11, %c0_12] : memref<25x1x96xf32, #tpu.memory_space<vmem>>, vector<1x1x96xf32>
      %15 = vector.shape_cast %14 : vector<1x1x96xf32> to vector<1x96xf32>
      %16 = vector.broadcast %15 : vector<1x96xf32> to vector<2x96xf32>
      %17 = arith.mulf %13, %16 : vector<2x96xf32>
      %18 = arith.addf %9, %17 : vector<2x96xf32>
      %c0_i32_13 = arith.constant 0 : i32
      %19 = arith.addi %1, %c0_i32_13 : i32
      %c0_14 = arith.constant 0 : index
      %20 = arith.index_cast %19 : i32 to index
      %c1_15 = arith.constant 1 : index
      %c0_16 = arith.constant 0 : index
      %21 = vector.load %arg1[%c0_14, %20, %c1_15, %c0_16] : memref<1x16x4x96xf32, #tpu.memory_space<vmem>>, vector<1x1x2x96xf32>
      %22 = vector.shape_cast %21 : vector<1x1x2x96xf32> to vector<2x96xf32>
      %c2 = arith.constant 2 : index
      %c0_17 = arith.constant 0 : index
      %c0_18 = arith.constant 0 : index
      %23 = vector.load %arg2[%c2, %c0_17, %c0_18] : memref<25x1x96xf32, #tpu.memory_space<vmem>>, vector<1x1x96xf32>
      %24 = vector.shape_cast %23 : vector<1x1x96xf32> to vector<1x96xf32>
      %25 = vector.broadcast %24 : vector<1x96xf32> to vector<2x96xf32>
      %26 = arith.mulf %22, %25 : vector<2x96xf32>
      %27 = arith.addf %18, %26 : vector<2x96xf32>
      %c8_i32_19 = arith.constant 8 : i32
      %28 = arith.addi %1, %c8_i32_19 : i32
      %c0_20 = arith.constant 0 : index
      %29 = arith.index_cast %28 : i32 to index
      %c1_21 = arith.constant 1 : index
      %c0_22 = arith.constant 0 : index
      %30 = vector.load %arg1[%c0_20, %29, %c1_21, %c0_22] : memref<1x16x4x96xf32, #tpu.memory_space<vmem>>, vector<1x1x2x96xf32>
      %31 = vector.shape_cast %30 : vector<1x1x2x96xf32> to vector<2x96xf32>
      %c3 = arith.constant 3 : index
      %c0_23 = arith.constant 0 : index
      %c0_24 = arith.constant 0 : index
      %32 = vector.load %arg2[%c3, %c0_23, %c0_24] : memref<25x1x96xf32, #tpu.memory_space<vmem>>, vector<1x1x96xf32>
      %33 = vector.shape_cast %32 : vector<1x1x96xf32> to vector<1x96xf32>
      %34 = vector.broadcast %33 : vector<1x96xf32> to vector<2x96xf32>
      %35 = arith.mulf %31, %34 : vector<2x96xf32>
      %36 = arith.addf %27, %35 : vector<2x96xf32>
      %c0_i32_25 = arith.constant 0 : i32
      %37 = arith.addi %1, %c0_i32_25 : i32
      %c0_26 = arith.constant 0 : index
      %38 = arith.index_cast %37 : i32 to index
      %c2_27 = arith.constant 2 : index
      %c0_28 = arith.constant 0 : index
      %39 = vector.load %arg1[%c0_26, %38, %c2_27, %c0_28] : memref<1x16x4x96xf32, #tpu.memory_space<vmem>>, vector<1x1x2x96xf32>
      %40 = vector.shape_cast %39 : vector<1x1x2x96xf32> to vector<2x96xf32>
      %c4 = arith.constant 4 : index
      %c0_29 = arith.constant 0 : index
      %c0_30 = arith.constant 0 : index
      %41 = vector.load %arg2[%c4, %c0_29, %c0_30] : memref<25x1x96xf32, #tpu.memory_space<vmem>>, vector<1x1x96xf32>
      %42 = vector.shape_cast %41 : vector<1x1x96xf32> to vector<1x96xf32>
      %43 = vector.broadcast %42 : vector<1x96xf32> to vector<2x96xf32>
      %44 = arith.mulf %40, %43 : vector<2x96xf32>
      %45 = arith.addf %36, %44 : vector<2x96xf32>
      %c1_i32_31 = arith.constant 1 : i32
      %46 = arith.addi %1, %c1_i32_31 : i32
      %c0_32 = arith.constant 0 : index
      %47 = arith.index_cast %46 : i32 to index
      %c0_33 = arith.constant 0 : index
      %c0_34 = arith.constant 0 : index
      %48 = vector.load %arg1[%c0_32, %47, %c0_33, %c0_34] : memref<1x16x4x96xf32, #tpu.memory_space<vmem>>, vector<1x1x2x96xf32>
      %49 = vector.shape_cast %48 : vector<1x1x2x96xf32> to vector<2x96xf32>
      %c5 = arith.constant 5 : index
      %c0_35 = arith.constant 0 : index
      %c0_36 = arith.constant 0 : index
      %50 = vector.load %arg2[%c5, %c0_35, %c0_36] : memref<25x1x96xf32, #tpu.memory_space<vmem>>, vector<1x1x96xf32>
      %51 = vector.shape_cast %50 : vector<1x1x96xf32> to vector<1x96xf32>
      %52 = vector.broadcast %51 : vector<1x96xf32> to vector<2x96xf32>
      %53 = arith.mulf %49, %52 : vector<2x96xf32>
      %54 = arith.addf %45, %53 : vector<2x96xf32>
      %c9_i32 = arith.constant 9 : i32
      %55 = arith.addi %1, %c9_i32 : i32
      %c0_37 = arith.constant 0 : index
      %56 = arith.index_cast %55 : i32 to index
      %c0_38 = arith.constant 0 : index
      %c0_39 = arith.constant 0 : index
      %57 = vector.load %arg1[%c0_37, %56, %c0_38, %c0_39] : memref<1x16x4x96xf32, #tpu.memory_space<vmem>>, vector<1x1x2x96xf32>
      %58 = vector.shape_cast %57 : vector<1x1x2x96xf32> to vector<2x96xf32>
      %c6 = arith.constant 6 : index
      %c0_40 = arith.constant 0 : index
      %c0_41 = arith.constant 0 : index
      %59 = vector.load %arg2[%c6, %c0_40, %c0_41] : memref<25x1x96xf32, #tpu.memory_space<vmem>>, vector<1x1x96xf32>
      %60 = vector.shape_cast %59 : vector<1x1x96xf32> to vector<1x96xf32>
      %61 = vector.broadcast %60 : vector<1x96xf32> to vector<2x96xf32>
      %62 = arith.mulf %58, %61 : vector<2x96xf32>
      %63 = arith.addf %54, %62 : vector<2x96xf32>
      %c1_i32_42 = arith.constant 1 : i32
      %64 = arith.addi %1, %c1_i32_42 : i32
      %c0_43 = arith.constant 0 : index
      %65 = arith.index_cast %64 : i32 to index
      %c1_44 = arith.constant 1 : index
      %c0_45 = arith.constant 0 : index
      %66 = vector.load %arg1[%c0_43, %65, %c1_44, %c0_45] : memref<1x16x4x96xf32, #tpu.memory_space<vmem>>, vector<1x1x2x96xf32>
      %67 = vector.shape_cast %66 : vector<1x1x2x96xf32> to vector<2x96xf32>
      %c7 = arith.constant 7 : index
      %c0_46 = arith.constant 0 : index
      %c0_47 = arith.constant 0 : index
      %68 = vector.load %arg2[%c7, %c0_46, %c0_47] : memref<25x1x96xf32, #tpu.memory_space<vmem>>, vector<1x1x96xf32>
      %69 = vector.shape_cast %68 : vector<1x1x96xf32> to vector<1x96xf32>
      %70 = vector.broadcast %69 : vector<1x96xf32> to vector<2x96xf32>
      %71 = arith.mulf %67, %70 : vector<2x96xf32>
      %72 = arith.addf %63, %71 : vector<2x96xf32>
      %c9_i32_48 = arith.constant 9 : i32
      %73 = arith.addi %1, %c9_i32_48 : i32
      %c0_49 = arith.constant 0 : index
      %74 = arith.index_cast %73 : i32 to index
      %c1_50 = arith.constant 1 : index
      %c0_51 = arith.constant 0 : index
      %75 = vector.load %arg1[%c0_49, %74, %c1_50, %c0_51] : memref<1x16x4x96xf32, #tpu.memory_space<vmem>>, vector<1x1x2x96xf32>
      %76 = vector.shape_cast %75 : vector<1x1x2x96xf32> to vector<2x96xf32>
      %c8 = arith.constant 8 : index
      %c0_52 = arith.constant 0 : index
      %c0_53 = arith.constant 0 : index
      %77 = vector.load %arg2[%c8, %c0_52, %c0_53] : memref<25x1x96xf32, #tpu.memory_space<vmem>>, vector<1x1x96xf32>
      %78 = vector.shape_cast %77 : vector<1x1x96xf32> to vector<1x96xf32>
      %79 = vector.broadcast %78 : vector<1x96xf32> to vector<2x96xf32>
      %80 = arith.mulf %76, %79 : vector<2x96xf32>
      %81 = arith.addf %72, %80 : vector<2x96xf32>
      %c1_i32_54 = arith.constant 1 : i32
      %82 = arith.addi %1, %c1_i32_54 : i32
      %c0_55 = arith.constant 0 : index
      %83 = arith.index_cast %82 : i32 to index
      %c2_56 = arith.constant 2 : index
      %c0_57 = arith.constant 0 : index
      %84 = vector.load %arg1[%c0_55, %83, %c2_56, %c0_57] : memref<1x16x4x96xf32, #tpu.memory_space<vmem>>, vector<1x1x2x96xf32>
      %85 = vector.shape_cast %84 : vector<1x1x2x96xf32> to vector<2x96xf32>
      %c9 = arith.constant 9 : index
      %c0_58 = arith.constant 0 : index
      %c0_59 = arith.constant 0 : index
      %86 = vector.load %arg2[%c9, %c0_58, %c0_59] : memref<25x1x96xf32, #tpu.memory_space<vmem>>, vector<1x1x96xf32>
      %87 = vector.shape_cast %86 : vector<1x1x96xf32> to vector<1x96xf32>
      %88 = vector.broadcast %87 : vector<1x96xf32> to vector<2x96xf32>
      %89 = arith.mulf %85, %88 : vector<2x96xf32>
      %90 = arith.addf %81, %89 : vector<2x96xf32>
      %c2_i32_60 = arith.constant 2 : i32
      %91 = arith.addi %1, %c2_i32_60 : i32
      %c0_61 = arith.constant 0 : index
      %92 = arith.index_cast %91 : i32 to index
      %c0_62 = arith.constant 0 : index
      %c0_63 = arith.constant 0 : index
      %93 = vector.load %arg1[%c0_61, %92, %c0_62, %c0_63] : memref<1x16x4x96xf32, #tpu.memory_space<vmem>>, vector<1x1x2x96xf32>
      %94 = vector.shape_cast %93 : vector<1x1x2x96xf32> to vector<2x96xf32>
      %c10 = arith.constant 10 : index
      %c0_64 = arith.constant 0 : index
      %c0_65 = arith.constant 0 : index
      %95 = vector.load %arg2[%c10, %c0_64, %c0_65] : memref<25x1x96xf32, #tpu.memory_space<vmem>>, vector<1x1x96xf32>
      %96 = vector.shape_cast %95 : vector<1x1x96xf32> to vector<1x96xf32>
      %97 = vector.broadcast %96 : vector<1x96xf32> to vector<2x96xf32>
      %98 = arith.mulf %94, %97 : vector<2x96xf32>
      %99 = arith.addf %90, %98 : vector<2x96xf32>
      %c10_i32 = arith.constant 10 : i32
      %100 = arith.addi %1, %c10_i32 : i32
      %c0_66 = arith.constant 0 : index
      %101 = arith.index_cast %100 : i32 to index
      %c0_67 = arith.constant 0 : index
      %c0_68 = arith.constant 0 : index
      %102 = vector.load %arg1[%c0_66, %101, %c0_67, %c0_68] : memref<1x16x4x96xf32, #tpu.memory_space<vmem>>, vector<1x1x2x96xf32>
      %103 = vector.shape_cast %102 : vector<1x1x2x96xf32> to vector<2x96xf32>
      %c11 = arith.constant 11 : index
      %c0_69 = arith.constant 0 : index
      %c0_70 = arith.constant 0 : index
      %104 = vector.load %arg2[%c11, %c0_69, %c0_70] : memref<25x1x96xf32, #tpu.memory_space<vmem>>, vector<1x1x96xf32>
      %105 = vector.shape_cast %104 : vector<1x1x96xf32> to vector<1x96xf32>
      %106 = vector.broadcast %105 : vector<1x96xf32> to vector<2x96xf32>
      %107 = arith.mulf %103, %106 : vector<2x96xf32>
      %108 = arith.addf %99, %107 : vector<2x96xf32>
      %c2_i32_71 = arith.constant 2 : i32
      %109 = arith.addi %1, %c2_i32_71 : i32
      %c0_72 = arith.constant 0 : index
      %110 = arith.index_cast %109 : i32 to index
      %c1_73 = arith.constant 1 : index
      %c0_74 = arith.constant 0 : index
      %111 = vector.load %arg1[%c0_72, %110, %c1_73, %c0_74] : memref<1x16x4x96xf32, #tpu.memory_space<vmem>>, vector<1x1x2x96xf32>
      %112 = vector.shape_cast %111 : vector<1x1x2x96xf32> to vector<2x96xf32>
      %c12 = arith.constant 12 : index
      %c0_75 = arith.constant 0 : index
      %c0_76 = arith.constant 0 : index
      %113 = vector.load %arg2[%c12, %c0_75, %c0_76] : memref<25x1x96xf32, #tpu.memory_space<vmem>>, vector<1x1x96xf32>
      %114 = vector.shape_cast %113 : vector<1x1x96xf32> to vector<1x96xf32>
      %115 = vector.broadcast %114 : vector<1x96xf32> to vector<2x96xf32>
      %116 = arith.mulf %112, %115 : vector<2x96xf32>
      %117 = arith.addf %108, %116 : vector<2x96xf32>
      %c10_i32_77 = arith.constant 10 : i32
      %118 = arith.addi %1, %c10_i32_77 : i32
      %c0_78 = arith.constant 0 : index
      %119 = arith.index_cast %118 : i32 to index
      %c1_79 = arith.constant 1 : index
      %c0_80 = arith.constant 0 : index
      %120 = vector.load %arg1[%c0_78, %119, %c1_79, %c0_80] : memref<1x16x4x96xf32, #tpu.memory_space<vmem>>, vector<1x1x2x96xf32>
      %121 = vector.shape_cast %120 : vector<1x1x2x96xf32> to vector<2x96xf32>
      %c13 = arith.constant 13 : index
      %c0_81 = arith.constant 0 : index
      %c0_82 = arith.constant 0 : index
      %122 = vector.load %arg2[%c13, %c0_81, %c0_82] : memref<25x1x96xf32, #tpu.memory_space<vmem>>, vector<1x1x96xf32>
      %123 = vector.shape_cast %122 : vector<1x1x96xf32> to vector<1x96xf32>
      %124 = vector.broadcast %123 : vector<1x96xf32> to vector<2x96xf32>
      %125 = arith.mulf %121, %124 : vector<2x96xf32>
      %126 = arith.addf %117, %125 : vector<2x96xf32>
      %c2_i32_83 = arith.constant 2 : i32
      %127 = arith.addi %1, %c2_i32_83 : i32
      %c0_84 = arith.constant 0 : index
      %128 = arith.index_cast %127 : i32 to index
      %c2_85 = arith.constant 2 : index
      %c0_86 = arith.constant 0 : index
      %129 = vector.load %arg1[%c0_84, %128, %c2_85, %c0_86] : memref<1x16x4x96xf32, #tpu.memory_space<vmem>>, vector<1x1x2x96xf32>
      %130 = vector.shape_cast %129 : vector<1x1x2x96xf32> to vector<2x96xf32>
      %c14 = arith.constant 14 : index
      %c0_87 = arith.constant 0 : index
      %c0_88 = arith.constant 0 : index
      %131 = vector.load %arg2[%c14, %c0_87, %c0_88] : memref<25x1x96xf32, #tpu.memory_space<vmem>>, vector<1x1x96xf32>
      %132 = vector.shape_cast %131 : vector<1x1x96xf32> to vector<1x96xf32>
      %133 = vector.broadcast %132 : vector<1x96xf32> to vector<2x96xf32>
      %134 = arith.mulf %130, %133 : vector<2x96xf32>
      %135 = arith.addf %126, %134 : vector<2x96xf32>
      %c3_i32 = arith.constant 3 : i32
      %136 = arith.addi %1, %c3_i32 : i32
      %c0_89 = arith.constant 0 : index
      %137 = arith.index_cast %136 : i32 to index
      %c0_90 = arith.constant 0 : index
      %c0_91 = arith.constant 0 : index
      %138 = vector.load %arg1[%c0_89, %137, %c0_90, %c0_91] : memref<1x16x4x96xf32, #tpu.memory_space<vmem>>, vector<1x1x2x96xf32>
      %139 = vector.shape_cast %138 : vector<1x1x2x96xf32> to vector<2x96xf32>
      %c15 = arith.constant 15 : index
      %c0_92 = arith.constant 0 : index
      %c0_93 = arith.constant 0 : index
      %140 = vector.load %arg2[%c15, %c0_92, %c0_93] : memref<25x1x96xf32, #tpu.memory_space<vmem>>, vector<1x1x96xf32>
      %141 = vector.shape_cast %140 : vector<1x1x96xf32> to vector<1x96xf32>
      %142 = vector.broadcast %141 : vector<1x96xf32> to vector<2x96xf32>
      %143 = arith.mulf %139, %142 : vector<2x96xf32>
      %144 = arith.addf %135, %143 : vector<2x96xf32>
      %c11_i32 = arith.constant 11 : i32
      %145 = arith.addi %1, %c11_i32 : i32
      %c0_94 = arith.constant 0 : index
      %146 = arith.index_cast %145 : i32 to index
      %c0_95 = arith.constant 0 : index
      %c0_96 = arith.constant 0 : index
      %147 = vector.load %arg1[%c0_94, %146, %c0_95, %c0_96] : memref<1x16x4x96xf32, #tpu.memory_space<vmem>>, vector<1x1x2x96xf32>
      %148 = vector.shape_cast %147 : vector<1x1x2x96xf32> to vector<2x96xf32>
      %c16 = arith.constant 16 : index
      %c0_97 = arith.constant 0 : index
      %c0_98 = arith.constant 0 : index
      %149 = vector.load %arg2[%c16, %c0_97, %c0_98] : memref<25x1x96xf32, #tpu.memory_space<vmem>>, vector<1x1x96xf32>
      %150 = vector.shape_cast %149 : vector<1x1x96xf32> to vector<1x96xf32>
      %151 = vector.broadcast %150 : vector<1x96xf32> to vector<2x96xf32>
      %152 = arith.mulf %148, %151 : vector<2x96xf32>
      %153 = arith.addf %144, %152 : vector<2x96xf32>
      %c3_i32_99 = arith.constant 3 : i32
      %154 = arith.addi %1, %c3_i32_99 : i32
      %c0_100 = arith.constant 0 : index
      %155 = arith.index_cast %154 : i32 to index
      %c1_101 = arith.constant 1 : index
      %c0_102 = arith.constant 0 : index
      %156 = vector.load %arg1[%c0_100, %155, %c1_101, %c0_102] : memref<1x16x4x96xf32, #tpu.memory_space<vmem>>, vector<1x1x2x96xf32>
      %157 = vector.shape_cast %156 : vector<1x1x2x96xf32> to vector<2x96xf32>
      %c17 = arith.constant 17 : index
      %c0_103 = arith.constant 0 : index
      %c0_104 = arith.constant 0 : index
      %158 = vector.load %arg2[%c17, %c0_103, %c0_104] : memref<25x1x96xf32, #tpu.memory_space<vmem>>, vector<1x1x96xf32>
      %159 = vector.shape_cast %158 : vector<1x1x96xf32> to vector<1x96xf32>
      %160 = vector.broadcast %159 : vector<1x96xf32> to vector<2x96xf32>
      %161 = arith.mulf %157, %160 : vector<2x96xf32>
      %162 = arith.addf %153, %161 : vector<2x96xf32>
      %c11_i32_105 = arith.constant 11 : i32
      %163 = arith.addi %1, %c11_i32_105 : i32
      %c0_106 = arith.constant 0 : index
      %164 = arith.index_cast %163 : i32 to index
      %c1_107 = arith.constant 1 : index
      %c0_108 = arith.constant 0 : index
      %165 = vector.load %arg1[%c0_106, %164, %c1_107, %c0_108] : memref<1x16x4x96xf32, #tpu.memory_space<vmem>>, vector<1x1x2x96xf32>
      %166 = vector.shape_cast %165 : vector<1x1x2x96xf32> to vector<2x96xf32>
      %c18 = arith.constant 18 : index
      %c0_109 = arith.constant 0 : index
      %c0_110 = arith.constant 0 : index
      %167 = vector.load %arg2[%c18, %c0_109, %c0_110] : memref<25x1x96xf32, #tpu.memory_space<vmem>>, vector<1x1x96xf32>
      %168 = vector.shape_cast %167 : vector<1x1x96xf32> to vector<1x96xf32>
      %169 = vector.broadcast %168 : vector<1x96xf32> to vector<2x96xf32>
      %170 = arith.mulf %166, %169 : vector<2x96xf32>
      %171 = arith.addf %162, %170 : vector<2x96xf32>
      %c3_i32_111 = arith.constant 3 : i32
      %172 = arith.addi %1, %c3_i32_111 : i32
      %c0_112 = arith.constant 0 : index
      %173 = arith.index_cast %172 : i32 to index
      %c2_113 = arith.constant 2 : index
      %c0_114 = arith.constant 0 : index
      %174 = vector.load %arg1[%c0_112, %173, %c2_113, %c0_114] : memref<1x16x4x96xf32, #tpu.memory_space<vmem>>, vector<1x1x2x96xf32>
      %175 = vector.shape_cast %174 : vector<1x1x2x96xf32> to vector<2x96xf32>
      %c19 = arith.constant 19 : index
      %c0_115 = arith.constant 0 : index
      %c0_116 = arith.constant 0 : index
      %176 = vector.load %arg2[%c19, %c0_115, %c0_116] : memref<25x1x96xf32, #tpu.memory_space<vmem>>, vector<1x1x96xf32>
      %177 = vector.shape_cast %176 : vector<1x1x96xf32> to vector<1x96xf32>
      %178 = vector.broadcast %177 : vector<1x96xf32> to vector<2x96xf32>
      %179 = arith.mulf %175, %178 : vector<2x96xf32>
      %180 = arith.addf %171, %179 : vector<2x96xf32>
      %c4_i32 = arith.constant 4 : i32
      %181 = arith.addi %1, %c4_i32 : i32
      %c0_117 = arith.constant 0 : index
      %182 = arith.index_cast %181 : i32 to index
      %c0_118 = arith.constant 0 : index
      %c0_119 = arith.constant 0 : index
      %183 = vector.load %arg1[%c0_117, %182, %c0_118, %c0_119] : memref<1x16x4x96xf32, #tpu.memory_space<vmem>>, vector<1x1x2x96xf32>
      %184 = vector.shape_cast %183 : vector<1x1x2x96xf32> to vector<2x96xf32>
      %c20 = arith.constant 20 : index
      %c0_120 = arith.constant 0 : index
      %c0_121 = arith.constant 0 : index
      %185 = vector.load %arg2[%c20, %c0_120, %c0_121] : memref<25x1x96xf32, #tpu.memory_space<vmem>>, vector<1x1x96xf32>
      %186 = vector.shape_cast %185 : vector<1x1x96xf32> to vector<1x96xf32>
      %187 = vector.broadcast %186 : vector<1x96xf32> to vector<2x96xf32>
      %188 = arith.mulf %184, %187 : vector<2x96xf32>
      %189 = arith.addf %180, %188 : vector<2x96xf32>
      %c12_i32 = arith.constant 12 : i32
      %190 = arith.addi %1, %c12_i32 : i32
      %c0_122 = arith.constant 0 : index
      %191 = arith.index_cast %190 : i32 to index
      %c0_123 = arith.constant 0 : index
      %c0_124 = arith.constant 0 : index
      %192 = vector.load %arg1[%c0_122, %191, %c0_123, %c0_124] : memref<1x16x4x96xf32, #tpu.memory_space<vmem>>, vector<1x1x2x96xf32>
      %193 = vector.shape_cast %192 : vector<1x1x2x96xf32> to vector<2x96xf32>
      %c21 = arith.constant 21 : index
      %c0_125 = arith.constant 0 : index
      %c0_126 = arith.constant 0 : index
      %194 = vector.load %arg2[%c21, %c0_125, %c0_126] : memref<25x1x96xf32, #tpu.memory_space<vmem>>, vector<1x1x96xf32>
      %195 = vector.shape_cast %194 : vector<1x1x96xf32> to vector<1x96xf32>
      %196 = vector.broadcast %195 : vector<1x96xf32> to vector<2x96xf32>
      %197 = arith.mulf %193, %196 : vector<2x96xf32>
      %198 = arith.addf %189, %197 : vector<2x96xf32>
      %c4_i32_127 = arith.constant 4 : i32
      %199 = arith.addi %1, %c4_i32_127 : i32
      %c0_128 = arith.constant 0 : index
      %200 = arith.index_cast %199 : i32 to index
      %c1_129 = arith.constant 1 : index
      %c0_130 = arith.constant 0 : index
      %201 = vector.load %arg1[%c0_128, %200, %c1_129, %c0_130] : memref<1x16x4x96xf32, #tpu.memory_space<vmem>>, vector<1x1x2x96xf32>
      %202 = vector.shape_cast %201 : vector<1x1x2x96xf32> to vector<2x96xf32>
      %c22 = arith.constant 22 : index
      %c0_131 = arith.constant 0 : index
      %c0_132 = arith.constant 0 : index
      %203 = vector.load %arg2[%c22, %c0_131, %c0_132] : memref<25x1x96xf32, #tpu.memory_space<vmem>>, vector<1x1x96xf32>
      %204 = vector.shape_cast %203 : vector<1x1x96xf32> to vector<1x96xf32>
      %205 = vector.broadcast %204 : vector<1x96xf32> to vector<2x96xf32>
      %206 = arith.mulf %202, %205 : vector<2x96xf32>
      %207 = arith.addf %198, %206 : vector<2x96xf32>
      %c12_i32_133 = arith.constant 12 : i32
      %208 = arith.addi %1, %c12_i32_133 : i32
      %c0_134 = arith.constant 0 : index
      %209 = arith.index_cast %208 : i32 to index
      %c1_135 = arith.constant 1 : index
      %c0_136 = arith.constant 0 : index
      %210 = vector.load %arg1[%c0_134, %209, %c1_135, %c0_136] : memref<1x16x4x96xf32, #tpu.memory_space<vmem>>, vector<1x1x2x96xf32>
      %211 = vector.shape_cast %210 : vector<1x1x2x96xf32> to vector<2x96xf32>
      %c23 = arith.constant 23 : index
      %c0_137 = arith.constant 0 : index
      %c0_138 = arith.constant 0 : index
      %212 = vector.load %arg2[%c23, %c0_137, %c0_138] : memref<25x1x96xf32, #tpu.memory_space<vmem>>, vector<1x1x96xf32>
      %213 = vector.shape_cast %212 : vector<1x1x96xf32> to vector<1x96xf32>
      %214 = vector.broadcast %213 : vector<1x96xf32> to vector<2x96xf32>
      %215 = arith.mulf %211, %214 : vector<2x96xf32>
      %216 = arith.addf %207, %215 : vector<2x96xf32>
      %c4_i32_139 = arith.constant 4 : i32
      %217 = arith.addi %1, %c4_i32_139 : i32
      %c0_140 = arith.constant 0 : index
      %218 = arith.index_cast %217 : i32 to index
      %c2_141 = arith.constant 2 : index
      %c0_142 = arith.constant 0 : index
      %219 = vector.load %arg1[%c0_140, %218, %c2_141, %c0_142] : memref<1x16x4x96xf32, #tpu.memory_space<vmem>>, vector<1x1x2x96xf32>
      %220 = vector.shape_cast %219 : vector<1x1x2x96xf32> to vector<2x96xf32>
      %c24 = arith.constant 24 : index
      %c0_143 = arith.constant 0 : index
      %c0_144 = arith.constant 0 : index
      %221 = vector.load %arg2[%c24, %c0_143, %c0_144] : memref<25x1x96xf32, #tpu.memory_space<vmem>>, vector<1x1x96xf32>
      %222 = vector.shape_cast %221 : vector<1x1x96xf32> to vector<1x96xf32>
      %223 = vector.broadcast %222 : vector<1x96xf32> to vector<2x96xf32>
      %224 = arith.mulf %220, %223 : vector<2x96xf32>
      %225 = arith.addf %216, %224 : vector<2x96xf32>
      %cst = arith.constant 0.000000e+00 : f32
      %226 = vector.broadcast %cst : f32 to vector<6x96xf32>
      %227 = tpu.concatenate %225, %226 in 0 : vector<2x96xf32>, vector<6x96xf32> -> vector<8x96xf32>
      %228 = arith.truncf %227 : vector<8x96xf32> to vector<8x96xbf16>
      %c0_145 = arith.constant 0 : index
      %c0_146 = arith.constant 0 : index
      %229 = vector.load %arg3[%c0_145, %c0_146] : memref<96x192xbf16, #tpu.memory_space<vmem>>, vector<96x192xbf16>
      %cst_147 = arith.constant dense<0.000000e+00> : vector<8x192xf32>
      %230 = tpu.matmul %228, %229, %cst_147 {dimension_numbers = #tpu.dot_dimension_numbers<[1], [0], [0], [1], [0, 0, 1, 1], [], []>} : vector<8x96xbf16>, vector<96x192xbf16>, vector<8x192xf32> -> vector<8x192xf32>
      %231 = vector.extract_strided_slice %230 {offsets = [0, 0], sizes = [2, 192], strides = [1, 1]} : vector<8x192xf32> to vector<2x192xf32>
      %c0_148 = arith.constant 0 : index
      %c0_149 = arith.constant 0 : index
      %232 = vector.load %arg4[%c0_148, %c0_149] : memref<1x192xf32, #tpu.memory_space<vmem>>, vector<1x192xf32>
      %233 = vector.broadcast %232 : vector<1x192xf32> to vector<2x192xf32>
      %234 = arith.addf %231, %233 : vector<2x192xf32>
      %cst_150 = arith.constant 0.000000e+00 : f32
      %235 = vector.broadcast %cst_150 : f32 to vector<2x192xf32>
      %236 = arith.maximumf %234, %235 : vector<2x192xf32>
      %c2_i32_151 = arith.constant 2 : i32
      %237 = arith.muli %c2_i32_151, %arg7 : i32
      %c2_i32_152 = arith.constant 2 : i32
      %238 = arith.addi %237, %c2_i32_152 : i32
      %c0_153 = arith.constant 0 : index
      %239 = arith.index_cast %238 : i32 to index
      %c1_154 = arith.constant 1 : index
      %c0_155 = arith.constant 0 : index
      %240 = vector.load %arg1[%c0_153, %239, %c1_154, %c0_155] : memref<1x16x4x96xf32, #tpu.memory_space<vmem>>, vector<1x1x2x96xf32>
      %241 = vector.shape_cast %240 : vector<1x1x2x96xf32> to vector<2x96xf32>
      %cst_156 = arith.constant 0.000000e+00 : f32
      %242 = vector.broadcast %cst_156 : f32 to vector<6x96xf32>
      %243 = tpu.concatenate %241, %242 in 0 : vector<2x96xf32>, vector<6x96xf32> -> vector<8x96xf32>
      %244 = arith.truncf %243 : vector<8x96xf32> to vector<8x96xbf16>
      %c0_157 = arith.constant 0 : index
      %c0_158 = arith.constant 0 : index
      %245 = vector.load %arg5[%c0_157, %c0_158] : memref<96x192xbf16, #tpu.memory_space<vmem>>, vector<96x192xbf16>
      %cst_159 = arith.constant dense<0.000000e+00> : vector<8x192xf32>
      %246 = tpu.matmul %244, %245, %cst_159 {dimension_numbers = #tpu.dot_dimension_numbers<[1], [0], [0], [1], [0, 0, 1, 1], [], []>} : vector<8x96xbf16>, vector<96x192xbf16>, vector<8x192xf32> -> vector<8x192xf32>
      %247 = vector.extract_strided_slice %246 {offsets = [0, 0], sizes = [2, 192], strides = [1, 1]} : vector<8x192xf32> to vector<2x192xf32>
      %248 = arith.addf %236, %247 : vector<2x192xf32>
      %cst_160 = arith.constant 0.000000e+00 : f32
      %249 = vector.broadcast %cst_160 : f32 to vector<2x192xf32>
      %250 = arith.maximumf %248, %249 : vector<2x192xf32>
      %c0_161 = arith.constant 0 : index
      %251 = arith.index_cast %arg7 : i32 to index
      %c0_162 = arith.constant 0 : index
      %c0_163 = arith.constant 0 : index
      %252 = vector.load %arg6[%c0_161, %251, %c0_162, %c0_163] : memref<1x2x2x192xf32, #tpu.memory_space<vmem>>, vector<1x1x2x192xf32>
      %253 = vector.shape_cast %252 : vector<1x1x2x192xf32> to vector<2x192xf32>
      %254 = vector.shape_cast %250 : vector<2x192xf32> to vector<1x1x2x192xf32>
      tpu.vector_store %arg6[%c0_161, %251, %c0_162, %c0_163], %254 {strides = array<i32>} : memref<1x2x2x192xf32, #tpu.memory_space<vmem>>, vector<1x1x2x192xf32>,
    }
    %c2_i32_0 = arith.constant 2 : i32
    return
  }
  func.func @transform_0(%arg0: i32) -> (i32, i32, i32, i32) {
    %c0_i32 = arith.constant 0 : i32
    %c0_i32_0 = arith.constant 0 : i32
    %c0_i32_1 = arith.constant 0 : i32
    %c0_i32_2 = arith.constant 0 : i32
    return %arg0, %c0_i32, %c0_i32_0, %c0_i32_1 : i32, i32, i32, i32
  }
  func.func @transform_1(%arg0: i32) -> (i32, i32, i32) {
    %c0_i32 = arith.constant 0 : i32
    %c0_i32_0 = arith.constant 0 : i32
    %c0_i32_1 = arith.constant 0 : i32
    %c0_i32_2 = arith.constant 0 : i32
    return %c0_i32, %c0_i32_0, %c0_i32_1 : i32, i32, i32
  }
  func.func @transform_2(%arg0: i32) -> (i32, i32) {
    %c0_i32 = arith.constant 0 : i32
    %c0_i32_0 = arith.constant 0 : i32
    %c0_i32_1 = arith.constant 0 : i32
    return %c0_i32, %c0_i32_0 : i32, i32
  }
  func.func @transform_3(%arg0: i32) -> (i32, i32) {
    %c0_i32 = arith.constant 0 : i32
    %c0_i32_0 = arith.constant 0 : i32
    %c0_i32_1 = arith.constant 0 : i32
    return %c0_i32, %c0_i32_0 : i32, i32
  }
  func.func @transform_4(%arg0: i32) -> (i32, i32) {
    %c0_i32 = arith.constant 0 : i32
    %c0_i32_0 = arith.constant 0 : i32
    %c0_i32_1 = arith.constant 0 : i32
    return %c0_i32, %c0_i32_0 : i32, i32
  }
  func.func @transform_5(%arg0: i32) -> (i32, i32, i32, i32) {
    %c0_i32 = arith.constant 0 : i32
    %c0_i32_0 = arith.constant 0 : i32
    %c0_i32_1 = arith.constant 0 : i32
    %c0_i32_2 = arith.constant 0 : i32
    return %arg0, %c0_i32, %c0_i32_0, %c0_i32_1 : i32, i32, i32, i32
  }
}

module attributes {stable_mosaic.version = 11 : i64} {
  func.func @kernel(%arg0: i32, %arg1: memref<1x4x192xf32, #tpu.memory_space<vmem>>, %arg2: memref<192x76xbf16, #tpu.memory_space<vmem>>, %arg3: memref<1x76xf32, #tpu.memory_space<vmem>>, %arg4: memref<1x4x76xf32, #tpu.memory_space<vmem>>) attributes {dimension_semantics = [#tpu.dimension_semantics<parallel>], iteration_bounds = array<i64: 2>, scalar_prefetch = 0 : i64, scratch_operands = 0 : i64, tpu.core_type = #tpu.core_type<tc>, window_params = [{transform_indices = @transform_0, window_bounds = array<i64: 1, 4, 192>}, {pipeline_mode = #tpu.pipeline_mode<synchronous>, transform_indices = @transform_1, window_bounds = array<i64: 192, 76>}, {pipeline_mode = #tpu.pipeline_mode<synchronous>, transform_indices = @transform_2, window_bounds = array<i64: 1, 76>}, {transform_indices = @transform_3, window_bounds = array<i64: 1, 4, 76>}]} {
    %c0 = arith.constant 0 : index
    %c0_0 = arith.constant 0 : index
    %c0_1 = arith.constant 0 : index
    %0 = vector.load %arg1[%c0, %c0_0, %c0_1] : memref<1x4x192xf32, #tpu.memory_space<vmem>>, vector<1x4x192xf32>
    %1 = vector.shape_cast %0 : vector<1x4x192xf32> to vector<4x192xf32>
    %cst = arith.constant 0.000000e+00 : f32
    %2 = vector.broadcast %cst : f32 to vector<4x192xf32>
    %3 = tpu.concatenate %1, %2 in 0 : vector<4x192xf32>, vector<4x192xf32> -> vector<8x192xf32>
    %4 = arith.truncf %3 : vector<8x192xf32> to vector<8x192xbf16>
    %c0_2 = arith.constant 0 : index
    %c0_3 = arith.constant 0 : index
    %5 = vector.load %arg2[%c0_2, %c0_3] : memref<192x76xbf16, #tpu.memory_space<vmem>>, vector<192x76xbf16>
    %cst_4 = arith.constant dense<0.000000e+00> : vector<8x76xf32>
    %6 = tpu.matmul %4, %5, %cst_4 {dimension_numbers = #tpu.dot_dimension_numbers<[1], [0], [0], [1], [0, 0, 1, 1], [], []>} : vector<8x192xbf16>, vector<192x76xbf16>, vector<8x76xf32> -> vector<8x76xf32>
    %c0_5 = arith.constant 0 : index
    %c0_6 = arith.constant 0 : index
    %7 = vector.load %arg3[%c0_5, %c0_6] : memref<1x76xf32, #tpu.memory_space<vmem>>, vector<1x76xf32>
    %8 = vector.broadcast %7 : vector<1x76xf32> to vector<8x76xf32>
    %9 = arith.addf %6, %8 : vector<8x76xf32>
    %10 = tpu.iota {dimensions = array<i32: 1>} : vector<8x76xi32>
    %c16_i32 = arith.constant 16 : i32
    %11 = vector.broadcast %c16_i32 : i32 to vector<8x76xi32>
    %12 = arith.cmpi sge, %10, %11 : vector<8x76xi32>
    %c20_i32 = arith.constant 20 : i32
    %13 = vector.broadcast %c20_i32 : i32 to vector<8x76xi32>
    %14 = arith.cmpi slt, %10, %13 : vector<8x76xi32>
    %15 = arith.andi %12, %14 : vector<8x76xi1>
    %16 = arith.negf %9 : vector<8x76xf32>
    %17 = math.exp %16 : vector<8x76xf32>
    %cst_7 = arith.constant 1.000000e+00 : f32
    %18 = vector.broadcast %cst_7 : f32 to vector<8x76xf32>
    %19 = arith.addf %18, %17 : vector<8x76xf32>
    %20 = arith.divf %18, %19 : vector<8x76xf32>
    %21 = arith.select %15, %20, %9 : vector<8x76xi1>, vector<8x76xf32>
    %22 = vector.extract_strided_slice %21 {offsets = [0, 0], sizes = [4, 76], strides = [1, 1]} : vector<8x76xf32> to vector<4x76xf32>
    %c0_8 = arith.constant 0 : index
    %c0_9 = arith.constant 0 : index
    %c0_10 = arith.constant 0 : index
    %23 = vector.load %arg4[%c0_8, %c0_9, %c0_10] : memref<1x4x76xf32, #tpu.memory_space<vmem>>, vector<1x4x76xf32>
    %24 = vector.shape_cast %23 : vector<1x4x76xf32> to vector<4x76xf32>
    %25 = vector.shape_cast %22 : vector<4x76xf32> to vector<1x4x76xf32>
    tpu.vector_store %arg4[%c0_8, %c0_9, %c0_10], %25 {strides = array<i32>} : memref<1x4x76xf32, #tpu.memory_space<vmem>>, vector<1x4x76xf32>,
    return
  }
  func.func @transform_0(%arg0: i32) -> (i32, i32, i32) {
    %c0_i32 = arith.constant 0 : i32
    %c0_i32_0 = arith.constant 0 : i32
    %c0_i32_1 = arith.constant 0 : i32
    return %arg0, %c0_i32, %c0_i32_0 : i32, i32, i32
  }
  func.func @transform_1(%arg0: i32) -> (i32, i32) {
    %c0_i32 = arith.constant 0 : i32
    %c0_i32_0 = arith.constant 0 : i32
    %c0_i32_1 = arith.constant 0 : i32
    return %c0_i32, %c0_i32_0 : i32, i32
  }
  func.func @transform_2(%arg0: i32) -> (i32, i32) {
    %c0_i32 = arith.constant 0 : i32
    %c0_i32_0 = arith.constant 0 : i32
    %c0_i32_1 = arith.constant 0 : i32
    return %c0_i32, %c0_i32_0 : i32, i32
  }
  func.func @transform_3(%arg0: i32) -> (i32, i32, i32) {
    %c0_i32 = arith.constant 0 : i32
    %c0_i32_0 = arith.constant 0 : i32
    %c0_i32_1 = arith.constant 0 : i32
    return %arg0, %c0_i32, %c0_i32_0 : i32, i32, i32
  }
}

</mosaic_0001>

<bundles_post_ra>
// kernel: blazeface_full_forward.22
= control target key start
LH: loop header
LB: loop body
LE: loop exit
PB: predicated region body
PF: predicated region fallthrough
CT: control target
= control target key end

     0   :  { %s754_s12 = smov 0   ;;  %s946_s0 = inlined_call_operand.vmem [shape: f32[2,256,75], index: 0, kind: input, shape index: {}]   ;;  %s947_s1 = inlined_call_operand.vmem [shape: bf16[75,32], index: 1, kind: input, shape index: {}]   ;;  %s948_s2 = inlined_call_operand.vmem [shape: f32[1,32], index: 2, kind: input, shape index: {}]   ;;  %s949_s3 = inlined_call_operand.vmem [shape: f32[2,256,32], index: 3, kind: output, shape index: {}]  }
   0x1 LB: > { %s603_s13 = sadd.s32 4294967295, %s731_s12   ;;  %p607_p0 = scmp.ge.s32.totalorder %s731_s12, 1  ;;  %s731_s12 = sphi %s754_s12, %s13_s12  }
   0x2   : > { %p137_p1 = scmp.lt.s32.totalorder %s731_s12, 3 }
   0x4   : > { %p138_p2 = pnand %p607_p0, %p137_p1 }
   0x5   : > { %v720_v0 = vld [vmem:[%s947_s1] sm:$0xff] (!%p138_p2)   ;;  %v721_v1 = vld [vmem:[%s947_s1 + $0x8] sm:$0xff] (!%p138_p2)   ;;  %vm315_vm0 = vcmask (!%p138_p2), 1044480   ;;  %v722_v2 = vld [vmem:[%s947_s1 + $0x10] sm:$0xff] (!%p138_p2)   ;;  %p161_p3 = scmp.lt.s32.totalorder (!%p138_p2), %s603_s13, 1  ;;  %vm316_vm1 = vcmask (!%p138_p2), 1045504  }
   0x6   : > { %141 = sbr.rel (%p138_p2) target bundleno = 271 (0x10f), region = 32  ;;  %659 = vmatprep.subr.bf16.mxu0 (!%p138_p2), %v720_v0  ;;  %701 = vmatprep.subr.bf16.mxu1 (!%p138_p2), %v720_v0  ;;  %v733_v3 = vmov (!%p138_p2), 65535   ;;  %v723_v5 = vld [vmem:[%s947_s1 + $0x18] sm:$0xff] (!%p138_p2)   ;;  %v724_v6 = vld [vmem:[%s947_s1 + $0x20] sm:$0x3f] (!%p138_p2)   ;;  %vm266_vm2 = vcmask (!%p138_p2), 613376  }
   0x7   : > { %660 = vmatpush3.bf16.msra.mxu0 (!%p138_p2), %v720_v0  ;;  %706 = vmatpush3.bf16.msra.mxu1 (!%p138_p2), %v720_v0  ;;  %v317_v4 = vsel (!%p138_p2), %vm315_vm0, 4294967295, %v733_v3  ;;  %v838_v57 = vld [vmem:[%s948_s2] ss:$0 sm:$0xff] (!%p138_p2)  ;;  %vm515_vm3 = vcmask (!%p138_p2), 261120  }
   0x8   : > { %661 = vmatprep.subr.bf16.mxu0 (!%p138_p2), %v721_v1  ;;  %702 = vmatprep.subr.bf16.mxu1 (!%p138_p2), %v721_v1  ;;  %v318_v7 = vsel (!%p138_p2), %vm316_vm1, %v317_v4, 0 }
   0x9   : > { %v320_v11 = vand.u32 (!%p138_p2), %v724_v6, %v318_v7 }
   0xb   : > { %662 = vmatpush3.bf16.msra.mxu0 (!%p138_p2), %v721_v1  ;;  %707 = vmatpush3.bf16.msra.mxu1 (!%p138_p2), %v721_v1 }
   0xc   : > { %663 = vmatprep.subr.bf16.mxu0 (!%p138_p2), %v722_v2  ;;  %703 = vmatprep.subr.bf16.mxu1 (!%p138_p2), %v722_v2 }
   0xd   : > { %s951_s13 = smov (!%p161_p3, %s603_s13), 1 }
   0xe   : > { %s636_s24 = sshll.u32 %s951_s13, 8 }
   0xf   : > { %s785_s27 = scalar_lea.vmem %s946_s0, %s636_s24  ;;  %664 = vmatpush3.bf16.msra.mxu0 %v722_v2  ;;  %708 = vmatpush3.bf16.msra.mxu1 %v722_v2  ;;  %s847_s5 = scalar_lea.vmem %s949_s3, %s636_s24 }
  0x10   : > { %v172_v8 = vld [vmem:[%s785_s27] sm:$0xff]  ;;  %v173_v9 = vld [vmem:[%s785_s27 + $0x8] sm:$0xff]  ;;  %665 = vmatprep.subr.bf16.mxu0 %v723_v5  ;;  %704 = vmatprep.subr.bf16.mxu1 %v723_v5  ;;  %v174_v15 = vld [vmem:[%s785_s27 + $0x10] sm:$0xff] }
  0x11   : > { %v188_v10 = vld [vmem:[%s785_s27 + $0x80] sm:$0xff]  ;;  %v204_v12 = vpack.c.bf16 %v173_v9, %v172_v8  ;;  %v189_v13 = vld [vmem:[%s785_s27 + $0x88] sm:$0xff]  ;;  %v175_v16 = vld [vmem:[%s785_s27 + $0x18] sm:$0xff] }
  0x12   : > { %v212_v14 = vpack.c.bf16 %v189_v13, %v188_v10  ;;  %v190_v17 = vld [vmem:[%s785_s27 + $0x90] sm:$0xff]  ;;  %v191_v18 = vld [vmem:[%s785_s27 + $0x98] sm:$0xff]  ;;  %v176_v19 = vld [vmem:[%s785_s27 + $0x20] sm:$0xff]  ;;  %v205_v23 = vpack.c.bf16 %v175_v16, %v174_v15 }
  0x13   : > { %669 = vmatprep.mubr.msk.bf16.mxu0 %vm266_vm2, %v204_v12  ;;  %666 = vmatpush3.bf16.msra.mxu0 %v723_v5  ;;  %v177_v20 = vld [vmem:[%s785_s27 + $0x28] sm:$0xff]  ;;  %v192_v21 = vld [vmem:[%s785_s27 + $0xa0] sm:$0xff]  ;;  %v213_v24 = vpack.c.bf16 %v191_v18, %v190_v17  ;;  %v178_v27 = vld [vmem:[%s785_s27 + $0x30] sm:$0xff] }
  0x14   : > { %709 = vmatpush3.bf16.msra.mxu1 %v723_v5  ;;  %667 = vmatprep.subr.bf16.mxu0 %v320_v11  ;;  %v193_v22 = vld [vmem:[%s785_s27 + $0xa8] sm:$0xff]  ;;  %v206_v25 = vpack.c.bf16 %v177_v20, %v176_v19  ;;  %v179_v28 = vld [vmem:[%s785_s27 + $0x38] sm:$0xff]  ;;  %v194_v29 = vld [vmem:[%s785_s27 + $0xb0] sm:$0xff] }
  0x15   : > { %705 = vmatprep.subr.bf16.mxu1 %v320_v11  ;;  %685 = vmatprep.mubr.msk.bf16.mxu1 %vm266_vm2, %v212_v14  ;;  %v214_v26 = vpack.c.bf16 %v193_v22, %v192_v21  ;;  %v195_v30 = vld [vmem:[%s785_s27 + $0xb8] sm:$0xff]  ;;  %v180_v31 = vld [vmem:[%s785_s27 + $0x40] sm:$0xff]  ;;  %v181_v32 = vld [vmem:[%s785_s27 + $0x48] sm:$0xff]  ;;  %v207_v35 = vpack.c.bf16 %v179_v28, %v178_v27 }
  0x16   : > { %v196_v33 = vld [vmem:[%s785_s27 + $0xc0] sm:$0xff]  ;;  %v197_v34 = vld [vmem:[%s785_s27 + $0xc8] sm:$0xff]  ;;  %v215_v36 = vpack.c.bf16 %v195_v30, %v194_v29  ;;  %v208_v37 = vpack.c.bf16 %v181_v32, %v180_v31  ;;  %v182_v39 = vld [vmem:[%s785_s27 + $0x50] sm:$0xff] }
  0x17   : > { %668 = vmatpush3.bf16.msra.mxu0 %v320_v11  ;;  %v216_v38 = vpack.c.bf16 %v197_v34, %v196_v33  ;;  %v183_v40 = vld [vmem:[%s785_s27 + $0x58] sm:$0xff]  ;;  %v198_v41 = vld [vmem:[%s785_s27 + $0xd0] sm:$0xff]  ;;  %v184_v43 = vld [vmem:[%s785_s27 + $0x60] sm:$0xff] }
  0x18   : > { %710 = vmatpush3.bf16.msra.mxu1 %v320_v11  ;;  %v199_v42 = vld [vmem:[%s785_s27 + $0xd8] sm:$0xff]  ;;  %v185_v44 = vld [vmem:[%s785_s27 + $0x68] sm:$0xff]  ;;  %v200_v45 = vld [vmem:[%s785_s27 + $0xe0] sm:$0xff]  ;;  %v209_v47 = vpack.c.bf16 %v183_v40, %v182_v39 }
  0x19   : > { %v201_v46 = vld [vmem:[%s785_s27 + $0xe8] sm:$0xff]  ;;  %v217_v48 = vpack.c.bf16 %v199_v42, %v198_v41  ;;  %v210_v49 = vpack.c.bf16 %v185_v44, %v184_v43  ;;  %v186_v51 = vld [vmem:[%s785_s27 + $0x70] sm:$0xff]  ;;  %v187_v52 = vld [vmem:[%s785_s27 + $0x78] sm:$0xff] }
  0x1a   : > { %670 = vmatmul.mubr.msk.bf16.vlgmr.msra.gmra.mrb[0].mxu0 %vm266_vm2, %v205_v23  ;;  %v218_v50 = vpack.c.bf16 %v201_v46, %v200_v45  ;;  %v202_v53 = vld [vmem:[%s785_s27 + $0xf0] sm:$0xff]  ;;  %v203_v54 = vld [vmem:[%s785_s27 + $0xf8] sm:$0xff]  ;;  %v211_v55 = vpack.c.bf16 %v187_v52, %v186_v51 }
  0x1b   : > { %686 = vmatmul.mubr.msk.bf16.vlgmr.msra.gmra.mrb[0].mxu1 %vm266_vm2, %v213_v24  ;;  %673 = vmatprep.mubr.msk.bf16.mxu0 %vm266_vm2, %v206_v25  ;;  %v219_v56 = vpack.c.bf16 %v203_v54, %v202_v53 }
  0x1c   : > { %689 = vmatprep.mubr.msk.bf16.mxu1 %vm266_vm2, %v214_v26 }
  0x22   : > { %674 = vmatmul.mubr.msk.bf16.gmra.mrb[4].mxu0 %vm266_vm2, %v207_v35 }
  0x23   : > { %690 = vmatmul.mubr.msk.bf16.gmra.mrb[4].mxu1 %vm266_vm2, %v215_v36  ;;  %677 = vmatprep.mubr.msk.bf16.mxu0 %vm266_vm2, %v208_v37 }
  0x24   : > { %693 = vmatprep.mubr.msk.bf16.mxu1 %vm266_vm2, %v216_v38 }
  0x2a   : > { %678 = vmatmul.mubr.msk.bf16.gmra.mrb[8].mxu0 %vm266_vm2, %v209_v47 }
  0x2b   : > { %694 = vmatmul.mubr.msk.bf16.gmra.mrb[8].mxu1 %vm266_vm2, %v217_v48  ;;  %681 = vmatprep.mubr.msk.bf16.mxu0 %vm266_vm2, %v210_v49 }
  0x2c   : > { %697 = vmatprep.mubr.msk.bf16.mxu1 %vm266_vm2, %v218_v50 }
  0x32   : > { %682 = vmatmul.mubr.msk.bf16.gmra.mrb[12].mxu0 %vm266_vm2, %v211_v55 }
  0x33   : > { %698 = vmatmul.mubr.msk.bf16.gmra.mrb[12].mxu1 %vm266_vm2, %v219_v56 }
  0xed   : > { %v671_v58 = vpop.f32.mrb[0].mxu0 }
  0xee   : > { %v687_v59 = vpop.f32.mrb[0].mxu1  ;;  %v365_v60 = vadd.f32 %v671_v58, %v838_v57  ;;  %v356_v62 = vpop.f32.mrb[1].mxu0 }
  0xef   : > { %v429_v61 = vadd.f32 %v687_v59, %v838_v57  ;;  %v420_v63 = vpop.f32.mrb[1].mxu1  ;;  %v357_v0 = vadd.f32 %v838_v57, %v356_v62  ;;  %v672_v2 = vpop.f32.mrb[2].mxu0 }
  0xf0   : > { %v421_v1 = vadd.f32 %v838_v57, %v420_v63  ;;  %v688_v3 = vpop.f32.mrb[2].mxu1  ;;  %v485_v4 = vmax.f32 %v365_v60, 0.0  ;;  %v368_v6 = vadd.f32 %v672_v2, %v838_v57  ;;  %v359_v8 = vpop.f32.mrb[3].mxu0 }
  0xf1   : > { %v501_v5 = vmax.f32 %v429_v61, 0.0  ;;  %v432_v7 = vadd.f32 %v688_v3, %v838_v57  ;;  %v423_v9 = vpop.f32.mrb[3].mxu1  ;;  %v483_v10 = vmax.f32 %v357_v0, 0.0  ;;  %v360_v12 = vadd.f32 %v838_v57, %v359_v8 }
  0xf2   : > { %v499_v11 = vmax.f32 %v421_v1, 0.0  ;;  %v424_v13 = vadd.f32 %v838_v57, %v423_v9  ;;  %518 = vst.msk [vmem:[%s847_s5 + $0x10] sm:$0xff] %vm515_vm3, %v485_v4  ;;  %v486_v14 = vmax.f32 %v368_v6, 0.0 }
  0xf3   : > { %534 = vst.msk [vmem:[%s847_s5 + $0x90] sm:$0xff] %vm515_vm3, %v501_v5  ;;  %v502_v15 = vmax.f32 %v432_v7, 0.0  ;;  %516 = vst.msk [vmem:[%s847_s5] sm:$0xff] %vm515_vm3, %v483_v10  ;;  %v484_v16 = vmax.f32 %v360_v12, 0.0 }
  0xf4   : > { %532 = vst.msk [vmem:[%s847_s5 + $0x80] sm:$0xff] %vm515_vm3, %v499_v11  ;;  %v500_v17 = vmax.f32 %v424_v13, 0.0  ;;  %519 = vst.msk [vmem:[%s847_s5 + $0x18] sm:$0xff] %vm515_vm3, %v486_v14 }
  0xf5   : > { %535 = vst.msk [vmem:[%s847_s5 + $0x98] sm:$0xff] %vm515_vm3, %v502_v15  ;;  %517 = vst.msk [vmem:[%s847_s5 + $0x8] sm:$0xff] %vm515_vm3, %v484_v16  ;;  %v675_v18 = vpop.f32.mrb[4].mxu0 }
  0xf6   : > { %533 = vst.msk [vmem:[%s847_s5 + $0x88] sm:$0xff] %vm515_vm3, %v500_v17  ;;  %v691_v19 = vpop.f32.mrb[4].mxu1  ;;  %v381_v20 = vadd.f32 %v675_v18, %v838_v57  ;;  %v372_v22 = vpop.f32.mrb[5].mxu0 }
  0xf7   : > { %v445_v21 = vadd.f32 %v691_v19, %v838_v57  ;;  %v436_v23 = vpop.f32.mrb[5].mxu1  ;;  %v373_v24 = vadd.f32 %v838_v57, %v372_v22  ;;  %v676_v26 = vpop.f32.mrb[6].mxu0 }
  0xf8   : > { %v437_v25 = vadd.f32 %v838_v57, %v436_v23  ;;  %v692_v27 = vpop.f32.mrb[6].mxu1  ;;  %v489_v28 = vmax.f32 %v381_v20, 0.0  ;;  %v384_v30 = vadd.f32 %v676_v26, %v838_v57  ;;  %v375_v32 = vpop.f32.mrb[7].mxu0 }
  0xf9   : > { %v505_v29 = vmax.f32 %v445_v21, 0.0  ;;  %v448_v31 = vadd.f32 %v692_v27, %v838_v57  ;;  %v439_v33 = vpop.f32.mrb[7].mxu1  ;;  %v487_v34 = vmax.f32 %v373_v24, 0.0  ;;  %v376_v36 = vadd.f32 %v838_v57, %v375_v32 }
  0xfa   : > { %v503_v35 = vmax.f32 %v437_v25, 0.0  ;;  %v440_v37 = vadd.f32 %v838_v57, %v439_v33  ;;  %522 = vst.msk [vmem:[%s847_s5 + $0x30] sm:$0xff] %vm515_vm3, %v489_v28  ;;  %v490_v38 = vmax.f32 %v384_v30, 0.0 }
  0xfb   : > { %538 = vst.msk [vmem:[%s847_s5 + $0xb0] sm:$0xff] %vm515_vm3, %v505_v29  ;;  %v506_v39 = vmax.f32 %v448_v31, 0.0  ;;  %520 = vst.msk [vmem:[%s847_s5 + $0x20] sm:$0xff] %vm515_vm3, %v487_v34  ;;  %v488_v40 = vmax.f32 %v376_v36, 0.0 }
  0xfc   : > { %536 = vst.msk [vmem:[%s847_s5 + $0xa0] sm:$0xff] %vm515_vm3, %v503_v35  ;;  %v504_v41 = vmax.f32 %v440_v37, 0.0  ;;  %523 = vst.msk [vmem:[%s847_s5 + $0x38] sm:$0xff] %vm515_vm3, %v490_v38 }
  0xfd   : > { %539 = vst.msk [vmem:[%s847_s5 + $0xb8] sm:$0xff] %vm515_vm3, %v506_v39  ;;  %521 = vst.msk [vmem:[%s847_s5 + $0x28] sm:$0xff] %vm515_vm3, %v488_v40  ;;  %v679_v42 = vpop.f32.mrb[8].mxu0 }
  0xfe   : > { %537 = vst.msk [vmem:[%s847_s5 + $0xa8] sm:$0xff] %vm515_vm3, %v504_v41  ;;  %v695_v43 = vpop.f32.mrb[8].mxu1  ;;  %v397_v44 = vadd.f32 %v679_v42, %v838_v57  ;;  %v388_v46 = vpop.f32.mrb[9].mxu0 }
  0xff   : > { %v461_v45 = vadd.f32 %v695_v43, %v838_v57  ;;  %v452_v47 = vpop.f32.mrb[9].mxu1  ;;  %v389_v48 = vadd.f32 %v838_v57, %v388_v46  ;;  %v680_v50 = vpop.f32.mrb[10].mxu0 }
 0x100   : > { %v453_v49 = vadd.f32 %v838_v57, %v452_v47  ;;  %v696_v51 = vpop.f32.mrb[10].mxu1  ;;  %v493_v52 = vmax.f32 %v397_v44, 0.0  ;;  %v400_v54 = vadd.f32 %v680_v50, %v838_v57  ;;  %v391_v56 = vpop.f32.mrb[11].mxu0 }
 0x101   : > { %v509_v53 = vmax.f32 %v461_v45, 0.0  ;;  %v464_v55 = vadd.f32 %v696_v51, %v838_v57  ;;  %v455_v58 = vpop.f32.mrb[11].mxu1  ;;  %v491_v59 = vmax.f32 %v389_v48, 0.0  ;;  %v392_v61 = vadd.f32 %v838_v57, %v391_v56 }
 0x102   : > { %v507_v60 = vmax.f32 %v453_v49, 0.0  ;;  %v456_v62 = vadd.f32 %v838_v57, %v455_v58  ;;  %526 = vst.msk [vmem:[%s847_s5 + $0x50] sm:$0xff] %vm515_vm3, %v493_v52  ;;  %v494_v63 = vmax.f32 %v400_v54, 0.0 }
 0x103   : > { %542 = vst.msk [vmem:[%s847_s5 + $0xd0] sm:$0xff] %vm515_vm3, %v509_v53  ;;  %v510_v0 = vmax.f32 %v464_v55, 0.0  ;;  %524 = vst.msk [vmem:[%s847_s5 + $0x40] sm:$0xff] %vm515_vm3, %v491_v59  ;;  %v492_v1 = vmax.f32 %v392_v61, 0.0 }
 0x104   : > { %540 = vst.msk [vmem:[%s847_s5 + $0xc0] sm:$0xff] %vm515_vm3, %v507_v60  ;;  %v508_v2 = vmax.f32 %v456_v62, 0.0  ;;  %527 = vst.msk [vmem:[%s847_s5 + $0x58] sm:$0xff] %vm515_vm3, %v494_v63 }
 0x105   : > { %543 = vst.msk [vmem:[%s847_s5 + $0xd8] sm:$0xff] %vm515_vm3, %v510_v0  ;;  %525 = vst.msk [vmem:[%s847_s5 + $0x48] sm:$0xff] %vm515_vm3, %v492_v1  ;;  %v683_v3 = vpop.f32.mrb[12].mxu0 }
 0x106   : > { %541 = vst.msk [vmem:[%s847_s5 + $0xc8] sm:$0xff] %vm515_vm3, %v508_v2  ;;  %v699_v4 = vpop.f32.mrb[12].mxu1  ;;  %v413_v5 = vadd.f32 %v683_v3, %v838_v57  ;;  %v404_v7 = vpop.f32.mrb[13].mxu0 }
 0x107   : > { %v477_v6 = vadd.f32 %v699_v4, %v838_v57  ;;  %v468_v8 = vpop.f32.mrb[13].mxu1  ;;  %v405_v9 = vadd.f32 %v838_v57, %v404_v7  ;;  %v684_v11 = vpop.f32.mrb[14].mxu0 }
 0x108   : > { %v469_v10 = vadd.f32 %v838_v57, %v468_v8  ;;  %v700_v12 = vpop.f32.mrb[14].mxu1  ;;  %v497_v13 = vmax.f32 %v413_v5, 0.0  ;;  %v416_v15 = vadd.f32 %v684_v11, %v838_v57  ;;  %v407_v17 = vpop.f32.mrb[15].mxu0 }
 0x109   : > { %v513_v14 = vmax.f32 %v477_v6, 0.0  ;;  %v480_v16 = vadd.f32 %v700_v12, %v838_v57  ;;  %v471_v18 = vpop.f32.mrb[15].mxu1  ;;  %v495_v19 = vmax.f32 %v405_v9, 0.0  ;;  %v408_v21 = vadd.f32 %v838_v57, %v407_v17 }
 0x10a   : > { %v511_v20 = vmax.f32 %v469_v10, 0.0  ;;  %v472_v22 = vadd.f32 %v838_v57, %v471_v18  ;;  %530 = vst.msk [vmem:[%s847_s5 + $0x70] sm:$0xff] %vm515_vm3, %v497_v13  ;;  %v498_v23 = vmax.f32 %v416_v15, 0.0 }
 0x10b   : > { %546 = vst.msk [vmem:[%s847_s5 + $0xf0] sm:$0xff] %vm515_vm3, %v513_v14  ;;  %v514_v24 = vmax.f32 %v480_v16, 0.0  ;;  %528 = vst.msk [vmem:[%s847_s5 + $0x60] sm:$0xff] %vm515_vm3, %v495_v19  ;;  %v496_v25 = vmax.f32 %v408_v21, 0.0 }
 0x10c   : > { %544 = vst.msk [vmem:[%s847_s5 + $0xe0] sm:$0xff] %vm515_vm3, %v511_v20  ;;  %v512_v26 = vmax.f32 %v472_v22, 0.0  ;;  %531 = vst.msk [vmem:[%s847_s5 + $0x78] sm:$0xff] %vm515_vm3, %v498_v23 }
 0x10d   : > { %547 = vst.msk [vmem:[%s847_s5 + $0xf8] sm:$0xff] %vm515_vm3, %v514_v24  ;;  %529 = vst.msk [vmem:[%s847_s5 + $0x68] sm:$0xff] %vm515_vm3, %v496_v25 }
 0x10e   : > { %545 = vst.msk [vmem:[%s847_s5 + $0xe8] sm:$0xff] %vm515_vm3, %v512_v26 }
 0x10f PF: > { %s13_s12 = sadd.s32 1, %s731_s12  }
 0x110   : > { %p10_p4 = scmp.ge.s32.totalorder %s13_s12, 4  }
 0x112   :  { %12 = sbr.rel (!%p10_p4) target bundleno = 1 (0x1), region = 62 }

// kernel: blazeface_full_forward.23
= control target key start
LH: loop header
LB: loop body
LE: loop exit
PB: predicated region body
PF: predicated region fallthrough
CT: control target
= control target key end

     0   :  { %s897_s15 = smov 0   ;;  %s1066_s0 = inlined_call_operand.vmem [shape: f32[2,20,20,32], index: 0, kind: input, shape index: {}]   ;;  %s1067_s1 = inlined_call_operand.vmem [shape: f32[25,1,32], index: 1, kind: input, shape index: {}]   ;;  %s1068_s2 = inlined_call_operand.vmem [shape: bf16[32,32], index: 2, kind: input, shape index: {}]   ;;  %s1069_s3 = inlined_call_operand.vmem [shape: f32[1,32], index: 3, kind: input, shape index: {}]   ;;  %s1070_s4 = inlined_call_operand.vmem [shape: f32[2,16,16,32], index: 4, kind: output, shape index: {}]  }
   0x1 LB: > { %s717_s16 = sadd.s32 4294967295, %s864_s15   ;;  %p721_p0 = scmp.ge.s32.totalorder %s864_s15, 1  ;;  %s864_s15 = sphi %s897_s15, %s14_s15  }
   0x2   : > { %p162_p1 = scmp.lt.s32.totalorder %s864_s15, 3 }
   0x4   : > { %p163_p2 = pnand %p721_p0, %p162_p1 }
   0x5   : > { %p188_p3 = scmp.lt.s32.totalorder (!%p163_p2), %s717_s16, 1  ;;  %s915_s25 = smov (!%p163_p2), 0  }
   0x6   : > { %166 = sbr.rel (%p163_p2) target bundleno = 293 (0x125), region = 36 }
   0xd   : > { %s1072_s16 = smov (!%p188_p3, %s717_s16), 1 }
   0xe   : > { %s833_s17 = smul.u32 480, %s1072_s16  ;;  %s821_s18 = sshll.u32 %s1072_s16, 8 }
   0xf   : > { %s908_s21 = scalar_lea.vmem %s1070_s4, %s821_s18 }
  0x10   : > { %s913_s24 = scalar_lea.vmem %s1066_s0, %s833_s17 }
  0x11 LB: >> { %v852_v0 = vld [vmem:[%s1068_s2] sm:$0xff]   ;;  %v870_v1 = vmov 0.0   ;;  %v853_v2 = vld [vmem:[%s1068_s2 + $0x8] sm:$0xff]   ;;  %vm871_vm0 = vmmov 0   ;;  %s205_s30 = smul.u32 24, %s868_s25  ;;  %vm590_vm1 = vcmask 261120   ;;  %s868_s25 = sphi %s915_s25, %s204_s25  }
  0x12   : >> { %825 = vmatprep.subr.bf16.mxu0 %v870_v1  ;;  %829 = vmatprep.mubr.msk.bf16.mxu0 %vm871_vm0, %v870_v1  ;;  %v725_v3 = vld [vmem:[%s1067_s1] ss:$0 sm:$0xff]  ;;  %v727_v4 = vld [vmem:[%s1067_s1 + $0x1] ss:$0 sm:$0xff]  ;;  %v729_v5 = vld [vmem:[%s1067_s1 + $0x2] ss:$0 sm:$0xff] }
  0x13   : >> { %826 = vmatpush3.bf16.msra.mxu0 %v852_v0  ;;  %s934_s9 = scalar_lea.vmem %s913_s24, %s205_s30  ;;  %v731_v6 = vld [vmem:[%s1067_s1 + $0x3] ss:$0 sm:$0xff]  ;;  %v733_v10 = vld [vmem:[%s1067_s1 + $0x4] ss:$0 sm:$0xff]  ;;  %v737_v29 = vld [vmem:[%s1067_s1 + $0x5] ss:$0 sm:$0xff] }
  0x14   : >> { %827 = vmatprep.subr.bf16.mxu0 %v870_v1  ;;  %v207_v7 = vld [vmem:[%s934_s9] sm:$0xff]  ;;  %v208_v8 = vld [vmem:[%s934_s9 + $0x8] sm:$0xff]  ;;  %v734_v28 = vld [vmem:[%s934_s9 + $0x18] sm:$0xff]  ;;  %s818_s17 = sshll.u32 %s868_s25, 4  ;;  %s204_s25 = sadd.s32 1, %s868_s25  }
  0x15   : >> { %v218_v9 = vld [vmem:[%s934_s9 + $0x1] sm:$0xff]  ;;  %v216_v11 = vmul.f32 %v725_v3, %v207_v7  ;;  %v217_v12 = vmul.f32 %v725_v3, %v208_v8  ;;  %v219_v13 = vld [vmem:[%s934_s9 + $0x9] sm:$0xff]  ;;  %v738_v35 = vld [vmem:[%s934_s9 + $0x19] sm:$0xff]  ;;  %v287_v38 = vmul.f32 %v737_v29, %v734_v28  ;;  %p201_p4 = scmp.ge.s32.totalorder %s204_s25, 16  }
  0x16   : >> { %v228_v14 = vmul.f32 %v727_v4, %v218_v9  ;;  %v232_v15 = vld [vmem:[%s934_s9 + $0x2] sm:$0xff]  ;;  %v233_v16 = vld [vmem:[%s934_s9 + $0xa] sm:$0xff]  ;;  %v229_v17 = vmul.f32 %v727_v4, %v219_v13  ;;  %v742_v42 = vld [vmem:[%s934_s9 + $0x1a] sm:$0xff] }
  0x17   : >> { %828 = vmatpush3.bf16.msra.mxu0 %v853_v2  ;;  %v242_v18 = vmul.f32 %v729_v5, %v232_v15  ;;  %v243_v19 = vmul.f32 %v729_v5, %v233_v16  ;;  %v246_v20 = vld [vmem:[%s934_s9 + $0x3] sm:$0xff]  ;;  %v247_v21 = vld [vmem:[%s934_s9 + $0xb] sm:$0xff]  ;;  %v746_v49 = vld [vmem:[%s934_s9 + $0x1b] sm:$0xff] }
  0x18   : >> { %v260_v22 = vld [vmem:[%s934_s9 + $0x4] sm:$0xff]  ;;  %v230_v23 = vadd.f32 %v228_v14, %v216_v11  ;;  %v256_v24 = vmul.f32 %v731_v6, %v246_v20  ;;  %v261_v25 = vld [vmem:[%s934_s9 + $0xc] sm:$0xff]  ;;  %v231_v26 = vadd.f32 %v229_v17, %v217_v12  ;;  %v257_v27 = vmul.f32 %v731_v6, %v247_v21  ;;  %v750_v56 = vld [vmem:[%s934_s9 + $0x1c] sm:$0xff] }
  0x19   : >> { %v270_v31 = vmul.f32 %v733_v10, %v260_v22  ;;  %v735_v32 = vld [vmem:[%s934_s9 + $0x20] sm:$0xff]  ;;  %v271_v34 = vmul.f32 %v733_v10, %v261_v25  ;;  %v749_v50 = vld [vmem:[%s1067_s1 + $0x8] ss:$0 sm:$0xff]  ;;  %v753_v57 = vld [vmem:[%s1067_s1 + $0x9] ss:$0 sm:$0xff] }
  0x1a   : >> { %v244_v30 = vadd.f32 %v242_v18, %v230_v23  ;;  %v245_v33 = vadd.f32 %v243_v19, %v231_v26  ;;  %v741_v36 = vld [vmem:[%s1067_s1 + $0x6] ss:$0 sm:$0xff]  ;;  %v288_v41 = vmul.f32 %v737_v29, %v735_v32  ;;  %v745_v43 = vld [vmem:[%s1067_s1 + $0x7] ss:$0 sm:$0xff]  ;;  %v329_v59 = vmul.f32 %v749_v50, %v746_v49  ;;  %v754_v63 = vld [vmem:[%s934_s9 + $0x30] sm:$0xff] }
  0x1b   : >> { %v739_v39 = vld [vmem:[%s934_s9 + $0x21] sm:$0xff]  ;;  %v301_v45 = vmul.f32 %v741_v36, %v738_v35  ;;  %v315_v52 = vmul.f32 %v745_v43, %v742_v42  ;;  %v757_v0 = vld [vmem:[%s1067_s1 + $0xa] ss:$0 sm:$0xff]  ;;  %v343_v2 = vmul.f32 %v753_v57, %v750_v56  ;;  %v755_v3 = vld [vmem:[%s934_s9 + $0x38] sm:$0xff] }
  0x1c   : >> { %v258_v37 = vadd.f32 %v256_v24, %v244_v30  ;;  %v259_v40 = vadd.f32 %v257_v27, %v245_v33  ;;  %v743_v46 = vld [vmem:[%s934_s9 + $0x22] sm:$0xff]  ;;  %v302_v48 = vmul.f32 %v741_v36, %v739_v39  ;;  %v758_v6 = vld [vmem:[%s934_s9 + $0x31] sm:$0xff]  ;;  %v761_v7 = vld [vmem:[%s1067_s1 + $0xb] ss:$0 sm:$0xff]  ;;  %v360_v9 = vmul.f32 %v757_v0, %v754_v63 }
  0x1d   : >> { %v747_v53 = vld [vmem:[%s934_s9 + $0x23] sm:$0xff]  ;;  %v316_v55 = vmul.f32 %v745_v43, %v743_v46  ;;  %v759_v10 = vld [vmem:[%s934_s9 + $0x39] sm:$0xff]  ;;  %v361_v12 = vmul.f32 %v757_v0, %v755_v3  ;;  %v765_v14 = vld [vmem:[%s1067_s1 + $0xc] ss:$0 sm:$0xff]  ;;  %v374_v16 = vmul.f32 %v761_v7, %v758_v6 }
  0x1e   : >> { %v272_v44 = vadd.f32 %v270_v31, %v258_v37  ;;  %v273_v47 = vadd.f32 %v271_v34, %v259_v40  ;;  %v751_v60 = vld [vmem:[%s934_s9 + $0x24] sm:$0xff]  ;;  %v330_v62 = vmul.f32 %v749_v50, %v747_v53  ;;  %v762_v13 = vld [vmem:[%s934_s9 + $0x32] sm:$0xff]  ;;  %v763_v17 = vld [vmem:[%s934_s9 + $0x3a] sm:$0xff]  ;;  %v375_v19 = vmul.f32 %v761_v7, %v759_v10 }
  0x1f   : >> { %v344_v5 = vmul.f32 %v753_v57, %v751_v60  ;;  %v766_v20 = vld [vmem:[%s934_s9 + $0x33] sm:$0xff]  ;;  %v769_v21 = vld [vmem:[%s1067_s1 + $0xd] ss:$0 sm:$0xff]  ;;  %v388_v23 = vmul.f32 %v765_v14, %v762_v13  ;;  %v767_v24 = vld [vmem:[%s934_s9 + $0x3b] sm:$0xff]  ;;  %v389_v26 = vmul.f32 %v765_v14, %v763_v17 }
  0x20   : >> { %v289_v51 = vadd.f32 %v287_v38, %v272_v44  ;;  %v290_v54 = vadd.f32 %v288_v41, %v273_v47  ;;  %v770_v27 = vld [vmem:[%s934_s9 + $0x34] sm:$0xff]  ;;  %v773_v28 = vld [vmem:[%s1067_s1 + $0xe] ss:$0 sm:$0xff]  ;;  %v402_v30 = vmul.f32 %v769_v21, %v766_v20  ;;  %v771_v31 = vld [vmem:[%s934_s9 + $0x3c] sm:$0xff]  ;;  %v403_v33 = vmul.f32 %v769_v21, %v767_v24 }
  0x21   : >> { %v774_v34 = vld [vmem:[%s934_s9 + $0x48] sm:$0xff]  ;;  %v416_v37 = vmul.f32 %v773_v28, %v770_v27  ;;  %v775_v38 = vld [vmem:[%s934_s9 + $0x50] sm:$0xff]  ;;  %v417_v40 = vmul.f32 %v773_v28, %v771_v31 }
  0x22   : >> { %v303_v58 = vadd.f32 %v301_v45, %v289_v51  ;;  %v304_v61 = vadd.f32 %v302_v48, %v290_v54  ;;  %v777_v35 = vld [vmem:[%s1067_s1 + $0xf] ss:$0 sm:$0xff]  ;;  %v781_v42 = vld [vmem:[%s1067_s1 + $0x10] ss:$0 sm:$0xff]  ;;  %v779_v45 = vld [vmem:[%s934_s9 + $0x51] sm:$0xff] }
  0x23   : >> { %v778_v41 = vld [vmem:[%s934_s9 + $0x49] sm:$0xff]  ;;  %v433_v44 = vmul.f32 %v777_v35, %v774_v34  ;;  %v434_v47 = vmul.f32 %v777_v35, %v775_v38  ;;  %v785_v49 = vld [vmem:[%s1067_s1 + $0x11] ss:$0 sm:$0xff]  ;;  %v448_v54 = vmul.f32 %v781_v42, %v779_v45  ;;  %v789_v56 = vld [vmem:[%s1067_s1 + $0x12] ss:$0 sm:$0xff] }
  0x24   : >> { %v317_v1 = vadd.f32 %v315_v52, %v303_v58  ;;  %v318_v4 = vadd.f32 %v316_v55, %v304_v61  ;;  %v782_v48 = vld [vmem:[%s934_s9 + $0x4a] sm:$0xff]  ;;  %v447_v51 = vmul.f32 %v781_v42, %v778_v41  ;;  %v783_v52 = vld [vmem:[%s934_s9 + $0x52] sm:$0xff] }
  0x25   : >> { %v786_v55 = vld [vmem:[%s934_s9 + $0x4b] sm:$0xff]  ;;  %v461_v58 = vmul.f32 %v785_v49, %v782_v48  ;;  %v462_v61 = vmul.f32 %v785_v49, %v783_v52  ;;  %v793_v63 = vld [vmem:[%s1067_s1 + $0x13] ss:$0 sm:$0xff]  ;;  %v797_v6 = vld [vmem:[%s1067_s1 + $0x14] ss:$0 sm:$0xff] }
  0x26   : >> { %v331_v8 = vadd.f32 %v329_v59, %v317_v1  ;;  %v332_v11 = vadd.f32 %v330_v62, %v318_v4  ;;  %v787_v59 = vld [vmem:[%s934_s9 + $0x53] sm:$0xff]  ;;  %v475_v1 = vmul.f32 %v789_v56, %v786_v55  ;;  %v814_v49 = vld [vmem:[%s1069_s3] ss:$0 sm:$0xff] }
  0x27   : >> { %v790_v62 = vld [vmem:[%s934_s9 + $0x4c] sm:$0xff]  ;;  %v476_v4 = vmul.f32 %v789_v56, %v787_v59  ;;  %v801_v13 = vld [vmem:[%s1067_s1 + $0x15] ss:$0 sm:$0xff]  ;;  %v805_v20 = vld [vmem:[%s1067_s1 + $0x16] ss:$0 sm:$0xff] }
  0x28   : >> { %v345_v15 = vadd.f32 %v343_v2, %v331_v8  ;;  %v346_v18 = vadd.f32 %v344_v5, %v332_v11  ;;  %v791_v2 = vld [vmem:[%s934_s9 + $0x54] sm:$0xff]  ;;  %v794_v5 = vld [vmem:[%s934_s9 + $0x60] sm:$0xff]  ;;  %v489_v8 = vmul.f32 %v793_v63, %v790_v62 }
  0x29   : >> { %v490_v11 = vmul.f32 %v793_v63, %v791_v2  ;;  %v809_v27 = vld [vmem:[%s1067_s1 + $0x17] ss:$0 sm:$0xff]  ;;  %v813_v34 = vld [vmem:[%s1067_s1 + $0x18] ss:$0 sm:$0xff] }
  0x2a   : >> { %v362_v22 = vadd.f32 %v360_v9, %v345_v15  ;;  %v363_v25 = vadd.f32 %v361_v12, %v346_v18  ;;  %v795_v9 = vld [vmem:[%s934_s9 + $0x68] sm:$0xff]  ;;  %v506_v15 = vmul.f32 %v797_v6, %v794_v5 }
  0x2b   : >> { %v798_v12 = vld [vmem:[%s934_s9 + $0x61] sm:$0xff]  ;;  %v507_v18 = vmul.f32 %v797_v6, %v795_v9 }
  0x2c   : >> { %v376_v29 = vadd.f32 %v374_v16, %v362_v22  ;;  %v377_v32 = vadd.f32 %v375_v19, %v363_v25  ;;  %v799_v16 = vld [vmem:[%s934_s9 + $0x69] sm:$0xff]  ;;  %v520_v22 = vmul.f32 %v801_v13, %v798_v12 }
  0x2d   : >> { %v802_v19 = vld [vmem:[%s934_s9 + $0x62] sm:$0xff]  ;;  %v521_v25 = vmul.f32 %v801_v13, %v799_v16 }
  0x2e   : >> { %v390_v36 = vadd.f32 %v388_v23, %v376_v29  ;;  %v391_v39 = vadd.f32 %v389_v26, %v377_v32  ;;  %v803_v23 = vld [vmem:[%s934_s9 + $0x6a] sm:$0xff]  ;;  %v534_v29 = vmul.f32 %v805_v20, %v802_v19 }
  0x2f   : >> { %v806_v26 = vld [vmem:[%s934_s9 + $0x63] sm:$0xff]  ;;  %v535_v32 = vmul.f32 %v805_v20, %v803_v23 }
  0x30   : >> { %v404_v43 = vadd.f32 %v402_v30, %v390_v36  ;;  %v405_v46 = vadd.f32 %v403_v33, %v391_v39  ;;  %v807_v30 = vld [vmem:[%s934_s9 + $0x6b] sm:$0xff]  ;;  %v548_v36 = vmul.f32 %v809_v27, %v806_v26 }
  0x31   : >> { %v810_v33 = vld [vmem:[%s934_s9 + $0x64] sm:$0xff]  ;;  %v549_v39 = vmul.f32 %v809_v27, %v807_v30 }
  0x32   : >> { %v418_v50 = vadd.f32 %v416_v37, %v404_v43  ;;  %v419_v53 = vadd.f32 %v417_v40, %v405_v46  ;;  %v811_v37 = vld [vmem:[%s934_s9 + $0x6c] sm:$0xff]  ;;  %v562_v41 = vmul.f32 %v813_v34, %v810_v33  ;;  %s638_s9 = scalar_lea.vmem %s908_s21, %s818_s17 }
  0x33   : >> { %v563_v43 = vmul.f32 %v813_v34, %v811_v37 }
  0x34   : >> { %v435_v57 = vadd.f32 %v433_v44, %v418_v50  ;;  %v436_v60 = vadd.f32 %v434_v47, %v419_v53 }
  0x36   : >> { %v449_v0 = vadd.f32 %v447_v51, %v435_v57  ;;  %v450_v3 = vadd.f32 %v448_v54, %v436_v60 }
  0x38   : >> { %v463_v7 = vadd.f32 %v461_v58, %v449_v0  ;;  %v464_v10 = vadd.f32 %v462_v61, %v450_v3 }
  0x3a   : >> { %v477_v14 = vadd.f32 %v475_v1, %v463_v7  ;;  %v478_v17 = vadd.f32 %v476_v4, %v464_v10 }
  0x3c   : >> { %v491_v21 = vadd.f32 %v489_v8, %v477_v14  ;;  %v492_v24 = vadd.f32 %v490_v11, %v478_v17 }
  0x3e   : >> { %v508_v28 = vadd.f32 %v506_v15, %v491_v21  ;;  %v509_v31 = vadd.f32 %v507_v18, %v492_v24 }
  0x40   : >> { %v522_v35 = vadd.f32 %v520_v22, %v508_v28  ;;  %v523_v38 = vadd.f32 %v521_v25, %v509_v31 }
  0x42   : >> { %v536_v40 = vadd.f32 %v534_v29, %v522_v35  ;;  %v537_v42 = vadd.f32 %v535_v32, %v523_v38 }
  0x44   : >> { %v550_v44 = vadd.f32 %v548_v36, %v536_v40  ;;  %v551_v45 = vadd.f32 %v549_v39, %v537_v42 }
  0x46   : >> { %v564_v46 = vadd.f32 %v562_v41, %v550_v44  ;;  %v565_v47 = vadd.f32 %v563_v43, %v551_v45 }
  0x48   : >> { %v566_v48 = vpack.c.bf16 %v565_v47, %v564_v46 }
  0x4a   : >> { %830 = vmatmul.mubr.msk.bf16.vlgmr.msra.gmra.mrb[0].mxu0 %vm590_vm1, %v566_v48 }
 0x11d   : >> { %v628_v50 = vpop.f32.mrb[0].mxu0 }
 0x11e   : >> { %v629_v51 = vadd.f32 %v814_v49, %v628_v50  ;;  %v831_v52 = vpop.f32.mrb[1].mxu0  ;;  %203 = sbr.rel (!%p201_p4) target bundleno = 17 (0x11), region = 103 }
 0x11f   : >> { %v631_v53 = vpop.f32.mrb[2].mxu0 }
 0x120   : >> { %v635_v54 = vmax.f32 %v629_v51, 0.0  ;;  %v632_v55 = vadd.f32 %v814_v49, %v631_v53  ;;  %v832_v56 = vpop.f32.mrb[3].mxu0 }
 0x122   : >> { %639 = vst.msk [vmem:[%s638_s9] sm:$0xff] %vm590_vm1, %v635_v54  ;;  %v636_v57 = vmax.f32 %v632_v55, 0.0 }
 0x124   : >> { %640 = vst.msk [vmem:[%s638_s9 + $0x8] sm:$0xff] %vm590_vm1, %v636_v57 }
 0x125 PF: > { %s14_s15 = sadd.s32 1, %s864_s15  }
 0x126   : > { %p11_p5 = scmp.ge.s32.totalorder %s14_s15, 4  }
 0x128   :  { %13 = sbr.rel (!%p11_p5) target bundleno = 1 (0x1), region = 114 }

// kernel: blazeface_full_forward.27
= control target key start
LH: loop header
LB: loop body
LE: loop exit
PB: predicated region body
PF: predicated region fallthrough
CT: control target
= control target key end

     0   :  { %s973_s18 = smov 0   ;;  %s1151_s0 = inlined_call_operand.vmem [shape: f32[2,20,20,32], index: 0, kind: input, shape index: {}]   ;;  %s1152_s1 = inlined_call_operand.vmem [shape: f32[25,1,32], index: 1, kind: input, shape index: {}]   ;;  %s1153_s2 = inlined_call_operand.vmem [shape: bf16[32,32], index: 2, kind: input, shape index: {}]   ;;  %s1154_s3 = inlined_call_operand.vmem [shape: f32[1,32], index: 3, kind: input, shape index: {}]   ;;  %s1155_s4 = inlined_call_operand.vmem [shape: f32[2,16,16,32], index: 4, kind: input, shape index: {}]   ;;  %s1156_s5 = inlined_call_operand.vmem [shape: f32[2,16,16,32], index: 5, kind: output, shape index: {}]  }
   0x1 LB: > { %s785_s19 = sadd.s32 4294967295, %s935_s18   ;;  %p789_p0 = scmp.ge.s32.totalorder %s935_s18, 1  ;;  %s935_s18 = sphi %s973_s18, %s15_s18  }
   0x2   : > { %p197_p1 = scmp.lt.s32.totalorder %s935_s18, 3 }
   0x4   : > { %p198_p2 = pnand %p789_p0, %p197_p1 }
   0x5   : > { %p230_p3 = scmp.lt.s32.totalorder (!%p198_p2), %s785_s19, 1  ;;  %s996_s6 = smov (!%p198_p2), 0  }
   0x6   : > { %201 = sbr.rel (%p198_p2) target bundleno = 297 (0x129), region = 40 }
   0xd   : > { %s1158_s19 = smov (!%p230_p3, %s785_s19), 1 }
   0xe   : > { %s904_s20 = smul.u32 480, %s1158_s19  ;;  %s891_s21 = sshll.u32 %s1158_s19, 8 }
   0xf   : > { %s984_s24 = scalar_lea.vmem %s1155_s4, %s891_s21  ;;  %s989_s27 = scalar_lea.vmem %s1156_s5, %s891_s21 }
  0x10   : > { %s994_s30 = scalar_lea.vmem %s1151_s0, %s904_s20 }
  0x11 LB: >> { %v923_v0 = vld [vmem:[%s1153_s2] sm:$0xff]   ;;  %v941_v1 = vmov 0.0   ;;  %v924_v2 = vld [vmem:[%s1153_s2 + $0x8] sm:$0xff]   ;;  %vm942_vm0 = vmmov 0   ;;  %s252_s11 = smul.u32 24, %s939_s6  ;;  %vm637_vm1 = vcmask 261120   ;;  %s939_s6 = sphi %s996_s6, %s251_s6  }
  0x12   : >> { %896 = vmatprep.subr.bf16.mxu0 %v941_v1  ;;  %900 = vmatprep.mubr.msk.bf16.mxu0 %vm942_vm0, %v941_v1  ;;  %v795_v3 = vld [vmem:[%s1152_s1] ss:$0 sm:$0xff]  ;;  %v797_v4 = vld [vmem:[%s1152_s1 + $0x1] ss:$0 sm:$0xff]  ;;  %v799_v5 = vld [vmem:[%s1152_s1 + $0x2] ss:$0 sm:$0xff] }
  0x13   : >> { %897 = vmatpush3.bf16.msra.mxu0 %v923_v0  ;;  %s1015_s16 = scalar_lea.vmem %s994_s30, %s252_s11  ;;  %v801_v6 = vld [vmem:[%s1152_s1 + $0x3] ss:$0 sm:$0xff]  ;;  %v803_v10 = vld [vmem:[%s1152_s1 + $0x4] ss:$0 sm:$0xff]  ;;  %v807_v29 = vld [vmem:[%s1152_s1 + $0x5] ss:$0 sm:$0xff] }
  0x14   : >> { %898 = vmatprep.subr.bf16.mxu0 %v941_v1  ;;  %v254_v7 = vld [vmem:[%s1015_s16] sm:$0xff]  ;;  %v255_v8 = vld [vmem:[%s1015_s16 + $0x8] sm:$0xff]  ;;  %v804_v28 = vld [vmem:[%s1015_s16 + $0x18] sm:$0xff]  ;;  %s888_s28 = sshll.u32 %s939_s6, 4  ;;  %s251_s6 = sadd.s32 1, %s939_s6  }
  0x15   : >> { %v265_v9 = vld [vmem:[%s1015_s16 + $0x1] sm:$0xff]  ;;  %v263_v11 = vmul.f32 %v795_v3, %v254_v7  ;;  %v264_v12 = vmul.f32 %v795_v3, %v255_v8  ;;  %v266_v13 = vld [vmem:[%s1015_s16 + $0x9] sm:$0xff]  ;;  %v808_v35 = vld [vmem:[%s1015_s16 + $0x19] sm:$0xff]  ;;  %v334_v38 = vmul.f32 %v807_v29, %v804_v28  ;;  %s692_s8 = scalar_lea.vmem %s989_s27, %s888_s28  ;;  %p248_p4 = scmp.ge.s32.totalorder %s251_s6, 16  }
  0x16   : >> { %v275_v14 = vmul.f32 %v797_v4, %v265_v9  ;;  %v279_v15 = vld [vmem:[%s1015_s16 + $0x2] sm:$0xff]  ;;  %v280_v16 = vld [vmem:[%s1015_s16 + $0xa] sm:$0xff]  ;;  %v276_v17 = vmul.f32 %v797_v4, %v266_v13  ;;  %v812_v42 = vld [vmem:[%s1015_s16 + $0x1a] sm:$0xff] }
  0x17   : >> { %899 = vmatpush3.bf16.msra.mxu0 %v924_v2  ;;  %v289_v18 = vmul.f32 %v799_v5, %v279_v15  ;;  %v290_v19 = vmul.f32 %v799_v5, %v280_v16  ;;  %v293_v20 = vld [vmem:[%s1015_s16 + $0x3] sm:$0xff]  ;;  %v294_v21 = vld [vmem:[%s1015_s16 + $0xb] sm:$0xff]  ;;  %v816_v49 = vld [vmem:[%s1015_s16 + $0x1b] sm:$0xff] }
  0x18   : >> { %v307_v22 = vld [vmem:[%s1015_s16 + $0x4] sm:$0xff]  ;;  %v277_v23 = vadd.f32 %v275_v14, %v263_v11  ;;  %v303_v24 = vmul.f32 %v801_v6, %v293_v20  ;;  %v308_v25 = vld [vmem:[%s1015_s16 + $0xc] sm:$0xff]  ;;  %v278_v26 = vadd.f32 %v276_v17, %v264_v12  ;;  %v304_v27 = vmul.f32 %v801_v6, %v294_v21  ;;  %v820_v56 = vld [vmem:[%s1015_s16 + $0x1c] sm:$0xff] }
  0x19   : >> { %v317_v31 = vmul.f32 %v803_v10, %v307_v22  ;;  %v805_v32 = vld [vmem:[%s1015_s16 + $0x20] sm:$0xff]  ;;  %v318_v34 = vmul.f32 %v803_v10, %v308_v25  ;;  %v819_v50 = vld [vmem:[%s1152_s1 + $0x8] ss:$0 sm:$0xff]  ;;  %v823_v57 = vld [vmem:[%s1152_s1 + $0x9] ss:$0 sm:$0xff] }
  0x1a   : >> { %v291_v30 = vadd.f32 %v289_v18, %v277_v23  ;;  %v292_v33 = vadd.f32 %v290_v19, %v278_v26  ;;  %v811_v36 = vld [vmem:[%s1152_s1 + $0x6] ss:$0 sm:$0xff]  ;;  %v335_v41 = vmul.f32 %v807_v29, %v805_v32  ;;  %v815_v43 = vld [vmem:[%s1152_s1 + $0x7] ss:$0 sm:$0xff]  ;;  %v376_v59 = vmul.f32 %v819_v50, %v816_v49  ;;  %v824_v63 = vld [vmem:[%s1015_s16 + $0x30] sm:$0xff] }
  0x1b   : >> { %v809_v39 = vld [vmem:[%s1015_s16 + $0x21] sm:$0xff]  ;;  %v348_v45 = vmul.f32 %v811_v36, %v808_v35  ;;  %v362_v52 = vmul.f32 %v815_v43, %v812_v42  ;;  %v827_v0 = vld [vmem:[%s1152_s1 + $0xa] ss:$0 sm:$0xff]  ;;  %v390_v2 = vmul.f32 %v823_v57, %v820_v56  ;;  %v825_v3 = vld [vmem:[%s1015_s16 + $0x38] sm:$0xff] }
  0x1c   : >> { %v305_v37 = vadd.f32 %v303_v24, %v291_v30  ;;  %v306_v40 = vadd.f32 %v304_v27, %v292_v33  ;;  %v813_v46 = vld [vmem:[%s1015_s16 + $0x22] sm:$0xff]  ;;  %v349_v48 = vmul.f32 %v811_v36, %v809_v39  ;;  %v828_v6 = vld [vmem:[%s1015_s16 + $0x31] sm:$0xff]  ;;  %v831_v7 = vld [vmem:[%s1152_s1 + $0xb] ss:$0 sm:$0xff]  ;;  %v407_v9 = vmul.f32 %v827_v0, %v824_v63 }
  0x1d   : >> { %v817_v53 = vld [vmem:[%s1015_s16 + $0x23] sm:$0xff]  ;;  %v363_v55 = vmul.f32 %v815_v43, %v813_v46  ;;  %v829_v10 = vld [vmem:[%s1015_s16 + $0x39] sm:$0xff]  ;;  %v408_v12 = vmul.f32 %v827_v0, %v825_v3  ;;  %v835_v14 = vld [vmem:[%s1152_s1 + $0xc] ss:$0 sm:$0xff]  ;;  %v421_v16 = vmul.f32 %v831_v7, %v828_v6 }
  0x1e   : >> { %v319_v44 = vadd.f32 %v317_v31, %v305_v37  ;;  %v320_v47 = vadd.f32 %v318_v34, %v306_v40  ;;  %v821_v60 = vld [vmem:[%s1015_s16 + $0x24] sm:$0xff]  ;;  %v377_v62 = vmul.f32 %v819_v50, %v817_v53  ;;  %v832_v13 = vld [vmem:[%s1015_s16 + $0x32] sm:$0xff]  ;;  %v833_v17 = vld [vmem:[%s1015_s16 + $0x3a] sm:$0xff]  ;;  %v422_v19 = vmul.f32 %v831_v7, %v829_v10 }
  0x1f   : >> { %v391_v5 = vmul.f32 %v823_v57, %v821_v60  ;;  %v836_v20 = vld [vmem:[%s1015_s16 + $0x33] sm:$0xff]  ;;  %v839_v21 = vld [vmem:[%s1152_s1 + $0xd] ss:$0 sm:$0xff]  ;;  %v435_v23 = vmul.f32 %v835_v14, %v832_v13  ;;  %v837_v24 = vld [vmem:[%s1015_s16 + $0x3b] sm:$0xff]  ;;  %v436_v26 = vmul.f32 %v835_v14, %v833_v17 }
  0x20   : >> { %v336_v51 = vadd.f32 %v334_v38, %v319_v44  ;;  %v337_v54 = vadd.f32 %v335_v41, %v320_v47  ;;  %v840_v27 = vld [vmem:[%s1015_s16 + $0x34] sm:$0xff]  ;;  %v843_v28 = vld [vmem:[%s1152_s1 + $0xe] ss:$0 sm:$0xff]  ;;  %v449_v30 = vmul.f32 %v839_v21, %v836_v20  ;;  %v841_v31 = vld [vmem:[%s1015_s16 + $0x3c] sm:$0xff]  ;;  %v450_v33 = vmul.f32 %v839_v21, %v837_v24 }
  0x21   : >> { %v844_v34 = vld [vmem:[%s1015_s16 + $0x48] sm:$0xff]  ;;  %v463_v37 = vmul.f32 %v843_v28, %v840_v27  ;;  %v845_v38 = vld [vmem:[%s1015_s16 + $0x50] sm:$0xff]  ;;  %v464_v40 = vmul.f32 %v843_v28, %v841_v31 }
  0x22   : >> { %v350_v58 = vadd.f32 %v348_v45, %v336_v51  ;;  %v351_v61 = vadd.f32 %v349_v48, %v337_v54  ;;  %v847_v35 = vld [vmem:[%s1152_s1 + $0xf] ss:$0 sm:$0xff]  ;;  %v851_v42 = vld [vmem:[%s1152_s1 + $0x10] ss:$0 sm:$0xff]  ;;  %v849_v45 = vld [vmem:[%s1015_s16 + $0x51] sm:$0xff] }
  0x23   : >> { %v848_v41 = vld [vmem:[%s1015_s16 + $0x49] sm:$0xff]  ;;  %v480_v44 = vmul.f32 %v847_v35, %v844_v34  ;;  %v481_v47 = vmul.f32 %v847_v35, %v845_v38  ;;  %v855_v49 = vld [vmem:[%s1152_s1 + $0x11] ss:$0 sm:$0xff]  ;;  %v495_v54 = vmul.f32 %v851_v42, %v849_v45  ;;  %v859_v56 = vld [vmem:[%s1152_s1 + $0x12] ss:$0 sm:$0xff] }
  0x24   : >> { %v364_v1 = vadd.f32 %v362_v52, %v350_v58  ;;  %v365_v4 = vadd.f32 %v363_v55, %v351_v61  ;;  %v852_v48 = vld [vmem:[%s1015_s16 + $0x4a] sm:$0xff]  ;;  %v494_v51 = vmul.f32 %v851_v42, %v848_v41  ;;  %v853_v52 = vld [vmem:[%s1015_s16 + $0x52] sm:$0xff] }
  0x25   : >> { %v856_v55 = vld [vmem:[%s1015_s16 + $0x4b] sm:$0xff]  ;;  %v508_v58 = vmul.f32 %v855_v49, %v852_v48  ;;  %v509_v61 = vmul.f32 %v855_v49, %v853_v52  ;;  %v863_v63 = vld [vmem:[%s1152_s1 + $0x13] ss:$0 sm:$0xff]  ;;  %v867_v6 = vld [vmem:[%s1152_s1 + $0x14] ss:$0 sm:$0xff] }
  0x26   : >> { %v378_v8 = vadd.f32 %v376_v59, %v364_v1  ;;  %v379_v11 = vadd.f32 %v377_v62, %v365_v4  ;;  %v857_v59 = vld [vmem:[%s1015_s16 + $0x53] sm:$0xff]  ;;  %v522_v1 = vmul.f32 %v859_v56, %v856_v55  ;;  %v884_v49 = vld [vmem:[%s1154_s3] ss:$0 sm:$0xff] }
  0x27   : >> { %v860_v62 = vld [vmem:[%s1015_s16 + $0x4c] sm:$0xff]  ;;  %v523_v4 = vmul.f32 %v859_v56, %v857_v59  ;;  %v871_v13 = vld [vmem:[%s1152_s1 + $0x15] ss:$0 sm:$0xff]  ;;  %v875_v20 = vld [vmem:[%s1152_s1 + $0x16] ss:$0 sm:$0xff] }
  0x28   : >> { %v392_v15 = vadd.f32 %v390_v2, %v378_v8  ;;  %v393_v18 = vadd.f32 %v391_v5, %v379_v11  ;;  %v861_v2 = vld [vmem:[%s1015_s16 + $0x54] sm:$0xff]  ;;  %v864_v5 = vld [vmem:[%s1015_s16 + $0x60] sm:$0xff]  ;;  %v536_v8 = vmul.f32 %v863_v63, %v860_v62 }
  0x29   : >> { %v537_v11 = vmul.f32 %v863_v63, %v861_v2  ;;  %v879_v27 = vld [vmem:[%s1152_s1 + $0x17] ss:$0 sm:$0xff]  ;;  %v883_v34 = vld [vmem:[%s1152_s1 + $0x18] ss:$0 sm:$0xff] }
  0x2a   : >> { %v409_v22 = vadd.f32 %v407_v9, %v392_v15  ;;  %v410_v25 = vadd.f32 %v408_v12, %v393_v18  ;;  %v865_v9 = vld [vmem:[%s1015_s16 + $0x68] sm:$0xff]  ;;  %v553_v15 = vmul.f32 %v867_v6, %v864_v5 }
  0x2b   : >> { %v868_v12 = vld [vmem:[%s1015_s16 + $0x61] sm:$0xff]  ;;  %v554_v18 = vmul.f32 %v867_v6, %v865_v9 }
  0x2c   : >> { %v423_v29 = vadd.f32 %v421_v16, %v409_v22  ;;  %v424_v32 = vadd.f32 %v422_v19, %v410_v25  ;;  %v869_v16 = vld [vmem:[%s1015_s16 + $0x69] sm:$0xff]  ;;  %v567_v22 = vmul.f32 %v871_v13, %v868_v12 }
  0x2d   : >> { %v872_v19 = vld [vmem:[%s1015_s16 + $0x62] sm:$0xff]  ;;  %v568_v25 = vmul.f32 %v871_v13, %v869_v16 }
  0x2e   : >> { %v437_v36 = vadd.f32 %v435_v23, %v423_v29  ;;  %v438_v39 = vadd.f32 %v436_v26, %v424_v32  ;;  %v873_v23 = vld [vmem:[%s1015_s16 + $0x6a] sm:$0xff]  ;;  %v581_v29 = vmul.f32 %v875_v20, %v872_v19 }
  0x2f   : >> { %v876_v26 = vld [vmem:[%s1015_s16 + $0x63] sm:$0xff]  ;;  %v582_v32 = vmul.f32 %v875_v20, %v873_v23 }
  0x30   : >> { %v451_v43 = vadd.f32 %v449_v30, %v437_v36  ;;  %v452_v46 = vadd.f32 %v450_v33, %v438_v39  ;;  %v877_v30 = vld [vmem:[%s1015_s16 + $0x6b] sm:$0xff]  ;;  %v595_v36 = vmul.f32 %v879_v27, %v876_v26 }
  0x31   : >> { %v880_v33 = vld [vmem:[%s1015_s16 + $0x64] sm:$0xff]  ;;  %v596_v39 = vmul.f32 %v879_v27, %v877_v30 }
  0x32   : >> { %v465_v50 = vadd.f32 %v463_v37, %v451_v43  ;;  %v466_v53 = vadd.f32 %v464_v40, %v452_v46  ;;  %v881_v37 = vld [vmem:[%s1015_s16 + $0x6c] sm:$0xff]  ;;  %v609_v41 = vmul.f32 %v883_v34, %v880_v33  ;;  %s685_s16 = scalar_lea.vmem %s984_s24, %s888_s28 }
  0x33   : >> { %v610_v43 = vmul.f32 %v883_v34, %v881_v37 }
  0x34   : >> { %v482_v57 = vadd.f32 %v480_v44, %v465_v50  ;;  %v483_v60 = vadd.f32 %v481_v47, %v466_v53  ;;  %v686_v53 = vld [vmem:[%s685_s16] sm:$0xff] }
  0x36   : >> { %v496_v0 = vadd.f32 %v494_v51, %v482_v57  ;;  %v497_v3 = vadd.f32 %v495_v54, %v483_v60 }
  0x38   : >> { %v510_v7 = vadd.f32 %v508_v58, %v496_v0  ;;  %v511_v10 = vadd.f32 %v509_v61, %v497_v3  ;;  %v687_v58 = vld [vmem:[%s685_s16 + $0x8] sm:$0xff] }
  0x3a   : >> { %v524_v14 = vadd.f32 %v522_v1, %v510_v7  ;;  %v525_v17 = vadd.f32 %v523_v4, %v511_v10 }
  0x3c   : >> { %v538_v21 = vadd.f32 %v536_v8, %v524_v14  ;;  %v539_v24 = vadd.f32 %v537_v11, %v525_v17 }
  0x3e   : >> { %v555_v28 = vadd.f32 %v553_v15, %v538_v21  ;;  %v556_v31 = vadd.f32 %v554_v18, %v539_v24 }
  0x40   : >> { %v569_v35 = vadd.f32 %v567_v22, %v555_v28  ;;  %v570_v38 = vadd.f32 %v568_v25, %v556_v31 }
  0x42   : >> { %v583_v40 = vadd.f32 %v581_v29, %v569_v35  ;;  %v584_v42 = vadd.f32 %v582_v32, %v570_v38 }
  0x44   : >> { %v597_v44 = vadd.f32 %v595_v36, %v583_v40  ;;  %v598_v45 = vadd.f32 %v596_v39, %v584_v42 }
  0x46   : >> { %v611_v46 = vadd.f32 %v609_v41, %v597_v44  ;;  %v612_v47 = vadd.f32 %v610_v43, %v598_v45 }
  0x48   : >> { %v613_v48 = vpack.c.bf16 %v612_v47, %v611_v46 }
  0x4a   : >> { %901 = vmatmul.mubr.msk.bf16.vlgmr.msra.gmra.mrb[0].mxu0 %vm637_vm1, %v613_v48 }
 0x11d   : >> { %v675_v50 = vpop.f32.mrb[0].mxu0 }
 0x11e   : >> { %v676_v51 = vadd.f32 %v884_v49, %v675_v50  ;;  %v902_v52 = vpop.f32.mrb[1].mxu0 }
 0x11f   : >> { %v678_v54 = vpop.f32.mrb[2].mxu0 }
 0x120   : >> { %v682_v55 = vmax.f32 %v676_v51, 0.0  ;;  %v679_v56 = vadd.f32 %v884_v49, %v678_v54  ;;  %v903_v57 = vpop.f32.mrb[3].mxu0 }
 0x122   : >> { %v688_v59 = vadd.f32 %v686_v53, %v682_v55  ;;  %v683_v60 = vmax.f32 %v679_v56, 0.0  ;;  %250 = sbr.rel (!%p248_p4) target bundleno = 17 (0x11), region = 111 }
 0x124   : >> { %v690_v61 = vmax.f32 %v688_v59, 0.0  ;;  %v689_v62 = vadd.f32 %v687_v58, %v683_v60 }
 0x126   : >> { %693 = vst.msk [vmem:[%s692_s8] sm:$0xff] %vm637_vm1, %v690_v61  ;;  %v691_v63 = vmax.f32 %v689_v62, 0.0 }
 0x128   : >> { %694 = vst.msk [vmem:[%s692_s8 + $0x8] sm:$0xff] %vm637_vm1, %v691_v63 }
 0x129 PF: > { %s15_s18 = sadd.s32 1, %s935_s18  }
 0x12a   : > { %p12_p5 = scmp.ge.s32.totalorder %s15_s18, 4  }
 0x12c   :  { %14 = sbr.rel (!%p12_p5) target bundleno = 1 (0x1), region = 122 }

// kernel: blazeface_full_forward.34
= control target key start
LH: loop header
LB: loop body
LE: loop exit
PB: predicated region body
PF: predicated region fallthrough
CT: control target
= control target key end

     0   :  { %s891_s18 = smov 0   ;;  %s1046_s0 = inlined_call_operand.vmem [shape: f32[2,12,12,48], index: 0, kind: input, shape index: {}]   ;;  %s1047_s1 = inlined_call_operand.vmem [shape: f32[25,1,48], index: 1, kind: input, shape index: {}]   ;;  %s1048_s2 = inlined_call_operand.vmem [shape: bf16[48,48], index: 2, kind: input, shape index: {}]   ;;  %s1049_s3 = inlined_call_operand.vmem [shape: f32[1,48], index: 3, kind: input, shape index: {}]   ;;  %s1050_s4 = inlined_call_operand.vmem [shape: f32[2,8,8,48], index: 4, kind: input, shape index: {}]   ;;  %s1051_s5 = inlined_call_operand.vmem [shape: f32[2,8,8,48], index: 5, kind: output, shape index: {}]  }
   0x1 LB: > { %s713_s19 = sadd.s32 4294967295, %s853_s18   ;;  %p717_p0 = scmp.ge.s32.totalorder %s853_s18, 1  ;;  %s853_s18 = sphi %s891_s18, %s15_s18  }
   0x2   : > { %p197_p1 = scmp.lt.s32.totalorder %s853_s18, 3 }
   0x4   : > { %p198_p2 = pnand %p717_p0, %p197_p1 }
   0x5   : > { %p230_p3 = scmp.lt.s32.totalorder (!%p198_p2), %s713_s19, 1  ;;  %s914_s6 = smov (!%p198_p2), 0  }
   0x6   : > { %201 = sbr.rel (%p198_p2) target bundleno = 294 (0x126), region = 40 }
   0xd   : > { %s1053_s19 = smov (!%p230_p3, %s713_s19), 1 }
   0xe   : > { %s821_s20 = smul.u32 192, %s1053_s19  ;;  %s805_s21 = sshll.u32 %s1053_s19, 6 }
   0xf   : > { %s902_s24 = scalar_lea.vmem %s1050_s4, %s805_s21  ;;  %s907_s27 = scalar_lea.vmem %s1051_s5, %s805_s21 }
  0x10   : > { %s912_s30 = scalar_lea.vmem %s1046_s0, %s821_s20 }
  0x11 LB: >> { %v840_v0 = vld [vmem:[%s1048_s2] sm:$0xff]   ;;  %v859_v1 = vmov 0.0   ;;  %v841_v2 = vld [vmem:[%s1048_s2 + $0x8] sm:$0xff]   ;;  %vm860_vm0 = vmmov 0   ;;  %s723_s11 = sshll.u32 %s857_s6, 4  ;;  %v842_v14 = vld [vmem:[%s1048_s2 + $0x10] sm:$0xff]   ;;  %s857_s6 = sphi %s914_s6, %s251_s6  }
  0x12   : >> { %811 = vmatprep.subr.bf16.mxu0 %v859_v1  ;;  %817 = vmatprep.mubr.msk.bf16.mxu0 %vm860_vm0, %v859_v1  ;;  %s927_s12 = scalar_lea.vmem %s912_s30, %s723_s11  ;;  %v724_v3 = vld [vmem:[%s1047_s1] ss:$0 sm:$0xff]  ;;  %v726_v4 = vld [vmem:[%s1047_s1 + $0x1] ss:$0 sm:$0xff]  ;;  %v728_v5 = vld [vmem:[%s1047_s1 + $0x2] ss:$0 sm:$0xff] }
  0x13   : >> { %812 = vmatpush3.bf16.msra.mxu0 %v840_v0  ;;  %v254_v6 = vld [vmem:[%s927_s12] sm:$0xff]  ;;  %v734_v19 = vld [vmem:[%s927_s12 + $0x10] sm:$0xff]  ;;  %v745_v32 = vld [vmem:[%s1047_s1 + $0x8] ss:$0 sm:$0xff]  ;;  %vm571_vm1 = vcmask 392192   ;;  %s802_s7 = sshll.u32 %s857_s6, 3 }
  0x14   : >> { %813 = vmatprep.subr.bf16.mxu0 %v859_v1  ;;  %v263_v7 = vld [vmem:[%s927_s12 + $0x1] sm:$0xff]  ;;  %v262_v9 = vmul.f32 %v724_v3, %v254_v6  ;;  %v737_v23 = vld [vmem:[%s927_s12 + $0x11] sm:$0xff]  ;;  %v748_v36 = vld [vmem:[%s1047_s1 + $0x9] ss:$0 sm:$0xff]  ;;  %s621_s10 = scalar_lea.vmem %s907_s27, %s802_s7  ;;  %s251_s6 = sadd.s32 1, %s857_s6  }
  0x15   : >> { %v274_v8 = vld [vmem:[%s927_s12 + $0x2] sm:$0xff]  ;;  %v272_v10 = vmul.f32 %v726_v4, %v263_v7  ;;  %v740_v27 = vld [vmem:[%s927_s12 + $0x12] sm:$0xff]  ;;  %v752_v40 = vld [vmem:[%s1047_s1 + $0xa] ss:$0 sm:$0xff]  ;;  %p248_p4 = scmp.ge.s32.totalorder %s251_s6, 8  }
  0x16   : >> { %v283_v11 = vmul.f32 %v728_v5, %v274_v8  ;;  %v285_v12 = vld [vmem:[%s927_s12 + $0x3] sm:$0xff]  ;;  %v743_v31 = vld [vmem:[%s927_s12 + $0x13] sm:$0xff]  ;;  %v755_v44 = vld [vmem:[%s1047_s1 + $0xb] ss:$0 sm:$0xff] }
  0x17   : >> { %v730_v13 = vld [vmem:[%s1047_s1 + $0x3] ss:$0 sm:$0xff]  ;;  %814 = vmatpush3.bf16.msra.mxu0 %v841_v2  ;;  %v296_v15 = vld [vmem:[%s927_s12 + $0x4] sm:$0xff]  ;;  %v273_v17 = vadd.f32 %v272_v10, %v262_v9  ;;  %v746_v35 = vld [vmem:[%s927_s12 + $0x14] sm:$0xff]  ;;  %v352_v38 = vmul.f32 %v745_v32, %v743_v31 }
  0x18   : >> { %v732_v16 = vld [vmem:[%s1047_s1 + $0x4] ss:$0 sm:$0xff]  ;;  %815 = vmatprep.subr.bf16.mxu0 %v859_v1  ;;  %v294_v18 = vmul.f32 %v730_v13, %v285_v12  ;;  %v736_v20 = vld [vmem:[%s1047_s1 + $0x5] ss:$0 sm:$0xff]  ;;  %v739_v24 = vld [vmem:[%s1047_s1 + $0x6] ss:$0 sm:$0xff]  ;;  %v363_v42 = vmul.f32 %v748_v36, %v746_v35 }
  0x19   : >> { %v284_v21 = vadd.f32 %v283_v11, %v273_v17  ;;  %v305_v22 = vmul.f32 %v732_v16, %v296_v15  ;;  %v319_v26 = vmul.f32 %v736_v20, %v734_v19  ;;  %v742_v28 = vld [vmem:[%s1047_s1 + $0x7] ss:$0 sm:$0xff]  ;;  %v330_v30 = vmul.f32 %v739_v24, %v737_v23  ;;  %v758_v48 = vld [vmem:[%s1047_s1 + $0xc] ss:$0 sm:$0xff]  ;;  %v761_v52 = vld [vmem:[%s1047_s1 + $0xd] ss:$0 sm:$0xff] }
  0x1a   : >> { %v341_v34 = vmul.f32 %v742_v28, %v740_v27  ;;  %v750_v39 = vld [vmem:[%s927_s12 + $0x20] sm:$0xff]  ;;  %v764_v56 = vld [vmem:[%s1047_s1 + $0xe] ss:$0 sm:$0xff]  ;;  %v766_v59 = vld [vmem:[%s927_s12 + $0x30] sm:$0xff] }
  0x1b   : >> { %816 = vmatpush3.bf16.msra.mxu0 %v842_v14  ;;  %v295_v25 = vadd.f32 %v294_v18, %v284_v21  ;;  %v753_v43 = vld [vmem:[%s927_s12 + $0x21] sm:$0xff]  ;;  %v377_v46 = vmul.f32 %v752_v40, %v750_v39  ;;  %v768_v60 = vld [vmem:[%s1047_s1 + $0xf] ss:$0 sm:$0xff]  ;;  %v769_v63 = vld [vmem:[%s927_s12 + $0x31] sm:$0xff] }
  0x1c   : >> { %v756_v47 = vld [vmem:[%s927_s12 + $0x22] sm:$0xff]  ;;  %v388_v50 = vmul.f32 %v755_v44, %v753_v43  ;;  %v771_v0 = vld [vmem:[%s1047_s1 + $0x10] ss:$0 sm:$0xff]  ;;  %v435_v2 = vmul.f32 %v768_v60, %v766_v59  ;;  %v772_v3 = vld [vmem:[%s927_s12 + $0x32] sm:$0xff] }
  0x1d   : >> { %v306_v29 = vadd.f32 %v305_v22, %v295_v25  ;;  %v759_v51 = vld [vmem:[%s927_s12 + $0x23] sm:$0xff]  ;;  %v399_v54 = vmul.f32 %v758_v48, %v756_v47  ;;  %v774_v4 = vld [vmem:[%s1047_s1 + $0x11] ss:$0 sm:$0xff]  ;;  %v446_v6 = vmul.f32 %v771_v0, %v769_v63  ;;  %v775_v7 = vld [vmem:[%s927_s12 + $0x33] sm:$0xff] }
  0x1e   : >> { %v762_v55 = vld [vmem:[%s927_s12 + $0x24] sm:$0xff]  ;;  %v410_v58 = vmul.f32 %v761_v52, %v759_v51  ;;  %v777_v8 = vld [vmem:[%s1047_s1 + $0x12] ss:$0 sm:$0xff]  ;;  %v457_v10 = vmul.f32 %v774_v4, %v772_v3  ;;  %v778_v11 = vld [vmem:[%s927_s12 + $0x34] sm:$0xff] }
  0x1f   : >> { %v320_v33 = vadd.f32 %v319_v26, %v306_v29  ;;  %v421_v62 = vmul.f32 %v764_v56, %v762_v55  ;;  %v780_v12 = vld [vmem:[%s1047_s1 + $0x13] ss:$0 sm:$0xff]  ;;  %v468_v14 = vmul.f32 %v777_v8, %v775_v7  ;;  %v782_v15 = vld [vmem:[%s927_s12 + $0x40] sm:$0xff]  ;;  %v784_v16 = vld [vmem:[%s1047_s1 + $0x14] ss:$0 sm:$0xff] }
  0x20   : >> { %v479_v18 = vmul.f32 %v780_v12, %v778_v11  ;;  %v785_v19 = vld [vmem:[%s927_s12 + $0x41] sm:$0xff]  ;;  %v787_v20 = vld [vmem:[%s1047_s1 + $0x15] ss:$0 sm:$0xff]  ;;  %v493_v22 = vmul.f32 %v784_v16, %v782_v15  ;;  %v790_v24 = vld [vmem:[%s1047_s1 + $0x16] ss:$0 sm:$0xff] }
  0x21   : >> { %v331_v37 = vadd.f32 %v330_v30, %v320_v33  ;;  %v788_v23 = vld [vmem:[%s927_s12 + $0x42] sm:$0xff]  ;;  %v504_v26 = vmul.f32 %v787_v20, %v785_v19  ;;  %v793_v28 = vld [vmem:[%s1047_s1 + $0x17] ss:$0 sm:$0xff]  ;;  %v796_v32 = vld [vmem:[%s1047_s1 + $0x18] ss:$0 sm:$0xff] }
  0x22   : >> { %v791_v27 = vld [vmem:[%s927_s12 + $0x43] sm:$0xff]  ;;  %v515_v30 = vmul.f32 %v790_v24, %v788_v23  ;;  %v797_v40 = vld [vmem:[%s1049_s3] ss:$0 sm:$0xff] }
  0x23   : >> { %v342_v41 = vadd.f32 %v341_v34, %v331_v37  ;;  %v794_v31 = vld [vmem:[%s927_s12 + $0x44] sm:$0xff]  ;;  %v526_v34 = vmul.f32 %v793_v28, %v791_v27  ;;  %s617_s12 = scalar_lea.vmem %s902_s24, %s802_s7 }
  0x24   : >> { %v537_v36 = vmul.f32 %v796_v32, %v794_v31  ;;  %v618_v44 = vld [vmem:[%s617_s12] sm:$0xff] }
  0x25   : >> { %v353_v45 = vadd.f32 %v352_v38, %v342_v41 }
  0x27   : >> { %v364_v49 = vadd.f32 %v363_v42, %v353_v45 }
  0x29   : >> { %v378_v53 = vadd.f32 %v377_v46, %v364_v49 }
  0x2b   : >> { %v389_v57 = vadd.f32 %v388_v50, %v378_v53 }
  0x2d   : >> { %v400_v61 = vadd.f32 %v399_v54, %v389_v57 }
  0x2f   : >> { %v411_v1 = vadd.f32 %v410_v58, %v400_v61 }
  0x31   : >> { %v422_v5 = vadd.f32 %v421_v62, %v411_v1 }
  0x33   : >> { %v436_v9 = vadd.f32 %v435_v2, %v422_v5 }
  0x35   : >> { %v447_v13 = vadd.f32 %v446_v6, %v436_v9 }
  0x37   : >> { %v458_v17 = vadd.f32 %v457_v10, %v447_v13 }
  0x39   : >> { %v469_v21 = vadd.f32 %v468_v14, %v458_v17 }
  0x3b   : >> { %v480_v25 = vadd.f32 %v479_v18, %v469_v21 }
  0x3d   : >> { %v494_v29 = vadd.f32 %v493_v22, %v480_v25 }
  0x3f   : >> { %v505_v33 = vadd.f32 %v504_v26, %v494_v29 }
  0x41   : >> { %v516_v35 = vadd.f32 %v515_v30, %v505_v33 }
  0x43   : >> { %v527_v37 = vadd.f32 %v526_v34, %v516_v35 }
  0x45   : >> { %v538_v38 = vadd.f32 %v537_v36, %v527_v37 }
  0x47   : >> { %v539_v39 = vpack.c.bf16 %v538_v38, %v538_v38 }
  0x49   : >> { %818 = vmatmul.mubr.msk.bf16.vlgmr.msra.gmra.mrb[0].mxu0 %vm571_vm1, %v539_v39 }
 0x11c   : >> { %v609_v41 = vpop.f32.mrb[0].mxu0 }
 0x11d   : >> { %v610_v42 = vadd.f32 %v797_v40, %v609_v41  ;;  %v819_v43 = vpop.f32.mrb[1].mxu0 }
 0x11e   : >> { %v612_v45 = vpop.f32.mrb[2].mxu0 }
 0x11f   : >> { %v615_v46 = vmax.f32 %v610_v42, 0.0  ;;  %v820_v47 = vpop.f32.mrb[3].mxu0  ;;  %250 = sbr.rel (!%p248_p4) target bundleno = 17 (0x11), region = 111 }
 0x121   : >> { %v619_v48 = vadd.f32 %v618_v44, %v615_v46 }
 0x123   : >> { %v620_v49 = vmax.f32 %v619_v48, 0.0 }
 0x125   : >> { %622 = vst.msk [vmem:[%s621_s10] sm:$0xff] %vm571_vm1, %v620_v49 }
 0x126 PF: > { %s15_s18 = sadd.s32 1, %s853_s18  }
 0x127   : > { %p12_p5 = scmp.ge.s32.totalorder %s15_s18, 4  }
 0x129   :  { %14 = sbr.rel (!%p12_p5) target bundleno = 1 (0x1), region = 122 }

// kernel: blazeface_full_forward.29
= control target key start
LH: loop header
LB: loop body
LE: loop exit
PB: predicated region body
PF: predicated region fallthrough
CT: control target
= control target key end

     0   :  { %s818_s15 = smov 0   ;;  %s965_s0 = inlined_call_operand.vmem [shape: f32[2,12,12,48], index: 0, kind: input, shape index: {}]   ;;  %s966_s1 = inlined_call_operand.vmem [shape: f32[25,1,48], index: 1, kind: input, shape index: {}]   ;;  %s967_s2 = inlined_call_operand.vmem [shape: bf16[48,48], index: 2, kind: input, shape index: {}]   ;;  %s968_s3 = inlined_call_operand.vmem [shape: f32[1,48], index: 3, kind: input, shape index: {}]   ;;  %s969_s4 = inlined_call_operand.vmem [shape: f32[2,8,8,48], index: 4, kind: output, shape index: {}]  }
   0x1 LB: > { %s648_s16 = sadd.s32 4294967295, %s785_s15   ;;  %p652_p0 = scmp.ge.s32.totalorder %s785_s15, 1  ;;  %s785_s15 = sphi %s818_s15, %s14_s15  }
   0x2   : > { %p162_p1 = scmp.lt.s32.totalorder %s785_s15, 3 }
   0x4   : > { %p163_p2 = pnand %p652_p0, %p162_p1 }
   0x5   : > { %p188_p3 = scmp.lt.s32.totalorder (!%p163_p2), %s648_s16, 1  ;;  %s836_s25 = smov (!%p163_p2), 0  }
   0x6   : > { %166 = sbr.rel (%p163_p2) target bundleno = 290 (0x122), region = 36 }
   0xd   : > { %s971_s16 = smov (!%p188_p3, %s648_s16), 1 }
   0xe   : > { %s753_s17 = smul.u32 192, %s971_s16  ;;  %s738_s18 = sshll.u32 %s971_s16, 6 }
   0xf   : > { %s829_s21 = scalar_lea.vmem %s969_s4, %s738_s18 }
  0x10   : > { %s834_s24 = scalar_lea.vmem %s965_s0, %s753_s17 }
  0x11 LB: >> { %v772_v0 = vld [vmem:[%s967_s2] sm:$0xff]   ;;  %v791_v1 = vmov 0.0   ;;  %v773_v2 = vld [vmem:[%s967_s2 + $0x8] sm:$0xff]   ;;  %vm792_vm0 = vmmov 0   ;;  %s656_s30 = sshll.u32 %s789_s25, 4  ;;  %v774_v14 = vld [vmem:[%s967_s2 + $0x10] sm:$0xff]   ;;  %s789_s25 = sphi %s836_s25, %s204_s25  }
  0x12   : >> { %743 = vmatprep.subr.bf16.mxu0 %v791_v1  ;;  %749 = vmatprep.mubr.msk.bf16.mxu0 %vm792_vm0, %v791_v1  ;;  %s849_s5 = scalar_lea.vmem %s834_s24, %s656_s30  ;;  %v657_v3 = vld [vmem:[%s966_s1] ss:$0 sm:$0xff]  ;;  %v659_v4 = vld [vmem:[%s966_s1 + $0x1] ss:$0 sm:$0xff]  ;;  %v661_v5 = vld [vmem:[%s966_s1 + $0x2] ss:$0 sm:$0xff] }
  0x13   : >> { %744 = vmatpush3.bf16.msra.mxu0 %v772_v0  ;;  %v207_v6 = vld [vmem:[%s849_s5] sm:$0xff]  ;;  %v667_v19 = vld [vmem:[%s849_s5 + $0x10] sm:$0xff]  ;;  %v678_v32 = vld [vmem:[%s966_s1 + $0x8] ss:$0 sm:$0xff]  ;;  %vm524_vm1 = vcmask 392192   ;;  %s735_s19 = sshll.u32 %s789_s25, 3 }
  0x14   : >> { %745 = vmatprep.subr.bf16.mxu0 %v791_v1  ;;  %v216_v7 = vld [vmem:[%s849_s5 + $0x1] sm:$0xff]  ;;  %v215_v9 = vmul.f32 %v657_v3, %v207_v6  ;;  %v670_v23 = vld [vmem:[%s849_s5 + $0x11] sm:$0xff]  ;;  %v681_v36 = vld [vmem:[%s966_s1 + $0x9] ss:$0 sm:$0xff]  ;;  %s204_s25 = sadd.s32 1, %s789_s25  }
  0x15   : >> { %v227_v8 = vld [vmem:[%s849_s5 + $0x2] sm:$0xff]  ;;  %v225_v10 = vmul.f32 %v659_v4, %v216_v7  ;;  %v673_v27 = vld [vmem:[%s849_s5 + $0x12] sm:$0xff]  ;;  %v685_v40 = vld [vmem:[%s966_s1 + $0xa] ss:$0 sm:$0xff]  ;;  %p201_p4 = scmp.ge.s32.totalorder %s204_s25, 8  }
  0x16   : >> { %v236_v11 = vmul.f32 %v661_v5, %v227_v8  ;;  %v238_v12 = vld [vmem:[%s849_s5 + $0x3] sm:$0xff]  ;;  %v676_v31 = vld [vmem:[%s849_s5 + $0x13] sm:$0xff]  ;;  %v688_v44 = vld [vmem:[%s966_s1 + $0xb] ss:$0 sm:$0xff] }
  0x17   : >> { %v663_v13 = vld [vmem:[%s966_s1 + $0x3] ss:$0 sm:$0xff]  ;;  %746 = vmatpush3.bf16.msra.mxu0 %v773_v2  ;;  %v249_v15 = vld [vmem:[%s849_s5 + $0x4] sm:$0xff]  ;;  %v226_v17 = vadd.f32 %v225_v10, %v215_v9  ;;  %v679_v35 = vld [vmem:[%s849_s5 + $0x14] sm:$0xff]  ;;  %v305_v38 = vmul.f32 %v678_v32, %v676_v31 }
  0x18   : >> { %v665_v16 = vld [vmem:[%s966_s1 + $0x4] ss:$0 sm:$0xff]  ;;  %747 = vmatprep.subr.bf16.mxu0 %v791_v1  ;;  %v247_v18 = vmul.f32 %v663_v13, %v238_v12  ;;  %v669_v20 = vld [vmem:[%s966_s1 + $0x5] ss:$0 sm:$0xff]  ;;  %v672_v24 = vld [vmem:[%s966_s1 + $0x6] ss:$0 sm:$0xff]  ;;  %v316_v42 = vmul.f32 %v681_v36, %v679_v35 }
  0x19   : >> { %v237_v21 = vadd.f32 %v236_v11, %v226_v17  ;;  %v258_v22 = vmul.f32 %v665_v16, %v249_v15  ;;  %v272_v26 = vmul.f32 %v669_v20, %v667_v19  ;;  %v675_v28 = vld [vmem:[%s966_s1 + $0x7] ss:$0 sm:$0xff]  ;;  %v283_v30 = vmul.f32 %v672_v24, %v670_v23  ;;  %v691_v48 = vld [vmem:[%s966_s1 + $0xc] ss:$0 sm:$0xff]  ;;  %v694_v52 = vld [vmem:[%s966_s1 + $0xd] ss:$0 sm:$0xff] }
  0x1a   : >> { %v294_v34 = vmul.f32 %v675_v28, %v673_v27  ;;  %v683_v39 = vld [vmem:[%s849_s5 + $0x20] sm:$0xff]  ;;  %v697_v56 = vld [vmem:[%s966_s1 + $0xe] ss:$0 sm:$0xff]  ;;  %v699_v59 = vld [vmem:[%s849_s5 + $0x30] sm:$0xff] }
  0x1b   : >> { %748 = vmatpush3.bf16.msra.mxu0 %v774_v14  ;;  %v248_v25 = vadd.f32 %v247_v18, %v237_v21  ;;  %v686_v43 = vld [vmem:[%s849_s5 + $0x21] sm:$0xff]  ;;  %v330_v46 = vmul.f32 %v685_v40, %v683_v39  ;;  %v701_v60 = vld [vmem:[%s966_s1 + $0xf] ss:$0 sm:$0xff]  ;;  %v702_v63 = vld [vmem:[%s849_s5 + $0x31] sm:$0xff] }
  0x1c   : >> { %v689_v47 = vld [vmem:[%s849_s5 + $0x22] sm:$0xff]  ;;  %v341_v50 = vmul.f32 %v688_v44, %v686_v43  ;;  %v704_v0 = vld [vmem:[%s966_s1 + $0x10] ss:$0 sm:$0xff]  ;;  %v388_v2 = vmul.f32 %v701_v60, %v699_v59  ;;  %v705_v3 = vld [vmem:[%s849_s5 + $0x32] sm:$0xff] }
  0x1d   : >> { %v259_v29 = vadd.f32 %v258_v22, %v248_v25  ;;  %v692_v51 = vld [vmem:[%s849_s5 + $0x23] sm:$0xff]  ;;  %v352_v54 = vmul.f32 %v691_v48, %v689_v47  ;;  %v707_v4 = vld [vmem:[%s966_s1 + $0x11] ss:$0 sm:$0xff]  ;;  %v399_v6 = vmul.f32 %v704_v0, %v702_v63  ;;  %v708_v7 = vld [vmem:[%s849_s5 + $0x33] sm:$0xff] }
  0x1e   : >> { %v695_v55 = vld [vmem:[%s849_s5 + $0x24] sm:$0xff]  ;;  %v363_v58 = vmul.f32 %v694_v52, %v692_v51  ;;  %v710_v8 = vld [vmem:[%s966_s1 + $0x12] ss:$0 sm:$0xff]  ;;  %v410_v10 = vmul.f32 %v707_v4, %v705_v3  ;;  %v711_v11 = vld [vmem:[%s849_s5 + $0x34] sm:$0xff] }
  0x1f   : >> { %v273_v33 = vadd.f32 %v272_v26, %v259_v29  ;;  %v374_v62 = vmul.f32 %v697_v56, %v695_v55  ;;  %v713_v12 = vld [vmem:[%s966_s1 + $0x13] ss:$0 sm:$0xff]  ;;  %v421_v14 = vmul.f32 %v710_v8, %v708_v7  ;;  %v715_v15 = vld [vmem:[%s849_s5 + $0x40] sm:$0xff]  ;;  %v717_v16 = vld [vmem:[%s966_s1 + $0x14] ss:$0 sm:$0xff] }
  0x20   : >> { %v432_v18 = vmul.f32 %v713_v12, %v711_v11  ;;  %v718_v19 = vld [vmem:[%s849_s5 + $0x41] sm:$0xff]  ;;  %v720_v20 = vld [vmem:[%s966_s1 + $0x15] ss:$0 sm:$0xff]  ;;  %v446_v22 = vmul.f32 %v717_v16, %v715_v15  ;;  %v723_v24 = vld [vmem:[%s966_s1 + $0x16] ss:$0 sm:$0xff] }
  0x21   : >> { %v284_v37 = vadd.f32 %v283_v30, %v273_v33  ;;  %v721_v23 = vld [vmem:[%s849_s5 + $0x42] sm:$0xff]  ;;  %v457_v26 = vmul.f32 %v720_v20, %v718_v19  ;;  %v726_v28 = vld [vmem:[%s966_s1 + $0x17] ss:$0 sm:$0xff]  ;;  %v729_v32 = vld [vmem:[%s966_s1 + $0x18] ss:$0 sm:$0xff] }
  0x22   : >> { %v724_v27 = vld [vmem:[%s849_s5 + $0x43] sm:$0xff]  ;;  %v468_v30 = vmul.f32 %v723_v24, %v721_v23  ;;  %v730_v40 = vld [vmem:[%s968_s3] ss:$0 sm:$0xff] }
  0x23   : >> { %v295_v41 = vadd.f32 %v294_v34, %v284_v37  ;;  %v727_v31 = vld [vmem:[%s849_s5 + $0x44] sm:$0xff]  ;;  %v479_v34 = vmul.f32 %v726_v28, %v724_v27  ;;  %s570_s5 = scalar_lea.vmem %s829_s21, %s735_s19 }
  0x24   : >> { %v490_v36 = vmul.f32 %v729_v32, %v727_v31 }
  0x25   : >> { %v306_v45 = vadd.f32 %v305_v38, %v295_v41 }
  0x27   : >> { %v317_v49 = vadd.f32 %v316_v42, %v306_v45 }
  0x29   : >> { %v331_v53 = vadd.f32 %v330_v46, %v317_v49 }
  0x2b   : >> { %v342_v57 = vadd.f32 %v341_v50, %v331_v53 }
  0x2d   : >> { %v353_v61 = vadd.f32 %v352_v54, %v342_v57 }
  0x2f   : >> { %v364_v1 = vadd.f32 %v363_v58, %v353_v61 }
  0x31   : >> { %v375_v5 = vadd.f32 %v374_v62, %v364_v1 }
  0x33   : >> { %v389_v9 = vadd.f32 %v388_v2, %v375_v5 }
  0x35   : >> { %v400_v13 = vadd.f32 %v399_v6, %v389_v9 }
  0x37   : >> { %v411_v17 = vadd.f32 %v410_v10, %v400_v13 }
  0x39   : >> { %v422_v21 = vadd.f32 %v421_v14, %v411_v17 }
  0x3b   : >> { %v433_v25 = vadd.f32 %v432_v18, %v422_v21 }
  0x3d   : >> { %v447_v29 = vadd.f32 %v446_v22, %v433_v25 }
  0x3f   : >> { %v458_v33 = vadd.f32 %v457_v26, %v447_v29 }
  0x41   : >> { %v469_v35 = vadd.f32 %v468_v30, %v458_v33 }
  0x43   : >> { %v480_v37 = vadd.f32 %v479_v34, %v469_v35 }
  0x45   : >> { %v491_v38 = vadd.f32 %v490_v36, %v480_v37 }
  0x47   : >> { %v492_v39 = vpack.c.bf16 %v491_v38, %v491_v38 }
  0x49   : >> { %750 = vmatmul.mubr.msk.bf16.vlgmr.msra.gmra.mrb[0].mxu0 %vm524_vm1, %v492_v39 }
 0x11b   : > { %203 = sbr.rel (!%p201_p4) target bundleno = 17 (0x11), region = 103 }
 0x11c   : >> { %v562_v41 = vpop.f32.mrb[0].mxu0 }
 0x11d   : >> { %v563_v42 = vadd.f32 %v730_v40, %v562_v41  ;;  %v751_v43 = vpop.f32.mrb[1].mxu0 }
 0x11e   : >> { %v565_v44 = vpop.f32.mrb[2].mxu0 }
 0x11f   : >> { %v568_v45 = vmax.f32 %v563_v42, 0.0  ;;  %v752_v46 = vpop.f32.mrb[3].mxu0 }
 0x121   : >> { %571 = vst.msk [vmem:[%s570_s5] sm:$0xff] %vm524_vm1, %v568_v45 }
 0x122 PF: > { %s14_s15 = sadd.s32 1, %s785_s15  }
 0x123   : > { %p11_p5 = scmp.ge.s32.totalorder %s14_s15, 4  }
 0x125   :  { %13 = sbr.rel (!%p11_p5) target bundleno = 1 (0x1), region = 114 }

// kernel: blazeface_full_forward.28
= control target key start
LH: loop header
LB: loop body
LE: loop exit
PB: predicated region body
PF: predicated region fallthrough
CT: control target
= control target key end

     0   :  { %s983_s18 = smov 0   ;;  %s1135_s0 = inlined_call_operand.vmem [shape: f32[2,40,10,32], index: 0, kind: input, shape index: {}]   ;;  %s1136_s1 = inlined_call_operand.vmem [shape: f32[25,1,32], index: 1, kind: input, shape index: {}]   ;;  %s1137_s2 = inlined_call_operand.vmem [shape: bf16[32,48], index: 2, kind: input, shape index: {}]   ;;  %s1138_s3 = inlined_call_operand.vmem [shape: f32[1,48], index: 3, kind: input, shape index: {}]   ;;  %s1139_s4 = inlined_call_operand.vmem [shape: bf16[32,48], index: 4, kind: input, shape index: {}]   ;;  %s1140_s5 = inlined_call_operand.vmem [shape: f32[2,8,8,48], index: 5, kind: output, shape index: {}]  }
   0x1 LB: > { %s770_s19 = sadd.s32 4294967295, %s945_s18   ;;  %p774_p0 = scmp.ge.s32.totalorder %s945_s18, 1  ;;  %s945_s18 = sphi %s983_s18, %s15_s18  }
   0x2   : > { %p187_p1 = scmp.lt.s32.totalorder %s945_s18, 3 }
   0x4   : > { %p188_p2 = pnand %p774_p0, %p187_p1 }
   0x5   : > { %p215_p3 = scmp.lt.s32.totalorder (!%p188_p2), %s770_s19, 1  ;;  %s1001_s28 = smov (!%p188_p2), 0  }
   0x6   : > { %191 = sbr.rel (%p188_p2) target bundleno = 295 (0x127), region = 40 }
   0xd   : > { %s1142_s19 = smov (!%p215_p3, %s770_s19), 1 }
   0xe   : > { %s912_s20 = smul.u32 640, %s1142_s19  ;;  %s879_s21 = sshll.u32 %s1142_s19, 6 }
   0xf   : > { %s994_s24 = scalar_lea.vmem %s1140_s5, %s879_s21 }
  0x10   : > { %s999_s27 = scalar_lea.vmem %s1135_s0, %s912_s20 }
  0x11 LB: >> { %v931_v0 = vld [vmem:[%s1137_s2] sm:$0xff]   ;;  %v951_v1 = vmov 0.0   ;;  %v933_v3 = vld [vmem:[%s1137_s2 + $0x8] sm:$0xff]   ;;  %vm952_vm0 = vmmov 0   ;;  %s880_s10 = sshll.u32 %s949_s28, 5  ;;  %vm559_vm1 = vcmask 261120   ;;  %s949_s28 = sphi %s1001_s28, %s231_s28  }
  0x12   : >> { %896 = vmatprep.subr.bf16.mxu0 %v951_v1  ;;  %904 = vmatprep.subr.bf16.mxu1 %v951_v1  ;;  %v932_v2 = vld [vmem:[%s1139_s4] sm:$0xff]   ;;  %v934_v4 = vld [vmem:[%s1139_s4 + $0x8] sm:$0xff]   ;;  %s1020_s13 = scalar_lea.vmem %s999_s27, %s880_s10  ;;  %s876_s29 = sshll.u32 %s949_s28, 3  ;;  %vm668_vm2 = vcmask 392192  }
  0x13   : >> { %897 = vmatpush3.bf16.msra.mxu0 %v931_v0  ;;  %900 = vmatprep.mubr.msk.bf16.mxu0 %vm952_vm0, %v951_v1  ;;  %v235_v5 = vld [vmem:[%s1020_s13] sm:$0xff]  ;;  %v795_v20 = vld [vmem:[%s1020_s13 + $0x10] sm:$0xff]  ;;  %v808_v35 = vld [vmem:[%s1136_s1 + $0x8] ss:$0 sm:$0xff]  ;;  %s667_s30 = scalar_lea.vmem %s994_s24, %s876_s29  ;;  %s231_s28 = sadd.s32 1, %s949_s28  }
  0x14   : >> { %905 = vmatpush3.bf16.msra.mxu1 %v932_v2  ;;  %898 = vmatprep.subr.bf16.mxu0 %v951_v1  ;;  %v780_v6 = vld [vmem:[%s1136_s1] ss:$0 sm:$0xff]  ;;  %v785_v9 = vld [vmem:[%s1136_s1 + $0x1] ss:$0 sm:$0xff]  ;;  %v787_v11 = vld [vmem:[%s1136_s1 + $0x2] ss:$0 sm:$0xff] }
  0x15   : >> { %906 = vmatprep.subr.bf16.mxu1 %v951_v1  ;;  %v783_v7 = vld [vmem:[%s1020_s13 + $0x140] sm:$0xff]  ;;  %908 = vmatprep.mubr.msk.bf16.mxu1 %vm952_vm0, %v951_v1  ;;  %v243_v8 = vmul.f32 %v780_v6, %v235_v5  ;;  %v800_v24 = vld [vmem:[%s1020_s13 + $0x150] sm:$0xff]  ;;  %v811_v39 = vld [vmem:[%s1136_s1 + $0x9] ss:$0 sm:$0xff]  ;;  %p228_p4 = scmp.ge.s32.totalorder %s231_s28, 8  }
  0x16   : >> { %v258_v10 = vld [vmem:[%s1020_s13 + $0x1] sm:$0xff]  ;;  %v256_v12 = vmul.f32 %v785_v9, %v783_v7  ;;  %v803_v29 = vld [vmem:[%s1020_s13 + $0x11] sm:$0xff]  ;;  %v816_v43 = vld [vmem:[%s1136_s1 + $0xa] ss:$0 sm:$0xff] }
  0x17   : >> { %899 = vmatpush3.bf16.msra.mxu0 %v933_v3  ;;  %v267_v13 = vmul.f32 %v787_v11, %v258_v10  ;;  %v788_v14 = vld [vmem:[%s1020_s13 + $0x141] sm:$0xff]  ;;  %v806_v34 = vld [vmem:[%s1020_s13 + $0x151] sm:$0xff]  ;;  %v821_v47 = vld [vmem:[%s1136_s1 + $0xb] ss:$0 sm:$0xff] }
  0x18   : >> { %v790_v15 = vld [vmem:[%s1136_s1 + $0x3] ss:$0 sm:$0xff]  ;;  %907 = vmatpush3.bf16.msra.mxu1 %v934_v4  ;;  %v792_v17 = vld [vmem:[%s1136_s1 + $0x4] ss:$0 sm:$0xff]  ;;  %v257_v18 = vadd.f32 %v256_v12, %v243_v8  ;;  %v797_v21 = vld [vmem:[%s1136_s1 + $0x5] ss:$0 sm:$0xff]  ;;  %v339_v41 = vmul.f32 %v808_v35, %v806_v34 }
  0x19   : >> { %v280_v16 = vld [vmem:[%s1020_s13 + $0x2] sm:$0xff]  ;;  %v278_v19 = vmul.f32 %v790_v15, %v788_v14  ;;  %v303_v27 = vmul.f32 %v797_v21, %v795_v20  ;;  %v809_v38 = vld [vmem:[%s1020_s13 + $0x12] sm:$0xff]  ;;  %v824_v50 = vld [vmem:[%s1136_s1 + $0xc] ss:$0 sm:$0xff] }
  0x1a   : >> { %v268_v22 = vadd.f32 %v267_v13, %v257_v18  ;;  %v289_v23 = vmul.f32 %v792_v17, %v280_v16  ;;  %v802_v25 = vld [vmem:[%s1136_s1 + $0x6] ss:$0 sm:$0xff]  ;;  %v805_v30 = vld [vmem:[%s1136_s1 + $0x7] ss:$0 sm:$0xff]  ;;  %v350_v45 = vmul.f32 %v811_v39, %v809_v38  ;;  %v827_v54 = vld [vmem:[%s1136_s1 + $0xd] ss:$0 sm:$0xff] }
  0x1b   : >> { %v822_v28 = vld [vmem:[%s1020_s13 + $0x21] sm:$0xff]  ;;  %v317_v33 = vmul.f32 %v802_v25, %v800_v24  ;;  %v328_v37 = vmul.f32 %v805_v30, %v803_v29  ;;  %v830_v58 = vld [vmem:[%s1136_s1 + $0xe] ss:$0 sm:$0xff]  ;;  %v833_v61 = vld [vmem:[%s1020_s13 + $0x30] sm:$0xff] }
  0x1c   : >> { %v279_v26 = vadd.f32 %v278_v19, %v268_v22  ;;  %v604_v31 = vpack.c.bf16 %v822_v28, %v822_v28  ;;  %v814_v42 = vld [vmem:[%s1020_s13 + $0x20] sm:$0xff]  ;;  %v389_v56 = vmul.f32 %v824_v50, %v822_v28  ;;  %v835_v62 = vld [vmem:[%s1136_s1 + $0xf] ss:$0 sm:$0xff]  ;;  %v838_v1 = vld [vmem:[%s1020_s13 + $0x170] sm:$0xff] }
  0x1d   : >> { %v819_v46 = vld [vmem:[%s1020_s13 + $0x160] sm:$0xff]  ;;  %v364_v49 = vmul.f32 %v816_v43, %v814_v42  ;;  %v840_v2 = vld [vmem:[%s1136_s1 + $0x10] ss:$0 sm:$0xff]  ;;  %v425_v4 = vmul.f32 %v835_v62, %v833_v61  ;;  %v841_v5 = vld [vmem:[%s1020_s13 + $0x31] sm:$0xff] }
  0x1e   : >> { %v290_v32 = vadd.f32 %v289_v23, %v279_v26  ;;  %909 = vmatmul.mubr.msk.bf16.vlgmr.msra.gmra.mrb[0].mxu1 %vm559_vm1, %v604_v31  ;;  %v378_v52 = vmul.f32 %v821_v47, %v819_v46  ;;  %v825_v53 = vld [vmem:[%s1020_s13 + $0x161] sm:$0xff]  ;;  %v843_v6 = vld [vmem:[%s1136_s1 + $0x11] ss:$0 sm:$0xff]  ;;  %v439_v8 = vmul.f32 %v840_v2, %v838_v1  ;;  %v846_v10 = vld [vmem:[%s1136_s1 + $0x12] ss:$0 sm:$0xff] }
  0x1f   : >> { %v828_v57 = vld [vmem:[%s1020_s13 + $0x22] sm:$0xff]  ;;  %v400_v60 = vmul.f32 %v827_v54, %v825_v53  ;;  %v844_v9 = vld [vmem:[%s1020_s13 + $0x171] sm:$0xff]  ;;  %v450_v12 = vmul.f32 %v843_v6, %v841_v5  ;;  %v869_v46 = vld [vmem:[%s1138_s3] ss:$0 sm:$0xff] }
  0x20   : >> { %v304_v36 = vadd.f32 %v303_v27, %v290_v32  ;;  %v411_v0 = vmul.f32 %v830_v58, %v828_v57  ;;  %v847_v13 = vld [vmem:[%s1020_s13 + $0x32] sm:$0xff]  ;;  %v461_v16 = vmul.f32 %v846_v10, %v844_v9  ;;  %v852_v17 = vld [vmem:[%s1020_s13 + $0x40] sm:$0xff] }
  0x21   : >> { %v849_v14 = vld [vmem:[%s1136_s1 + $0x13] ss:$0 sm:$0xff]  ;;  %v854_v18 = vld [vmem:[%s1136_s1 + $0x14] ss:$0 sm:$0xff]  ;;  %v857_v21 = vld [vmem:[%s1020_s13 + $0x180] sm:$0xff] }
  0x22   : >> { %v318_v40 = vadd.f32 %v317_v33, %v304_v36  ;;  %v472_v20 = vmul.f32 %v849_v14, %v847_v13  ;;  %v859_v22 = vld [vmem:[%s1136_s1 + $0x15] ss:$0 sm:$0xff]  ;;  %v486_v24 = vmul.f32 %v854_v18, %v852_v17  ;;  %v860_v25 = vld [vmem:[%s1020_s13 + $0x41] sm:$0xff]  ;;  %v862_v26 = vld [vmem:[%s1136_s1 + $0x16] ss:$0 sm:$0xff] }
  0x23   : >> { %v500_v28 = vmul.f32 %v859_v22, %v857_v21  ;;  %v863_v29 = vld [vmem:[%s1020_s13 + $0x181] sm:$0xff]  ;;  %v865_v30 = vld [vmem:[%s1136_s1 + $0x17] ss:$0 sm:$0xff]  ;;  %v511_v32 = vmul.f32 %v862_v26, %v860_v25  ;;  %v868_v34 = vld [vmem:[%s1136_s1 + $0x18] ss:$0 sm:$0xff] }
  0x24   : >> { %v329_v44 = vadd.f32 %v328_v37, %v318_v40  ;;  %v866_v33 = vld [vmem:[%s1020_s13 + $0x42] sm:$0xff]  ;;  %v522_v36 = vmul.f32 %v865_v30, %v863_v29 }
  0x25   : >> { %v533_v38 = vmul.f32 %v868_v34, %v866_v33 }
  0x26   : >> { %v340_v48 = vadd.f32 %v339_v41, %v329_v44 }
  0x28   : >> { %v351_v51 = vadd.f32 %v350_v45, %v340_v48 }
  0x2a   : >> { %v365_v55 = vadd.f32 %v364_v49, %v351_v51 }
  0x2c   : >> { %v379_v59 = vadd.f32 %v378_v52, %v365_v55 }
  0x2e   : >> { %v390_v63 = vadd.f32 %v389_v56, %v379_v59 }
  0x30   : >> { %v401_v3 = vadd.f32 %v400_v60, %v390_v63 }
  0x32   : >> { %v412_v7 = vadd.f32 %v411_v0, %v401_v3 }
  0x34   : >> { %v426_v11 = vadd.f32 %v425_v4, %v412_v7 }
  0x36   : >> { %v440_v15 = vadd.f32 %v439_v8, %v426_v11 }
  0x38   : >> { %v451_v19 = vadd.f32 %v450_v12, %v440_v15 }
  0x3a   : >> { %v462_v23 = vadd.f32 %v461_v16, %v451_v19 }
  0x3c   : >> { %v473_v27 = vadd.f32 %v472_v20, %v462_v23 }
  0x3e   : >> { %v487_v31 = vadd.f32 %v486_v24, %v473_v27 }
  0x40   : >> { %v501_v35 = vadd.f32 %v500_v28, %v487_v31 }
  0x42   : >> { %v512_v37 = vadd.f32 %v511_v32, %v501_v35 }
  0x44   : >> { %v523_v39 = vadd.f32 %v522_v36, %v512_v37 }
  0x46   : >> { %v534_v40 = vadd.f32 %v533_v38, %v523_v39 }
  0x48   : >> { %v535_v41 = vpack.c.bf16 %v534_v40, %v534_v40 }
  0x4a   : >> { %901 = vmatmul.mubr.msk.bf16.vlgmr.msra.gmra.mrb[0].mxu0 %vm559_vm1, %v535_v41 }
  0xf1   : >> { %v658_v42 = vpop.f32.mrb[0].mxu1 }
  0xf2   : >> { %v910_v43 = vpop.f32.mrb[1].mxu1 }
  0xf3   : >> { %v661_v44 = vpop.f32.mrb[2].mxu1 }
  0xf4   : >> { %v911_v45 = vpop.f32.mrb[3].mxu1 }
 0x11d   : >> { %v597_v47 = vpop.f32.mrb[0].mxu0 }
 0x11e   : >> { %v598_v48 = vadd.f32 %v869_v46, %v597_v47  ;;  %v902_v49 = vpop.f32.mrb[1].mxu0 }
 0x11f   : >> { %v600_v50 = vpop.f32.mrb[2].mxu0 }
 0x120   : >> { %v603_v51 = vmax.f32 %v598_v48, 0.0  ;;  %v903_v52 = vpop.f32.mrb[3].mxu0  ;;  %230 = sbr.rel (!%p228_p4) target bundleno = 17 (0x11), region = 112 }
 0x122   : >> { %v664_v53 = vadd.f32 %v658_v42, %v603_v51 }
 0x124   : >> { %v665_v54 = vmax.f32 %v664_v53, 0.0 }
 0x126   : >> { %669 = vst.msk [vmem:[%s667_s30] sm:$0xff] %vm668_vm2, %v665_v54 }
 0x127 PF: > { %s15_s18 = sadd.s32 1, %s945_s18  }
 0x128   : > { %p12_p5 = scmp.ge.s32.totalorder %s15_s18, 4  }
 0x12a   :  { %14 = sbr.rel (!%p12_p5) target bundleno = 1 (0x1), region = 123 }

// kernel: blazeface_full_forward.35
= control target key start
LH: loop header
LB: loop body
LE: loop exit
PB: predicated region body
PF: predicated region fallthrough
CT: control target
= control target key end

     0   :  { %s1013_s18 = smov 0   ;;  %s1173_s0 = inlined_call_operand.vmem [shape: f32[2,24,6,48], index: 0, kind: input, shape index: {}]   ;;  %s1174_s1 = inlined_call_operand.vmem [shape: f32[25,1,48], index: 1, kind: input, shape index: {}]   ;;  %s1175_s2 = inlined_call_operand.vmem [shape: bf16[48,96], index: 2, kind: input, shape index: {}]   ;;  %s1176_s3 = inlined_call_operand.vmem [shape: f32[1,96], index: 3, kind: input, shape index: {}]   ;;  %s1177_s4 = inlined_call_operand.vmem [shape: bf16[48,96], index: 4, kind: input, shape index: {}]   ;;  %s1178_s5 = inlined_call_operand.vmem [shape: f32[2,4,4,96], index: 5, kind: output, shape index: {}]  }
   0x1 LB: > { %s790_s19 = sadd.s32 4294967295, %s975_s18   ;;  %p794_p0 = scmp.ge.s32.totalorder %s975_s18, 1  ;;  %s975_s18 = sphi %s1013_s18, %s15_s18  }
   0x2   : > { %p187_p1 = scmp.lt.s32.totalorder %s975_s18, 3 }
   0x4   : > { %p188_p2 = pnand %p794_p0, %p187_p1 }
   0x5   : > { %p215_p3 = scmp.lt.s32.totalorder (!%p188_p2), %s790_s19, 1  ;;  %s1031_s28 = smov (!%p188_p2), 0  }
   0x6   : > { %191 = sbr.rel (%p188_p2) target bundleno = 296 (0x128), region = 40 }
   0xd   : > { %s1180_s19 = smov (!%p215_p3, %s790_s19), 1 }
   0xe   : > { %s940_s20 = smul.u32 192, %s1180_s19  ;;  %s901_s21 = sshll.u32 %s1180_s19, 4 }
   0xf   : > { %s1024_s24 = scalar_lea.vmem %s1178_s5, %s901_s21 }
  0x10   : > { %s1029_s27 = scalar_lea.vmem %s1173_s0, %s940_s20 }
  0x11 LB: >> { %v959_v0 = vld [vmem:[%s1175_s2] sm:$0xff]   ;;  %v981_v1 = vmov 0.0   ;;  %v961_v3 = vld [vmem:[%s1175_s2 + $0x8] sm:$0xff]   ;;  %vm982_vm0 = vmmov 0   ;;  %s902_s10 = sshll.u32 %s979_s28, 4  ;;  %v963_v5 = vld [vmem:[%s1175_s2 + $0x10] sm:$0xff]   ;;  %s979_s28 = sphi %s1031_s28, %s231_s28  }
  0x12   : >> { %920 = vmatprep.subr.bf16.mxu0 %v981_v1  ;;  %930 = vmatprep.subr.bf16.mxu1 %v981_v1  ;;  %v960_v2 = vld [vmem:[%s1177_s4] sm:$0xff]   ;;  %v962_v4 = vld [vmem:[%s1177_s4 + $0x8] sm:$0xff]   ;;  %s1050_s13 = scalar_lea.vmem %s1029_s27, %s902_s10  ;;  %v964_v6 = vld [vmem:[%s1177_s4 + $0x10] sm:$0xff]   ;;  %vm535_vm1 = vcmask 1043456   ;;  %vm562_vm2 = vcmask 392192   ;;  %s898_s8 = sshll.u32 %s979_s28, 2 }
  0x13   : >> { %921 = vmatpush3.bf16.msra.mxu0 %v959_v0  ;;  %926 = vmatprep.mubr.msk.bf16.mxu0 %vm982_vm0, %v981_v1  ;;  %v235_v7 = vld [vmem:[%s1050_s13] sm:$0xf]  ;;  %v812_v19 = vld [vmem:[%s1174_s1 + $0x4] ss:$0 sm:$0xff]  ;;  %v815_v22 = vld [vmem:[%s1050_s13 + $0x8] sm:$0xf]  ;;  %s687_s9 = scalar_lea.vmem %s1024_s24, %s898_s8 }
  0x14   : >> { %931 = vmatpush3.bf16.msra.mxu1 %v960_v2  ;;  %922 = vmatprep.subr.bf16.mxu0 %v981_v1  ;;  %v800_v8 = vld [vmem:[%s1174_s1] ss:$0 sm:$0xff]  ;;  %v805_v11 = vld [vmem:[%s1174_s1 + $0x1] ss:$0 sm:$0xff]  ;;  %v807_v13 = vld [vmem:[%s1174_s1 + $0x2] ss:$0 sm:$0xff] }
  0x15   : >> { %932 = vmatprep.subr.bf16.mxu1 %v981_v1  ;;  %936 = vmatprep.mubr.msk.bf16.mxu1 %vm982_vm0, %v981_v1  ;;  %v803_v9 = vld [vmem:[%s1050_s13 + $0x60] sm:$0xf]  ;;  %v243_v10 = vmul.f32 %v800_v8, %v235_v7  ;;  %v817_v23 = vld [vmem:[%s1174_s1 + $0x5] ss:$0 sm:$0xff]  ;;  %v820_v26 = vld [vmem:[%s1050_s13 + $0x68] sm:$0xf] }
  0x16   : >> { %v258_v12 = vld [vmem:[%s1050_s13 + $0x1] sm:$0xf]  ;;  %v256_v14 = vmul.f32 %v805_v11, %v803_v9  ;;  %v822_v27 = vld [vmem:[%s1174_s1 + $0x6] ss:$0 sm:$0xff]  ;;  %v303_v29 = vmul.f32 %v817_v23, %v815_v22  ;;  %v823_v30 = vld [vmem:[%s1050_s13 + $0x9] sm:$0xf] }
  0x17   : >> { %923 = vmatpush3.bf16.msra.mxu0 %v961_v3  ;;  %v267_v15 = vmul.f32 %v807_v13, %v258_v12  ;;  %v808_v16 = vld [vmem:[%s1050_s13 + $0x61] sm:$0xf]  ;;  %v825_v31 = vld [vmem:[%s1174_s1 + $0x7] ss:$0 sm:$0xff]  ;;  %v317_v33 = vmul.f32 %v822_v27, %v820_v26  ;;  %v826_v34 = vld [vmem:[%s1050_s13 + $0x69] sm:$0xf] }
  0x18   : >> { %933 = vmatpush3.bf16.msra.mxu1 %v962_v4  ;;  %924 = vmatprep.subr.bf16.mxu0 %v981_v1  ;;  %v810_v17 = vld [vmem:[%s1174_s1 + $0x3] ss:$0 sm:$0xff]  ;;  %v257_v20 = vadd.f32 %v256_v14, %v243_v10  ;;  %v828_v35 = vld [vmem:[%s1174_s1 + $0x8] ss:$0 sm:$0xff]  ;;  %v328_v37 = vmul.f32 %v825_v31, %v823_v30  ;;  %v829_v38 = vld [vmem:[%s1050_s13 + $0xa] sm:$0xf] }
  0x19   : >> { %934 = vmatprep.subr.bf16.mxu1 %v981_v1  ;;  %v280_v18 = vld [vmem:[%s1050_s13 + $0x2] sm:$0xf]  ;;  %v278_v21 = vmul.f32 %v810_v17, %v808_v16  ;;  %v831_v39 = vld [vmem:[%s1174_s1 + $0x9] ss:$0 sm:$0xff]  ;;  %v339_v41 = vmul.f32 %v828_v35, %v826_v34  ;;  %v834_v42 = vld [vmem:[%s1050_s13 + $0x10] sm:$0xf] }
  0x1a   : >> { %v268_v24 = vadd.f32 %v267_v15, %v257_v20  ;;  %v289_v25 = vmul.f32 %v812_v19, %v280_v18  ;;  %v836_v43 = vld [vmem:[%s1174_s1 + $0xa] ss:$0 sm:$0xff]  ;;  %v842_v44 = vld [vmem:[%s1050_s13 + $0x11] sm:$0xf]  ;;  %v350_v46 = vmul.f32 %v831_v39, %v829_v38  ;;  %v841_v49 = vld [vmem:[%s1174_s1 + $0xb] ss:$0 sm:$0xff] }
  0x1b   : >> { %925 = vmatpush3.bf16.msra.mxu0 %v963_v5  ;;  %v615_v47 = vsel %vm535_vm1, %v842_v44, 0.0  ;;  %v839_v48 = vld [vmem:[%s1050_s13 + $0x70] sm:$0xf]  ;;  %v364_v52 = vmul.f32 %v836_v43, %v834_v42  ;;  %v844_v53 = vld [vmem:[%s1174_s1 + $0xc] ss:$0 sm:$0xff]  ;;  %vm688_vm3 = vcmask 781312  }
  0x1c   : >> { %935 = vmatpush3.bf16.msra.mxu1 %v964_v6  ;;  %v279_v28 = vadd.f32 %v278_v21, %v268_v24  ;;  %v616_v50 = vpack.c.bf16 %v615_v47, %v615_v47  ;;  %v378_v55 = vmul.f32 %v841_v49, %v839_v48  ;;  %v845_v56 = vld [vmem:[%s1050_s13 + $0x71] sm:$0xf]  ;;  %v847_v57 = vld [vmem:[%s1174_s1 + $0xd] ss:$0 sm:$0xff]  ;;  %v389_v59 = vmul.f32 %v844_v53, %v842_v44  ;;  %v850_v61 = vld [vmem:[%s1174_s1 + $0xe] ss:$0 sm:$0xff] }
  0x1d   : >> { %v848_v60 = vld [vmem:[%s1050_s13 + $0x12] sm:$0xf]  ;;  %v400_v63 = vmul.f32 %v847_v57, %v845_v56  ;;  %v853_v0 = vld [vmem:[%s1050_s13 + $0x18] sm:$0xf]  ;;  %v855_v1 = vld [vmem:[%s1174_s1 + $0xf] ss:$0 sm:$0xff] }
  0x1e   : >> { %v290_v32 = vadd.f32 %v289_v25, %v279_v28  ;;  %v411_v3 = vmul.f32 %v850_v61, %v848_v60  ;;  %v858_v4 = vld [vmem:[%s1050_s13 + $0x78] sm:$0xf]  ;;  %v860_v5 = vld [vmem:[%s1174_s1 + $0x10] ss:$0 sm:$0xff]  ;;  %v425_v7 = vmul.f32 %v855_v1, %v853_v0  ;;  %v863_v9 = vld [vmem:[%s1174_s1 + $0x11] ss:$0 sm:$0xff] }
  0x1f   : >> { %937 = vmatmul.mubr.msk.bf16.vlgmr.msra.gmra.mrb[0].mxu1 %vm562_vm2, %v616_v50  ;;  %v861_v8 = vld [vmem:[%s1050_s13 + $0x19] sm:$0xf]  ;;  %v439_v11 = vmul.f32 %v860_v5, %v858_v4  ;;  %v866_v13 = vld [vmem:[%s1174_s1 + $0x12] ss:$0 sm:$0xff]  ;;  %v869_v17 = vld [vmem:[%s1174_s1 + $0x13] ss:$0 sm:$0xff] }
  0x20   : >> { %v304_v36 = vadd.f32 %v303_v29, %v290_v32  ;;  %v864_v12 = vld [vmem:[%s1050_s13 + $0x79] sm:$0xf]  ;;  %v450_v15 = vmul.f32 %v863_v9, %v861_v8  ;;  %v872_v20 = vld [vmem:[%s1050_s13 + $0x20] sm:$0xf]  ;;  %v874_v21 = vld [vmem:[%s1174_s1 + $0x14] ss:$0 sm:$0xff] }
  0x21   : >> { %v867_v16 = vld [vmem:[%s1050_s13 + $0x1a] sm:$0xf]  ;;  %v461_v19 = vmul.f32 %v866_v13, %v864_v12  ;;  %v877_v24 = vld [vmem:[%s1050_s13 + $0x80] sm:$0xf]  ;;  %v879_v25 = vld [vmem:[%s1174_s1 + $0x15] ss:$0 sm:$0xff]  ;;  %v486_v27 = vmul.f32 %v874_v21, %v872_v20 }
  0x22   : >> { %v318_v40 = vadd.f32 %v317_v33, %v304_v36  ;;  %v472_v23 = vmul.f32 %v869_v17, %v867_v16  ;;  %v880_v28 = vld [vmem:[%s1050_s13 + $0x21] sm:$0xf]  ;;  %v882_v29 = vld [vmem:[%s1174_s1 + $0x16] ss:$0 sm:$0xff]  ;;  %v500_v31 = vmul.f32 %v879_v25, %v877_v24  ;;  %v885_v33 = vld [vmem:[%s1174_s1 + $0x17] ss:$0 sm:$0xff] }
  0x23   : >> { %v883_v32 = vld [vmem:[%s1050_s13 + $0x81] sm:$0xf]  ;;  %v511_v35 = vmul.f32 %v882_v29, %v880_v28  ;;  %v893_v50 = vld [vmem:[%s1176_s3] ss:$0 sm:$0xff]  ;;  %s231_s28 = sadd.s32 1, %s979_s28  }
  0x24   : >> { %v329_v45 = vadd.f32 %v328_v37, %v318_v40  ;;  %v886_v36 = vld [vmem:[%s1050_s13 + $0x22] sm:$0xf]  ;;  %v888_v37 = vld [vmem:[%s1174_s1 + $0x18] ss:$0 sm:$0xff]  ;;  %v522_v39 = vmul.f32 %v885_v33, %v883_v32  ;;  %p228_p4 = scmp.ge.s32.totalorder %s231_s28, 4  }
  0x26   : >> { %v340_v51 = vadd.f32 %v339_v41, %v329_v45  ;;  %v533_v41 = vmul.f32 %v888_v37, %v886_v36 }
  0x28   : >> { %v351_v54 = vadd.f32 %v350_v46, %v340_v51 }
  0x2a   : >> { %v365_v58 = vadd.f32 %v364_v52, %v351_v54 }
  0x2c   : >> { %v379_v62 = vadd.f32 %v378_v55, %v365_v58 }
  0x2e   : >> { %v390_v2 = vadd.f32 %v389_v59, %v379_v62 }
  0x30   : >> { %v401_v6 = vadd.f32 %v400_v63, %v390_v2 }
  0x32   : >> { %v412_v10 = vadd.f32 %v411_v3, %v401_v6 }
  0x34   : >> { %v426_v14 = vadd.f32 %v425_v7, %v412_v10 }
  0x36   : >> { %v440_v18 = vadd.f32 %v439_v11, %v426_v14 }
  0x38   : >> { %v451_v22 = vadd.f32 %v450_v15, %v440_v18 }
  0x3a   : >> { %v462_v26 = vadd.f32 %v461_v19, %v451_v22 }
  0x3c   : >> { %v473_v30 = vadd.f32 %v472_v23, %v462_v26 }
  0x3e   : >> { %v487_v34 = vadd.f32 %v486_v27, %v473_v30 }
  0x40   : >> { %v501_v38 = vadd.f32 %v500_v31, %v487_v34 }
  0x42   : >> { %v512_v40 = vadd.f32 %v511_v35, %v501_v38 }
  0x44   : >> { %v523_v42 = vadd.f32 %v522_v39, %v512_v40 }
  0x46   : >> { %v534_v43 = vadd.f32 %v533_v41, %v523_v42 }
  0x48   : >> { %v536_v44 = vsel %vm535_vm1, %v534_v43, 0.0 }
  0x49   : >> { %v537_v45 = vpack.c.bf16 %v536_v44, %v536_v44 }
  0x4b   : >> { %927 = vmatmul.mubr.msk.bf16.vlgmr.msra.gmra.mrb[0].mxu0 %vm562_vm2, %v537_v45 }
  0xf2   : >> { %v678_v46 = vpop.f32.mrb[0].mxu1 }
  0xf3   : >> { %v938_v47 = vpop.f32.mrb[1].mxu1 }
  0xf4   : >> { %v681_v48 = vpop.f32.mrb[2].mxu1 }
  0xf5   : >> { %v939_v49 = vpop.f32.mrb[3].mxu1 }
 0x11e   : >> { %v600_v51 = vpop.f32.mrb[0].mxu0 }
 0x11f   : >> { %v613_v52 = vadd.f32 %v893_v50, %v600_v51  ;;  %v928_v53 = vpop.f32.mrb[1].mxu0 }
 0x120   : >> { %v603_v54 = vpop.f32.mrb[2].mxu0 }
 0x121   : >> { %v614_v55 = vmax.f32 %v613_v52, 0.0  ;;  %v929_v56 = vpop.f32.mrb[3].mxu0  ;;  %230 = sbr.rel (!%p228_p4) target bundleno = 17 (0x11), region = 112 }
 0x123   : >> { %v684_v57 = vadd.f32 %v678_v46, %v614_v55 }
 0x125   : >> { %v685_v58 = vmax.f32 %v684_v57, 0.0 }
 0x127   : >> { %689 = vst.msk [vmem:[%s687_s9] sm:$0xf] %vm688_vm3, %v685_v58 }
 0x128 PF: > { %s15_s18 = sadd.s32 1, %s975_s18  }
 0x129   : > { %p12_p5 = scmp.ge.s32.totalorder %s15_s18, 4  }
 0x12b   :  { %14 = sbr.rel (!%p12_p5) target bundleno = 1 (0x1), region = 123 }

// kernel: blazeface_full_forward.36
= control target key start
LH: loop header
LB: loop body
LE: loop exit
PB: predicated region body
PF: predicated region fallthrough
CT: control target
= control target key end

     0   :  { %s862_s15 = smov 0   ;;  %s1018_s0 = inlined_call_operand.vmem [shape: f32[2,8,8,96], index: 0, kind: input, shape index: {}]   ;;  %s1019_s1 = inlined_call_operand.vmem [shape: f32[25,1,96], index: 1, kind: input, shape index: {}]   ;;  %s1020_s2 = inlined_call_operand.vmem [shape: bf16[96,96], index: 2, kind: input, shape index: {}]   ;;  %s1021_s3 = inlined_call_operand.vmem [shape: f32[1,96], index: 3, kind: input, shape index: {}]   ;;  %s1022_s4 = inlined_call_operand.vmem [shape: f32[2,4,4,96], index: 4, kind: output, shape index: {}]  }
   0x1 LB: > { %s676_s16 = sadd.s32 4294967295, %s829_s15   ;;  %p680_p0 = scmp.ge.s32.totalorder %s829_s15, 1  ;;  %s829_s15 = sphi %s862_s15, %s14_s15  }
   0x2   : > { %p162_p1 = scmp.lt.s32.totalorder %s829_s15, 3 }
   0x4   : > { %p163_p2 = pnand %p680_p0, %p162_p1 }
   0x5   : > { %p188_p3 = scmp.lt.s32.totalorder (!%p163_p2), %s676_s16, 1  ;;  %s880_s25 = smov (!%p163_p2), 0  }
   0x6   : > { %166 = sbr.rel (%p163_p2) target bundleno = 290 (0x122), region = 36 }
   0xd   : > { %s1024_s16 = smov (!%p188_p3, %s676_s16), 1 }
   0xe   : > { %s770_s17 = sshll.u32 %s1024_s16, 6  ;;  %s771_s18 = sshll.u32 %s1024_s16, 4 }
   0xf   : > { %s873_s21 = scalar_lea.vmem %s1018_s0, %s770_s17  ;;  %s878_s24 = scalar_lea.vmem %s1022_s4, %s771_s18 }
  0x10 LB: >> { %v813_v0 = vld [vmem:[%s1020_s2] sm:$0xff]   ;;  %v835_v1 = vmov 0.0   ;;  %v814_v2 = vld [vmem:[%s1020_s2 + $0x8] sm:$0xff]   ;;  %vm836_vm0 = vmmov 0   ;;  %s685_s30 = sshll.u32 %s833_s25, 3  ;;  %v815_v3 = vld [vmem:[%s1020_s2 + $0x10] sm:$0xff]   ;;  %s833_s25 = sphi %s880_s25, %s204_s25  }
  0x11   : >> { %779 = vmatprep.subr.bf16.mxu0 %v835_v1  ;;  %791 = vmatprep.mubr.msk.bf16.mxu0 %vm836_vm0, %v835_v1  ;;  %s893_s5 = scalar_lea.vmem %s873_s21, %s685_s30  ;;  %v686_v5 = vld [vmem:[%s1019_s1] ss:$0 sm:$0xff]  ;;  %v688_v8 = vld [vmem:[%s1019_s1 + $0x1] ss:$0 sm:$0xff]  ;;  %v690_v10 = vld [vmem:[%s1019_s1 + $0x2] ss:$0 sm:$0xff] }
  0x12   : >> { %780 = vmatpush3.bf16.msra.mxu0 %v813_v0  ;;  %v207_v4 = vld [vmem:[%s893_s5] sm:$0xf]  ;;  %v249_v15 = vld [vmem:[%s893_s5 + $0x4] sm:$0xf]  ;;  %v816_v17 = vld [vmem:[%s1020_s2 + $0x18] sm:$0xff]   ;;  %vm492_vm1 = vcmask 1043456  }
  0x13   : >> { %781 = vmatprep.subr.bf16.mxu0 %v835_v1  ;;  %v216_v6 = vld [vmem:[%s893_s5 + $0x1] sm:$0xf]  ;;  %v215_v7 = vmul.f32 %v686_v5, %v207_v4  ;;  %v696_v20 = vld [vmem:[%s893_s5 + $0x8] sm:$0xf]  ;;  %v698_v21 = vld [vmem:[%s1019_s1 + $0x5] ss:$0 sm:$0xff] }
  0x14   : >> { %v227_v9 = vld [vmem:[%s893_s5 + $0x2] sm:$0xf]  ;;  %v225_v11 = vmul.f32 %v688_v8, %v216_v6  ;;  %v699_v24 = vld [vmem:[%s893_s5 + $0x9] sm:$0xf]  ;;  %v701_v25 = vld [vmem:[%s1019_s1 + $0x6] ss:$0 sm:$0xff]  ;;  %v272_v28 = vmul.f32 %v698_v21, %v696_v20 }
  0x15   : >> { %v236_v12 = vmul.f32 %v690_v10, %v227_v9  ;;  %v238_v13 = vld [vmem:[%s893_s5 + $0x3] sm:$0xf]  ;;  %v702_v29 = vld [vmem:[%s893_s5 + $0xa] sm:$0xf]  ;;  %v704_v30 = vld [vmem:[%s1019_s1 + $0x7] ss:$0 sm:$0xff]  ;;  %v283_v32 = vmul.f32 %v701_v25, %v699_v24 }
  0x16   : >> { %782 = vmatpush3.bf16.msra.mxu0 %v814_v2  ;;  %v692_v14 = vld [vmem:[%s1019_s1 + $0x3] ss:$0 sm:$0xff]  ;;  %v694_v16 = vld [vmem:[%s1019_s1 + $0x4] ss:$0 sm:$0xff]  ;;  %v226_v18 = vadd.f32 %v225_v11, %v215_v7  ;;  %v705_v33 = vld [vmem:[%s893_s5 + $0xb] sm:$0xf]  ;;  %v294_v37 = vmul.f32 %v704_v30, %v702_v29 }
  0x17   : >> { %783 = vmatprep.subr.bf16.mxu0 %v835_v1  ;;  %v247_v19 = vmul.f32 %v692_v14, %v238_v13  ;;  %v258_v23 = vmul.f32 %v694_v16, %v249_v15  ;;  %v817_v26 = vld [vmem:[%s1020_s2 + $0x20] sm:$0xff]   ;;  %v707_v34 = vld [vmem:[%s1019_s1 + $0x8] ss:$0 sm:$0xff]  ;;  %v708_v38 = vld [vmem:[%s893_s5 + $0xc] sm:$0xf]  ;;  %vm543_vm2 = vcmask 785408  }
  0x18   : >> { %v237_v22 = vadd.f32 %v236_v12, %v226_v18  ;;  %v818_v35 = vld [vmem:[%s1020_s2 + $0x28] sm:$0xff]   ;;  %v305_v41 = vmul.f32 %v707_v34, %v705_v33  ;;  %v712_v42 = vld [vmem:[%s893_s5 + $0x10] sm:$0xf]  ;;  %v724_v58 = vld [vmem:[%s893_s5 + $0x14] sm:$0xf]  ;;  %vm598_vm3 = vcmask 781312  }
  0x19   : >> { %v710_v39 = vld [vmem:[%s1019_s1 + $0x9] ss:$0 sm:$0xff]  ;;  %v714_v43 = vld [vmem:[%s1019_s1 + $0xa] ss:$0 sm:$0xff]  ;;  %v715_v46 = vld [vmem:[%s893_s5 + $0x11] sm:$0xf] }
  0x1a   : >> { %784 = vmatpush3.bf16.msra.mxu0 %v815_v3  ;;  %v248_v27 = vadd.f32 %v247_v19, %v237_v22  ;;  %v316_v45 = vmul.f32 %v710_v39, %v708_v38  ;;  %v717_v47 = vld [vmem:[%s1019_s1 + $0xb] ss:$0 sm:$0xff]  ;;  %v330_v49 = vmul.f32 %v714_v43, %v712_v42  ;;  %v718_v50 = vld [vmem:[%s893_s5 + $0x12] sm:$0xf]  ;;  %v720_v51 = vld [vmem:[%s1019_s1 + $0xc] ss:$0 sm:$0xff] }
  0x1b   : >> { %785 = vmatprep.subr.bf16.mxu0 %v835_v1  ;;  %v341_v53 = vmul.f32 %v717_v47, %v715_v46  ;;  %v721_v54 = vld [vmem:[%s893_s5 + $0x13] sm:$0xf]  ;;  %v723_v55 = vld [vmem:[%s1019_s1 + $0xd] ss:$0 sm:$0xff]  ;;  %v352_v57 = vmul.f32 %v720_v51, %v718_v50  ;;  %v726_v59 = vld [vmem:[%s1019_s1 + $0xe] ss:$0 sm:$0xff] }
  0x1c   : >> { %v259_v31 = vadd.f32 %v258_v23, %v248_v27  ;;  %v363_v61 = vmul.f32 %v723_v55, %v721_v54  ;;  %v728_v62 = vld [vmem:[%s893_s5 + $0x18] sm:$0xf]  ;;  %v730_v63 = vld [vmem:[%s1019_s1 + $0xf] ss:$0 sm:$0xff]  ;;  %v733_v3 = vld [vmem:[%s1019_s1 + $0x10] ss:$0 sm:$0xff] }
  0x1d   : >> { %v731_v2 = vld [vmem:[%s893_s5 + $0x19] sm:$0xf]  ;;  %v388_v5 = vmul.f32 %v730_v63, %v728_v62  ;;  %v736_v7 = vld [vmem:[%s1019_s1 + $0x11] ss:$0 sm:$0xff]  ;;  %v739_v11 = vld [vmem:[%s1019_s1 + $0x12] ss:$0 sm:$0xff] }
  0x1e   : >> { %786 = vmatpush3.bf16.msra.mxu0 %v816_v17  ;;  %v273_v36 = vadd.f32 %v272_v28, %v259_v31  ;;  %v734_v6 = vld [vmem:[%s893_s5 + $0x1a] sm:$0xf]  ;;  %v399_v9 = vmul.f32 %v733_v3, %v731_v2  ;;  %v742_v15 = vld [vmem:[%s1019_s1 + $0x13] ss:$0 sm:$0xff]  ;;  %v744_v18 = vld [vmem:[%s893_s5 + $0x20] sm:$0xf] }
  0x1f   : >> { %787 = vmatprep.subr.bf16.mxu0 %v835_v1  ;;  %v737_v10 = vld [vmem:[%s893_s5 + $0x1b] sm:$0xf]  ;;  %v410_v13 = vmul.f32 %v736_v7, %v734_v6  ;;  %v746_v19 = vld [vmem:[%s1019_s1 + $0x14] ss:$0 sm:$0xff]  ;;  %v747_v22 = vld [vmem:[%s893_s5 + $0x21] sm:$0xf] }
  0x20   : >> { %v284_v40 = vadd.f32 %v283_v32, %v273_v36  ;;  %v740_v14 = vld [vmem:[%s893_s5 + $0x1c] sm:$0xf]  ;;  %v421_v17 = vmul.f32 %v739_v11, %v737_v10  ;;  %v749_v23 = vld [vmem:[%s1019_s1 + $0x15] ss:$0 sm:$0xff]  ;;  %v446_v25 = vmul.f32 %v746_v19, %v744_v18  ;;  %v752_v27 = vld [vmem:[%s1019_s1 + $0x16] ss:$0 sm:$0xff] }
  0x21   : >> { %v432_v21 = vmul.f32 %v742_v15, %v740_v14  ;;  %v457_v29 = vmul.f32 %v749_v23, %v747_v22  ;;  %v753_v30 = vld [vmem:[%s893_s5 + $0x23] sm:$0xf]  ;;  %v755_v31 = vld [vmem:[%s1019_s1 + $0x17] ss:$0 sm:$0xff] }
  0x22   : >> { %788 = vmatpush3.bf16.msra.mxu0 %v817_v26  ;;  %v295_v44 = vadd.f32 %v294_v37, %v284_v40  ;;  %v750_v26 = vld [vmem:[%s893_s5 + $0x22] sm:$0xf]  ;;  %v479_v37 = vmul.f32 %v755_v31, %v753_v30 }
  0x23   : >> { %789 = vmatprep.subr.bf16.mxu0 %v835_v1  ;;  %v374_v1 = vmul.f32 %v726_v59, %v724_v58  ;;  %v468_v33 = vmul.f32 %v752_v27, %v750_v26  ;;  %v756_v34 = vld [vmem:[%s893_s5 + $0x24] sm:$0xf]  ;;  %s767_s5 = sshll.u32 %s833_s25, 2  ;;  %s204_s25 = sadd.s32 1, %s833_s25  }
  0x24   : >> { %v306_v48 = vadd.f32 %v305_v41, %v295_v44  ;;  %v766_v44 = vld [vmem:[%s1021_s3] ss:$0 sm:$0xff]  ;;  %s597_s28 = scalar_lea.vmem %s878_s24, %s767_s5  ;;  %p201_p4 = scmp.ge.s32.totalorder %s204_s25, 4  }
  0x26   : >> { %790 = vmatpush3.bf16.msra.mxu0 %v818_v35  ;;  %v317_v52 = vadd.f32 %v316_v45, %v306_v48  ;;  %v758_v35 = vld [vmem:[%s1019_s1 + $0x18] ss:$0 sm:$0xff] }
  0x27   : >> { %v490_v39 = vmul.f32 %v758_v35, %v756_v34 }
  0x28   : >> { %v331_v56 = vadd.f32 %v330_v49, %v317_v52 }
  0x2a   : >> { %v342_v60 = vadd.f32 %v341_v53, %v331_v56 }
  0x2c   : >> { %v353_v0 = vadd.f32 %v352_v57, %v342_v60 }
  0x2e   : >> { %v364_v4 = vadd.f32 %v363_v61, %v353_v0 }
  0x30   : >> { %v375_v8 = vadd.f32 %v374_v1, %v364_v4 }
  0x32   : >> { %v389_v12 = vadd.f32 %v388_v5, %v375_v8 }
  0x34   : >> { %v400_v16 = vadd.f32 %v399_v9, %v389_v12 }
  0x36   : >> { %v411_v20 = vadd.f32 %v410_v13, %v400_v16 }
  0x38   : >> { %v422_v24 = vadd.f32 %v421_v17, %v411_v20 }
  0x3a   : >> { %v433_v28 = vadd.f32 %v432_v21, %v422_v24 }
  0x3c   : >> { %v447_v32 = vadd.f32 %v446_v25, %v433_v28 }
  0x3e   : >> { %v458_v36 = vadd.f32 %v457_v29, %v447_v32 }
  0x40   : >> { %v469_v38 = vadd.f32 %v468_v33, %v458_v36 }
  0x42   : >> { %v480_v40 = vadd.f32 %v479_v37, %v469_v38 }
  0x44   : >> { %v491_v41 = vadd.f32 %v490_v39, %v480_v40 }
  0x46   : >> { %v493_v42 = vsel %vm492_vm1, %v491_v41, 0.0 }
  0x47   : >> { %v494_v43 = vpack.c.bf16 %v493_v42, %v493_v42 }
  0x49   : >> { %792 = vmatmul.mubr.msk.bf16.vlgmr.msra.gmra.mrb[0].mxu0 %vm543_vm2, %v494_v43 }
 0x11b   : > { %203 = sbr.rel (!%p201_p4) target bundleno = 16 (0x10), region = 103 }
 0x11c   : >> { %v581_v45 = vpop.f32.mrb[0].mxu0 }
 0x11d   : >> { %v594_v46 = vadd.f32 %v766_v44, %v581_v45  ;;  %v793_v47 = vpop.f32.mrb[1].mxu0 }
 0x11e   : >> { %v584_v48 = vpop.f32.mrb[2].mxu0 }
 0x11f   : >> { %v595_v49 = vmax.f32 %v594_v46, 0.0  ;;  %v794_v50 = vpop.f32.mrb[3].mxu0 }
 0x121   : >> { %599 = vst.msk [vmem:[%s597_s28] sm:$0xf] %vm598_vm3, %v595_v49 }
 0x122 PF: > { %s14_s15 = sadd.s32 1, %s829_s15  }
 0x123   : > { %p11_p5 = scmp.ge.s32.totalorder %s14_s15, 4  }
 0x125   :  { %13 = sbr.rel (!%p11_p5) target bundleno = 1 (0x1), region = 114 }

// kernel: blazeface_full_forward.41
= control target key start
LH: loop header
LB: loop body
LE: loop exit
PB: predicated region body
PF: predicated region fallthrough
CT: control target
= control target key end

     0   :  { %s935_s18 = smov 0   ;;  %s1097_s0 = inlined_call_operand.vmem [shape: f32[2,8,8,96], index: 0, kind: input, shape index: {}]   ;;  %s1098_s1 = inlined_call_operand.vmem [shape: f32[25,1,96], index: 1, kind: input, shape index: {}]   ;;  %s1099_s2 = inlined_call_operand.vmem [shape: bf16[96,96], index: 2, kind: input, shape index: {}]   ;;  %s1100_s3 = inlined_call_operand.vmem [shape: f32[1,96], index: 3, kind: input, shape index: {}]   ;;  %s1101_s4 = inlined_call_operand.vmem [shape: f32[2,4,4,96], index: 4, kind: input, shape index: {}]   ;;  %s1102_s5 = inlined_call_operand.vmem [shape: f32[2,4,4,96], index: 5, kind: output, shape index: {}]  }
   0x1 LB: > { %s741_s19 = sadd.s32 4294967295, %s897_s18   ;;  %p745_p0 = scmp.ge.s32.totalorder %s897_s18, 1  ;;  %s897_s18 = sphi %s935_s18, %s15_s18  }
   0x2   : > { %p197_p1 = scmp.lt.s32.totalorder %s897_s18, 3 }
   0x4   : > { %p198_p2 = pnand %p745_p0, %p197_p1 }
   0x5   : > { %p230_p3 = scmp.lt.s32.totalorder (!%p198_p2), %s741_s19, 1  ;;  %s958_s6 = smov (!%p198_p2), 0  }
   0x6   : > { %201 = sbr.rel (%p198_p2) target bundleno = 295 (0x127), region = 40 }
   0xd   : > { %s1104_s19 = smov (!%p230_p3, %s741_s19), 1 }
   0xe   : > { %s837_s20 = sshll.u32 %s1104_s19, 6  ;;  %s838_s21 = sshll.u32 %s1104_s19, 4 }
   0xf   : > { %s946_s24 = scalar_lea.vmem %s1097_s0, %s837_s20  ;;  %s951_s27 = scalar_lea.vmem %s1101_s4, %s838_s21 }
  0x10   : > { %s956_s30 = scalar_lea.vmem %s1102_s5, %s838_s21 }
  0x11 LB: >> { %v881_v0 = vld [vmem:[%s1099_s2] sm:$0xff]   ;;  %v903_v1 = vmov 0.0   ;;  %v882_v2 = vld [vmem:[%s1099_s2 + $0x8] sm:$0xff]   ;;  %vm904_vm0 = vmmov 0   ;;  %s752_s11 = sshll.u32 %s901_s6, 3  ;;  %v883_v3 = vld [vmem:[%s1099_s2 + $0x10] sm:$0xff]   ;;  %s901_s6 = sphi %s958_s6, %s251_s6  }
  0x12   : >> { %847 = vmatprep.subr.bf16.mxu0 %v903_v1  ;;  %859 = vmatprep.mubr.msk.bf16.mxu0 %vm904_vm0, %v903_v1  ;;  %s971_s12 = scalar_lea.vmem %s946_s24, %s752_s11  ;;  %v753_v5 = vld [vmem:[%s1098_s1] ss:$0 sm:$0xff]  ;;  %v755_v8 = vld [vmem:[%s1098_s1 + $0x1] ss:$0 sm:$0xff]  ;;  %v757_v10 = vld [vmem:[%s1098_s1 + $0x2] ss:$0 sm:$0xff] }
  0x13   : >> { %848 = vmatpush3.bf16.msra.mxu0 %v881_v0  ;;  %v254_v4 = vld [vmem:[%s971_s12] sm:$0xf]  ;;  %v296_v15 = vld [vmem:[%s971_s12 + $0x4] sm:$0xf]  ;;  %v884_v17 = vld [vmem:[%s1099_s2 + $0x18] sm:$0xff]   ;;  %vm539_vm1 = vcmask 1043456  }
  0x14   : >> { %849 = vmatprep.subr.bf16.mxu0 %v903_v1  ;;  %v263_v6 = vld [vmem:[%s971_s12 + $0x1] sm:$0xf]  ;;  %v262_v7 = vmul.f32 %v753_v5, %v254_v4  ;;  %v763_v20 = vld [vmem:[%s971_s12 + $0x8] sm:$0xf]  ;;  %v765_v21 = vld [vmem:[%s1098_s1 + $0x5] ss:$0 sm:$0xff] }
  0x15   : >> { %v274_v9 = vld [vmem:[%s971_s12 + $0x2] sm:$0xf]  ;;  %v272_v11 = vmul.f32 %v755_v8, %v263_v6  ;;  %v766_v24 = vld [vmem:[%s971_s12 + $0x9] sm:$0xf]  ;;  %v768_v25 = vld [vmem:[%s1098_s1 + $0x6] ss:$0 sm:$0xff]  ;;  %v319_v28 = vmul.f32 %v765_v21, %v763_v20 }
  0x16   : >> { %v283_v12 = vmul.f32 %v757_v10, %v274_v9  ;;  %v285_v13 = vld [vmem:[%s971_s12 + $0x3] sm:$0xf]  ;;  %v769_v29 = vld [vmem:[%s971_s12 + $0xa] sm:$0xf]  ;;  %v771_v30 = vld [vmem:[%s1098_s1 + $0x7] ss:$0 sm:$0xff]  ;;  %v330_v32 = vmul.f32 %v768_v25, %v766_v24 }
  0x17   : >> { %850 = vmatpush3.bf16.msra.mxu0 %v882_v2  ;;  %v759_v14 = vld [vmem:[%s1098_s1 + $0x3] ss:$0 sm:$0xff]  ;;  %v761_v16 = vld [vmem:[%s1098_s1 + $0x4] ss:$0 sm:$0xff]  ;;  %v273_v18 = vadd.f32 %v272_v11, %v262_v7  ;;  %v772_v33 = vld [vmem:[%s971_s12 + $0xb] sm:$0xf]  ;;  %v341_v37 = vmul.f32 %v771_v30, %v769_v29 }
  0x18   : >> { %851 = vmatprep.subr.bf16.mxu0 %v903_v1  ;;  %v294_v19 = vmul.f32 %v759_v14, %v285_v13  ;;  %v305_v23 = vmul.f32 %v761_v16, %v296_v15  ;;  %v885_v26 = vld [vmem:[%s1099_s2 + $0x20] sm:$0xff]   ;;  %v774_v34 = vld [vmem:[%s1098_s1 + $0x8] ss:$0 sm:$0xff]  ;;  %v775_v38 = vld [vmem:[%s971_s12 + $0xc] sm:$0xf]  ;;  %vm590_vm2 = vcmask 785408  }
  0x19   : >> { %v284_v22 = vadd.f32 %v283_v12, %v273_v18  ;;  %v886_v35 = vld [vmem:[%s1099_s2 + $0x28] sm:$0xff]   ;;  %v352_v41 = vmul.f32 %v774_v34, %v772_v33  ;;  %v779_v42 = vld [vmem:[%s971_s12 + $0x10] sm:$0xf]  ;;  %v791_v58 = vld [vmem:[%s971_s12 + $0x14] sm:$0xf]  ;;  %s834_s14 = sshll.u32 %s901_s6, 2 }
  0x1a   : >> { %v777_v39 = vld [vmem:[%s1098_s1 + $0x9] ss:$0 sm:$0xff]  ;;  %v781_v43 = vld [vmem:[%s1098_s1 + $0xa] ss:$0 sm:$0xff]  ;;  %v782_v46 = vld [vmem:[%s971_s12 + $0x11] sm:$0xf]  ;;  %s648_s17 = scalar_lea.vmem %s956_s30, %s834_s14 }
  0x1b   : >> { %852 = vmatpush3.bf16.msra.mxu0 %v883_v3  ;;  %v295_v27 = vadd.f32 %v294_v19, %v284_v22  ;;  %v363_v45 = vmul.f32 %v777_v39, %v775_v38  ;;  %v784_v47 = vld [vmem:[%s1098_s1 + $0xb] ss:$0 sm:$0xff]  ;;  %v377_v49 = vmul.f32 %v781_v43, %v779_v42  ;;  %v785_v50 = vld [vmem:[%s971_s12 + $0x12] sm:$0xf]  ;;  %v787_v51 = vld [vmem:[%s1098_s1 + $0xc] ss:$0 sm:$0xff] }
  0x1c   : >> { %853 = vmatprep.subr.bf16.mxu0 %v903_v1  ;;  %v388_v53 = vmul.f32 %v784_v47, %v782_v46  ;;  %v788_v54 = vld [vmem:[%s971_s12 + $0x13] sm:$0xf]  ;;  %v790_v55 = vld [vmem:[%s1098_s1 + $0xd] ss:$0 sm:$0xff]  ;;  %v399_v57 = vmul.f32 %v787_v51, %v785_v50  ;;  %v793_v59 = vld [vmem:[%s1098_s1 + $0xe] ss:$0 sm:$0xff] }
  0x1d   : >> { %v306_v31 = vadd.f32 %v305_v23, %v295_v27  ;;  %v410_v61 = vmul.f32 %v790_v55, %v788_v54  ;;  %v795_v62 = vld [vmem:[%s971_s12 + $0x18] sm:$0xf]  ;;  %v797_v63 = vld [vmem:[%s1098_s1 + $0xf] ss:$0 sm:$0xff]  ;;  %v800_v3 = vld [vmem:[%s1098_s1 + $0x10] ss:$0 sm:$0xff] }
  0x1e   : >> { %v798_v2 = vld [vmem:[%s971_s12 + $0x19] sm:$0xf]  ;;  %v435_v5 = vmul.f32 %v797_v63, %v795_v62  ;;  %v803_v7 = vld [vmem:[%s1098_s1 + $0x11] ss:$0 sm:$0xff]  ;;  %v806_v11 = vld [vmem:[%s1098_s1 + $0x12] ss:$0 sm:$0xff] }
  0x1f   : >> { %854 = vmatpush3.bf16.msra.mxu0 %v884_v17  ;;  %v320_v36 = vadd.f32 %v319_v28, %v306_v31  ;;  %v801_v6 = vld [vmem:[%s971_s12 + $0x1a] sm:$0xf]  ;;  %v446_v9 = vmul.f32 %v800_v3, %v798_v2  ;;  %v809_v15 = vld [vmem:[%s1098_s1 + $0x13] ss:$0 sm:$0xff]  ;;  %v811_v18 = vld [vmem:[%s971_s12 + $0x20] sm:$0xf] }
  0x20   : >> { %855 = vmatprep.subr.bf16.mxu0 %v903_v1  ;;  %v804_v10 = vld [vmem:[%s971_s12 + $0x1b] sm:$0xf]  ;;  %v457_v13 = vmul.f32 %v803_v7, %v801_v6  ;;  %v813_v19 = vld [vmem:[%s1098_s1 + $0x14] ss:$0 sm:$0xff]  ;;  %v814_v22 = vld [vmem:[%s971_s12 + $0x21] sm:$0xf] }
  0x21   : >> { %v331_v40 = vadd.f32 %v330_v32, %v320_v36  ;;  %v807_v14 = vld [vmem:[%s971_s12 + $0x1c] sm:$0xf]  ;;  %v468_v17 = vmul.f32 %v806_v11, %v804_v10  ;;  %v816_v23 = vld [vmem:[%s1098_s1 + $0x15] ss:$0 sm:$0xff]  ;;  %v493_v25 = vmul.f32 %v813_v19, %v811_v18  ;;  %v819_v27 = vld [vmem:[%s1098_s1 + $0x16] ss:$0 sm:$0xff] }
  0x22   : >> { %v479_v21 = vmul.f32 %v809_v15, %v807_v14  ;;  %v504_v29 = vmul.f32 %v816_v23, %v814_v22  ;;  %v820_v30 = vld [vmem:[%s971_s12 + $0x23] sm:$0xf]  ;;  %v822_v31 = vld [vmem:[%s1098_s1 + $0x17] ss:$0 sm:$0xff]  ;;  %vm649_vm3 = vcmask 781312   ;;  %s251_s6 = sadd.s32 1, %s901_s6  }
  0x23   : >> { %856 = vmatpush3.bf16.msra.mxu0 %v885_v26  ;;  %v342_v44 = vadd.f32 %v341_v37, %v331_v40  ;;  %v817_v26 = vld [vmem:[%s971_s12 + $0x22] sm:$0xf]  ;;  %v526_v37 = vmul.f32 %v822_v31, %v820_v30  ;;  %p248_p4 = scmp.ge.s32.totalorder %s251_s6, 4  }
  0x24   : >> { %857 = vmatprep.subr.bf16.mxu0 %v903_v1  ;;  %v421_v1 = vmul.f32 %v793_v59, %v791_v58  ;;  %v515_v33 = vmul.f32 %v819_v27, %v817_v26  ;;  %v823_v34 = vld [vmem:[%s971_s12 + $0x24] sm:$0xf]  ;;  %s644_s12 = scalar_lea.vmem %s951_s27, %s834_s14 }
  0x25   : >> { %v353_v48 = vadd.f32 %v352_v41, %v342_v44  ;;  %v833_v44 = vld [vmem:[%s1100_s3] ss:$0 sm:$0xff] }
  0x27   : >> { %858 = vmatpush3.bf16.msra.mxu0 %v886_v35  ;;  %v364_v52 = vadd.f32 %v363_v45, %v353_v48  ;;  %v825_v35 = vld [vmem:[%s1098_s1 + $0x18] ss:$0 sm:$0xff]  ;;  %v645_v48 = vld [vmem:[%s644_s12] sm:$0xf] }
  0x28   : >> { %v537_v39 = vmul.f32 %v825_v35, %v823_v34 }
  0x29   : >> { %v378_v56 = vadd.f32 %v377_v49, %v364_v52 }
  0x2b   : >> { %v389_v60 = vadd.f32 %v388_v53, %v378_v56 }
  0x2d   : >> { %v400_v0 = vadd.f32 %v399_v57, %v389_v60 }
  0x2f   : >> { %v411_v4 = vadd.f32 %v410_v61, %v400_v0 }
  0x31   : >> { %v422_v8 = vadd.f32 %v421_v1, %v411_v4 }
  0x33   : >> { %v436_v12 = vadd.f32 %v435_v5, %v422_v8 }
  0x35   : >> { %v447_v16 = vadd.f32 %v446_v9, %v436_v12 }
  0x37   : >> { %v458_v20 = vadd.f32 %v457_v13, %v447_v16 }
  0x39   : >> { %v469_v24 = vadd.f32 %v468_v17, %v458_v20 }
  0x3b   : >> { %v480_v28 = vadd.f32 %v479_v21, %v469_v24 }
  0x3d   : >> { %v494_v32 = vadd.f32 %v493_v25, %v480_v28 }
  0x3f   : >> { %v505_v36 = vadd.f32 %v504_v29, %v494_v32 }
  0x41   : >> { %v516_v38 = vadd.f32 %v515_v33, %v505_v36 }
  0x43   : >> { %v527_v40 = vadd.f32 %v526_v37, %v516_v38 }
  0x45   : >> { %v538_v41 = vadd.f32 %v537_v39, %v527_v40 }
  0x47   : >> { %v540_v42 = vsel %vm539_vm1, %v538_v41, 0.0 }
  0x48   : >> { %v541_v43 = vpack.c.bf16 %v540_v42, %v540_v42 }
  0x4a   : >> { %860 = vmatmul.mubr.msk.bf16.vlgmr.msra.gmra.mrb[0].mxu0 %vm590_vm2, %v541_v43 }
 0x11d   : >> { %v628_v45 = vpop.f32.mrb[0].mxu0 }
 0x11e   : >> { %v641_v46 = vadd.f32 %v833_v44, %v628_v45  ;;  %v861_v47 = vpop.f32.mrb[1].mxu0 }
 0x11f   : >> { %v631_v49 = vpop.f32.mrb[2].mxu0 }
 0x120   : >> { %v642_v50 = vmax.f32 %v641_v46, 0.0  ;;  %v862_v51 = vpop.f32.mrb[3].mxu0  ;;  %250 = sbr.rel (!%p248_p4) target bundleno = 17 (0x11), region = 111 }
 0x122   : >> { %v646_v52 = vadd.f32 %v645_v48, %v642_v50 }
 0x124   : >> { %v647_v53 = vmax.f32 %v646_v52, 0.0 }
 0x126   : >> { %650 = vst.msk [vmem:[%s648_s17] sm:$0xf] %vm649_vm3, %v647_v53 }
 0x127 PF: > { %s15_s18 = sadd.s32 1, %s897_s18  }
 0x128   : > { %p12_p5 = scmp.ge.s32.totalorder %s15_s18, 4  }
 0x12a   :  { %14 = sbr.rel (!%p12_p5) target bundleno = 1 (0x1), region = 122 }

// kernel: blazeface_full_forward.43
= control target key start
LH: loop header
LB: loop body
LE: loop exit
PB: predicated region body
PF: predicated region fallthrough
CT: control target
= control target key end

     0   :  { %s477_s12 = smov 0   ;;  %s540_s0 = inlined_call_operand.vmem [shape: f32[2,4,192], index: 0, kind: input, shape index: {}]   ;;  %s541_s1 = inlined_call_operand.vmem [shape: bf16[192,76], index: 1, kind: input, shape index: {}]   ;;  %s542_s2 = inlined_call_operand.vmem [shape: f32[1,76], index: 2, kind: input, shape index: {}]   ;;  %s543_s3 = inlined_call_operand.vmem [shape: f32[2,4,76], index: 3, kind: output, shape index: {}]  }
   0x1 LB: > { %s393_s13 = sadd.s32 4294967295, %s454_s12   ;;  %p397_p0 = scmp.ge.s32.totalorder %s454_s12, 1  ;;  %s454_s12 = sphi %s477_s12, %s13_s12  }
   0x2   : > { %p137_p1 = scmp.lt.s32.totalorder %s454_s12, 3 }
   0x4   : > { %p138_p2 = pnand %p397_p0, %p137_p1 }
   0x5   : > { %v431_v0 = vld [vmem:[%s541_s1] sm:$0xff] (!%p138_p2)   ;;  %v456_v1 = vmov (!%p138_p2), 0   ;;  %p160_p3 = scmp.lt.s32.totalorder (!%p138_p2), %s393_s13, 1  ;;  %v432_v2 = vld [vmem:[%s541_s1 + $0x8] sm:$0xff] (!%p138_p2)   ;;  %v433_v3 = vld [vmem:[%s541_s1 + $0x10] sm:$0xff] (!%p138_p2)   ;;  %vm174_vm0 = vcmask (!%p138_p2), 1043456   ;;  %v326_v26 = vlaneseq (!%p138_p2) }
   0x6   : > { %141 = sbr.rel (%p138_p2) target bundleno = 296 (0x128), region = 32  ;;  %286 = vmatprep.subr.bf16.mxu0 (!%p138_p2), %v456_v1  ;;  %v434_v4 = vld [vmem:[%s541_s1 + $0x18] sm:$0xff] (!%p138_p2)   ;;  %v435_v7 = vld [vmem:[%s541_s1 + $0x20] sm:$0xff] (!%p138_p2)   ;;  %vm282_vm1 = vcmask (!%p138_p2), 523264   ;;  %v436_v10 = vld [vmem:[%s541_s1 + $0x28] sm:$0xff] (!%p138_p2)   ;;  %vm338_vm6 = vcmask (!%p138_p2), 617472  }
   0x7   : > { %287 = vmatpush1.bf16.msra.mxu0 (!%p138_p2), %v431_v0  ;;  %v437_v11 = vld [vmem:[%s541_s1 + $0x30] sm:$0xff] (!%p138_p2)   ;;  %v438_v12 = vld [vmem:[%s541_s1 + $0x38] sm:$0xff] (!%p138_p2)   ;;  %v439_v13 = vld [vmem:[%s541_s1 + $0x40] sm:$0xff] (!%p138_p2)   ;;  %v327_v28 = vand.u32 (!%p138_p2), 127, %v326_v26 }
   0x8   : > { %288 = vmatprep.subr.bf16.mxu0 (!%p138_p2), %v456_v1  ;;  %v440_v14 = vld [vmem:[%s541_s1 + $0x48] sm:$0xff] (!%p138_p2)   ;;  %v441_v15 = vld [vmem:[%s541_s1 + $0x50] sm:$0xff] (!%p138_p2)   ;;  %v442_v16 = vld [vmem:[%s541_s1 + $0x58] sm:$0xff] (!%p138_p2)  }
   0x9   : > { %vm415_vm2 = vmpackc.low (!%p138_p2), %vm174_vm0, %vm174_vm0  ;;  %v401_v18 = vld [vmem:[%s542_s2] ss:$0 sm:$0xff] (!%p138_p2)  ;;  %vm328_vm3 = vcmp.ge.s32.totalorder (!%p138_p2), %v327_v28, 16  ;;  %vm329_vm4 = vcmp.lt.s32.totalorder (!%p138_p2), %v327_v28, 20 }
   0xa   : > { %vm330_vm5 = vmand (!%p138_p2), %vm328_vm3, %vm329_vm4 }
   0xb   : > { %289 = vmatpush1.bf16.msra.mxu0 (!%p138_p2), %v432_v2 }
   0xc   : > { %290 = vmatprep.subr.bf16.mxu0 (!%p138_p2), %v456_v1 }
   0xd   : > { %s545_s13 = smov (!%p160_p3, %s393_s13), 1 }
   0xe   : > { %s421_s20 = sshll.u32 %s545_s13, 3  ;;  %s400_s19 = sshll.u32 %s545_s13, 2 }
   0xf   : > { %s164_s23 = scalar_lea.vmem %s540_s0, %s421_s20  ;;  %291 = vmatpush1.bf16.msra.mxu0 %v433_v3  ;;  %s168_s22 = scalar_lea.vmem %s543_s3, %s400_s19 }
  0x10   : > { %292 = vmatprep.subr.bf16.mxu0 %v456_v1  ;;  %v170_v5 = vld [vmem:[%s164_s23] sm:$0xff] }
  0x11   : > { %v172_v6 = vcombine.high %v170_v5, %v170_v5  ;;  %v416_v17 = vpack.c.bf16 %v170_v5, %v170_v5 }
  0x13   : > { %293 = vmatpush1.bf16.msra.mxu0 %v434_v4  ;;  %v176_v8 = vsel %vm174_vm0, %v172_v6, 0.0 }
  0x14   : > { %294 = vmatprep.subr.bf16.mxu0 %v456_v1  ;;  %v178_v9 = vpack.c.bf16 %v176_v8, %v176_v8 }
  0x16   : > { %414 = vmatprep.mubr.msk.bf16.mxu0 %vm282_vm1, %v178_v9 }
  0x17   : > { %295 = vmatpush1.bf16.msra.mxu0 %v435_v7 }
  0x18   : > { %296 = vmatprep.subr.bf16.mxu0 %v456_v1 }
  0x1b   : > { %297 = vmatpush1.bf16.msra.mxu0 %v436_v10 }
  0x1c   : > { %298 = vmatprep.subr.bf16.mxu0 %v456_v1 }
  0x1f   : > { %299 = vmatpush1.bf16.msra.mxu0 %v437_v11 }
  0x20   : > { %300 = vmatprep.subr.bf16.mxu0 %v456_v1 }
  0x23   : > { %301 = vmatpush1.bf16.msra.mxu0 %v438_v12 }
  0x24   : > { %302 = vmatprep.subr.bf16.mxu0 %v456_v1 }
  0x27   : > { %303 = vmatpush1.bf16.msra.mxu0 %v439_v13 }
  0x28   : > { %304 = vmatprep.subr.bf16.mxu0 %v456_v1 }
  0x2b   : > { %305 = vmatpush1.bf16.msra.mxu0 %v440_v14 }
  0x2c   : > { %306 = vmatprep.subr.bf16.mxu0 %v456_v1 }
  0x2f   : > { %307 = vmatpush1.bf16.msra.mxu0 %v441_v15 }
  0x30   : > { %308 = vmatprep.subr.bf16.mxu0 %v456_v1 }
  0x33   : > { %309 = vmatpush1.bf16.msra.mxu0 %v442_v16 }
  0x36   : > { %417 = vmatmul.mubr.msk.bf16.vlgmr.msra.gmra.mrb[0].mxu0 %vm415_vm2, %v416_v17 }
 0x109   : > { %v320_v19 = vpop.f32.mrb[0].mxu0 }
 0x10a   : > { %v321_v20 = vadd.f32 %v401_v18, %v320_v19  ;;  %v322_v21 = vpop.f32.mrb[1].mxu0 }
 0x10b   : > { %v323_v22 = vpop.f32.mrb[2].mxu0 }
 0x10c   : > { %v418_v23 = vmul.f32 -1.442695, %v321_v20  ;;  %v324_v24 = vpop.f32.mrb[3].mxu0 }
 0x10e   : > { %444 = vpow2.f32 %v418_v23 }
 0x118   : > { %v445_v25 = vpop.eup %444 }
 0x119   : > { %v334_v27 = vadd.f32 1.0, %v445_v25 }
 0x11b   : > { %446 = vrcp.f32 %v334_v27 }
 0x125   : > { %v447_v29 = vpop.eup %446 }
 0x126   : > { %v337_v30 = vsel %vm330_vm5, %v447_v29, %v321_v20 }
 0x127   : > { %339 = vst.msk [vmem:[%s168_s22] sm:$0xf] %vm338_vm6, %v337_v30 }
 0x128 PF: > { %s13_s12 = sadd.s32 1, %s454_s12  }
 0x129   : > { %p10_p4 = scmp.ge.s32.totalorder %s13_s12, 4  }
 0x12b   :  { %12 = sbr.rel (!%p10_p4) target bundleno = 1 (0x1), region = 62 }

// kernel: blazeface_full_forward.42
= control target key start
LH: loop header
LB: loop body
LE: loop exit
PB: predicated region body
PF: predicated region fallthrough
CT: control target
= control target key end

     0   :  { %s1153_s18 = smov 0   ;;  %s1368_s0 = inlined_call_operand.vmem [shape: f32[2,16,4,96], index: 0, kind: input, shape index: {}]   ;;  %s1369_s1 = inlined_call_operand.vmem [shape: f32[25,1,96], index: 1, kind: input, shape index: {}]   ;;  %s1370_s2 = inlined_call_operand.vmem [shape: bf16[96,192], index: 2, kind: input, shape index: {}]   ;;  %s1371_s3 = inlined_call_operand.vmem [shape: f32[1,192], index: 3, kind: input, shape index: {}]   ;;  %s1372_s4 = inlined_call_operand.vmem [shape: bf16[96,192], index: 4, kind: input, shape index: {}]   ;;  %s1373_s5 = inlined_call_operand.vmem [shape: f32[2,2,2,192], index: 5, kind: output, shape index: {}]  }
   0x1 LB: > { %s909_s19 = sadd.s32 4294967295, %s1115_s18   ;;  %p913_p0 = scmp.ge.s32.totalorder %s1115_s18, 1  ;;  %s1115_s18 = sphi %s1153_s18, %s15_s18  }
   0x2   : > { %p187_p1 = scmp.lt.s32.totalorder %s1115_s18, 3 }
   0x4   : > { %p188_p2 = pnand %p913_p0, %p187_p1 }
   0x5   : > { %p215_p3 = scmp.lt.s32.totalorder (!%p188_p2), %s909_s19, 1  ;;  %s1171_s28 = smov (!%p188_p2), 0  }
   0x6   : > { %191 = sbr.rel (%p188_p2) target bundleno = 306 (0x132), region = 40 }
   0xd   : > { %s1375_s19 = smov (!%p215_p3, %s909_s19), 1 }
   0xe   : > { %s1038_s20 = sshll.u32 %s1375_s19, 6  ;;  %s1039_s21 = sshll.u32 %s1375_s19, 3 }
   0xf   : > { %s1164_s24 = scalar_lea.vmem %s1368_s0, %s1038_s20  ;;  %s1169_s27 = scalar_lea.vmem %s1373_s5, %s1039_s21 }
  0x10 LB: >> { %v1069_v0 = vld [vmem:[%s1370_s2 + $0x4] ss:$8 sps:$4 sm:$0xff]   ;;  %v1071_v1 = vld [vmem:[%s1370_s2] ss:$8 sps:$4 sm:$0xff]   ;;  %v1121_v2 = vmov 0   ;;  %s1040_s11 = sshll.u32 %s1119_s28, 3  ;;  %s1119_s28 = sphi %s1171_s28, %s231_s28  }
  0x11   : >> { %646 = vmatprep.mubr.bf16.mxu0 %v1121_v2  ;;  %780 = vmatprep.mubr.bf16.mxu1 %v1121_v2  ;;  %v1072_v3 = vld [vmem:[%s1372_s4 + $0x4] ss:$8 sps:$4 sm:$0xff]   ;;  %v1074_v4 = vld [vmem:[%s1372_s4] ss:$8 sps:$4 sm:$0xff]   ;;  %v1075_v5 = vld [vmem:[%s1370_s2 + $0x14] ss:$8 sps:$4 sm:$0xff]   ;;  %s1229_s19 = scalar_lea.vmem %s1164_s24, %s1040_s11 }
  0x12   : >> { %614 = vmatprep.subr.bf16.mxu0 %v1069_v0  ;;  %v1077_v6 = vld [vmem:[%s1370_s2 + $0x10] ss:$8 sps:$4 sm:$0xff]   ;;  %748 = vmatprep.subr.bf16.mxu1 %v1072_v3  ;;  %v1078_v7 = vld [vmem:[%s1372_s4 + $0x14] ss:$8 sps:$4 sm:$0xff]   ;;  %v1081_v9 = vld [vmem:[%s1370_s2 + $0x24] ss:$8 sps:$4 sm:$0xff]  }
  0x13   : >> { %615 = vmatpush1.bf16.msra.mxu0 %v1071_v1  ;;  %749 = vmatpush1.bf16.msra.mxu1 %v1074_v4  ;;  %v1080_v8 = vld [vmem:[%s1372_s4 + $0x10] ss:$8 sps:$4 sm:$0xff]   ;;  %v1083_v10 = vld [vmem:[%s1370_s2 + $0x20] ss:$8 sps:$4 sm:$0xff]   ;;  %v1084_v11 = vld [vmem:[%s1372_s4 + $0x24] ss:$8 sps:$4 sm:$0xff]  }
  0x14   : >> { %616 = vmatprep.subr.bf16.mxu0 %v1075_v5  ;;  %750 = vmatprep.subr.bf16.mxu1 %v1078_v7  ;;  %v1087_v12 = vld [vmem:[%s1370_s2 + $0x34] ss:$8 sps:$4 sm:$0xff]   ;;  %v1086_v13 = vld [vmem:[%s1372_s4 + $0x20] ss:$8 sps:$4 sm:$0xff]   ;;  %v1089_v15 = vld [vmem:[%s1370_s2 + $0x30] ss:$8 sps:$4 sm:$0xff]  }
  0x15   : >> { %v1090_v14 = vld [vmem:[%s1372_s4 + $0x34] ss:$8 sps:$4 sm:$0xff]   ;;  %v1093_v16 = vld [vmem:[%s1370_s2 + $0x44] ss:$8 sps:$4 sm:$0xff]   ;;  %v1092_v17 = vld [vmem:[%s1372_s4 + $0x30] ss:$8 sps:$4 sm:$0xff]  }
  0x16   : >> { %v1095_v18 = vld [vmem:[%s1370_s2 + $0x40] ss:$8 sps:$4 sm:$0xff]   ;;  %v1096_v19 = vld [vmem:[%s1372_s4 + $0x44] ss:$8 sps:$4 sm:$0xff]   ;;  %v1099_v21 = vld [vmem:[%s1370_s2 + $0x54] ss:$8 sps:$4 sm:$0xff]  }
  0x17   : >> { %617 = vmatpush1.bf16.msra.mxu0 %v1077_v6  ;;  %751 = vmatpush1.bf16.msra.mxu1 %v1080_v8  ;;  %v1098_v20 = vld [vmem:[%s1372_s4 + $0x40] ss:$8 sps:$4 sm:$0xff]   ;;  %v1102_v29 = vld [vmem:[%s1372_s4 + $0x54] ss:$8 sps:$4 sm:$0xff]   ;;  %v1101_v34 = vld [vmem:[%s1370_s2 + $0x50] ss:$8 sps:$4 sm:$0xff]  }
  0x18   : >> { %618 = vmatprep.subr.bf16.mxu0 %v1081_v9  ;;  %752 = vmatprep.subr.bf16.mxu1 %v1084_v11  ;;  %v235_v22 = vld [vmem:[%s1229_s19] sm:$0x3]  ;;  %v927_v28 = vld [vmem:[%s1369_s1 + $0x2] ss:$0 sm:$0xff]  ;;  %v930_v33 = vld [vmem:[%s1369_s1 + $0x3] ss:$0 sm:$0xff] }
  0x19   : >> { %v920_v23 = vld [vmem:[%s1369_s1] ss:$0 sm:$0xff]  ;;  %v925_v26 = vld [vmem:[%s1369_s1 + $0x1] ss:$0 sm:$0xff]  ;;  %v280_v35 = vld [vmem:[%s1229_s19 + $0x2] sm:$0x3] }
  0x1a   : >> { %v923_v24 = vld [vmem:[%s1229_s19 + $0x20] sm:$0x3]  ;;  %v243_v25 = vmul.f32 %v920_v23, %v235_v22  ;;  %v932_v36 = vld [vmem:[%s1369_s1 + $0x4] ss:$0 sm:$0xff]  ;;  %v1104_v39 = vld [vmem:[%s1372_s4 + $0x50] ss:$8 sps:$4 sm:$0xff]  }
  0x1b   : >> { %619 = vmatpush1.bf16.msra.mxu0 %v1083_v10  ;;  %753 = vmatpush1.bf16.msra.mxu1 %v1086_v13  ;;  %v258_v27 = vld [vmem:[%s1229_s19 + $0x1] sm:$0x3]  ;;  %v256_v30 = vmul.f32 %v925_v26, %v923_v24  ;;  %v935_v40 = vld [vmem:[%s1229_s19 + $0x4] sm:$0x3]  ;;  %v289_v43 = vmul.f32 %v932_v36, %v280_v35  ;;  %v942_v45 = vld [vmem:[%s1369_s1 + $0x6] ss:$0 sm:$0xff] }
  0x1c   : >> { %620 = vmatprep.subr.bf16.mxu0 %v1087_v12  ;;  %754 = vmatprep.subr.bf16.mxu1 %v1090_v14  ;;  %v267_v31 = vmul.f32 %v927_v28, %v258_v27  ;;  %v928_v32 = vld [vmem:[%s1229_s19 + $0x21] sm:$0x3]  ;;  %v937_v41 = vld [vmem:[%s1369_s1 + $0x5] ss:$0 sm:$0xff]  ;;  %v945_v49 = vld [vmem:[%s1369_s1 + $0x7] ss:$0 sm:$0xff] }
  0x1d   : >> { %v257_v37 = vadd.f32 %v256_v30, %v243_v25  ;;  %v278_v38 = vmul.f32 %v930_v33, %v928_v32  ;;  %v940_v44 = vld [vmem:[%s1229_s19 + $0x24] sm:$0x3]  ;;  %v303_v47 = vmul.f32 %v937_v41, %v935_v40  ;;  %v948_v53 = vld [vmem:[%s1369_s1 + $0x8] ss:$0 sm:$0xff]  ;;  %v949_v56 = vld [vmem:[%s1229_s19 + $0x6] sm:$0x3] }
  0x1e   : >> { %v943_v48 = vld [vmem:[%s1229_s19 + $0x5] sm:$0x3]  ;;  %v317_v51 = vmul.f32 %v942_v45, %v940_v44  ;;  %v951_v57 = vld [vmem:[%s1369_s1 + $0x9] ss:$0 sm:$0xff]  ;;  %vm535_vm0 = vcmask 1041408   ;;  %vm610_vm1 = vcmask 785408  }
  0x1f   : >> { %621 = vmatpush1.bf16.msra.mxu0 %v1089_v15  ;;  %755 = vmatpush1.bf16.msra.mxu1 %v1092_v17  ;;  %v268_v42 = vadd.f32 %v267_v31, %v257_v37  ;;  %v946_v52 = vld [vmem:[%s1229_s19 + $0x25] sm:$0x3]  ;;  %v328_v55 = vmul.f32 %v945_v49, %v943_v48  ;;  %v954_v60 = vld [vmem:[%s1229_s19 + $0x8] sm:$0x3]  ;;  %v956_v61 = vld [vmem:[%s1369_s1 + $0xa] ss:$0 sm:$0xff]  ;;  %v350_v0 = vmul.f32 %v951_v57, %v949_v56 }
  0x20   : >> { %622 = vmatprep.subr.bf16.mxu0 %v1093_v16  ;;  %756 = vmatprep.subr.bf16.mxu1 %v1096_v19  ;;  %v339_v59 = vmul.f32 %v948_v53, %v946_v52  ;;  %v962_v62 = vld [vmem:[%s1229_s19 + $0x9] sm:$0x3]  ;;  %v961_v3 = vld [vmem:[%s1369_s1 + $0xb] ss:$0 sm:$0xff]  ;;  %v364_v6 = vmul.f32 %v956_v61, %v954_v60  ;;  %v964_v7 = vld [vmem:[%s1369_s1 + $0xc] ss:$0 sm:$0xff] }
  0x21   : >> { %v279_v46 = vadd.f32 %v278_v38, %v268_v42  ;;  %v671_v1 = vsel %vm535_vm0, %v962_v62, 0.0  ;;  %v959_v2 = vld [vmem:[%s1229_s19 + $0x28] sm:$0x3]  ;;  %v967_v11 = vld [vmem:[%s1369_s1 + $0xd] ss:$0 sm:$0xff]  ;;  %v389_v13 = vmul.f32 %v964_v7, %v962_v62  ;;  %s1050_s26 = sshll.u32 %s1119_s28, 2 }
  0x22   : >> { %v672_v4 = vpack.c.bf16 %v671_v1, %v671_v1  ;;  %v378_v9 = vmul.f32 %v961_v3, %v959_v2  ;;  %v965_v10 = vld [vmem:[%s1229_s19 + $0x29] sm:$0x3]  ;;  %v970_v15 = vld [vmem:[%s1369_s1 + $0xe] ss:$0 sm:$0xff]  ;;  %v975_v19 = vld [vmem:[%s1369_s1 + $0xf] ss:$0 sm:$0xff]  ;;  %s805_s29 = scalar_lea.vmem %s1169_s27, %s1050_s26 }
  0x23   : >> { %623 = vmatpush1.bf16.msra.mxu0 %v1095_v18  ;;  %757 = vmatpush1.bf16.msra.mxu1 %v1098_v20  ;;  %v290_v50 = vadd.f32 %v289_v43, %v279_v46  ;;  %v968_v14 = vld [vmem:[%s1229_s19 + $0xa] sm:$0x3]  ;;  %v400_v17 = vmul.f32 %v967_v11, %v965_v10  ;;  %v973_v18 = vld [vmem:[%s1229_s19 + $0xc] sm:$0x3]  ;;  %v980_v23 = vld [vmem:[%s1369_s1 + $0x10] ss:$0 sm:$0xff] }
  0x24   : >> { %624 = vmatprep.subr.bf16.mxu0 %v1099_v21  ;;  %758 = vmatprep.subr.bf16.mxu1 %v1102_v29  ;;  %v411_v21 = vmul.f32 %v970_v15, %v968_v14  ;;  %v978_v22 = vld [vmem:[%s1229_s19 + $0x2c] sm:$0x3]  ;;  %v425_v25 = vmul.f32 %v975_v19, %v973_v18  ;;  %v983_v27 = vld [vmem:[%s1369_s1 + $0x11] ss:$0 sm:$0xff]  ;;  %v986_v31 = vld [vmem:[%s1369_s1 + $0x12] ss:$0 sm:$0xff] }
  0x25   : >> { %v304_v54 = vadd.f32 %v303_v47, %v290_v50  ;;  %v981_v26 = vld [vmem:[%s1229_s19 + $0xd] sm:$0x3]  ;;  %v439_v29 = vmul.f32 %v980_v23, %v978_v22  ;;  %v989_v35 = vld [vmem:[%s1369_s1 + $0x13] ss:$0 sm:$0xff]  ;;  %v992_v38 = vld [vmem:[%s1229_s19 + $0x10] sm:$0x3] }
  0x26   : >> { %v984_v30 = vld [vmem:[%s1229_s19 + $0x2d] sm:$0x3]  ;;  %v450_v33 = vmul.f32 %v983_v27, %v981_v26  ;;  %v997_v42 = vld [vmem:[%s1229_s19 + $0x30] sm:$0x3]  ;;  %v999_v43 = vld [vmem:[%s1369_s1 + $0x15] ss:$0 sm:$0xff] }
  0x27   : >> { %625 = vmatpush1.bf16.msra.mxu0 %v1101_v34  ;;  %759 = vmatpush1.bf16.msra.mxu1 %v1104_v39  ;;  %v318_v58 = vadd.f32 %v317_v51, %v304_v54  ;;  %v987_v34 = vld [vmem:[%s1229_s19 + $0xe] sm:$0x3]  ;;  %v461_v37 = vmul.f32 %v986_v31, %v984_v30  ;;  %v994_v39 = vld [vmem:[%s1369_s1 + $0x14] ss:$0 sm:$0xff]  ;;  %v1000_v46 = vld [vmem:[%s1229_s19 + $0x11] sm:$0x3]  ;;  %v500_v49 = vmul.f32 %v999_v43, %v997_v42 }
  0x28   : >> { %v472_v41 = vmul.f32 %v989_v35, %v987_v34  ;;  %v486_v45 = vmul.f32 %v994_v39, %v992_v38  ;;  %v1002_v47 = vld [vmem:[%s1369_s1 + $0x16] ss:$0 sm:$0xff]  ;;  %v1003_v50 = vld [vmem:[%s1229_s19 + $0x31] sm:$0x3]  ;;  %v1005_v51 = vld [vmem:[%s1369_s1 + $0x17] ss:$0 sm:$0xff] }
  0x29   : >> { %v329_v63 = vadd.f32 %v328_v55, %v318_v58  ;;  %v511_v53 = vmul.f32 %v1002_v47, %v1000_v46  ;;  %v1006_v54 = vld [vmem:[%s1229_s19 + $0x12] sm:$0x3]  ;;  %v1008_v55 = vld [vmem:[%s1369_s1 + $0x18] ss:$0 sm:$0xff]  ;;  %v522_v57 = vmul.f32 %v1005_v51, %v1003_v50  ;;  %v655_v7 = vld [vmem:[%s1371_s3] sm:$0x3] }
  0x2a   : >> { %1034 = vmatmul.mubr.msk.bf16.vlgmr.msra.gmra.mrb[0].mxu1 %vm610_vm1, %v672_v4  ;;  %v657_v4 = vlaneseq  ;;  %vm806_vm2 = vcmask 519170   ;;  %s231_s28 = sadd.s32 1, %s1119_s28  }
  0x2b   : >> { %v340_v5 = vadd.f32 %v339_v59, %v329_v63  ;;  %v533_v59 = vmul.f32 %v1008_v55, %v1006_v54  ;;  %vm807_vm3 = vmor %vm806_vm2, %vm535_vm0  ;;  %p228_p4 = scmp.ge.s32.totalorder %s231_s28, 2  }
  0x2d   : >> { %v351_v8 = vadd.f32 %v350_v0, %v340_v5  ;;  %v658_v5 = vshrl.u32 %v657_v4, 7 }
  0x2f   : >> { %v365_v12 = vadd.f32 %v364_v6, %v351_v8  ;;  %v659_v6 = vsub.s32 0, %v658_v5  ;;  %v663_v8 = vsub.s32 1, %v658_v5 }
  0x31   : >> { %v379_v16 = vadd.f32 %v378_v9, %v365_v12  ;;  %v660_v9 = vrot.slane %v655_v7, %v659_v6  ;;  %v664_v10 = vrot.slane %v655_v7, %v663_v8  ;;  %v1122_v12 = vmov 1983009808  }
  0x33   : >> { %v390_v20 = vadd.f32 %v389_v13, %v379_v16  ;;  %v797_v13 = vunpack.c.l.s4 %v1122_v12 }
  0x35   : >> { %v401_v24 = vadd.f32 %v400_v17, %v390_v20 }
  0x37   : >> { %v412_v28 = vadd.f32 %v411_v21, %v401_v24  ;;  %v798_v21 = vunpack.c.0.s8 %v797_v13 }
  0x39   : >> { %v426_v32 = vadd.f32 %v425_v25, %v412_v28  ;;  %v801_v26 = vsub.s32 %v798_v21, %v658_v5 }
  0x3b   : >> { %v440_v36 = vadd.f32 %v439_v29, %v426_v32 }
  0x3d   : >> { %v451_v40 = vadd.f32 %v450_v33, %v440_v36 }
  0x3f   : >> { %v462_v44 = vadd.f32 %v461_v37, %v451_v40 }
  0x41   : >> { %v473_v48 = vadd.f32 %v472_v41, %v462_v44 }
  0x43   : >> { %v487_v52 = vadd.f32 %v486_v45, %v473_v48 }
  0x45   : >> { %v501_v56 = vadd.f32 %v500_v49, %v487_v52 }
  0x47   : >> { %v512_v58 = vadd.f32 %v511_v53, %v501_v56 }
  0x49   : >> { %v523_v60 = vadd.f32 %v522_v57, %v512_v58 }
  0x4b   : >> { %v534_v61 = vadd.f32 %v533_v59, %v523_v60 }
  0x4d   : >> { %v536_v62 = vsel %vm535_vm0, %v534_v61, 0.0 }
  0x4e   : >> { %v537_v63 = vpack.c.bf16 %v536_v62, %v536_v62 }
  0x50   : >> { %1021 = vmatmul.mubr.msk.bf16.vlgmr.msra.gmra.mrb[0].mxu0 %vm610_vm1, %v537_v63 }
  0xfd   : >> { %v782_v0 = vpop.f32.mrb[0].mxu1 }
  0xfe   : >> { %v784_v1 = vpop.f32.mrb[1].mxu1 }
  0xff   : >> { %v786_v2 = vpop.f32.mrb[2].mxu1 }
 0x100   : >> { %v787_v3 = vpop.f32.mrb[3].mxu1 }
 0x123   : >> { %v648_v11 = vpop.f32.mrb[0].mxu0 }
 0x124   : >> { %v667_v14 = vadd.f32 %v660_v9, %v648_v11  ;;  %v650_v15 = vpop.f32.mrb[1].mxu0 }
 0x125   : >> { %v668_v16 = vadd.f32 %v664_v10, %v650_v15  ;;  %v652_v17 = vpop.f32.mrb[2].mxu0 }
 0x126   : >> { %v669_v18 = vmax.f32 %v667_v14, 0.0  ;;  %v653_v19 = vpop.f32.mrb[3].mxu0 }
 0x127   : >> { %v670_v20 = vmax.f32 %v668_v16, 0.0 }
 0x128   : >> { %v789_v22 = vadd.f32 %v782_v0, %v669_v18 }
 0x129   : >> { %v790_v23 = vadd.f32 %v784_v1, %v670_v20 }
 0x12a   : >> { %v791_v24 = vmax.f32 %v789_v22, 0.0 }
 0x12b   : >> { %v792_v25 = vmax.f32 %v790_v23, 0.0  ;;  %230 = sbr.rel (!%p228_p4) target bundleno = 16 (0x10), region = 112 }
 0x12d   : >> { %v795_v27 = vcombine.low %v791_v24, %v792_v25 }
 0x12f   : >> { %v802_v28 = vrot.slane %v795_v27, %v801_v26 }
 0x131   : >> { %808 = vst.msk [vmem:[%s805_s29] sm:$0xf] %vm807_vm3, %v802_v28 }
 0x132 PF: > { %s15_s18 = sadd.s32 1, %s1115_s18  }
 0x133   : > { %p12_p5 = scmp.ge.s32.totalorder %s15_s18, 4  }
 0x135   :  { %14 = sbr.rel (!%p12_p5) target bundleno = 1 (0x1), region = 123 }

</bundles_post_ra>
